<compile_context>
chip_gen: v7x
topology: tpu7x:2x2x1
jax: 0.10.0
libtpu: 0.0.40
codegen_flags: <defaults>
</compile_context>

<pallas_src>
import jax
import jax.numpy as jnp
from jax.experimental import pallas as pl
from jax.experimental.pallas import tpu as pltpu


# ----------------------------------------------------------------------------
# Kernel
# ----------------------------------------------------------------------------
def linear_kernel(x_ref, w_ref, b_ref, o_ref, acc_ref):
    # x_ref: (tm, tk) VMEM, w_ref: (1, tk) VMEM, b_ref: (1, 1) SMEM,
    # o_ref: (1, tm) VMEM, acc_ref: (1, tm) f32 VMEM scratch.
    k = pl.program_id(1)

    @pl.when(k == 0)
    def _():
        acc_ref[...] = jnp.zeros_like(acc_ref)

    # W @ x^T -> (1, tm): contracting the last dim of both operands keeps the
    # weight lane-dense and yields the result already lane-major, so the final
    # store is a full-lane (unmasked) (1, tm) vector store.
    acc_ref[...] += jax.lax.dot_general(
        w_ref[...], x_ref[...],
        dimension_numbers=(((1,), (1,)), ((), ())),
        preferred_element_type=jnp.float32,
        precision=jax.lax.Precision.HIGHEST,
    )

    @pl.when(k == pl.num_programs(1) - 1)
    def _():
        o_ref[...] = (acc_ref[...] + b_ref[0, 0]).astype(o_ref.dtype)


# ----------------------------------------------------------------------------
# Generation-aware tiling policy
# ----------------------------------------------------------------------------
def _round_up(x, m):
    return ((x + m - 1) // m) * m


def _vmem_capacity_bytes():
    try:
        info = pltpu.get_tpu_info()
        cap = int(getattr(info, "vmem_capacity_bytes", 0) or 0)
        if cap > 0:
            return cap
    except Exception:
        pass
    return 64 << 20  # conservative fallback: v7x per-TensorCore VMEM


def _vmem_budgets():
    cap = _vmem_capacity_bytes()
    # Scoped compiler limit: 3/4 of physical, capped at 96 MiB.
    #   v7x (64 MiB)       -> 48 MiB
    #   v5e/v6e (128 MiB)  -> 96 MiB
    vmem_limit = min((cap * 3) // 4, 96 << 20)
    # Budget for the double-buffered x slab (2 * tm * tk * itemsize):
    #   v7x -> 24 MiB, v5e/v6e -> 48 MiB
    x_slab_budget = min((cap * 3) // 8, 48 << 20)
    return vmem_limit, x_slab_budget


def _choose_tiles(n, d, itemsize, x_slab_budget):
    """Pick (tm, tk, d_eff).  tk == d (and d_eff == d) means no K tiling."""
    n_pad = _round_up(max(n, 1), 128)
    d_pad = _round_up(max(d, 1), 128)

    # Try a full-width (no K tiling) row tile first; let the VMEM budget bind.
    tm = (x_slab_budget // (2 * d_pad * itemsize) // 128) * 128
    if tm >= 128:
        tm = min(tm, 32768, n_pad)
        tk, d_eff = d, d
    else:
        # D too large for a full-width tile: tile the feature axis too and
        # accumulate across it (pads D to a tk multiple in the wrapper).
        tm = min(512, n_pad)
        tk = (x_slab_budget // (2 * tm * itemsize) // 128) * 128
        tk = max(128, min(tk, d_pad))
        d_eff = _round_up(d, tk)

    # v7x megacore: prefer >= 2 (and even) row steps so both TCs get work.
    grid_m = pl.cdiv(n, tm)
    if grid_m == 1 and n >= 2048:
        tm = min(tm, _round_up(pl.cdiv(n, 2), 128))
        grid_m = pl.cdiv(n, tm)
    if 1 < grid_m < 16 and grid_m % 2 == 1:
        tm_even = _round_up(pl.cdiv(n, grid_m + 1), 128)
        if tm_even >= 128 and pl.cdiv(n, tm_even) % 2 == 0:
            tm = tm_even
    return tm, tk, d_eff


# ----------------------------------------------------------------------------
# Pallas wrapper
# ----------------------------------------------------------------------------
def linear_forward(x, w_row, b, *, force_tiles=None):
    """y = x @ w_row.T + b  with x:(N, D), w_row:(1, D), b:(1, 1) -> y:(N, 1)."""
    n, d = x.shape
    if w_row.dtype != x.dtype:
        # W is only (1, D), so its HBM cost is negligible; matching x's dtype
        # keeps the MXU op homogeneous.  For bf16 x this deviates slightly from
        # the f32 PyTorch weights (documented tolerance).
        w_row = w_row.astype(x.dtype)
    b = jnp.asarray(b, jnp.float32).reshape(1, 1)

    itemsize = jnp.dtype(x.dtype).itemsize
    vmem_limit, x_slab_budget = _vmem_budgets()

    if force_tiles is not None:
        tm, tk = force_tiles
        d_eff = d if tk == d else _round_up(d, tk)
    else:
        tm, tk, d_eff = _choose_tiles(n, d, itemsize, x_slab_budget)

    if d_eff != d:
        # Rare large-D path: zero-pad the feature axis so it splits evenly into
        # tk chunks; zero weight columns contribute nothing to the dot product.
        x = jnp.pad(x, ((0, 0), (0, d_eff - d)))
        w_row = jnp.pad(w_row, ((0, 0), (0, d_eff - d)))

    grid_m = pl.cdiv(n, tm)
    grid_k = pl.cdiv(d_eff, tk)

    cost = pl.CostEstimate(
        flops=2 * n * d,
        transcendentals=0,
        bytes_accessed=n * d_eff * itemsize + d_eff * itemsize + n * itemsize,
    )

    y_t = pl.pallas_call(
        linear_kernel,
        out_shape=jax.ShapeDtypeStruct((1, grid_m * tm), x.dtype),
        grid_spec=pltpu.PrefetchScalarGridSpec(
            num_scalar_prefetch=0,
            grid=(grid_m, grid_k),
            in_specs=[
                pl.BlockSpec((tm, tk), lambda i, k: (i, k)),          # x tile
                pl.BlockSpec((1, tk), lambda i, k: (0, k)),           # weight row
                pl.BlockSpec(memory_space=pltpu.MemorySpace.SMEM),    # bias scalar
            ],
            out_specs=pl.BlockSpec((1, tm), lambda i, k: (0, i)),     # lane-dense
            scratch_shapes=[pltpu.VMEM((1, tm), jnp.float32)],        # accumulator
        ),
        compiler_params=pltpu.CompilerParams(
            dimension_semantics=("parallel", "arbitrary"),
            vmem_limit_bytes=vmem_limit,
        ),
        cost_estimate=cost,
    )(x, w_row, b)
    # Drop block padding (garbage rows of the partial last tile land only in
    # columns >= n) and present the PyTorch (N, 1) shape.
    return y_t[0, :n].reshape(n, 1)


def torch_linear_regression_forward(X, w_row, b, *, min_pallas_elems=1 << 18):
    """X: (n_t, n_f, n_h) -> flatten -> Linear(D, 1) -> (n_t, 1)."""
    n_t = X.shape[0]
    x2d = X.reshape(n_t, -1)   # native dtype: bf16 inputs stay bf16 (half HBM reads)
    if x2d.size < min_pallas_elems:
        # Tiny problems: pallas_call launch/pipeline overhead dwarfs the FLOPs;
        # XLA's fused GEMV is already at roofline here on every generation.
        return (x2d @ w_row.T.astype(x2d.dtype)
                + b.reshape(1, 1).astype(x2d.dtype)).astype(x2d.dtype)
    return linear_forward(x2d, w_row, b)


# ----------------------------------------------------------------------------
# Self-test
# ----------------------------------------------------------------------------
if __name__ == "__main__":
    # Representative shapes: 4096 trials, 8 features x 16 lags -> D = 128
    # (large enough to take the Pallas path, still small/fast).
    n_t, n_f, n_h = 4096, 8, 16
    D = n_f * n_h

    key = jax.random.PRNGKey(0)
    kx, kw, kb = jax.random.split(key, 3)

    # nn.Linear default init: U(-1/sqrt(D), 1/sqrt(D)); W stored as (1, D).
    bound = float(D) ** -0.5
    w = jax.random.uniform(kw, (1, D), jnp.float32, -bound, bound)
    b = jax.random.uniform(kb, (1, 1), jnp.float32, -bound, bound)
    X = jax.random.normal(kx, (n_t, n_f, n_h), jnp.float32)

    out = jax.block_until_ready(torch_linear_regression_forward(X, w, b))
    ref = jnp.dot(X.reshape(n_t, D), w.T,
                  precision=jax.lax.Precision.HIGHEST) + b
    assert out.shape == (n_t, 1)
    assert jnp.allclose(out, ref, atol=1e-3, rtol=1e-3), \
        float(jnp.max(jnp.abs(out - ref)))

    # Exercise the K-tiled (feature-axis reduction) path on a small problem by
    # forcing the tiles: D = 320 padded to 384, tk = 128 -> grid (2, 3).
    n2, D2 = 512, 320
    k2x, k2w, k2b = jax.random.split(jax.random.PRNGKey(1), 3)
    bound2 = float(D2) ** -0.5
    w2 = jax.random.uniform(k2w, (1, D2), jnp.float32, -bound2, bound2)
    b2 = jax.random.uniform(k2b, (1, 1), jnp.float32, -bound2, bound2)
    X2 = jax.random.normal(k2x, (n2, D2), jnp.float32)
    out2 = jax.block_until_ready(linear_forward(X2, w2, b2, force_tiles=(256, 128)))
    ref2 = jnp.dot(X2, w2.T, precision=jax.lax.Precision.HIGHEST) + b2
    assert out2.shape == (n2, 1)
    assert jnp.allclose(out2, ref2, atol=1e-3, rtol=1e-3), \
        float(jnp.max(jnp.abs(out2 - ref2)))

    print("KERNEL_OK")
</pallas_src>

<mosaic_0001>
module attributes {stable_mosaic.version = 11 : i64} {
  func.func @linear_kernel(%arg0: i32, %arg1: i32, %arg2: memref<2048x128xf32, #tpu.memory_space<vmem>>, %arg3: memref<1x128xf32, #tpu.memory_space<vmem>>, %arg4: memref<1x1xf32, #tpu.memory_space<smem>>, %arg5: memref<1x2048xf32, #tpu.memory_space<vmem>>, %arg6: memref<1x2048xf32, #tpu.memory_space<vmem>>) attributes {dimension_semantics = [#tpu.dimension_semantics<parallel>, #tpu.dimension_semantics<arbitrary>], iteration_bounds = array<i64: 2, 1>, scalar_prefetch = 0 : i64, scratch_operands = 1 : i64, tpu.core_type = #tpu.core_type<tc>, window_params = [{transform_indices = @transform_0, window_bounds = array<i64: 2048, 128>}, {transform_indices = @transform_1, window_bounds = array<i64: 1, 128>}, {transform_indices = @transform_2, window_bounds = array<i64: 1, 1>}, {transform_indices = @transform_3, window_bounds = array<i64: 1, 2048>}]} {
    %c0_i32 = arith.constant 0 : i32
    %0 = arith.cmpi eq, %arg1, %c0_i32 : i32
    %1 = arith.extui %0 : i1 to i32
    %c0_i32_0 = arith.constant 0 : i32
    %2 = arith.cmpi ne, %1, %c0_i32_0 : i32
    scf.if %2 {
      %cst_10 = arith.constant 0.000000e+00 : f32
      %12 = vector.broadcast %cst_10 : f32 to vector<1x2048xf32>
      %c0_11 = arith.constant 0 : index
      %c0_12 = arith.constant 0 : index
      %13 = vector.load %arg6[%c0_11, %c0_12] : memref<1x2048xf32, #tpu.memory_space<vmem>>, vector<1x2048xf32>
      tpu.vector_store %arg6[%c0_11, %c0_12], %12 {strides = array<i32>} : memref<1x2048xf32, #tpu.memory_space<vmem>>, vector<1x2048xf32>,
    } else {
    }
    %c0 = arith.constant 0 : index
    %c0_1 = arith.constant 0 : index
    %3 = vector.load %arg6[%c0, %c0_1] : memref<1x2048xf32, #tpu.memory_space<vmem>>, vector<1x2048xf32>
    %c0_2 = arith.constant 0 : index
    %c0_3 = arith.constant 0 : index
    %4 = vector.load %arg3[%c0_2, %c0_3] : memref<1x128xf32, #tpu.memory_space<vmem>>, vector<1x128xf32>
    %c0_4 = arith.constant 0 : index
    %c0_5 = arith.constant 0 : index
    %5 = vector.load %arg2[%c0_4, %c0_5] : memref<2048x128xf32, #tpu.memory_space<vmem>>, vector<2048x128xf32>
    %cst = arith.constant dense<0.000000e+00> : vector<1x2048xf32>
    %6 = tpu.matmul %4, %5, %cst {dimension_numbers = #tpu.dot_dimension_numbers<[1], [1], [0], [0], [0, 0, 1, 0], [], []>, precision = #tpu.contract_precision<fp32>} : vector<1x128xf32>, vector<2048x128xf32>, vector<1x2048xf32> -> vector<1x2048xf32>
    %7 = arith.addf %3, %6 : vector<1x2048xf32>
    %c0_6 = arith.constant 0 : index
    %c0_7 = arith.constant 0 : index
    %8 = vector.load %arg6[%c0_6, %c0_7] : memref<1x2048xf32, #tpu.memory_space<vmem>>, vector<1x2048xf32>
    tpu.vector_store %arg6[%c0_6, %c0_7], %7 {strides = array<i32>} : memref<1x2048xf32, #tpu.memory_space<vmem>>, vector<1x2048xf32>,
    %c0_i32_8 = arith.constant 0 : i32
    %9 = arith.cmpi eq, %arg1, %c0_i32_8 : i32
    %10 = arith.extui %9 : i1 to i32
    %c0_i32_9 = arith.constant 0 : i32
    %11 = arith.cmpi ne, %10, %c0_i32_9 : i32
    scf.if %11 {
      %c0_10 = arith.constant 0 : index
      %c0_11 = arith.constant 0 : index
      %12 = vector.load %arg6[%c0_10, %c0_11] : memref<1x2048xf32, #tpu.memory_space<vmem>>, vector<1x2048xf32>
      %c0_12 = arith.constant 0 : index
      %c0_13 = arith.constant 0 : index
      %13 = memref.load %arg4[%c0_12, %c0_13] : memref<1x1xf32, #tpu.memory_space<smem>>
      %14 = vector.broadcast %13 : f32 to vector<1x2048xf32>
      %15 = arith.addf %12, %14 : vector<1x2048xf32>
      %c0_14 = arith.constant 0 : index
      %c0_15 = arith.constant 0 : index
      %16 = vector.load %arg5[%c0_14, %c0_15] : memref<1x2048xf32, #tpu.memory_space<vmem>>, vector<1x2048xf32>
      tpu.vector_store %arg5[%c0_14, %c0_15], %15 {strides = array<i32>} : memref<1x2048xf32, #tpu.memory_space<vmem>>, vector<1x2048xf32>,
    } else {
    }
    return
  }
  func.func @transform_0(%arg0: i32, %arg1: i32) -> (i32, i32) {
    %c0_i32 = arith.constant 0 : i32
    return %arg0, %arg1 : i32, i32
  }
  func.func @transform_1(%arg0: i32, %arg1: i32) -> (i32, i32) {
    %c0_i32 = arith.constant 0 : i32
    %c0_i32_0 = arith.constant 0 : i32
    return %c0_i32, %arg1 : i32, i32
  }
  func.func @transform_2(%arg0: i32, %arg1: i32) -> (i32, i32) {
    %c0_i32 = arith.constant 0 : i32
    %c0_i32_0 = arith.constant 0 : i32
    %c0_i32_1 = arith.constant 0 : i32
    return %c0_i32, %c0_i32_0 : i32, i32
  }
  func.func @transform_3(%arg0: i32, %arg1: i32) -> (i32, i32) {
    %c0_i32 = arith.constant 0 : i32
    %c0_i32_0 = arith.constant 0 : i32
    return %c0_i32, %arg0 : i32, i32
  }
}

</mosaic_0001>

<bundles_post_ra>
// kernel: tpu_custom_call.1
= control target key start
LH: loop header
LB: loop body
LE: loop exit
PB: predicated region body
PF: predicated region fallthrough
CT: control target
= control target key end

     0   :  { %s16593_s0 = inlined_call_operand.hbm [shape: f32[4096,128], index: 0, kind: input, shape index: {}]   ;;  %s16594_s1 = inlined_call_operand.hbm [shape: f32[1,128], index: 1, kind: input, shape index: {}]   ;;  %s16595_s2 = inlined_call_operand.<no memory space> [shape: f32[1,1], index: 2, kind: input, shape index: {}]   ;;  %s16596_s3 = inlined_call_operand.hbm [shape: f32[1,4096], index: 3, kind: output, shape index: {}]  }
   0x1   :  { %8 = sst [smem:[#allocation3]] %s16595_s2 }
   0x2   :  { %9 = vsyncpa [#allocation5], 0 }
   0x3   :  { %11 = vsyncpa [#allocation5 + $0x1], 0 }
   0x4   :  { %12 = vsyncpa [#allocation8], 0 }
   0x5   :  { %13 = vsyncpa [#allocation6], 0 }
   0x6   :  { %15 = vsyncpa [#allocation6 + $0x1], 0  ;;  %s11088_s14 = smov 0   ;;  %s11090_s15 = smov 0  }
   0x7   :  { %s11092_s16 = smov 0   ;;  %s11094_s17 = smov 0  }
   0x8   :  { %s11096_s18 = smov 0   ;;  %s11098_s19 = smov 0  }
   0x9 LB: > { %s7570_s2 = sadd.s32 4294967295, %s11057_s19   ;;  %s7571_s20 = sadd.s32 4294967294, %s11057_s19   ;;  %s11057_s19 = sphi %s11098_s19, %s21_s19   ;;  %s11053_s18 = sphi %s11096_s18, %s19163_s18   ;;  %s11049_s17 = sphi %s11094_s17, %s19162_s17   ;;  %s11045_s16 = sphi %s11092_s16, %s19161_s16   ;;  %s11041_s15 = sphi %s11090_s15, %s19160_s15   ;;  %s11037_s14 = sphi %s11088_s14, %s19159_s14  }
   0xa   : > { %s42_s21 = sadd.s32 1, %s11045_s16  ;;  %p49_p0 = scmp.ne.s32.totalorder %s11045_s16, %s11041_s15 }
   0xb   : > { %p50_p1 = scmp.eq.s32.totalorder %s11057_s19, 0  ;;  %p55_p2 = scmp.ne.s32.totalorder %s11041_s15, %s11037_s14 }
   0xc   : > { %p11126_p3 = scmp.eq.s32.totalorder %s7570_s2, 0  ;;  %p126_p4 = scmp.eq.s32.totalorder %s7570_s2, 1 }
   0xd   : > { %p11130_p5 = por %p50_p1, %p49_p0  ;;  %p132_p6 = scmp.eq.s32.totalorder %s7571_s20, 1 }
   0xe   : > { %s17486_s22 = scalar_select %p11126_p3, 1, 0 }
   0xf   : > { %p11136_p7 = por %p11126_p3, %p55_p2  ;;  %p11140_p8 = por %p126_p4, %p49_p0 }
  0x10   : > { %p11144_p9 = por %p132_p6, %p55_p2  ;;  %p7572_p10 = scmp.ge.s32.totalorder %s11057_s19, 1 }
  0x11   : > { %s17488_s24 = scalar_select %p11136_p7, 1, 0 }
  0x12   : > { %s17489_s25 = scalar_select %p11140_p8, 1, 0 }
  0x13   : > { %s17490_s26 = scalar_select %p11144_p9, 1, 0 }
  0x14   : > { %p139_p11 = scmp.lt.s32.totalorder %s11057_s19, 3  ;;  %s11059_s28 = smov [#allocation7]  }
  0x15   : > { %s154_s29 = sshll.u32 %s11059_s28, 4  ;;  %p10858_p1 = scmp.lt.s32.totalorder %s11057_s19, 2  ;;  %s155_s29 = int_to_ptr.vmem [resolvable:$true] %s154_s29 }
  0x16   : > { %p11151_p13 = pnand %p7572_p10, %p139_p11  ;;  %s33_s5 = sadd.s32 1, %s11053_s18 }
  0x17   : > { %p11160_p4 = pnand %p10858_p1, %p11130_p5  ;;  %p11171_p6 = scmp.ge.s32.totalorder %s33_s5, 2 }
  0x18   : > { %s17491_s27 = scalar_select %p11151_p13, 1, 0 }
  0x19   : > { %p10845_p0 = pneg %p11151_p13  ;;  %s168_s7 = sand.u32 1, %s11045_s16  }
  0x1a   : > { %s17492_s30 = scalar_select %p11160_p4, 1, 0 }
  0x1b   : > { %p11166_p2 = pnand %p10845_p0, %p11126_p3  ;;  %s10913_s10 = scalar_lea.hbm %s16594_s1, 16 }
  0x1c   : > { %s17494_s6 = scalar_select %p11171_p6, 1, 0 }
  0x1d   : > { %p10914_p5 = scmp.ne.s32.totalorder %s16594_s1, %s10913_s10  ;;  %p10915_p10 = pneg %p11166_p2 }
  0x1e   : > { %p10920_p0 = scmp.lt.u32.totalorder %s10913_s10, %s16594_s1 }
  0x1f   : > { %p10916_p11 = pnand %p10915_p10, %p10914_p5 }
  0x21   : > { %p10917_p1 = pneg %p10916_p11 }
  0x23   : > { %p10922_p12 = pnand %p10920_p0, %p10917_p1 }
  0x25   : > { %10925 = shalt.err (!%p10922_p12)
}
  0x26   : > { %s10926_s20 = scalar_lea.vmem %s155_s29, 16  ;;  %s10933_s23 = scalar_lea.vmem %s155_s29, 32 }
  0x27   : > { %p10927_p9 = scmp.ne.s32.totalorder %s155_s29, %s10926_s20  ;;  %p10934_p7 = scmp.lt.s32.totalorder %s155_s29, %s155_s29 }
  0x28   : > { %p10935_p13 = scmp.lt.s32.totalorder %s10933_s23, %s10926_s20 }
  0x29   : > { %p10929_p8 = pnand %p10927_p9, %p10915_p10 }
  0x2a   : > { %p10936_p4 = por %p10935_p13, %p10934_p7 }
  0x2b   : > { %p10930_p3 = pneg %p10929_p8 }
  0x2d   : > { %p10937_p6 = pnand %p10936_p4, %p10930_p3 }
  0x2f   : > { %10940 = shalt.err (!%p10937_p6)
}
  0x30   : > { %10848 = dma.hbm_to_vmem [thread:$0]  (!%p11166_p2), %s16594_s1, 16, %s155_s29, [#allocation8]  }
  0x31   : > { %p17495_p8 = scmp.ne.s32.totalorder %s17494_s6, 0  ;;  %s7575_s9 = sshll.u32 %s168_s7, 11 }
  0x32   : > { %s7587_s10 = sshll.u32 %s11053_s18, 15  ;;  %s172_s2 = scalar_lea.vmem [#allocation4], %s7575_s9 }
  0x33   : > { %s19165_s5 = smov (%p17495_p8, %s33_s5), 0  ;;  %s11204_s13 = scalar_lea.hbm %s16593_s0, %s7587_s10 }
  0x34   : > { %s37_s4 = ssub.s32 %s11053_s18, %s19165_s5  ;;  %s180_s29 = sshll.u32 %s172_s2, 4  ;;  %s11211_s29 = int_to_ptr.vmem [resolvable:$true] %s180_s29 }
  0x35   : > { %p40_p3 = scmp.eq.s32.totalorder %s37_s4, 0  ;;  %s11215_s20 = scalar_lea.sflag [#allocation5], %s168_s7 }
  0x36   : > { %s10941_s23 = scalar_lea.hbm %s11204_s13, 32768  ;;  %p17496_p9 = scmp.ne.s32.totalorder %s17492_s30, 0 }
  0x37   : > { %s11209_s6 = scalar_select %p40_p3, %s11045_s16, %s42_s21  }
  0x38   : > { %p10942_p7 = scmp.ne.s32.totalorder %s11204_s13, %s10941_s23  ;;  %p10943_p12 = pneg %p17496_p9 }
  0x39   : > { %s10946_s9 = scalar_lea.hbm %s16593_s0, 65536  ;;  %p10947_p2 = scmp.lt.u32.totalorder %s11204_s13, %s16593_s0 }
  0x3a   : > { %p10944_p13 = pnand %p10943_p12, %p10942_p7  ;;  %p10948_p6 = scmp.lt.u32.totalorder %s10946_s9, %s10941_s23 }
  0x3b   : > { %p10950_p10 = scmp.lt.u32.totalorder %s10941_s23, %s11204_s13 }
  0x3c   : > { %p10945_p4 = pneg %p10944_p13  ;;  %p10949_p5 = por %p10948_p6, %p10947_p2 }
  0x3e   : > { %p10951_p11 = por %p10950_p10, %p10949_p5 }
  0x40   : > { %p10952_p1 = pnand %p10951_p11, %p10945_p4 }
  0x42   : > { %10955 = shalt.err (!%p10952_p1)
}
  0x43   : > { %s10956_s7 = scalar_lea.vmem %s11211_s29, 32768  ;;  %s11060_s10 = smov [#allocation4]  }
  0x44   : > { %p10957_p0 = scmp.ne.s32.totalorder %s11211_s29, %s10956_s7  ;;  %s10961_s11 = sshll.u32 %s11060_s10, 4  ;;  %s10962_s11 = int_to_ptr.vmem [resolvable:$false] %s10961_s11 }
  0x45   : > { %s10963_s12 = scalar_lea.vmem %s10962_s11, 65536  ;;  %p10964_p7 = scmp.lt.s32.totalorder %s11211_s29, %s10962_s11 }
  0x46   : > { %p10959_p8 = pnand %p10957_p0, %p10943_p12  ;;  %p10965_p13 = scmp.lt.s32.totalorder %s10963_s12, %s10956_s7 }
  0x48   : > { %p10960_p3 = pneg %p10959_p8  ;;  %p10966_p2 = por %p10965_p13, %p10964_p7 }
  0x4a   : > { %p10967_p6 = pnand %p10966_p2, %p10960_p3 }
  0x4c   : > { %10970 = shalt.err (!%p10967_p6)
}
  0x4d   : > { %s11061_s2 = smov 128   ;;  %s11062_s23 = smov 8  }
  0x4e   : > { %10852 = dma.hbm_to_vmem [thread:$0]  (!%p17496_p9), %s11204_s13, 32768, %s11211_s29, %s11215_s20, %s11061_s2, %s11061_s2, %s11062_s23  }
  0x4f   : > { %p17497_p12 = scmp.ne.s32.totalorder %s17491_s27, 0 }
  0x51   : > { %192 = sbr.rel (%p17497_p12) target bundleno = 1914 (0x77a), region = 32 }
  0x58   : > { %s11246_s28 = sand.u32 1, %s11041_s15   ;;  %p17498_p4 = scmp.ne.s32.totalorder %s17488_s24, 0 }
  0x59   : > { %s7579_s8 = sshll.u32 %s11246_s28, 11  ;;  %s195_s9 = scalar_lea.sflag [#allocation5], %s11246_s28 }
  0x5a   : > { %s11250_s4 = scalar_lea.vmem [#allocation4], %s7579_s8 }
  0x5b   : > { %11024 = dma.done.wait (%p17498_p4), %s195_s9, 32768  }
  0x5c   : > { %11026 = vsyncadd (%p17498_p4), %s195_s9, 4294934528  ;;  %p17499_p9 = scmp.ne.s32.totalorder %s17486_s22, 0 }
  0x5e   : > { %11028 = dma.done.wait (%p17499_p9), [#allocation8], 16  }
  0x5f   : > { %11030 = vsyncadd (%p17499_p9), [#allocation8], 4294967280  ;;  %v11261_v0 = vld [vmem:[%s11250_s4 + $0x80] sm:$0xff]  ;;  %v11264_v1 = vld [vmem:[%s11250_s4 + $0x88] sm:$0xff]  ;;  %s14981_s22 = sld [smem:[#allocation3]]  ;;  %s7581_s24 = sshll.u32 %s11246_s28, 4 }
  0x60   : > { %v11267_v2 = vld [vmem:[%s11250_s4 + $0x180] sm:$0xff]  ;;  %v541_v3 = vand.u32 4294901760, %v11261_v0  ;;  %v544_v4 = vand.u32 4294901760, %v11264_v1  ;;  %v11272_v5 = vld [vmem:[%s11250_s4 + $0x188] sm:$0xff]  ;;  %v11291_v14 = vld [vmem:[%s11250_s4 + $0x90] sm:$0xff]  ;;  %s15001_s27 = scalar_lea.vmem [#allocation9], %s7581_s24 }
  0x61   : > { %v1396_v6 = vand.u32 4294901760, %v11267_v2  ;;  %v11276_v7 = vld [vmem:[%s11250_s4] sm:$0xff]  ;;  %v11279_v8 = vld [vmem:[%s11250_s4 + $0x8] sm:$0xff]  ;;  %v1399_v9 = vand.u32 4294901760, %v11272_v5  ;;  %v11300_v16 = vld [vmem:[%s11250_s4 + $0x98] sm:$0xff]  ;;  %v547_v24 = vand.u32 4294901760, %v11291_v14 }
  0x62   : > { %v493_v10 = vand.u32 4294901760, %v11276_v7  ;;  %v496_v11 = vand.u32 4294901760, %v11279_v8  ;;  %v11285_v12 = vld [vmem:[%s11250_s4 + $0x100] sm:$0xff]  ;;  %v11288_v13 = vld [vmem:[%s11250_s4 + $0x108] sm:$0xff]  ;;  %v11297_v15 = vpack.c.bf16 %v544_v4, %v541_v3  ;;  %v11303_v17 = vld [vmem:[%s11250_s4 + $0x190] sm:$0xff]  ;;  %v550_v25 = vand.u32 4294901760, %v11300_v16 }
  0x63   : > { %v11306_v18 = vld [vmem:[%s11250_s4 + $0x198] sm:$0xff]  ;;  %v11312_v19 = vpack.c.bf16 %v1399_v9, %v1396_v6  ;;  %v11321_v21 = vld [vmem:[%s11250_s4 + $0x10] sm:$0xff]  ;;  %v1348_v22 = vand.u32 4294901760, %v11285_v12  ;;  %v1351_v23 = vand.u32 4294901760, %v11288_v13  ;;  %v1402_v26 = vand.u32 4294901760, %v11303_v17  ;;  %v11349_v33 = vld [vmem:[%s11250_s4 + $0xa0] sm:$0xff] }
  0x64   : > { %17500 = vst [vmem:[#allocation13_spill] sm:$0xff] %v11297_v15  ;;  %v11318_v20 = vpack.c.bf16 %v496_v11, %v493_v10  ;;  %9222 = vmatprep.subr.bf16.mxu0 %v11297_v15  ;;  %v16617_v27 = vand.u32 4294901760, %v11306_v18  ;;  %v11333_v28 = vld [vmem:[%s11250_s4 + $0x18] sm:$0xff]  ;;  %v11336_v29 = vld [vmem:[%s11250_s4 + $0x110] sm:$0xff]  ;;  %v16616_v32 = vand.u32 4294901760, %v11321_v21  ;;  %v11352_v34 = vld [vmem:[%s11250_s4 + $0xa8] sm:$0xff]  ;;  %v11361_v36 = vpack.c.bf16 %v550_v25, %v547_v24 }
  0x65   : > { %17501 = vst [vmem:[#allocation14_spill] sm:$0xff] %v11312_v19  ;;  %9414 = vmatprep.subr.bf16.mxu1 %v11312_v19  ;;  %v11339_v30 = vld [vmem:[%s11250_s4 + $0x118] sm:$0xff]  ;;  %v11345_v31 = vpack.c.bf16 %v1351_v23, %v1348_v22  ;;  %v11355_v35 = vld [vmem:[%s11250_s4 + $0x1a0] sm:$0xff]  ;;  %v11370_v38 = vld [vmem:[%s11250_s4 + $0x1a8] sm:$0xff]  ;;  %v16611_v39 = vand.u32 4294901760, %v11333_v28  ;;  %v16608_v40 = vand.u32 4294901760, %v11336_v29 }
  0x66   : > { %17502 = vst [vmem:[#allocation15_spill] sm:$0xff] %v11318_v20  ;;  %9224 = vmatpush3.bf16.xpose.msra.mxu0 %v11318_v20  ;;  %17504 = vst [vmem:[#allocation17_spill] sm:$0xff] %v11361_v36  ;;  %v11367_v37 = vpack.c.bf16 %v16617_v27, %v1402_v26  ;;  %v16607_v41 = vand.u32 4294901760, %v11339_v30  ;;  %v16606_v42 = vand.u32 4294901760, %v11349_v33  ;;  %v16605_v43 = vand.u32 4294901760, %v11352_v34  ;;  %v11389_v47 = vld [vmem:[%s11250_s4 + $0x20] sm:$0xff] }
  0x67   : > { %17503 = vst [vmem:[#allocation16_spill] sm:$0xff] %v11345_v31  ;;  %9416 = vmatpush3.bf16.xpose.msra.mxu1 %v11345_v31  ;;  %9226 = vmatprep.subr.bf16.mxu0 %v11361_v36  ;;  %v16604_v44 = vand.u32 4294901760, %v11355_v35  ;;  %v11385_v45 = vpack.c.bf16 %v16611_v39, %v16616_v32  ;;  %v16603_v46 = vand.u32 4294901760, %v11370_v38  ;;  %v11392_v48 = vld [vmem:[%s11250_s4 + $0x28] sm:$0xff]  ;;  %v11401_v50 = vld [vmem:[%s11250_s4 + $0xb0] sm:$0xff]  ;;  %v11404_v51 = vld [vmem:[%s11250_s4 + $0xb8] sm:$0xff]  ;;  %v11529_v27 = vsub.f32 %v11291_v14, %v547_v24 }
  0x68   : > { %17505 = vst [vmem:[#allocation18_spill] sm:$0xff] %v11367_v37  ;;  %9418 = vmatprep.subr.bf16.mxu1 %v11367_v37  ;;  %v11398_v49 = vpack.c.bf16 %v16605_v43, %v16606_v42  ;;  %v11410_v52 = vpack.c.bf16 %v16607_v41, %v16608_v40  ;;  %v16610_v54 = vand.u32 4294901760, %v11389_v47  ;;  %v16609_v55 = vand.u32 4294901760, %v11392_v48  ;;  %v11422_v56 = vld [vmem:[%s11250_s4 + $0x120] sm:$0xff]  ;;  %v11425_v57 = vld [vmem:[%s11250_s4 + $0x128] sm:$0xff]  ;;  %v11431_v60 = vld [vmem:[%s11250_s4 + $0x1b0] sm:$0xff] }
  0x69   : > { %17506 = vst [vmem:[#allocation19_spill] sm:$0xff] %v11385_v45  ;;  %v11417_v53 = vpack.c.bf16 %v16603_v46, %v16604_v44  ;;  %v16613_v58 = vand.u32 4294901760, %v11401_v50  ;;  %v16612_v59 = vand.u32 4294901760, %v11404_v51  ;;  %v11434_v61 = vld [vmem:[%s11250_s4 + $0x1b8] sm:$0xff]  ;;  %v1360_v62 = vand.u32 4294901760, %v11422_v56  ;;  %v11455_v41 = vld [vmem:[%s11250_s4 + $0x30] sm:$0xff] }
  0x6a   : > { %17507 = vst [vmem:[#allocation20_spill] sm:$0xff] %v11398_v49  ;;  %17508 = vst [vmem:[#allocation21_spill] sm:$0xff] %v11410_v52  ;;  %v1363_v63 = vand.u32 4294901760, %v11425_v57  ;;  %v11444_v46 = vpack.c.bf16 %v16609_v55, %v16610_v54  ;;  %v16615_v44 = vand.u32 4294901760, %v11431_v60  ;;  %v16614_v43 = vand.u32 4294901760, %v11434_v61  ;;  %v11458_v40 = vld [vmem:[%s11250_s4 + $0x38] sm:$0xff] }
  0x6b   : > { %17509 = vst [vmem:[#allocation22_spill] sm:$0xff] %v11417_v53  ;;  %v11452_v42 = vpack.c.bf16 %v16612_v59, %v16613_v58  ;;  %v11463_v55 = vsub.f32 %v11261_v0, %v541_v3  ;;  %v11468_v54 = vsub.f32 %v11264_v1, %v544_v4  ;;  %v11471_v39 = vld [vmem:[%s11250_s4 + $0xc0] sm:$0xff]  ;;  %v11474_v59 = vld [vmem:[%s11250_s4 + $0xc8] sm:$0xff]  ;;  %v11479_v58 = vsub.f32 %v11267_v2, %v1396_v6  ;;  %v262_v37 = vld [vmem:[%s11250_s4 + $0xd0] sm:$0xff]  ;;  %s7588_s30 = sshll.u32 %s11049_s17, 8  ;;  %s7478_s13 = sshll.u32 %s15001_s27, 4  ;;  %s16545_s13 = int_to_ptr.vmem [resolvable:$true] %s7478_s13 }
  0x6c   : > { %17510 = vst [vmem:[#allocation23_spill] sm:$0xff] %v11444_v46  ;;  %v11484_v0 = vsub.f32 %v11272_v5, %v1399_v9  ;;  %v11489_v1 = vsub.f32 %v11276_v7, %v493_v10  ;;  %v11491_v3 = vpack.c.bf16 %v1363_v63, %v1360_v62  ;;  %v11496_v4 = vsub.f32 %v11279_v8, %v496_v11  ;;  %v274_v7 = vld [vmem:[%s11250_s4 + $0x130] sm:$0xff]  ;;  %v275_v9 = vld [vmem:[%s11250_s4 + $0x138] sm:$0xff]  ;;  %v11524_v32 = vld [vmem:[%s11250_s4 + $0x1c8] sm:$0xff]  ;;  %s16543_s21 = scalar_lea.hbm %s16596_s3, %s7588_s30  ;;  %s7464_s7 = scalar_lea.sflag [#allocation6], %s11246_s28 }
  0x6d   : > { %17511 = vst [vmem:[#allocation24_spill] sm:$0xff] %v11452_v42  ;;  %v11503_v2 = vpack.c.bf16 %v16614_v43, %v16615_v44  ;;  %v511_v5 = vand.u32 4294901760, %v11455_v41  ;;  %v514_v6 = vand.u32 4294901760, %v11458_v40  ;;  %v11512_v10 = vsub.f32 %v11285_v12, %v1348_v22  ;;  %v292_v44 = vld [vmem:[%s11250_s4 + $0x1c0] sm:$0xff]  ;;  %17518 = vst [vmem:[#allocation31_spill] sm:$0xff] %v11529_v27  ;;  %v263_v31 = vld [vmem:[%s11250_s4 + $0xd8] sm:$0xff] }
  0x6e   : > { %9228 = vmatpush3.bf16.xpose.msra.mxu0 %v11385_v45  ;;  %17512 = vst [vmem:[#allocation25_spill] sm:$0xff] %v11489_v1  ;;  %17513 = vst [vmem:[#allocation26_spill] sm:$0xff] %v11491_v3  ;;  %v11517_v8 = vsub.f32 %v11288_v13, %v1351_v23  ;;  %v565_v11 = vand.u32 4294901760, %v11471_v39  ;;  %v568_v43 = vand.u32 4294901760, %v11474_v59  ;;  %v11534_v12 = vsub.f32 %v11300_v16, %v550_v25  ;;  %v295_v19 = vld [vmem:[%s11250_s4 + $0x1d8] sm:$0xff]  ;;  %s10971_s10 = scalar_lea.vmem %s16545_s13, 256 }
  0x6f   : > { %9230 = vmatprep.subr.bf16.mxu0 %v11398_v49  ;;  %9420 = vmatpush3.bf16.xpose.msra.mxu1 %v11410_v52  ;;  %17514 = vst [vmem:[#allocation27_spill] sm:$0xff] %v11496_v4  ;;  %17515 = vst [vmem:[#allocation28_spill] sm:$0xff] %v11503_v2  ;;  %v11539_v13 = vsub.f32 %v11303_v17, %v1402_v26  ;;  %v17521_v22 = vand.u32 4294901760, %v11306_v18  ;;  %v17525_v16 = vand.u32 4294901760, %v11333_v28  ;;  %v1366_v17 = vand.u32 4294901760, %v274_v7  ;;  %v245_v52 = vld [vmem:[%s11250_s4 + $0x48] sm:$0xff]  ;;  %p10972_p5 = scmp.ne.s32.totalorder %s16545_s13, %s10971_s10 }
  0x70   : > { %9422 = vmatprep.subr.bf16.mxu1 %v11417_v53  ;;  %17516 = vst [vmem:[#allocation29_spill] sm:$0xff] %v11512_v10  ;;  %17517 = vst [vmem:[#allocation30_spill] sm:$0xff] %v11517_v8  ;;  %v1369_v25 = vand.u32 4294901760, %v275_v9  ;;  %v17526_v26 = vand.u32 4294901760, %v11336_v29  ;;  %v244_v53 = vld [vmem:[%s11250_s4 + $0x40] sm:$0xff]  ;;  %v17533_v49 = vand.u32 4294901760, %v11355_v35  ;;  %v11644_v15 = vsub.f32 %v11455_v41, %v511_v5 }
  0x71   : > { %17519 = vst [vmem:[#allocation32_spill] sm:$0xff] %v11534_v12  ;;  %17520 = vst [vmem:[#allocation33_spill] sm:$0xff] %v11539_v13  ;;  %v11544_v23 = vsub.f32 %v11306_v18, %v17521_v22  ;;  %v11554_v24 = vsub.f32 %v11333_v28, %v17525_v16  ;;  %v1423_v22 = vand.u32 4294901760, %v11524_v32  ;;  %v17529_v28 = vand.u32 4294901760, %v11339_v30  ;;  %p19156_p10 = scmp.ne.s32.totalorder %s17489_s25, 0  ;;  %s11064_s17 = smov [#allocation9]  }
  0x72   : > { %v11560_v18 = vsub.f32 %v11336_v29, %v17526_v26  ;;  %v17531_v29 = vand.u32 4294901760, %v11352_v34  ;;  %17551 = vst [vmem:[#allocation49_spill] sm:$0xff] %v11644_v15  ;;  %v11658_v41 = vsub.f32 %v11474_v59, %v568_v43  ;;  %s10975_s11 = sshll.u32 %s11064_s17, 4  ;;  %s10976_s11 = int_to_ptr.vmem [resolvable:$false] %s10975_s11 }
  0x73   : > { %17522 = vst [vmem:[#allocation34_spill] sm:$0xff] %v11544_v23  ;;  %v11569_v16 = vsub.f32 %v11339_v30, %v17529_v28  ;;  %v11588_v30 = vsub.f32 %v11355_v35, %v17533_v49  ;;  %v17534_v28 = vand.u32 4294901760, %v11370_v38  ;;  %v11608_v35 = vsub.f32 %v11422_v56, %v1360_v62  ;;  %p10973_p11 = pnand %p10972_p5, %p19156_p10  ;;  %s10977_s12 = scalar_lea.vmem %s10976_s11, 512 }
  0x74   : > { %17527 = vst [vmem:[#allocation36_spill] sm:$0xff] %v11560_v18  ;;  %v11579_v26 = vsub.f32 %v11352_v34, %v17531_v29  ;;  %v17537_v34 = vand.u32 4294901760, %v11392_v48  ;;  %v11611_v49 = vsub.f32 %v11425_v57, %v1363_v63  ;;  %v517_v57 = vand.u32 4294901760, %v244_v53  ;;  %17556 = vst [vmem:[#allocation54_spill] sm:$0xff] %v11658_v41  ;;  %v297_v41 = vld [vmem:[%s11250_s4 + $0x1e8] sm:$0xff]  ;;  %p10978_p0 = scmp.lt.s32.totalorder %s16545_s13, %s10976_s11  ;;  %p10979_p8 = scmp.lt.s32.totalorder %s10977_s12, %s10971_s10 }
  0x75   : > { %17539 = vst [vmem:[#allocation41_spill] sm:$0xff] %v11608_v35  ;;  %v520_v62 = vand.u32 4294901760, %v245_v52  ;;  %v17547_v63 = vand.u32 4294901760, %v11431_v60  ;;  %p10974_p1 = pneg %p10973_p11 }
  0x76   : > { %9232 = vmatpush3.bf16.xpose.msra.mxu0 %v11444_v46  ;;  %v11603_v29 = vsub.f32 %v11392_v48, %v17537_v34  ;;  %17540 = vst [vmem:[#allocation42_spill] sm:$0xff] %v11611_v49  ;;  %v277_v48 = vld [vmem:[%s11250_s4 + $0x148] sm:$0xff]  ;;  %v17544_v34 = vand.u32 4294901760, %v11404_v51  ;;  %p10980_p3 = por %p10979_p8, %p10978_p0 }
  0x77   : > { %9234 = vmatprep.subr.bf16.mxu0 %v11452_v42  ;;  %v17523_v42 = vand.u32 4294901760, %v11321_v21  ;;  %9424 = vmatpush3.bf16.xpose.msra.mxu1 %v11491_v3  ;;  %v17530_v3 = vand.u32 4294901760, %v11349_v33  ;;  %v11676_v59 = vsub.f32 %v245_v52, %v520_v62 }
  0x78   : > { %9426 = vmatprep.subr.bf16.mxu1 %v11503_v2  ;;  %v11581_v2 = vpack.c.bf16 %v568_v43, %v565_v11  ;;  %17538 = vst [vmem:[#allocation40_spill] sm:$0xff] %v11603_v29  ;;  %v11625_v36 = vsub.f32 %v11404_v51, %v17544_v34  ;;  %v571_v51 = vand.u32 4294901760, %v262_v37  ;;  %v574_v34 = vand.u32 4294901760, %v263_v31  ;;  %p10981_p7 = pnand %p10980_p3, %p10974_p1 }
  0x79   : > { %v11549_v14 = vsub.f32 %v11321_v21, %v17523_v42  ;;  %v11563_v21 = vpack.c.bf16 %v514_v6, %v511_v5  ;;  %v1420_v42 = vand.u32 4294901760, %v292_v44  ;;  %v11574_v46 = vsub.f32 %v11349_v33, %v17530_v3  ;;  %v246_v5 = vld [vmem:[%s11250_s4 + $0x50] sm:$0xff]  ;;  %17561 = vst [vmem:[#allocation59_spill] sm:$0xff] %v11676_v59 }
  0x7a   : > { %17532 = vst [vmem:[#allocation38_spill] sm:$0xff] %v11581_v2  ;;  %v11593_v33 = vsub.f32 %v11370_v38, %v17534_v28  ;;  %v17535_v3 = vand.u32 4294901760, %v11389_v47  ;;  %v17541_v38 = vand.u32 4294901760, %v11401_v50  ;;  %v11618_v28 = vpack.c.bf16 %v1369_v25, %v1366_v17  ;;  %17545 = vst [vmem:[#allocation45_spill] sm:$0xff] %v11625_v36 }
  0x7b   : > { %17524 = vst [vmem:[#allocation35_spill] sm:$0xff] %v11549_v14  ;;  %17528 = vst [vmem:[#allocation37_spill] sm:$0xff] %v11563_v21  ;;  %v11628_v56 = vpack.c.bf16 %v1423_v22, %v1420_v42  ;;  %v11674_v43 = vsub.f32 %v244_v53, %v517_v57  ;;  %v235_v53 = vld [vmem:[#allocation7] sm:$0x1] }
  0x7c   : > { %v11598_v45 = vsub.f32 %v11389_v47, %v17535_v3  ;;  %v11616_v47 = vsub.f32 %v11401_v50, %v17541_v38  ;;  %17543 = vst [vmem:[#allocation44_spill] sm:$0xff] %v11618_v28  ;;  %v276_v3 = vld [vmem:[%s11250_s4 + $0x140] sm:$0xff]  ;;  %v11633_v50 = vsub.f32 %v11431_v60, %v17547_v63  ;;  %v17549_v38 = vand.u32 4294901760, %v11434_v61 }
  0x7d   : > { %17546 = vst [vmem:[#allocation46_spill] sm:$0xff] %v11628_v56  ;;  %v11647_v60 = vsub.f32 %v11458_v40, %v514_v6  ;;  %v1372_v63 = vand.u32 4294901760, %v276_v3  ;;  %v247_v40 = vld [vmem:[%s11250_s4 + $0x58] sm:$0xff]  ;;  %v278_v6 = vld [vmem:[%s11250_s4 + $0x150] sm:$0xff]  ;;  %17560 = vst [vmem:[#allocation58_spill] sm:$0xff] %v11674_v43  ;;  %v1435_v43 = vand.u32 4294901760, %v297_v41 }
  0x7e   : > { %17536 = vst [vmem:[#allocation39_spill] sm:$0xff] %v11598_v45  ;;  %17542 = vst [vmem:[#allocation43_spill] sm:$0xff] %v11616_v47  ;;  %9236 = vmatpush3.bf16.xpose.msra.mxu0 %v11563_v21  ;;  %v11638_v20 = vsub.f32 %v11434_v61, %v17549_v38  ;;  %v294_v21 = vld [vmem:[%s11250_s4 + $0x1d0] sm:$0xff]  ;;  %v11650_v61 = vsub.f32 %v274_v7, %v1366_v17  ;;  %v11652_v38 = vsub.f32 %v275_v9, %v1369_v25  ;;  %v279_v17 = vld [vmem:[%s11250_s4 + $0x158] sm:$0xff] }
  0x7f   : > { %17548 = vst [vmem:[#allocation47_spill] sm:$0xff] %v11633_v50  ;;  %9238 = vmatprep.subr.bf16.mxu0 %v11581_v2  ;;  %17552 = vst [vmem:[#allocation50_spill] sm:$0xff] %v11647_v60  ;;  %v1375_v50 = vand.u32 4294901760, %v277_v48  ;;  %9428 = vmatpush3.bf16.xpose.msra.mxu1 %v11618_v28  ;;  %v11655_v2 = vsub.f32 %v11471_v39, %v565_v11  ;;  %v11664_v60 = vsub.f32 %v292_v44, %v1420_v42  ;;  %v264_v25 = vld [vmem:[%s11250_s4 + $0xe0] sm:$0xff]  ;;  %v265_v39 = vld [vmem:[%s11250_s4 + $0xe8] sm:$0xff] }
  0x80   : > { %17550 = vst [vmem:[#allocation48_spill] sm:$0xff] %v11638_v20  ;;  %17553 = vst [vmem:[#allocation51_spill] sm:$0xff] %v11650_v61  ;;  %9430 = vmatprep.subr.bf16.mxu1 %v11628_v56  ;;  %v11666_v28 = vpack.c.bf16 %v520_v62, %v517_v57  ;;  %v1426_v7 = vand.u32 4294901760, %v294_v21  ;;  %v1429_v9 = vand.u32 4294901760, %v295_v19  ;;  %v11672_v11 = vsub.f32 %v11524_v32, %v1423_v22  ;;  %v296_v61 = vld [vmem:[%s11250_s4 + $0x1e0] sm:$0xff]  ;;  %v249_v20 = vld [vmem:[%s11250_s4 + $0x68] sm:$0xff] }
  0x81   : > { %17554 = vst [vmem:[#allocation52_spill] sm:$0xff] %v11652_v38  ;;  %17555 = vst [vmem:[#allocation53_spill] sm:$0xff] %v11655_v2  ;;  %v11678_v38 = vpack.c.bf16 %v574_v34, %v571_v51  ;;  %v11680_v56 = vpack.c.bf16 %v1375_v50, %v1372_v63  ;;  %v11682_v44 = vsub.f32 %v276_v3, %v1372_v63  ;;  %v523_v42 = vand.u32 4294901760, %v246_v5 }
  0x82   : > { %17557 = vst [vmem:[#allocation55_spill] sm:$0xff] %v11664_v60  ;;  %17558 = vst [vmem:[#allocation56_spill] sm:$0xff] %v11666_v28  ;;  %v526_v60 = vand.u32 4294901760, %v247_v40  ;;  %v1378_v2 = vand.u32 4294901760, %v278_v6  ;;  %v1381_v15 = vand.u32 4294901760, %v279_v17  ;;  %v577_v32 = vand.u32 4294901760, %v264_v25 }
  0x83   : > { %17559 = vst [vmem:[#allocation57_spill] sm:$0xff] %v11672_v11  ;;  %17562 = vst [vmem:[#allocation60_spill] sm:$0xff] %v11678_v38  ;;  %v580_v22 = vand.u32 4294901760, %v265_v39  ;;  %v11687_v52 = vsub.f32 %v277_v48, %v1375_v50  ;;  %v11689_v57 = vsub.f32 %v262_v37, %v571_v51  ;;  %v11691_v3 = vsub.f32 %v263_v31, %v574_v34  ;;  %v248_v11 = vld [vmem:[%s11250_s4 + $0x60] sm:$0xff]  ;;  %v281_v50 = vld [vmem:[%s11250_s4 + $0x168] sm:$0xff] }
  0x84   : > { %17563 = vst [vmem:[#allocation61_spill] sm:$0xff] %v11680_v56  ;;  %17564 = vst [vmem:[#allocation62_spill] sm:$0xff] %v11682_v44  ;;  %v11693_v62 = vpack.c.bf16 %v1429_v9, %v1426_v7  ;;  %v11696_v63 = vsub.f32 %v294_v21, %v1426_v7  ;;  %v11698_v44 = vsub.f32 %v295_v19, %v1429_v9  ;;  %v1432_v59 = vand.u32 4294901760, %v296_v61  ;;  %v280_v48 = vld [vmem:[%s11250_s4 + $0x160] sm:$0xff]  ;;  %v266_v9 = vld [vmem:[%s11250_s4 + $0xf0] sm:$0xff] }
  0x85   : > { %17565 = vst [vmem:[#allocation63_spill] sm:$0xff] %v11687_v52  ;;  %17566 = vst [vmem:[#allocation64_spill] sm:$0xff] %v11689_v57  ;;  %v11704_v37 = vsub.f32 %v246_v5, %v523_v42  ;;  %v11706_v31 = vsub.f32 %v247_v40, %v526_v60  ;;  %v11710_v51 = vand.u32 4294901760, %v235_v53  ;;  %v11713_v19 = vpack.c.bf16 %v1381_v15, %v1378_v2 }
  0x86   : > { %9240 = vmatpush3.bf16.xpose.msra.mxu0 %v11666_v28  ;;  %17567 = vst [vmem:[#allocation65_spill] sm:$0xff] %v11691_v3  ;;  %17568 = vst [vmem:[#allocation66_spill] sm:$0xff] %v11693_v62  ;;  %v11702_v28 = vpack.c.bf16 %v526_v60, %v523_v42  ;;  %v11715_v21 = vsub.f32 %v278_v6, %v1378_v2  ;;  %v11717_v34 = vsub.f32 %v279_v17, %v1381_v15  ;;  %v267_v42 = vld [vmem:[%s11250_s4 + $0xf8] sm:$0xff] }
  0x87   : > { %9242 = vmatprep.subr.bf16.mxu0 %v11678_v38  ;;  %17569 = vst [vmem:[#allocation67_spill] sm:$0xff] %v11696_v63  ;;  %17570 = vst [vmem:[#allocation68_spill] sm:$0xff] %v11698_v44  ;;  %9432 = vmatpush3.bf16.xpose.msra.mxu1 %v11680_v56  ;;  %v11719_v7 = vpack.c.bf16 %v580_v22, %v577_v32  ;;  %v11722_v5 = vsub.f32 %v264_v25, %v577_v32  ;;  %v529_v60 = vand.u32 4294901760, %v248_v11  ;;  %v298_v38 = vld [vmem:[%s11250_s4 + $0x1f0] sm:$0xff]  ;;  %v11735_v17 = vld [vmem:[%s11250_s4 + $0x1f8] sm:$0xff] }
  0x88   : > { %17571 = vst [vmem:[#allocation69_spill] sm:$0xff] %v11702_v28  ;;  %17572 = vst [vmem:[#allocation70_spill] sm:$0xff] %v11704_v37  ;;  %9434 = vmatprep.subr.bf16.mxu1 %v11693_v62  ;;  %v532_v40 = vand.u32 4294901760, %v249_v20  ;;  %v11728_v56 = vsub.f32 %v235_v53, %v11710_v51  ;;  %v11732_v2 = vpack.c.bf16 %v1435_v43, %v1432_v59  ;;  %v1384_v15 = vand.u32 4294901760, %v280_v48 }
  0x89   : > { %17573 = vst [vmem:[#allocation71_spill] sm:$0xff] %v11706_v31  ;;  %17574 = vst [vmem:[#allocation72_spill] sm:$0xff] %v11710_v51  ;;  %v11730_v31 = vsub.f32 %v265_v39, %v580_v22  ;;  %v1387_v6 = vand.u32 4294901760, %v281_v50  ;;  %v11744_v53 = vsub.f32 %v297_v41, %v1435_v43  ;;  %v583_v39 = vand.u32 4294901760, %v266_v9 }
  0x8a   : > { %17575 = vst [vmem:[#allocation73_spill] sm:$0xff] %v11713_v19  ;;  %17576 = vst [vmem:[#allocation74_spill] sm:$0xff] %v11715_v21  ;;  %v11740_v25 = vand.u32 4294901760, %v11728_v56  ;;  %v586_v22 = vand.u32 4294901760, %v267_v42  ;;  %v11755_v62 = vsub.f32 %v249_v20, %v532_v40  ;;  %v11759_v43 = vsub.f32 %v280_v48, %v1384_v15  ;;  %v11777_v48 = vld [vmem:[%s11250_s4 + $0x78] sm:$0xff] }
  0x8b   : > { %17577 = vst [vmem:[#allocation75_spill] sm:$0xff] %v11717_v34  ;;  %17578 = vst [vmem:[#allocation76_spill] sm:$0xff] %v11719_v7  ;;  %v11737_v34 = vsub.f32 %v296_v61, %v1432_v59  ;;  %v11749_v61 = vsub.f32 %v248_v11, %v529_v60  ;;  %v11757_v41 = vpack.c.bf16 %v1387_v6, %v1384_v15  ;;  %v17592_v11 = vand.u32 4294901760, %v11463_v55 }
  0x8c   : > { %17579 = vst [vmem:[#allocation77_spill] sm:$0xff] %v11722_v5  ;;  %17580 = vst [vmem:[#allocation78_spill] sm:$0xff] %v11728_v56  ;;  %v11747_v5 = vpack.c.bf16 %v532_v40, %v529_v60  ;;  %v592_v32 = vsub.f32 %v11728_v56, %v11740_v25  ;;  %v17593_v59 = vand.u32 4294901760, %v11468_v54  ;;  %v11774_v40 = vpack.c.bf16 %v586_v22, %v583_v39 }
  0x8d   : > { %17581 = vst [vmem:[#allocation79_spill] sm:$0xff] %v11730_v31  ;;  %17582 = vst [vmem:[#allocation80_spill] sm:$0xff] %v11732_v2  ;;  %v1438_v31 = vand.u32 4294901760, %v298_v38  ;;  %v716_v60 = vsub.f32 %v11463_v55, %v17592_v11  ;;  %v17599_v11 = vand.u32 4294901760, %v11479_v58  ;;  %v17601_v56 = vand.u32 4294901760, %v11484_v0 }
  0x8e   : > { %17583 = vst [vmem:[#allocation81_spill] sm:$0xff] %v11737_v34  ;;  %17584 = vst [vmem:[#allocation82_spill] sm:$0xff] %v11740_v25  ;;  %9244 = vmatpush3.bf16.xpose.msra.mxu0 %v11702_v28  ;;  %v250_v28 = vld [vmem:[%s11250_s4 + $0x70] sm:$0xff]  ;;  %v11764_v34 = vand.u32 4294901760, %v592_v32  ;;  %v723_v25 = vsub.f32 %v11468_v54, %v17593_v59  ;;  %v11783_v32 = vsub.f32 %v266_v9, %v583_v39  ;;  %v17602_v9 = vand.u32 4294901760, %v11489_v1 }
  0x8f   : > { %17585 = vst [vmem:[#allocation83_spill] sm:$0xff] %v11744_v53  ;;  %17586 = vst [vmem:[#allocation84_spill] sm:$0xff] %v11747_v5  ;;  %9246 = vmatprep.subr.bf16.mxu0 %v11719_v7  ;;  %v11761_v53 = vsub.f32 %v281_v50, %v1387_v6  ;;  %9436 = vmatpush3.bf16.xpose.msra.mxu1 %v11713_v19  ;;  %v11785_v59 = vsub.f32 %v267_v42, %v586_v22  ;;  %v17597_v19 = vand.u32 4294901760, %v11735_v17  ;;  %v11799_v39 = vld [vmem:[%s11250_s4 + $0x170] sm:$0xff] }
  0x90   : > { %17587 = vst [vmem:[#allocation85_spill] sm:$0xff] %v11749_v61  ;;  %17588 = vst [vmem:[#allocation86_spill] sm:$0xff] %v11755_v62  ;;  %9438 = vmatprep.subr.bf16.mxu1 %v11732_v2  ;;  %7621 = vmatprep.mubr.f32.mxu0 %v11764_v34  ;;  %v535_v15 = vand.u32 4294901760, %v250_v28  ;;  %v717_v22 = vand.u32 4294901760, %v716_v60  ;;  %v724_v2 = vand.u32 4294901760, %v723_v25  ;;  %v1571_v20 = vsub.f32 %v11479_v58, %v17599_v11 }
  0x91   : > { %17589 = vst [vmem:[#allocation87_spill] sm:$0xff] %v11757_v41  ;;  %17590 = vst [vmem:[#allocation88_spill] sm:$0xff] %v11759_v43  ;;  %v11792_v50 = vpack.c.bf16 %v17597_v19, %v1438_v31  ;;  %7825 = vmatprep.mubr.f32.mxu1 %v11764_v34  ;;  %v11804_v7 = vsub.f32 %v298_v38, %v1438_v31  ;;  %v11807_v19 = vld [vmem:[%s11250_s4 + $0x178] sm:$0xff]  ;;  %v1578_v6 = vsub.f32 %v11484_v0, %v17601_v56 }
  0x92   : > { %17591 = vst [vmem:[#allocation89_spill] sm:$0xff] %v11764_v34  ;;  %17594 = vst [vmem:[#allocation90_spill] sm:$0xff] %v11774_v40  ;;  %v604_v42 = vsub.f32 %v11489_v1, %v17602_v9  ;;  %v17604_v60 = vand.u32 4294901760, %v11512_v10  ;;  %v17605_v31 = vand.u32 4294901760, %v11517_v8  ;;  %v9253_v56 = vpack.c.bf16 %v724_v2, %v717_v22 }
  0x93   : > { %17595 = vst [vmem:[#allocation91_spill] sm:$0xff] %v11783_v32  ;;  %17596 = vst [vmem:[#allocation92_spill] sm:$0xff] %v11785_v59  ;;  %v17603_v59 = vand.u32 4294901760, %v11496_v4  ;;  %v17607_v32 = vand.u32 4294901760, %v11534_v12  ;;  %v1579_v9 = vand.u32 4294901760, %v1578_v6  ;;  %v17612_v6 = vand.u32 4294901760, %v11549_v14 }
  0x94   : > { %17598 = vst [vmem:[#allocation93_spill] sm:$0xff] %v11792_v50  ;;  %17600 = vst [vmem:[#allocation94_spill] sm:$0xff] %v11804_v7  ;;  %v1459_v38 = vsub.f32 %v11512_v10, %v17604_v60  ;;  %v1466_v11 = vsub.f32 %v11517_v8, %v17605_v31  ;;  %v17608_v31 = vand.u32 4294901760, %v11777_v48  ;;  %v17610_v10 = vand.u32 4294901760, %v11539_v13 }
  0x95   : > { %v611_v25 = vsub.f32 %v11496_v4, %v17603_v59  ;;  %v17606_v59 = vand.u32 4294901760, %v11529_v27  ;;  %v737_v60 = vsub.f32 %v11534_v12, %v17607_v32  ;;  %v605_v4 = vand.u32 4294901760, %v604_v42 }
  0x96   : > { %9248 = vmatpush3.bf16.xpose.msra.mxu0 %v11747_v5  ;;  %v11838_v8 = vpack.c.bf16 %v17608_v31, %v535_v15  ;;  %v1460_v32 = vand.u32 4294901760, %v1459_v38  ;;  %v1467_v12 = vand.u32 4294901760, %v1466_v11  ;;  %v1585_v31 = vsub.f32 %v11539_v13, %v17610_v10  ;;  %v17690_v13 = vld [vmem:[#allocation63_spill] sm:$0xff] }
  0x97   : > { %9250 = vmatprep.subr.bf16.mxu0 %v11774_v40  ;;  %v730_v5 = vsub.f32 %v11529_v27, %v17606_v59  ;;  %v1572_v40 = vand.u32 4294901760, %v1571_v20  ;;  %9440 = vmatpush3.bf16.xpose.msra.mxu1 %v11757_v41  ;;  %v612_v1 = vand.u32 4294901760, %v611_v25  ;;  %v17611_v27 = vand.u32 4294901760, %v11544_v23 }
  0x98   : > { %17609 = vst [vmem:[#allocation95_spill] sm:$0xff] %v11838_v8  ;;  %9442 = vmatprep.subr.bf16.mxu1 %v11792_v50  ;;  %v738_v22 = vand.u32 4294901760, %v737_v60  ;;  %v618_v42 = vsub.f32 %v11549_v14, %v17612_v6  ;;  %v17613_v59 = vand.u32 4294901760, %v11735_v17  ;;  %v11859_v11 = vsub.f32 %v250_v28, %v535_v15  ;;  %v17692_v14 = vld [vmem:[#allocation65_spill] sm:$0xff] }
  0x99   : > { %v1592_v2 = vsub.f32 %v11544_v23, %v17611_v27  ;;  %v731_v20 = vand.u32 4294901760, %v730_v5  ;;  %v17616_v27 = vand.u32 4294901760, %v11799_v39  ;;  %v17617_v5 = vand.u32 4294901760, %v11807_v19 }
  0x9a   : > { %v11857_v38 = vsub.f32 %v11735_v17, %v17613_v59  ;;  %17615 = vst [vmem:[#allocation97_spill] sm:$0xff] %v11859_v11  ;;  %v9445_v6 = vpack.c.bf16 %v1579_v9, %v1572_v40  ;;  %v9255_v50 = vpack.c.bf16 %v612_v1, %v605_v4  ;;  %v17619_v25 = vand.u32 4294901760, %v11554_v24 }
  0x9b   : > { %v11867_v60 = vpack.c.bf16 %v17617_v5, %v17616_v27  ;;  %v9447_v28 = vpack.c.bf16 %v1467_v12, %v1460_v32  ;;  %v1586_v17 = vand.u32 4294901760, %v1585_v31  ;;  %v1593_v15 = vand.u32 4294901760, %v1592_v2  ;;  %v17623_v5 = vld [vmem:[#allocation47_spill] sm:$0xff]  ;;  %v17624_v2 = vld [vmem:[#allocation48_spill] sm:$0xff] }
  0x9c   : > { %17614 = vst [vmem:[#allocation96_spill] sm:$0xff] %v11857_v38  ;;  %v625_v41 = vsub.f32 %v11554_v24, %v17619_v25  ;;  %v16717_v59 = vand.u32 4294901760, %v11569_v16  ;;  %v9257_v7 = vpack.c.bf16 %v738_v22, %v731_v20  ;;  %v619_v10 = vand.u32 4294901760, %v618_v42  ;;  %v17634_v38 = vld [vmem:[#allocation50_spill] sm:$0xff] }
  0x9d   : > { %17618 = vst [vmem:[#allocation98_spill] sm:$0xff] %v11867_v60  ;;  %v17620_v11 = vand.u32 4294901760, %v11560_v18  ;;  %v16718_v1 = vand.u32 4294901760, %v11588_v30  ;;  %v17621_v4 = vand.u32 4294901760, %v11574_v46  ;;  %v17622_v12 = vand.u32 4294901760, %v11579_v26 }
  0x9e   : > { %9252 = vmatpush3.bf16.xpose.msra.mxu0 %v11838_v8  ;;  %v16719_v32 = vand.u32 4294901760, %v11593_v33  ;;  %v626_v31 = vand.u32 4294901760, %v625_v41  ;;  %v1480_v42 = vsub.f32 %v11569_v16, %v16717_v59  ;;  %v17625_v25 = vand.u32 4294901760, %v11598_v45 }
  0x9f   : > { %9254 = vmatprep.subr.bf16.mxu0 %v9253_v56  ;;  %v11877_v27 = vsub.f32 %v11560_v18, %v17620_v11  ;;  %v744_v40 = vsub.f32 %v11574_v46, %v17621_v4  ;;  %v751_v9 = vsub.f32 %v11579_v26, %v17622_v12  ;;  %9444 = vmatpush3.bf16.xpose.msra.mxu1 %v11867_v60  ;;  %v17629_v4 = vand.u32 4294901760, %v11616_v47  ;;  %v17691_v18 = vld [vmem:[#allocation64_spill] sm:$0xff] }
  0xa0   : > { %9446 = vmatprep.subr.bf16.mxu1 %v9445_v6  ;;  %v9449_v12 = vpack.c.bf16 %v1593_v15, %v1586_v17  ;;  %v1599_v20 = vsub.f32 %v11588_v30, %v16718_v1  ;;  %v1606_v59 = vsub.f32 %v11593_v33, %v16719_v32  ;;  %v632_v11 = vsub.f32 %v11598_v45, %v17625_v25 }
  0xa1   : > { %v1474_v41 = vand.u32 4294901760, %v11877_v27  ;;  %v745_v6 = vand.u32 4294901760, %v744_v40  ;;  %v752_v56 = vand.u32 4294901760, %v751_v9  ;;  %v9259_v17 = vpack.c.bf16 %v626_v31, %v619_v10 }
  0xa2   : > { %v17626_v15 = vand.u32 4294901760, %v11603_v29  ;;  %v17627_v1 = vand.u32 4294901760, %v11608_v35  ;;  %v17628_v9 = vand.u32 4294901760, %v11611_v49  ;;  %v1481_v32 = vand.u32 4294901760, %v1480_v42  ;;  %v17633_v42 = vld [vmem:[#allocation49_spill] sm:$0xff] }
  0xa3   : > { %v758_v25 = vsub.f32 %v11616_v47, %v17629_v4  ;;  %v17630_v10 = vand.u32 4294901760, %v11625_v36  ;;  %v9261_v47 = vpack.c.bf16 %v752_v56, %v745_v6  ;;  %v17637_v4 = vld [vmem:[#allocation51_spill] sm:$0xff] }
  0xa4   : > { %v639_v27 = vsub.f32 %v11603_v29, %v17626_v15  ;;  %v1487_v40 = vsub.f32 %v11608_v35, %v17627_v1  ;;  %v1494_v22 = vsub.f32 %v11611_v49, %v17628_v9  ;;  %v17631_v15 = vand.u32 4294901760, %v17623_v5  ;;  %v17635_v49 = vld [vmem:[#allocation53_spill] sm:$0xff] }
  0xa5   : > { %7622 = vmatmul.mubr.f32.vlgmr.msra.gmra.mrb[0].mxu0 %v11764_v34  ;;  %v765_v31 = vsub.f32 %v11625_v36, %v17630_v10  ;;  %v1600_v1 = vand.u32 4294901760, %v1599_v20  ;;  %v17632_v9 = vand.u32 4294901760, %v17624_v2  ;;  %v1607_v10 = vand.u32 4294901760, %v1606_v59  ;;  %v17636_v20 = vld [vmem:[#allocation54_spill] sm:$0xff] }
  0xa6   : > { %9256 = vmatpush3.bf16.xpose.msra.mxu0 %v9255_v50  ;;  %v1613_v60 = vsub.f32 %v17623_v5, %v17631_v15  ;;  %7655 = vmatprep.mubr.f32.mxu0 %v11710_v51  ;;  %v633_v36 = vand.u32 4294901760, %v632_v11  ;;  %v16744_v35 = vand.u32 4294901760, %v17635_v49  ;;  %v640_v15 = vand.u32 4294901760, %v639_v27 }
  0xa7   : > { %9258 = vmatprep.subr.bf16.mxu0 %v9257_v7  ;;  %v1620_v50 = vsub.f32 %v17624_v2, %v17632_v9  ;;  %7826 = vmatmul.mubr.f32.vlgmr.msra.gmra.mrb[0].mxu1 %v11764_v34  ;;  %v1488_v5 = vand.u32 4294901760, %v1487_v40  ;;  %v1495_v7 = vand.u32 4294901760, %v1494_v22  ;;  %v16745_v29 = vand.u32 4294901760, %v17636_v20  ;;  %v17640_v22 = vld [vmem:[#allocation52_spill] sm:$0xff] }
  0xa8   : > { %9448 = vmatpush3.bf16.xpose.msra.mxu1 %v9447_v28  ;;  %7859 = vmatprep.mubr.f32.mxu1 %v11710_v51  ;;  %v759_v9 = vand.u32 4294901760, %v758_v25  ;;  %v766_v8 = vand.u32 4294901760, %v765_v31  ;;  %v1614_v2 = vand.u32 4294901760, %v1613_v60  ;;  %v17638_v59 = vand.u32 4294901760, %v17633_v42  ;;  %v17645_v31 = vld [vmem:[#allocation55_spill] sm:$0xff] }
  0xa9   : > { %9450 = vmatprep.subr.bf16.mxu1 %v9449_v12  ;;  %v1621_v34 = vand.u32 4294901760, %v1620_v50  ;;  %v17639_v28 = vand.u32 4294901760, %v17634_v38  ;;  %v17641_v27 = vand.u32 4294901760, %v11777_v48  ;;  %v17643_v60 = vand.u32 4294901760, %v11799_v39 }
  0xaa   : > { %v646_v56 = vsub.f32 %v17633_v42, %v17638_v59  ;;  %v772_v25 = vsub.f32 %v17635_v49, %v16744_v35  ;;  %v9451_v59 = vpack.c.bf16 %v1481_v32, %v1474_v41  ;;  %v9263_v45 = vpack.c.bf16 %v640_v15, %v633_v36  ;;  %v17651_v15 = vld [vmem:[#allocation59_spill] sm:$0xff]  ;;  %v17694_v42 = vld [vmem:[#allocation68_spill] sm:$0xff] }
  0xab   : > { %v653_v11 = vsub.f32 %v17634_v38, %v17639_v28  ;;  %v11949_v12 = vsub.f32 %v11777_v48, %v17641_v27  ;;  %v11954_v40 = vsub.f32 %v11799_v39, %v17643_v60  ;;  %v9453_v28 = vpack.c.bf16 %v1607_v10, %v1600_v1  ;;  %v17647_v60 = vld [vmem:[#allocation57_spill] sm:$0xff] }
  0xac   : > { %v779_v6 = vsub.f32 %v17636_v20, %v16745_v29  ;;  %v9455_v48 = vpack.c.bf16 %v1495_v7, %v1488_v5  ;;  %v9265_v27 = vpack.c.bf16 %v766_v8, %v759_v9  ;;  %v17646_v51 = vand.u32 4294901760, %v17637_v4  ;;  %v17650_v5 = vld [vmem:[#allocation58_spill] sm:$0xff]  ;;  %v17653_v29 = vld [vmem:[#allocation71_spill] sm:$0xff] }
  0xad   : > { %17642 = vst [vmem:[#allocation53_spill] sm:$0xff] %v11949_v12  ;;  %17644 = vst [vmem:[#allocation54_spill] sm:$0xff] %v11954_v40  ;;  %v16746_v40 = vand.u32 4294901760, %v17647_v60  ;;  %v9457_v35 = vpack.c.bf16 %v1621_v34, %v1614_v2  ;;  %v647_v50 = vand.u32 4294901760, %v646_v56  ;;  %v654_v32 = vand.u32 4294901760, %v653_v11  ;;  %v17652_v9 = vld [vmem:[#allocation62_spill] sm:$0xff] }
  0xae   : > { %9260 = vmatpush3.bf16.xpose.msra.mxu0 %v9259_v17  ;;  %v11966_v39 = vsub.f32 %v17637_v4, %v17646_v51  ;;  %v17648_v36 = vand.u32 4294901760, %v17640_v22  ;;  %v773_v1 = vand.u32 4294901760, %v772_v25  ;;  %v17649_v17 = vand.u32 4294901760, %v17645_v31  ;;  %v17696_v4 = vld [vmem:[#allocation71_spill] sm:$0xff] }
  0xaf   : > { %9262 = vmatprep.subr.bf16.mxu0 %v9261_v47  ;;  %v16747_v10 = vand.u32 4294901760, %v17650_v5  ;;  %v16748_v51 = vand.u32 4294901760, %v17651_v15  ;;  %v780_v7 = vand.u32 4294901760, %v779_v6  ;;  %v1634_v56 = vsub.f32 %v17647_v60, %v16746_v40 }
  0xb0   : > { %v1508_v41 = vsub.f32 %v17640_v22, %v17648_v36  ;;  %v1627_v8 = vsub.f32 %v17645_v31, %v17649_v17  ;;  %9452 = vmatpush3.bf16.xpose.msra.mxu1 %v9451_v59  ;;  %v16749_v11 = vand.u32 4294901760, %v11691_v3  ;;  %v9267_v17 = vpack.c.bf16 %v654_v32, %v647_v50  ;;  %v17697_v22 = vld [vmem:[#allocation96_spill] sm:$0xff] }
  0xb1   : > { %9454 = vmatprep.subr.bf16.mxu1 %v9453_v28  ;;  %v1502_v6 = vand.u32 4294901760, %v11966_v39  ;;  %v16763_v59 = vand.u32 4294901760, %v11704_v37  ;;  %v660_v28 = vsub.f32 %v17650_v5, %v16747_v10  ;;  %v667_v40 = vsub.f32 %v17651_v15, %v16748_v51  ;;  %v17663_v15 = vld [vmem:[#allocation81_spill] sm:$0xff] }
  0xb2   : > { %v1509_v47 = vand.u32 4294901760, %v1508_v41  ;;  %v1628_v2 = vand.u32 4294901760, %v1627_v8  ;;  %v9269_v25 = vpack.c.bf16 %v780_v7, %v773_v1  ;;  %v17654_v36 = vand.u32 4294901760, %v17652_v9 }
  0xb3   : > { %v17655_v39 = vand.u32 4294901760, %v11687_v52  ;;  %v17656_v41 = vand.u32 4294901760, %v11689_v57  ;;  %v1635_v34 = vand.u32 4294901760, %v1634_v56  ;;  %v793_v10 = vsub.f32 %v11691_v3, %v16749_v11  ;;  %v17660_v11 = vld [vmem:[#allocation75_spill] sm:$0xff] }
  0xb4   : > { %v1515_v50 = vsub.f32 %v17652_v9, %v17654_v36  ;;  %v17657_v1 = vand.u32 4294901760, %v11696_v63  ;;  %v17658_v36 = vand.u32 4294901760, %v11698_v44  ;;  %v661_v3 = vand.u32 4294901760, %v660_v28 }
  0xb5   : > { %v1522_v32 = vsub.f32 %v11687_v52, %v17655_v39  ;;  %v786_v8 = vsub.f32 %v11689_v57, %v17656_v41  ;;  %v674_v39 = vsub.f32 %v11704_v37, %v16763_v59  ;;  %v668_v57 = vand.u32 4294901760, %v667_v40  ;;  %v17662_v52 = vld [vmem:[#allocation79_spill] sm:$0xff] }
  0xb6   : > { %9264 = vmatpush3.bf16.xpose.msra.mxu0 %v9263_v45  ;;  %v1641_v7 = vsub.f32 %v11696_v63, %v17657_v1  ;;  %v1648_v51 = vsub.f32 %v11698_v44, %v17658_v36  ;;  %v17659_v45 = vand.u32 4294901760, %v17653_v29  ;;  %v17661_v1 = vld [vmem:[#allocation77_spill] sm:$0xff]  ;;  %v16770_v9 = vand.u32 4294901760, %v17662_v52 }
  0xb7   : > { %9266 = vmatprep.subr.bf16.mxu0 %v9265_v27  ;;  %v16771_v63 = vand.u32 4294901760, %v17661_v1  ;;  %v1516_v27 = vand.u32 4294901760, %v1515_v50  ;;  %v1523_v36 = vand.u32 4294901760, %v1522_v32  ;;  %v787_v44 = vand.u32 4294901760, %v786_v8 }
  0xb8   : > { %v681_v56 = vsub.f32 %v17653_v29, %v17659_v45  ;;  %9456 = vmatpush3.bf16.xpose.msra.mxu1 %v9455_v48  ;;  %v16769_v59 = vand.u32 4294901760, %v17663_v15  ;;  %v794_v37 = vand.u32 4294901760, %v793_v10  ;;  %v1642_v5 = vand.u32 4294901760, %v1641_v7  ;;  %v17664_v29 = vld [vmem:[#allocation83_spill] sm:$0xff] }
  0xb9   : > { %9458 = vmatprep.subr.bf16.mxu1 %v9457_v35  ;;  %v1649_v45 = vand.u32 4294901760, %v1648_v51  ;;  %v16774_v41 = vand.u32 4294901760, %v17664_v29  ;;  %v675_v60 = vand.u32 4294901760, %v674_v39  ;;  %v17665_v40 = vand.u32 4294901760, %v11715_v21 }
  0xba   : > { %v682_v12 = vand.u32 4294901760, %v681_v56  ;;  %v17666_v48 = vand.u32 4294901760, %v17660_v11  ;;  %v17667_v32 = vand.u32 4294901760, %v11807_v19  ;;  %v9459_v10 = vpack.c.bf16 %v1509_v47, %v1502_v6 }
  0xbb   : > { %v12028_v28 = vsub.f32 %v11715_v21, %v17665_v40  ;;  %v12043_v51 = vsub.f32 %v17661_v1, %v16771_v63  ;;  %v12048_v8 = vsub.f32 %v17662_v52, %v16770_v9  ;;  %v9461_v7 = vpack.c.bf16 %v1635_v34, %v1628_v2 }
  0xbc   : > { %v12033_v50 = vsub.f32 %v17660_v11, %v17666_v48  ;;  %v12038_v35 = vsub.f32 %v11807_v19, %v17667_v32  ;;  %v12053_v39 = vsub.f32 %v17663_v15, %v16769_v59  ;;  %v16772_v19 = vand.u32 4294901760, %v11749_v61  ;;  %v17700_v11 = vld [vmem:[#allocation54_spill] sm:$0xff] }
  0xbd   : > { %v16773_v47 = vand.u32 4294901760, %v11755_v62  ;;  %v9271_v6 = vpack.c.bf16 %v668_v57, %v661_v3  ;;  %v9463_v56 = vpack.c.bf16 %v1523_v36, %v1516_v27  ;;  %v9273_v40 = vpack.c.bf16 %v794_v37, %v787_v44  ;;  %v17670_v27 = vld [vmem:[#allocation27_spill] sm:$0xff]  ;;  %v17677_v44 = vld [vmem:[#allocation94_spill] sm:$0xff] }
  0xbe   : > { %17668 = vst [vmem:[#allocation55_spill] sm:$0xff] %v12038_v35  ;;  %9268 = vmatpush3.bf16.xpose.msra.mxu0 %v9267_v17  ;;  %v1662_v48 = vsub.f32 %v17664_v29, %v16774_v41  ;;  %v9465_v32 = vpack.c.bf16 %v1649_v45, %v1642_v5  ;;  %v9275_v34 = vpack.c.bf16 %v682_v12, %v675_v60  ;;  %v1530_v2 = vand.u32 4294901760, %v12028_v28  ;;  %v17672_v28 = vld [vmem:[#allocation30_spill] sm:$0xff]  ;;  %v17678_v17 = vld [vmem:[#allocation39_spill] sm:$0xff]  ;;  %v17686_v41 = vld [vmem:[#allocation57_spill] sm:$0xff] }
  0xbf   : > { %9270 = vmatprep.subr.bf16.mxu0 %v9269_v25  ;;  %v1537_v59 = vand.u32 4294901760, %v12033_v50  ;;  %v801_v9 = vand.u32 4294901760, %v12043_v51  ;;  %v808_v63 = vand.u32 4294901760, %v12048_v8  ;;  %v1656_v57 = vand.u32 4294901760, %v12053_v39  ;;  %v17669_v25 = vld [vmem:[#allocation25_spill] sm:$0xff]  ;;  %v17674_v8 = vld [vmem:[#allocation92_spill] sm:$0xff] }
  0xc0   : > { %9460 = vmatpush3.bf16.xpose.msra.mxu1 %v9459_v10  ;;  %v12071_v3 = vsub.f32 %v11749_v61, %v16772_v19  ;;  %v12076_v37 = vsub.f32 %v11755_v62, %v16773_v47  ;;  %v1663_v60 = vand.u32 4294901760, %v1662_v48  ;;  %v17673_v10 = vld [vmem:[#allocation91_spill] sm:$0xff]  ;;  %v17676_v47 = vld [vmem:[#allocation32_spill] sm:$0xff]  ;;  %v17687_v51 = vld [vmem:[#allocation58_spill] sm:$0xff]  ;;  %v17702_v61 = vand.u32 4294901760, %v17674_v8 }
  0xc1   : > { %9462 = vmatprep.subr.bf16.mxu1 %v9461_v7  ;;  %v17675_v19 = vld [vmem:[#allocation31_spill] sm:$0xff]  ;;  %v17679_v39 = vld [vmem:[#allocation40_spill] sm:$0xff]  ;;  %v17695_v50 = vld [vmem:[#allocation70_spill] sm:$0xff]  ;;  %v9277_v15 = vpack.c.bf16 %v808_v63, %v801_v9  ;;  %v17701_v23 = vand.u32 4294901760, %v17673_v10  ;;  %v9467_v38 = vpack.c.bf16 %v1537_v59, %v1530_v2  ;;  %v17703_v5 = vand.u32 4294901760, %v11759_v43 }
  0xc2   : > { %v17688_v45 = vld [vmem:[#allocation59_spill] sm:$0xff]  ;;  %v17698_v12 = vld [vmem:[#allocation97_spill] sm:$0xff]  ;;  %v9469_v62 = vpack.c.bf16 %v1663_v60, %v1656_v57  ;;  %v689_v21 = vand.u32 4294901760, %v12071_v3  ;;  %v696_v29 = vand.u32 4294901760, %v12076_v37  ;;  %v17704_v63 = vand.u32 4294901760, %v11761_v53 }
  0xc3   : > { %v17693_v36 = vld [vmem:[#allocation67_spill] sm:$0xff]  ;;  %v814_v48 = vsub.f32 %v17673_v10, %v17701_v23  ;;  %v17705_v23 = vand.u32 4294901760, %v17677_v44  ;;  %v16802_v2 = vand.u32 4294901760, %v17698_v12 }
  0xc4   : > { %v1550_v9 = vsub.f32 %v11761_v53, %v17704_v63 }
  0xc5   : > { %v1669_v7 = vsub.f32 %v17677_v44, %v17705_v23  ;;  %v815_v3 = vand.u32 4294901760, %v814_v48 }
  0xc6   : > { %9272 = vmatpush3.bf16.xpose.msra.mxu0 %v9271_v6  ;;  %v17689_v6 = vld [vmem:[#allocation62_spill] sm:$0xff]  ;;  %v1551_v63 = vand.u32 4294901760, %v1550_v9 }
  0xc7   : > { %9274 = vmatprep.subr.bf16.mxu0 %v9273_v40  ;;  %v1543_v40 = vsub.f32 %v11759_v43, %v17703_v5  ;;  %v9279_v5 = vpack.c.bf16 %v696_v29, %v689_v21  ;;  %v16799_v43 = vand.u32 4294901760, %v12038_v35  ;;  %v1670_v23 = vand.u32 4294901760, %v1669_v7 }
  0xc8   : > { %9464 = vmatpush3.bf16.xpose.msra.mxu1 %v9463_v56  ;;  %v17699_v56 = vld [vmem:[#allocation53_spill] sm:$0xff] }
  0xc9   : > { %9466 = vmatprep.subr.bf16.mxu1 %v9465_v32  ;;  %v821_v32 = vsub.f32 %v17674_v8, %v17702_v61  ;;  %v17706_v61 = vand.u32 4294901760, %v17697_v22  ;;  %v16801_v57 = vand.u32 4294901760, %v17699_v56  ;;  %v1544_v60 = vand.u32 4294901760, %v1543_v40 }
  0xcb   : > { %v1676_v59 = vsub.f32 %v17697_v22, %v17706_v61  ;;  %v822_v37 = vand.u32 4294901760, %v821_v32  ;;  %v702_v61 = vsub.f32 %v17698_v12, %v16802_v2  ;;  %v9471_v40 = vpack.c.bf16 %v1551_v63, %v1544_v60  ;;  %v17711_v63 = vld [vmem:[#allocation78_spill] sm:$0xff] }
  0xcc   : > { %v17708_v60 = vpack.c.bf16 %v11484_v0, %v11479_v58 }
  0xcd   : > { %v1677_v44 = vand.u32 4294901760, %v1676_v59  ;;  %v9281_v48 = vpack.c.bf16 %v822_v37, %v815_v3  ;;  %v17707_v37 = vpack.c.bf16 %v11468_v54, %v11463_v55 }
  0xce   : > { %9276 = vmatpush3.bf16.xpose.msra.mxu0 %v9275_v34  ;;  %v16800_v34 = vand.u32 4294901760, %v17700_v11 }
  0xcf   : > { %9278 = vmatprep.subr.bf16.mxu0 %v9277_v15  ;;  %v709_v15 = vsub.f32 %v17699_v56, %v16801_v57  ;;  %v9473_v21 = vpack.c.bf16 %v1677_v44, %v1670_v23  ;;  %v17709_v44 = vld [vmem:[#allocation72_spill] sm:$0xff]  ;;  %v17712_v23 = vpack.c.bf16 %v17676_v47, %v17675_v19  ;;  %v17739_v57 = vld [vmem:[#allocation51_spill] sm:$0xff] }
  0xd0   : > { %9468 = vmatpush3.bf16.xpose.msra.mxu1 %v9467_v38  ;;  %v1557_v29 = vsub.f32 %v17700_v11, %v16800_v34  ;;  %v703_v38 = vand.u32 4294901760, %v702_v61  ;;  %v17713_v61 = vld [vmem:[#allocation29_spill] sm:$0xff] }
  0xd1   : > { %9470 = vmatprep.subr.bf16.mxu1 %v9469_v62  ;;  %v1564_v62 = vsub.f32 %v12038_v35, %v16799_v43  ;;  %v710_v7 = vand.u32 4294901760, %v709_v15  ;;  %v17714_v15 = vpack.c.bf16 %v17672_v28, %v17713_v61  ;;  %v17735_v43 = vld [vmem:[#allocation49_spill] sm:$0xff] }
  0xd2   : > { %v1558_v32 = vand.u32 4294901760, %v1557_v29 }
  0xd3   : > { %v1565_v9 = vand.u32 4294901760, %v1564_v62  ;;  %v9283_v59 = vpack.c.bf16 %v710_v7, %v703_v38  ;;  %v17718_v62 = vld [vmem:[#allocation35_spill] sm:$0xff]  ;;  %v17720_v38 = vpack.c.bf16 %v11579_v26, %v11574_v46  ;;  %v17721_v7 = vld [vmem:[#allocation36_spill] sm:$0xff] }
  0xd5   : > { %v9475_v3 = vpack.c.bf16 %v1565_v9, %v1558_v32  ;;  %v17722_v32 = vpack.c.bf16 %v11569_v16, %v17721_v7  ;;  %v17723_v9 = vpack.c.bf16 %v11593_v33, %v11588_v30 }
  0xd6   : > { %9280 = vmatpush3.bf16.xpose.msra.mxu0 %v9279_v5  ;;  %v17710_v5 = vpack.c.bf16 %v17670_v27, %v17669_v25 }
  0xd7   : > { %9282 = vmatprep.subr.bf16.mxu0 %v9281_v48  ;;  %v17715_v48 = vld [vmem:[#allocation34_spill] sm:$0xff] }
  0xd8   : > { %9472 = vmatpush3.bf16.xpose.msra.mxu1 %v9471_v40  ;;  %v17716_v40 = vld [vmem:[#allocation33_spill] sm:$0xff] }
  0xd9   : > { %9474 = vmatprep.subr.bf16.mxu1 %v9473_v21  ;;  %v17717_v29 = vpack.c.bf16 %v17715_v48, %v17716_v40  ;;  %v17719_v21 = vpack.c.bf16 %v11554_v24, %v17718_v62 }
  0xde   : > { %9284 = vmatpush3.bf16.xpose.msra.mxu0 %v9283_v59  ;;  %v17724_v59 = vpack.c.bf16 %v17679_v39, %v17678_v17 }
  0xdf   : > { %9286 = vmatprep.subr.bf16.mxu0 %v17707_v37  ;;  %v17726_v37 = vld [vmem:[#allocation43_spill] sm:$0xff] }
  0xe0   : > { %9476 = vmatpush3.bf16.xpose.msra.mxu1 %v9475_v3  ;;  %v17725_v3 = vld [vmem:[#allocation45_spill] sm:$0xff] }
  0xe1   : > { %9478 = vmatprep.subr.bf16.mxu1 %v17708_v60  ;;  %v17727_v60 = vpack.c.bf16 %v17725_v3, %v17726_v37 }
  0xe5   : > { %7656 = vmatmul.mubr.f32.vlgmr.msra.gmra.mrb[0].mxu0 %v17709_v44 }
  0xe6   : > { %9288 = vmatpush3.bf16.xpose.msra.mxu0 %v17710_v5  ;;  %7689 = vmatprep.mubr.f32.mxu0 %v17711_v63  ;;  %v17728_v5 = vld [vmem:[#allocation42_spill] sm:$0xff] }
  0xe7   : > { %9290 = vmatprep.subr.bf16.mxu0 %v17712_v23  ;;  %7860 = vmatmul.mubr.f32.vlgmr.msra.gmra.mrb[0].mxu1 %v17709_v44  ;;  %v17729_v23 = vld [vmem:[#allocation41_spill] sm:$0xff] }
  0xe8   : > { %9480 = vmatpush3.bf16.xpose.msra.mxu1 %v17714_v15  ;;  %7893 = vmatprep.mubr.f32.mxu1 %v17711_v63  ;;  %v17730_v15 = vpack.c.bf16 %v17728_v5, %v17729_v23 }
  0xe9   : > { %9482 = vmatprep.subr.bf16.mxu1 %v17717_v29  ;;  %v17731_v29 = vld [vmem:[#allocation48_spill] sm:$0xff] }
  0xee   : > { %9292 = vmatpush3.bf16.xpose.msra.mxu0 %v17719_v21  ;;  %v17732_v21 = vld [vmem:[#allocation47_spill] sm:$0xff] }
  0xef   : > { %9294 = vmatprep.subr.bf16.mxu0 %v17720_v38  ;;  %v17733_v38 = vpack.c.bf16 %v17731_v29, %v17732_v21 }
  0xf0   : > { %9484 = vmatpush3.bf16.xpose.msra.mxu1 %v17722_v32  ;;  %v17734_v32 = vld [vmem:[#allocation50_spill] sm:$0xff] }
  0xf1   : > { %9486 = vmatprep.subr.bf16.mxu1 %v17723_v9  ;;  %v17736_v34 = vpack.c.bf16 %v17734_v32, %v17735_v43  ;;  %v17737_v9 = vpack.c.bf16 %v17636_v20, %v17635_v49 }
  0xf6   : > { %9296 = vmatpush3.bf16.xpose.msra.mxu0 %v17724_v59  ;;  %v17738_v59 = vld [vmem:[#allocation52_spill] sm:$0xff] }
  0xf7   : > { %9298 = vmatprep.subr.bf16.mxu0 %v17727_v60  ;;  %v17740_v2 = vpack.c.bf16 %v17738_v59, %v17739_v57  ;;  %v17741_v60 = vpack.c.bf16 %v17686_v41, %v17645_v31 }
  0xf8   : > { %9488 = vmatpush3.bf16.xpose.msra.mxu1 %v17730_v15  ;;  %v17742_v15 = vpack.c.bf16 %v17688_v45, %v17687_v51  ;;  %v17749_v45 = vld [vmem:[#allocation74_spill] sm:$0xff] }
  0xf9   : > { %9490 = vmatprep.subr.bf16.mxu1 %v17733_v38  ;;  %v17743_v38 = vpack.c.bf16 %v17692_v14, %v17691_v18  ;;  %v17752_v18 = vld [vmem:[#allocation81_spill] sm:$0xff] }
  0xfe   : > { %9300 = vmatpush3.bf16.xpose.msra.mxu0 %v17736_v34  ;;  %v17744_v34 = vpack.c.bf16 %v17690_v13, %v17689_v6  ;;  %v17755_v6 = vld [vmem:[#allocation85_spill] sm:$0xff] }
  0xff   : > { %9302 = vmatprep.subr.bf16.mxu0 %v17737_v9  ;;  %v17745_v9 = vpack.c.bf16 %v17694_v42, %v17693_v36 }
 0x100   : > { %9492 = vmatpush3.bf16.xpose.msra.mxu1 %v17740_v2  ;;  %v17746_v2 = vpack.c.bf16 %v17696_v4, %v17695_v50 }
 0x101   : > { %9494 = vmatprep.subr.bf16.mxu1 %v17741_v60  ;;  %v17747_v60 = vpack.c.bf16 %v17662_v52, %v17661_v1 }
 0x106   : > { %9304 = vmatpush3.bf16.xpose.msra.mxu0 %v17742_v15  ;;  %v17748_v15 = vld [vmem:[#allocation75_spill] sm:$0xff] }
 0x107   : > { %9306 = vmatprep.subr.bf16.mxu0 %v17743_v38  ;;  %v17750_v14 = vpack.c.bf16 %v17748_v15, %v17749_v45  ;;  %v17751_v38 = vld [vmem:[#allocation83_spill] sm:$0xff] }
 0x108   : > { %9496 = vmatpush3.bf16.xpose.msra.mxu1 %v17744_v34  ;;  %v17753_v13 = vpack.c.bf16 %v17751_v38, %v17752_v18  ;;  %v17754_v34 = vld [vmem:[#allocation86_spill] sm:$0xff] }
 0x109   : > { %9498 = vmatprep.subr.bf16.mxu1 %v17745_v9  ;;  %v17756_v42 = vpack.c.bf16 %v17754_v34, %v17755_v6  ;;  %v17757_v9 = vpack.c.bf16 %v17674_v8, %v17673_v10  ;;  %v17765_v8 = vld [vmem:[#allocation14_spill] sm:$0xff] }
 0x10e   : > { %9308 = vmatpush3.bf16.xpose.msra.mxu0 %v17746_v2  ;;  %v17758_v2 = vld [vmem:[#allocation88_spill] sm:$0xff] }
 0x10f   : > { %9310 = vmatprep.subr.bf16.mxu0 %v17747_v60  ;;  %v17759_v52 = vpack.c.bf16 %v11761_v53, %v17758_v2  ;;  %v17760_v60 = vld [vmem:[#allocation94_spill] sm:$0xff] }
 0x110   : > { %9500 = vmatpush3.bf16.xpose.msra.mxu1 %v17750_v14  ;;  %v17761_v15 = vpack.c.bf16 %v17697_v22, %v17760_v60  ;;  %v17762_v14 = vpack.c.bf16 %v17699_v56, %v17698_v12  ;;  %v17768_v22 = vld [vmem:[#allocation17_spill] sm:$0xff]  ;;  %v17780_v56 = vld [vmem:[#allocation38_spill] sm:$0xff] }
 0x111   : > { %9502 = vmatprep.subr.bf16.mxu1 %v17753_v13  ;;  %v17763_v13 = vld [vmem:[#allocation13_spill] sm:$0xff] }
 0x116   : > { %9312 = vmatpush3.bf16.xpose.msra.mxu0 %v17756_v42  ;;  %v17764_v42 = vpack.c.bf16 %v12038_v35, %v17700_v11  ;;  %v17774_v35 = vld [vmem:[#allocation22_spill] sm:$0xff]  ;;  %v17776_v11 = vld [vmem:[#allocation24_spill] sm:$0xff] }
 0x117   : > { %9314 = vmatprep.subr.bf16.mxu0 %v17757_v9  ;;  %v17766_v9 = vld [vmem:[#allocation15_spill] sm:$0xff] }
 0x118   : > { %9504 = vmatpush3.bf16.xpose.msra.mxu1 %v17759_v52  ;;  %v17767_v52 = vld [vmem:[#allocation82_spill] sm:$0xff] }
 0x119   : > { %9506 = vmatprep.subr.bf16.mxu1 %v17761_v15  ;;  %v17769_v15 = vld [vmem:[#allocation16_spill] sm:$0xff] }
 0x11e   : > { %9316 = vmatpush3.bf16.xpose.msra.mxu0 %v17762_v14  ;;  %v17770_v14 = vld [vmem:[#allocation18_spill] sm:$0xff] }
 0x11f   : > { %9318 = vmatprep.subr.bf16.mxu0 %v17763_v13  ;;  %v17771_v13 = vld [vmem:[#allocation19_spill] sm:$0xff] }
 0x120   : > { %9508 = vmatpush3.bf16.xpose.msra.mxu1 %v17764_v42  ;;  %v17772_v42 = vld [vmem:[#allocation20_spill] sm:$0xff] }
 0x121   : > { %9510 = vmatprep.subr.bf16.mxu1 %v17765_v8  ;;  %v17773_v8 = vld [vmem:[#allocation21_spill] sm:$0xff] }
 0x125   : > { %7690 = vmatmul.mubr.f32.vlgmr.msra.gmra.mrb[0].mxu0 %v17711_v63 }
 0x126   : > { %9320 = vmatpush3.bf16.xpose.msra.mxu0 %v17766_v9  ;;  %7723 = vmatprep.mubr.f32.mxu0 %v17767_v52  ;;  %v17775_v9 = vld [vmem:[#allocation23_spill] sm:$0xff] }
 0x127   : > { %9322 = vmatprep.subr.bf16.mxu0 %v17768_v22  ;;  %7894 = vmatmul.mubr.f32.vlgmr.msra.gmra.mrb[0].mxu1 %v17711_v63  ;;  %v17777_v22 = vld [vmem:[#allocation26_spill] sm:$0xff]  ;;  %v17778_v63 = vld [vmem:[#allocation28_spill] sm:$0xff] }
 0x128   : > { %9512 = vmatpush3.bf16.xpose.msra.mxu1 %v17769_v15  ;;  %7927 = vmatprep.mubr.f32.mxu1 %v17767_v52  ;;  %v17779_v15 = vld [vmem:[#allocation37_spill] sm:$0xff] }
 0x129   : > { %9514 = vmatprep.subr.bf16.mxu1 %v17770_v14  ;;  %v17781_v14 = vld [vmem:[#allocation44_spill] sm:$0xff] }
 0x12e   : > { %9324 = vmatpush3.bf16.xpose.msra.mxu0 %v17771_v13  ;;  %v17782_v13 = vld [vmem:[#allocation46_spill] sm:$0xff] }
 0x12f   : > { %9326 = vmatprep.subr.bf16.mxu0 %v17772_v42  ;;  %v17783_v42 = vld [vmem:[#allocation56_spill] sm:$0xff] }
 0x130   : > { %9516 = vmatpush3.bf16.xpose.msra.mxu1 %v17773_v8  ;;  %v17784_v8 = vld [vmem:[#allocation60_spill] sm:$0xff] }
 0x131   : > { %9518 = vmatprep.subr.bf16.mxu1 %v17774_v35  ;;  %v17785_v35 = vld [vmem:[#allocation61_spill] sm:$0xff] }
 0x136   : > { %9328 = vmatpush3.bf16.xpose.msra.mxu0 %v17775_v9  ;;  %v17786_v9 = vld [vmem:[#allocation66_spill] sm:$0xff] }
 0x137   : > { %9330 = vmatprep.subr.bf16.mxu0 %v17776_v11  ;;  %v17787_v11 = vld [vmem:[#allocation69_spill] sm:$0xff] }
 0x138   : > { %9520 = vmatpush3.bf16.xpose.msra.mxu1 %v17777_v22  ;;  %v17788_v22 = vld [vmem:[#allocation76_spill] sm:$0xff] }
 0x139   : > { %9522 = vmatprep.subr.bf16.mxu1 %v17778_v63  ;;  %v17789_v63 = vld [vmem:[#allocation73_spill] sm:$0xff] }
 0x13e   : > { %9332 = vmatpush3.bf16.xpose.msra.mxu0 %v17779_v15  ;;  %v17790_v15 = vld [vmem:[#allocation80_spill] sm:$0xff] }
 0x13f   : > { %9334 = vmatprep.subr.bf16.mxu0 %v17780_v56  ;;  %v17791_v56 = vld [vmem:[#allocation84_spill] sm:$0xff] }
 0x140   : > { %9524 = vmatpush3.bf16.xpose.msra.mxu1 %v17781_v14  ;;  %v17792_v14 = vld [vmem:[#allocation90_spill] sm:$0xff] }
 0x141   : > { %9526 = vmatprep.subr.bf16.mxu1 %v17782_v13  ;;  %v17793_v13 = vld [vmem:[#allocation87_spill] sm:$0xff] }
 0x146   : > { %9336 = vmatpush3.bf16.xpose.msra.mxu0 %v17783_v42  ;;  %v17794_v42 = vld [vmem:[#allocation93_spill] sm:$0xff] }
 0x147   : > { %9338 = vmatprep.subr.bf16.mxu0 %v17784_v8 }
 0x148   : > { %9528 = vmatpush3.bf16.xpose.msra.mxu1 %v17785_v35  ;;  %v17795_v35 = vand.u32 4294901760, %v11463_v55  ;;  %v17803_v55 = vand.u32 4294901760, %v17675_v19  ;;  %v17809_v19 = vand.u32 4294901760, %v17718_v62  ;;  %v17819_v62 = vand.u32 4294901760, %v17726_v37 }
 0x149   : > { %9530 = vmatprep.subr.bf16.mxu1 %v17786_v9  ;;  %v17796_v9 = vand.u32 4294901760, %v11468_v54  ;;  %v17804_v54 = vand.u32 4294901760, %v17676_v47  ;;  %v17810_v47 = vand.u32 4294901760, %v11554_v24  ;;  %v17817_v24 = vand.u32 4294901760, %v17678_v17 }
 0x14a   : > { %v17825_v17 = vand.u32 4294901760, %v17735_v43  ;;  %v17827_v37 = vand.u32 4294901760, %v17635_v49  ;;  %v17833_v43 = vand.u32 4294901760, %v17687_v51  ;;  %v17834_v49 = vld [vmem:[#allocation59_spill] sm:$0xff]  ;;  %v17847_v51 = vand.u32 4294901760, %v17695_v50 }
 0x14b   : > { %v9349_v8 = vpack.c.bf16 %v17796_v9, %v17795_v35  ;;  %v9353_v35 = vpack.c.bf16 %v17804_v54, %v17803_v55  ;;  %v17821_v55 = vand.u32 4294901760, %v17729_v23  ;;  %v17828_v23 = vand.u32 4294901760, %v17636_v20 }
 0x14e   : > { %9340 = vmatpush3.bf16.xpose.msra.mxu0 %v17787_v11  ;;  %v17797_v11 = vld [vmem:[#allocation95_spill] sm:$0xff] }
 0x14f   : > { %9342 = vmatprep.subr.bf16.mxu0 %v17788_v22  ;;  %v17798_v22 = vand.u32 4294901760, %v11479_v58  ;;  %v17805_v58 = vand.u32 4294901760, %v17713_v61  ;;  %v17812_v61 = vand.u32 4294901760, %v11579_v26 }
 0x150   : > { %9532 = vmatpush3.bf16.xpose.msra.mxu1 %v17789_v63  ;;  %v17799_v63 = vand.u32 4294901760, %v11484_v0  ;;  %v17806_v0 = vand.u32 4294901760, %v17672_v28  ;;  %v17811_v28 = vand.u32 4294901760, %v11574_v46  ;;  %v17818_v46 = vand.u32 4294901760, %v17679_v39 }
 0x151   : > { %9534 = vmatprep.subr.bf16.mxu1 %v17790_v15  ;;  %v17826_v39 = vand.u32 4294901760, %v17734_v32  ;;  %v17835_v32 = vand.u32 4294901760, %v17834_v49  ;;  %v17880_v49 = vld [vmem:[#allocation19_spill] sm:$0xff] }
 0x152   : > { %v9541_v15 = vpack.c.bf16 %v17799_v63, %v17798_v22  ;;  %v9543_v22 = vpack.c.bf16 %v17806_v0, %v17805_v58  ;;  %v9359_v26 = vpack.c.bf16 %v17818_v46, %v17817_v24  ;;  %v17829_v0 = vand.u32 4294901760, %v17739_v57  ;;  %v17838_v57 = vld [vmem:[#allocation65_spill] sm:$0xff]  ;;  %v17850_v24 = vld [vmem:[#allocation79_spill] sm:$0xff] }
 0x153   : > { %v9367_v20 = vpack.c.bf16 %v17835_v32, %v17833_v43  ;;  %v17851_v46 = vand.u32 4294901760, %v17850_v24  ;;  %v17879_v43 = vld [vmem:[#allocation18_spill] sm:$0xff]  ;;  %v17881_v32 = vld [vmem:[#allocation20_spill] sm:$0xff] }
 0x154   : > { %v12483_v24 = vld [vmem:[%s11250_s4 + $0x288] sm:$0xff] }
 0x156   : > { %9344 = vmatpush3.bf16.xpose.msra.mxu0 %v17791_v56  ;;  %v17800_v56 = vld [vmem:[#allocation98_spill] sm:$0xff] }
 0x157   : > { %9346 = vmatprep.subr.bf16.mxu0 %v17792_v14 }
 0x158   : > { %9536 = vmatpush3.bf16.xpose.msra.mxu1 %v17793_v13  ;;  %v17801_v13 = vand.u32 4294901760, %v17669_v25  ;;  %v17808_v25 = vand.u32 4294901760, %v17715_v48  ;;  %v9357_v48 = vpack.c.bf16 %v17812_v61, %v17811_v28  ;;  %v17842_v61 = vld [vmem:[#allocation63_spill] sm:$0xff] }
 0x159   : > { %9538 = vmatprep.subr.bf16.mxu1 %v17794_v42  ;;  %v17802_v42 = vand.u32 4294901760, %v17670_v27  ;;  %v9355_v27 = vpack.c.bf16 %v17810_v47, %v17809_v19  ;;  %v17839_v47 = vand.u32 4294901760, %v17838_v57  ;;  %v17885_v57 = vld [vmem:[#allocation24_spill] sm:$0xff] }
 0x15b   : > { %v9351_v14 = vpack.c.bf16 %v17802_v42, %v17801_v13  ;;  %v17814_v13 = vand.u32 4294901760, %v11569_v16 }
 0x15e   : > { %9348 = vmatpush3.bf16.xpose.msra.mxu0 %v17797_v11 }
 0x15f   : > { %9350 = vmatprep.subr.bf16.mxu0 %v9349_v8  ;;  %v17807_v8 = vand.u32 4294901760, %v17716_v40  ;;  %v17813_v40 = vand.u32 4294901760, %v17721_v7  ;;  %v17820_v7 = vand.u32 4294901760, %v17725_v3  ;;  %v9363_v3 = vpack.c.bf16 %v17826_v39, %v17825_v17 }
 0x160   : > { %9540 = vmatpush3.bf16.xpose.msra.mxu1 %v17800_v56  ;;  %v17862_v17 = vand.u32 4294901760, %v17758_v2  ;;  %v17872_v2 = vld [vmem:[#allocation55_spill] sm:$0xff] }
 0x161   : > { %9542 = vmatprep.subr.bf16.mxu1 %v9541_v15  ;;  %v9545_v63 = vpack.c.bf16 %v17808_v25, %v17807_v8  ;;  %v9547_v9 = vpack.c.bf16 %v17814_v13, %v17813_v40  ;;  %v17815_v15 = vand.u32 4294901760, %v11588_v30  ;;  %v9361_v16 = vpack.c.bf16 %v17820_v7, %v17819_v62  ;;  %v17845_v40 = vld [vmem:[#allocation68_spill] sm:$0xff]  ;;  %v17853_v7 = vld [vmem:[#allocation75_spill] sm:$0xff] }
 0x162   : > { %v17822_v30 = vand.u32 4294901760, %v17728_v5  ;;  %v9365_v5 = vpack.c.bf16 %v17828_v23, %v17827_v37  ;;  %v17832_v8 = vand.u32 4294901760, %v17686_v41  ;;  %v17844_v41 = vand.u32 4294901760, %v17693_v36 }
 0x163   : > { %v17846_v13 = vand.u32 4294901760, %v17845_v40  ;;  %v17852_v62 = vand.u32 4294901760, %v17749_v45  ;;  %v17854_v36 = vand.u32 4294901760, %v17853_v7  ;;  %v17860_v45 = vld [vmem:[#allocation92_spill] sm:$0xff]  ;;  %v17894_v40 = vld [vmem:[#allocation61_spill] sm:$0xff]  ;;  %v16842_v7 = vand.u32 4294901760, %v12483_v24 }
 0x164   : > { %v9551_v54 = vpack.c.bf16 %v17822_v30, %v17821_v55  ;;  %v17855_v55 = vand.u32 4294901760, %v17752_v18  ;;  %v17856_v30 = vand.u32 4294901760, %v17751_v38  ;;  %v17863_v18 = vand.u32 4294901760, %v11761_v53 }
 0x165   : > { %7724 = vmatmul.mubr.f32.vlgmr.msra.gmra.mrb[0].mxu0 %v17767_v52  ;;  %v17864_v38 = vand.u32 4294901760, %v17760_v60  ;;  %v17875_v60 = vld [vmem:[#allocation14_spill] sm:$0xff] }
 0x166   : > { %9352 = vmatpush3.bf16.xpose.msra.mxu0 %v9351_v14  ;;  %7757 = vmatprep.mubr.f32.mxu0 %v17709_v44  ;;  %v17816_v14 = vand.u32 4294901760, %v11593_v33  ;;  %v17823_v33 = vand.u32 4294901760, %v17732_v21  ;;  %v17830_v21 = vand.u32 4294901760, %v17738_v59  ;;  %v9567_v39 = vpack.c.bf16 %v17863_v18, %v17862_v17 }
 0x167   : > { %9354 = vmatprep.subr.bf16.mxu0 %v9353_v35  ;;  %7928 = vmatmul.mubr.f32.vlgmr.msra.gmra.mrb[0].mxu1 %v17767_v52  ;;  %v17824_v35 = vand.u32 4294901760, %v17731_v29  ;;  %v17831_v29 = vand.u32 4294901760, %v17645_v31  ;;  %v17843_v31 = vand.u32 4294901760, %v17842_v61  ;;  %v17890_v61 = vld [vmem:[#allocation44_spill] sm:$0xff] }
 0x168   : > { %9544 = vmatpush3.bf16.xpose.msra.mxu1 %v9543_v22  ;;  %7961 = vmatprep.mubr.f32.mxu1 %v17709_v44  ;;  %v9549_v42 = vpack.c.bf16 %v17816_v14, %v17815_v15  ;;  %v9555_v22 = vpack.c.bf16 %v17830_v21, %v17829_v0  ;;  %v17848_v15 = vand.u32 4294901760, %v17696_v4  ;;  %v17857_v4 = vand.u32 4294901760, %v17755_v6  ;;  %v17870_v0 = vld [vmem:[#allocation54_spill] sm:$0xff] }
 0x169   : > { %9546 = vmatprep.subr.bf16.mxu1 %v9545_v63  ;;  %v9553_v58 = vpack.c.bf16 %v17824_v35, %v17823_v33  ;;  %v9557_v25 = vpack.c.bf16 %v17832_v8, %v17831_v29  ;;  %v17836_v63 = vld [vmem:[#allocation64_spill] sm:$0xff]  ;;  %v17859_v33 = vand.u32 4294901760, %v17673_v10  ;;  %v17861_v35 = vand.u32 4294901760, %v17860_v45  ;;  %v17868_v10 = vld [vmem:[#allocation53_spill] sm:$0xff]  ;;  %v17876_v8 = vld [vmem:[#allocation15_spill] sm:$0xff] }
 0x16a   : > { %v17837_v19 = vand.u32 4294901760, %v17836_v63  ;;  %v9371_v14 = vpack.c.bf16 %v17848_v15, %v17847_v51  ;;  %v17867_v6 = vand.u32 4294901760, %v17698_v12  ;;  %v17871_v21 = vand.u32 4294901760, %v17870_v0  ;;  %v17874_v29 = vld [vmem:[#allocation13_spill] sm:$0xff]  ;;  %v17883_v63 = vld [vmem:[#allocation22_spill] sm:$0xff]  ;;  %v17897_v51 = vld [vmem:[#allocation76_spill] sm:$0xff] }
 0x16b   : > { %v17877_v12 = vld [vmem:[#allocation17_spill] sm:$0xff]  ;;  %v12512_v45 = vld [vmem:[%s11250_s4 + $0x290] sm:$0xff] }
 0x16c   : > { %v9369_v59 = vpack.c.bf16 %v17839_v47, %v17837_v19  ;;  %v17884_v19 = vld [vmem:[#allocation23_spill] sm:$0xff]  ;;  %v17886_v47 = vld [vmem:[#allocation26_spill] sm:$0xff]  ;;  %v17898_v15 = vld [vmem:[#allocation73_spill] sm:$0xff] }
 0x16e   : > { %9356 = vmatpush3.bf16.xpose.msra.mxu0 %v9355_v27  ;;  %v17840_v27 = vld [vmem:[#allocation62_spill] sm:$0xff] }
 0x16f   : > { %9358 = vmatprep.subr.bf16.mxu0 %v9357_v48  ;;  %v17841_v28 = vand.u32 4294901760, %v17840_v27  ;;  %v17888_v27 = vld [vmem:[#allocation37_spill] sm:$0xff] }
 0x170   : > { %9548 = vmatpush3.bf16.xpose.msra.mxu1 %v9547_v9  ;;  %v9561_v9 = vpack.c.bf16 %v17846_v13, %v17844_v41  ;;  %v17893_v41 = vld [vmem:[#allocation60_spill] sm:$0xff]  ;;  %v17895_v13 = vld [vmem:[#allocation66_spill] sm:$0xff] }
 0x171   : > { %9550 = vmatprep.subr.bf16.mxu1 %v9549_v42  ;;  %v9559_v48 = vpack.c.bf16 %v17843_v31, %v17841_v28  ;;  %v17849_v42 = vand.u32 4294901760, %v17661_v1  ;;  %v17858_v1 = vand.u32 4294901760, %v17754_v34  ;;  %v17869_v34 = vand.u32 4294901760, %v17868_v10  ;;  %v17889_v28 = vld [vmem:[#allocation38_spill] sm:$0xff] }
 0x172   : > { %v17891_v31 = vld [vmem:[#allocation46_spill] sm:$0xff] }
 0x173   : > { %v9375_v50 = vpack.c.bf16 %v17858_v1, %v17857_v4 }
 0x176   : > { %9360 = vmatpush3.bf16.xpose.msra.mxu0 %v9359_v26  ;;  %v9373_v26 = vpack.c.bf16 %v17851_v46, %v17849_v42  ;;  %v12480_v42 = vld [vmem:[%s11250_s4 + $0x280] sm:$0xff] }
 0x177   : > { %9362 = vmatprep.subr.bf16.mxu0 %v9361_v16  ;;  %v9563_v16 = vpack.c.bf16 %v17854_v36, %v17852_v62  ;;  %v17900_v46 = vld [vmem:[#allocation84_spill] sm:$0xff]  ;;  %v16843_v62 = vand.u32 4294901760, %v12480_v42 }
 0x178   : > { %9552 = vmatpush3.bf16.xpose.msra.mxu1 %v9551_v54  ;;  %v9565_v54 = vpack.c.bf16 %v17856_v30, %v17855_v55  ;;  %v12490_v36 = vld [vmem:[%s11250_s4 + $0x380] sm:$0xff]  ;;  %v17902_v55 = vld [vmem:[#allocation87_spill] sm:$0xff] }
 0x179   : > { %9554 = vmatprep.subr.bf16.mxu1 %v9553_v58  ;;  %v9377_v58 = vpack.c.bf16 %v17861_v35, %v17859_v33  ;;  %v17903_v30 = vld [vmem:[#allocation93_spill] sm:$0xff]  ;;  %v12503_v1 = vpack.c.bf16 %v16842_v7, %v16843_v62  ;;  %v12515_v35 = vld [vmem:[%s11250_s4 + $0x298] sm:$0xff] }
 0x17a   : > { %v12509_v33 = vld [vmem:[%s11250_s4 + $0x208] sm:$0xff]  ;;  %v12744_v62 = vld [vmem:[%s11250_s4 + $0x240] sm:$0xff] }
 0x17b   : > { %17904 = vst [vmem:[#allocation77_spill] sm:$0xff] %v12503_v1  ;;  %v16838_v18 = vand.u32 4294901760, %v12509_v33 }
 0x17e   : > { %9364 = vmatpush3.bf16.xpose.msra.mxu0 %v9363_v3  ;;  %v17865_v3 = vld [vmem:[#allocation96_spill] sm:$0xff] }
 0x17f   : > { %9366 = vmatprep.subr.bf16.mxu0 %v9365_v5  ;;  %v17866_v37 = vand.u32 4294901760, %v17865_v3  ;;  %v9379_v5 = vpack.c.bf16 %v17869_v34, %v17867_v6  ;;  %v16830_v3 = vand.u32 4294901760, %v12515_v35 }
 0x180   : > { %9556 = vmatpush3.bf16.xpose.msra.mxu1 %v9555_v22  ;;  %v17873_v22 = vand.u32 4294901760, %v17872_v2  ;;  %v12563_v2 = vld [vmem:[%s11250_s4 + $0x218] sm:$0xff] }
 0x181   : > { %9558 = vmatprep.subr.bf16.mxu1 %v9557_v25  ;;  %v9569_v23 = vpack.c.bf16 %v17866_v37, %v17864_v38  ;;  %v17878_v25 = vld [vmem:[#allocation16_spill] sm:$0xff]  ;;  %v12530_v38 = vld [vmem:[%s11250_s4 + $0x308] sm:$0xff]  ;;  %v12536_v37 = vld [vmem:[%s11250_s4 + $0x390] sm:$0xff] }
 0x182   : > { %v9571_v53 = vpack.c.bf16 %v17873_v22, %v17871_v21  ;;  %v16832_v10 = vand.u32 4294901760, %v12530_v38  ;;  %v12560_v21 = vld [vmem:[%s11250_s4 + $0x210] sm:$0xff]  ;;  %v12566_v22 = vld [vmem:[%s11250_s4 + $0x2a0] sm:$0xff] }
 0x186   : > { %9368 = vmatpush3.bf16.xpose.msra.mxu0 %v9367_v20  ;;  %v17882_v20 = vld [vmem:[#allocation21_spill] sm:$0xff] }
 0x187   : > { %9370 = vmatprep.subr.bf16.mxu0 %v9369_v59  ;;  %v17887_v59 = vld [vmem:[#allocation28_spill] sm:$0xff] }
 0x188   : > { %9560 = vmatpush3.bf16.xpose.msra.mxu1 %v9559_v48  ;;  %v17892_v48 = vld [vmem:[#allocation56_spill] sm:$0xff] }
 0x189   : > { %9562 = vmatprep.subr.bf16.mxu1 %v9561_v9  ;;  %v17896_v9 = vld [vmem:[#allocation69_spill] sm:$0xff] }
 0x18e   : > { %9372 = vmatpush3.bf16.xpose.msra.mxu0 %v9371_v14  ;;  %v17899_v14 = vld [vmem:[#allocation80_spill] sm:$0xff] }
 0x18f   : > { %9374 = vmatprep.subr.bf16.mxu0 %v9373_v26  ;;  %v17901_v26 = vld [vmem:[#allocation90_spill] sm:$0xff] }
 0x190   : > { %9564 = vmatpush3.bf16.xpose.msra.mxu1 %v9563_v16  ;;  %v12493_v16 = vld [vmem:[%s11250_s4 + $0x388] sm:$0xff] }
 0x191   : > { %9566 = vmatprep.subr.bf16.mxu1 %v9565_v54  ;;  %v16841_v54 = vand.u32 4294901760, %v12490_v36  ;;  %v16840_v4 = vand.u32 4294901760, %v12493_v16 }
 0x196   : > { %9376 = vmatpush3.bf16.xpose.msra.mxu0 %v9375_v50  ;;  %v12506_v50 = vld [vmem:[%s11250_s4 + $0x200] sm:$0xff] }
 0x197   : > { %9378 = vmatprep.subr.bf16.mxu0 %v9377_v58  ;;  %v12522_v58 = vpack.c.bf16 %v16840_v4, %v16841_v54  ;;  %v16839_v17 = vand.u32 4294901760, %v12506_v50 }
 0x198   : > { %9568 = vmatpush3.bf16.xpose.msra.mxu1 %v9567_v39  ;;  %v12527_v39 = vld [vmem:[%s11250_s4 + $0x300] sm:$0xff] }
 0x199   : > { %9570 = vmatprep.subr.bf16.mxu1 %v9569_v23  ;;  %17905 = vst [vmem:[#allocation25_spill] sm:$0xff] %v12522_v58  ;;  %v12539_v23 = vld [vmem:[%s11250_s4 + $0x398] sm:$0xff]  ;;  %v16837_v6 = vand.u32 4294901760, %v12527_v39  ;;  %v12549_v34 = vpack.c.bf16 %v16838_v18, %v16839_v17  ;;  %v12747_v18 = vld [vmem:[%s11250_s4 + $0x248] sm:$0xff] }
 0x19a   : > { %v16824_v0 = vand.u32 4294901760, %v12539_v23 }
 0x19b   : > { %17906 = vst [vmem:[#allocation27_spill] sm:$0xff] %v12549_v34 }
 0x19e   : > { %9380 = vmatpush3.bf16.xpose.msra.mxu0 %v9379_v5  ;;  %v16825_v5 = vand.u32 4294901760, %v12536_v37 }
 0x19f   : > { %9382 = vmatprep.subr.bf16.mxu0 %v17874_v29  ;;  %v12576_v29 = vpack.c.bf16 %v16832_v10, %v16837_v6  ;;  %v12714_v10 = vld [vmem:[%s11250_s4 + $0x338] sm:$0xff]  ;;  %v12750_v6 = vld [vmem:[%s11250_s4 + $0x2d0] sm:$0xff] }
 0x1a0   : > { %9572 = vmatpush3.bf16.xpose.msra.mxu1 %v9571_v53  ;;  %v12569_v53 = vld [vmem:[%s11250_s4 + $0x2a8] sm:$0xff]  ;;  %v17922_v54 = vand.u32 4294901760, %v12714_v10 }
 0x1a1   : > { %9574 = vmatprep.subr.bf16.mxu1 %v17875_v60  ;;  %17908 = vst [vmem:[#allocation91_spill] sm:$0xff] %v12576_v29  ;;  %v12583_v60 = vpack.c.bf16 %v16824_v0, %v16825_v5  ;;  %v12687_v0 = vld [vmem:[%s11250_s4 + $0x238] sm:$0xff]  ;;  %v12690_v5 = vld [vmem:[%s11250_s4 + $0x2c0] sm:$0xff] }
 0x1a3   : > { %17909 = vst [vmem:[#allocation31_spill] sm:$0xff] %v12583_v60 }
 0x1a5   : > { %7758 = vmatmul.mubr.f32.vlgmr.msra.gmra.mrb[0].mxu0 %v17709_v44 }
 0x1a6   : > { %9384 = vmatpush3.bf16.xpose.msra.mxu0 %v17876_v8  ;;  %7791 = vmatprep.mubr.f32.mxu0 %v17709_v44  ;;  %v16823_v8 = vand.u32 4294901760, %v12560_v21 }
 0x1a7   : > { %9386 = vmatprep.subr.bf16.mxu0 %v17877_v12  ;;  %7962 = vmatmul.mubr.f32.vlgmr.msra.gmra.mrb[0].mxu1 %v17709_v44  ;;  %v16822_v12 = vand.u32 4294901760, %v12563_v2 }
 0x1a8   : > { %9576 = vmatpush3.bf16.xpose.msra.mxu1 %v17878_v25  ;;  %7995 = vmatprep.mubr.f32.mxu1 %v17709_v44  ;;  %v12588_v25 = vld [vmem:[%s11250_s4 + $0x310] sm:$0xff] }
 0x1a9   : > { %9578 = vmatprep.subr.bf16.mxu1 %v17879_v43  ;;  %v12591_v43 = vld [vmem:[%s11250_s4 + $0x318] sm:$0xff] }
 0x1ae   : > { %9388 = vmatpush3.bf16.xpose.msra.mxu0 %v17880_v49  ;;  %v17910_v49 = vld [vmem:[#allocation89_spill] sm:$0xff] }
 0x1af   : > { %9390 = vmatprep.subr.bf16.mxu0 %v17881_v32  ;;  %v16819_v32 = vand.u32 4294901760, %v12566_v22 }
 0x1b0   : > { %9580 = vmatpush3.bf16.xpose.msra.mxu1 %v17882_v20  ;;  %v16818_v20 = vand.u32 4294901760, %v12569_v53 }
 0x1b1   : > { %9582 = vmatprep.subr.bf16.mxu1 %v17883_v63  ;;  %v12598_v63 = vld [vmem:[%s11250_s4 + $0x3a0] sm:$0xff] }
 0x1b6   : > { %9392 = vmatpush3.bf16.xpose.msra.mxu0 %v17884_v19  ;;  %v12601_v19 = vld [vmem:[%s11250_s4 + $0x3a8] sm:$0xff] }
 0x1b7   : > { %9394 = vmatprep.subr.bf16.mxu0 %v17885_v57  ;;  %v16821_v57 = vand.u32 4294901760, %v12588_v25 }
 0x1b8   : > { %9584 = vmatpush3.bf16.xpose.msra.mxu1 %v17886_v47  ;;  %v16820_v47 = vand.u32 4294901760, %v12591_v43 }
 0x1b9   : > { %9586 = vmatprep.subr.bf16.mxu1 %v17887_v59  ;;  %v12613_v59 = vpack.c.bf16 %v16822_v12, %v16823_v8  ;;  %v12684_v8 = vld [vmem:[%s11250_s4 + $0x230] sm:$0xff] }
 0x1bb   : > { %17911 = vst [vmem:[#allocation32_spill] sm:$0xff] %v12613_v59 }
 0x1be   : > { %9396 = vmatpush3.bf16.xpose.msra.mxu0 %v17888_v27  ;;  %v16817_v27 = vand.u32 4294901760, %v12598_v63 }
 0x1bf   : > { %9398 = vmatprep.subr.bf16.mxu0 %v17889_v28  ;;  %v16816_v28 = vand.u32 4294901760, %v12601_v19 }
 0x1c0   : > { %9588 = vmatpush3.bf16.xpose.msra.mxu1 %v17890_v61  ;;  %v12621_v61 = vpack.c.bf16 %v16818_v20, %v16819_v32 }
 0x1c1   : > { %9590 = vmatprep.subr.bf16.mxu1 %v17891_v31  ;;  %v12624_v31 = vld [vmem:[%s11250_s4 + $0x220] sm:$0xff] }
 0x1c2   : > { %17912 = vst [vmem:[#allocation39_spill] sm:$0xff] %v12621_v61 }
 0x1c6   : > { %9400 = vmatpush3.bf16.xpose.msra.mxu0 %v17892_v48  ;;  %v12627_v48 = vld [vmem:[%s11250_s4 + $0x228] sm:$0xff] }
 0x1c7   : > { %9402 = vmatprep.subr.bf16.mxu0 %v17893_v41  ;;  %v12630_v41 = vld [vmem:[%s11250_s4 + $0x2b0] sm:$0xff] }
 0x1c8   : > { %9592 = vmatpush3.bf16.xpose.msra.mxu1 %v17894_v40  ;;  %v12633_v40 = vld [vmem:[%s11250_s4 + $0x2b8] sm:$0xff] }
 0x1c9   : > { %9594 = vmatprep.subr.bf16.mxu1 %v17895_v13  ;;  %v12639_v13 = vpack.c.bf16 %v16820_v47, %v16821_v57 }
 0x1cb   : > { %17913 = vst [vmem:[#allocation40_spill] sm:$0xff] %v12639_v13 }
 0x1ce   : > { %9404 = vmatpush3.bf16.xpose.msra.mxu0 %v17896_v9  ;;  %v12646_v9 = vpack.c.bf16 %v16816_v28, %v16817_v27  ;;  %v12663_v28 = vld [vmem:[%s11250_s4 + $0x3b8] sm:$0xff] }
 0x1cf   : > { %9406 = vmatprep.subr.bf16.mxu0 %v17897_v51  ;;  %v16827_v51 = vand.u32 4294901760, %v12624_v31  ;;  %v16835_v57 = vand.u32 4294901760, %v12663_v28 }
 0x1d0   : > { %9596 = vmatpush3.bf16.xpose.msra.mxu1 %v17898_v15  ;;  %17914 = vst [vmem:[#allocation57_spill] sm:$0xff] %v12646_v9  ;;  %v16826_v15 = vand.u32 4294901760, %v12627_v48 }
 0x1d1   : > { %9598 = vmatprep.subr.bf16.mxu1 %v17899_v14  ;;  %v12651_v14 = vld [vmem:[%s11250_s4 + $0x320] sm:$0xff] }
 0x1d2   : > { %v16834_v27 = vand.u32 4294901760, %v12651_v14  ;;  %v12673_v32 = vpack.c.bf16 %v16826_v15, %v16827_v51  ;;  %v12693_v15 = vld [vmem:[%s11250_s4 + $0x2c8] sm:$0xff] }
 0x1d4   : > { %17915 = vst [vmem:[#allocation58_spill] sm:$0xff] %v12673_v32 }
 0x1d6   : > { %9408 = vmatpush3.bf16.xpose.msra.mxu0 %v17900_v46  ;;  %v12654_v46 = vld [vmem:[%s11250_s4 + $0x328] sm:$0xff] }
 0x1d7   : > { %9410 = vmatprep.subr.bf16.mxu0 %v17901_v26  ;;  %v16829_v26 = vand.u32 4294901760, %v12630_v41  ;;  %v16833_v20 = vand.u32 4294901760, %v12654_v46 }
 0x1d8   : > { %9600 = vmatpush3.bf16.xpose.msra.mxu1 %v17902_v55  ;;  %v16828_v55 = vand.u32 4294901760, %v12633_v40 }
 0x1d9   : > { %9602 = vmatprep.subr.bf16.mxu1 %v17903_v30  ;;  %v12660_v30 = vld [vmem:[%s11250_s4 + $0x3b0] sm:$0xff]  ;;  %v12699_v51 = vpack.c.bf16 %v16833_v20, %v16834_v27  ;;  %v16847_v20 = vand.u32 4294901760, %v12690_v5  ;;  %v16846_v27 = vand.u32 4294901760, %v12693_v15 }
 0x1da   : > { %v16836_v47 = vand.u32 4294901760, %v12660_v30  ;;  %v12681_v12 = vpack.c.bf16 %v16828_v55, %v16829_v26  ;;  %v16845_v26 = vand.u32 4294901760, %v12684_v8 }
 0x1db   : > { %17917 = vst [vmem:[#allocation70_spill] sm:$0xff] %v12699_v51  ;;  %v12741_v7 = vpack.c.bf16 %v16846_v27, %v16847_v20 }
 0x1dc   : > { %17916 = vst [vmem:[#allocation67_spill] sm:$0xff] %v12681_v12  ;;  %v12706_v55 = vpack.c.bf16 %v16835_v57, %v16836_v47  ;;  %v12720_v57 = vld [vmem:[%s11250_s4 + $0x3c0] sm:$0xff]  ;;  %v12723_v47 = vld [vmem:[%s11250_s4 + $0x3c8] sm:$0xff] }
 0x1dd   : > { %17920 = vst [vmem:[#allocation29_spill] sm:$0xff] %v12741_v7  ;;  %v17924_v27 = vand.u32 4294901760, %v12720_v57  ;;  %v17925_v20 = vand.u32 4294901760, %v12723_v47 }
 0x1de   : > { %9412 = vmatpush3.bf16.xpose.msra.mxu0 %v17797_v11  ;;  %v16831_v11 = vand.u32 4294901760, %v12512_v45  ;;  %17918 = vst [vmem:[#allocation71_spill] sm:$0xff] %v12706_v55 }
 0x1df   : > { %9606 = vmatprep.subr.bf16.mxu0 %v12503_v1  ;;  %v17960_v1 = vand.u32 4294901760, %v12515_v35 }
 0x1e0   : > { %9604 = vmatpush3.bf16.xpose.msra.mxu1 %v17800_v56  ;;  %v12557_v56 = vpack.c.bf16 %v16830_v3, %v16831_v11  ;;  %v16844_v3 = vand.u32 4294901760, %v12687_v0  ;;  %v12711_v11 = vld [vmem:[%s11250_s4 + $0x330] sm:$0xff] }
 0x1e1   : > { %9798 = vmatprep.subr.bf16.mxu1 %v12522_v58  ;;  %v12866_v58 = vld [vmem:[%s11250_s4 + $0x350] sm:$0xff] }
 0x1e2   : > { %17907 = vst [vmem:[#allocation30_spill] sm:$0xff] %v12557_v56  ;;  %v12733_v17 = vpack.c.bf16 %v16844_v3, %v16845_v26  ;;  %v12753_v3 = vld [vmem:[%s11250_s4 + $0x2d8] sm:$0xff]  ;;  %v17921_v26 = vand.u32 4294901760, %v12711_v11 }
 0x1e4   : > { %17919 = vst [vmem:[#allocation97_spill] sm:$0xff] %v12733_v17  ;;  %v12759_v4 = vpack.c.bf16 %v17922_v54, %v17921_v26  ;;  %v17927_v54 = vand.u32 4294901760, %v12747_v18  ;;  %v17938_v26 = vand.u32 4294901760, %v12490_v36 }
 0x1e5   : > { %7792 = vmatmul.mubr.f32.vlgmr.msra.gmra.mrb[0].mxu0 %v17709_v44 }
 0x1e6   : > { %9608 = vmatpush3.bf16.xpose.msra.mxu0 %v12549_v34  ;;  %8029 = vmatprep.mubr.f32.mxu0 %v17910_v49  ;;  %17923 = vst [vmem:[#allocation34_spill] sm:$0xff] %v12759_v4 }
 0x1e7   : > { %9610 = vmatprep.subr.bf16.mxu0 %v12557_v56  ;;  %7996 = vmatmul.mubr.f32.vlgmr.msra.gmra.mrb[0].mxu1 %v17709_v44  ;;  %v17966_v44 = vand.u32 4294901760, %v12563_v2 }
 0x1e8   : > { %9800 = vmatpush3.bf16.xpose.msra.mxu1 %v12576_v29  ;;  %8233 = vmatprep.mubr.f32.mxu1 %v17910_v49  ;;  %v17942_v29 = vand.u32 4294901760, %v12493_v16 }
 0x1e9   : > { %9802 = vmatprep.subr.bf16.mxu1 %v12583_v60  ;;  %v12828_v60 = vld [vmem:[%s11250_s4 + $0x2e8] sm:$0xff] }
 0x1ea   : > { %17941 = vst [vmem:[#allocation50_spill] sm:$0xff] %v12828_v60  ;;  %v12833_v56 = vsub.f32 %v12493_v16, %v17942_v29  ;;  %v17950_v16 = vand.u32 4294901760, %v12527_v39 }
 0x1ec   : > { %17943 = vst [vmem:[#allocation49_spill] sm:$0xff] %v12833_v56  ;;  %v12854_v29 = vsub.f32 %v12527_v39, %v17950_v16  ;;  %v17956_v16 = vand.u32 4294901760, %v12512_v45 }
 0x1ee   : > { %9612 = vmatpush3.bf16.xpose.msra.mxu0 %v12613_v59 }
 0x1ef   : > { %9614 = vmatprep.subr.bf16.mxu0 %v12621_v61  ;;  %v17929_v61 = vand.u32 4294901760, %v12750_v6 }
 0x1f0   : > { %9804 = vmatpush3.bf16.xpose.msra.mxu1 %v12639_v13 }
 0x1f1   : > { %9806 = vmatprep.subr.bf16.mxu1 %v12646_v9  ;;  %v12774_v9 = vld [vmem:[%s11250_s4 + $0x348] sm:$0xff] }
 0x1f6   : > { %9616 = vmatpush3.bf16.xpose.msra.mxu0 %v12673_v32  ;;  %v12771_v32 = vld [vmem:[%s11250_s4 + $0x340] sm:$0xff] }
 0x1f7   : > { %9618 = vmatprep.subr.bf16.mxu0 %v12681_v12  ;;  %v12807_v12 = vld [vmem:[%s11250_s4 + $0x258] sm:$0xff] }
 0x1f8   : > { %9808 = vmatpush3.bf16.xpose.msra.mxu1 %v12699_v51  ;;  %v16872_v51 = vand.u32 4294901760, %v12744_v62  ;;  %17933 = vst [vmem:[#allocation43_spill] sm:$0xff] %v12807_v12 }
 0x1f9   : > { %9810 = vmatprep.subr.bf16.mxu1 %v12706_v55  ;;  %v12766_v55 = vpack.c.bf16 %v17925_v20, %v17924_v27  ;;  %v12783_v20 = vld [vmem:[%s11250_s4 + $0x3d8] sm:$0xff]  ;;  %v12804_v27 = vld [vmem:[%s11250_s4 + $0x250] sm:$0xff] }
 0x1fa   : > { %17932 = vst [vmem:[#allocation45_spill] sm:$0xff] %v12804_v27 }
 0x1fb   : > { %17926 = vst [vmem:[#allocation33_spill] sm:$0xff] %v12766_v55 }
 0x1fe   : > { %9620 = vmatpush3.bf16.xpose.msra.mxu0 %v12733_v17  ;;  %v12780_v17 = vld [vmem:[%s11250_s4 + $0x3d0] sm:$0xff] }
 0x1ff   : > { %9622 = vmatprep.subr.bf16.mxu0 %v12741_v7  ;;  %v12793_v7 = vpack.c.bf16 %v17927_v54, %v16872_v51  ;;  %v17936_v51 = vand.u32 4294901760, %v12483_v24 }
 0x200   : > { %9812 = vmatpush3.bf16.xpose.msra.mxu1 %v12759_v4  ;;  %v17930_v4 = vand.u32 4294901760, %v12753_v3 }
 0x201   : > { %9814 = vmatprep.subr.bf16.mxu1 %v12766_v55  ;;  %17928 = vst [vmem:[#allocation35_spill] sm:$0xff] %v12793_v7  ;;  %v17934_v55 = vand.u32 4294901760, %v12480_v42  ;;  %v12817_v13 = vsub.f32 %v12483_v24, %v17936_v51  ;;  %v17945_v51 = vand.u32 4294901760, %v12509_v33 }
 0x202   : > { %v12801_v59 = vpack.c.bf16 %v17930_v4, %v17929_v61  ;;  %v12822_v4 = vsub.f32 %v12490_v36, %v17938_v26  ;;  %v12825_v61 = vld [vmem:[%s11250_s4 + $0x2e0] sm:$0xff]  ;;  %v17948_v26 = vand.u32 4294901760, %v12774_v9 }
 0x203   : > { %v12812_v54 = vsub.f32 %v12480_v42, %v17934_v55  ;;  %17937 = vst [vmem:[#allocation41_spill] sm:$0xff] %v12817_v13  ;;  %17940 = vst [vmem:[#allocation47_spill] sm:$0xff] %v12825_v61  ;;  %v17944_v42 = vand.u32 4294901760, %v12506_v50  ;;  %v12843_v36 = vsub.f32 %v12509_v33, %v17945_v51  ;;  %v17947_v55 = vand.u32 4294901760, %v12771_v32  ;;  %v12885_v51 = vld [vmem:[%s11250_s4 + $0x3e0] sm:$0xff]  ;;  %v12888_v33 = vld [vmem:[%s11250_s4 + $0x3e8] sm:$0xff] }
 0x204   : > { %17931 = vst [vmem:[#allocation36_spill] sm:$0xff] %v12801_v59  ;;  %17939 = vst [vmem:[#allocation48_spill] sm:$0xff] %v12822_v4 }
 0x205   : > { %17935 = vst [vmem:[#allocation42_spill] sm:$0xff] %v12812_v54  ;;  %v12838_v24 = vsub.f32 %v12506_v50, %v17944_v42  ;;  %17946 = vst [vmem:[#allocation52_spill] sm:$0xff] %v12843_v36  ;;  %v12849_v52 = vpack.c.bf16 %v17948_v26, %v17947_v55  ;;  %v17951_v50 = vand.u32 4294901760, %v12780_v17  ;;  %v17952_v42 = vand.u32 4294901760, %v12783_v20  ;;  %v12869_v55 = vld [vmem:[%s11250_s4 + $0x358] sm:$0xff] }
 0x206   : > { %9624 = vmatpush3.bf16.xpose.msra.mxu0 %v12793_v7  ;;  %17954 = vst [vmem:[#allocation83_spill] sm:$0xff] %v12869_v55  ;;  %v17955_v26 = vand.u32 4294901760, %v12530_v38  ;;  %v12879_v7 = vsub.f32 %v12512_v45, %v17956_v16  ;;  %17958 = vst [vmem:[#allocation86_spill] sm:$0xff] %v12885_v51  ;;  %v17964_v16 = vand.u32 4294901760, %v12539_v23 }
 0x207   : > { %17949 = vst [vmem:[#allocation51_spill] sm:$0xff] %v12849_v52  ;;  %v12861_v34 = vpack.c.bf16 %v17952_v42, %v17951_v50  ;;  %9626 = vmatprep.subr.bf16.mxu0 %v12801_v59  ;;  %17959 = vst [vmem:[#allocation85_spill] sm:$0xff] %v12888_v33  ;;  %v17965_v42 = vand.u32 4294901760, %v12560_v21 }
 0x208   : > { %v12874_v39 = vsub.f32 %v12530_v38, %v17955_v26  ;;  %17957 = vst [vmem:[#allocation81_spill] sm:$0xff] %v12879_v7  ;;  %v12893_v38 = vsub.f32 %v12515_v35, %v17960_v1  ;;  %v17962_v26 = vand.u32 4294901760, %v12536_v37  ;;  %v12903_v50 = vsub.f32 %v12539_v23, %v17964_v16  ;;  %9816 = vmatpush3.bf16.xpose.msra.mxu1 %v12849_v52  ;;  %v12959_v16 = vld [vmem:[%s11250_s4 + $0x260] sm:$0xff] }
 0x209   : > { %17953 = vst [vmem:[#allocation74_spill] sm:$0xff] %v12861_v34  ;;  %v12908_v59 = vsub.f32 %v12560_v21, %v17965_v42  ;;  %v12913_v1 = vsub.f32 %v12563_v2, %v17966_v44  ;;  %v17967_v35 = vand.u32 4294901760, %v12588_v25  ;;  %v17969_v21 = vand.u32 4294901760, %v12591_v43  ;;  %9818 = vmatprep.subr.bf16.mxu1 %v12861_v34  ;;  %17981 = vst [vmem:[#allocation62_spill] sm:$0xff] %v12959_v16 }
 0x20a   : > { %17961 = vst [vmem:[#allocation88_spill] sm:$0xff] %v12893_v38  ;;  %v12898_v45 = vsub.f32 %v12536_v37, %v17962_v26  ;;  %v17971_v44 = vand.u32 4294901760, %v12804_v27  ;;  %v17972_v2 = vand.u32 4294901760, %v12807_v12  ;;  %v17974_v26 = vand.u32 4294901760, %v12566_v22 }
 0x20b   : > { %v12918_v37 = vsub.f32 %v12588_v25, %v17967_v35  ;;  %v12926_v42 = vsub.f32 %v12591_v43, %v17969_v21  ;;  %v17975_v43 = vand.u32 4294901760, %v12569_v53  ;;  %v17976_v34 = vand.u32 4294901760, %v12598_v63 }
 0x20c   : > { %17963 = vst [vmem:[#allocation94_spill] sm:$0xff] %v12898_v45  ;;  %v12933_v25 = vpack.c.bf16 %v17972_v2, %v17971_v44  ;;  %v12940_v23 = vsub.f32 %v12566_v22, %v17974_v26  ;;  %v17978_v44 = vand.u32 4294901760, %v12825_v61  ;;  %v17979_v2 = vand.u32 4294901760, %v12828_v60  ;;  %v12962_v22 = vld [vmem:[%s11250_s4 + $0x268] sm:$0xff]  ;;  %v12985_v61 = vld [vmem:[%s11250_s4 + $0x2f0] sm:$0xff] }
 0x20d   : > { %17968 = vst [vmem:[#allocation95_spill] sm:$0xff] %v12918_v37  ;;  %17970 = vst [vmem:[#allocation98_spill] sm:$0xff] %v12926_v42  ;;  %v12945_v21 = vsub.f32 %v12569_v53, %v17975_v43  ;;  %v12950_v52 = vsub.f32 %v12598_v63, %v17976_v34  ;;  %v17983_v26 = vand.u32 4294901760, %v12601_v19  ;;  %v17985_v43 = vand.u32 4294901760, %v12624_v31 }
 0x20e   : > { %17973 = vst [vmem:[#allocation59_spill] sm:$0xff] %v12933_v25  ;;  %v12956_v35 = vpack.c.bf16 %v17979_v2, %v17978_v44  ;;  %17982 = vst [vmem:[#allocation63_spill] sm:$0xff] %v12962_v22  ;;  %v17986_v63 = vand.u32 4294901760, %v12627_v48  ;;  %v17988_v2 = vand.u32 4294901760, %v12651_v14  ;;  %v17999_v12 = vand.u32 4294901760, %v12869_v55  ;;  %9628 = vmatpush3.bf16.xpose.msra.mxu0 %v12933_v25  ;;  %v13026_v55 = vld [vmem:[%s11250_s4 + $0x360] sm:$0xff] }
 0x20f   : > { %17977 = vst [vmem:[#allocation64_spill] sm:$0xff] %v12950_v52  ;;  %v12967_v53 = vsub.f32 %v12601_v19, %v17983_v26  ;;  %v12972_v34 = vsub.f32 %v12624_v31, %v17985_v43  ;;  %17990 = vst [vmem:[#allocation92_spill] sm:$0xff] %v12985_v61  ;;  %v12988_v19 = vld [vmem:[%s11250_s4 + $0x2f8] sm:$0xff]  ;;  %v17992_v26 = vand.u32 4294901760, %v12654_v46  ;;  %v17994_v43 = vand.u32 4294901760, %v12630_v41 }
 0x210   : > { %17980 = vst [vmem:[#allocation65_spill] sm:$0xff] %v12956_v35  ;;  %v12977_v44 = vsub.f32 %v12627_v48, %v17986_v63  ;;  %v12982_v60 = vsub.f32 %v12651_v14, %v17988_v2  ;;  %17991 = vst [vmem:[#allocation96_spill] sm:$0xff] %v12988_v19  ;;  %v17996_v63 = vand.u32 4294901760, %v12633_v40  ;;  %v17998_v2 = vand.u32 4294901760, %v12866_v58  ;;  %9630 = vmatprep.subr.bf16.mxu0 %v12956_v35  ;;  %v13038_v25 = vld [vmem:[%s11250_s4 + $0x3f8] sm:$0xff] }
 0x211   : > { %17984 = vst [vmem:[#allocation68_spill] sm:$0xff] %v12967_v53  ;;  %v12993_v31 = vsub.f32 %v12654_v46, %v17992_v26  ;;  %v12998_v48 = vsub.f32 %v12630_v41, %v17994_v43  ;;  %v18001_v27 = vand.u32 4294901760, %v12660_v30  ;;  %v18003_v41 = vand.u32 4294901760, %v12885_v51  ;;  %18006 = vst [vmem:[#allocation17_spill] sm:$0xff] %v13026_v55 }
 0x212   : > { %17987 = vst [vmem:[#allocation79_spill] sm:$0xff] %v12977_v44  ;;  %17989 = vst [vmem:[#allocation75_spill] sm:$0xff] %v12982_v60  ;;  %v13003_v14 = vsub.f32 %v12633_v40, %v17996_v63  ;;  %v13009_v60 = vpack.c.bf16 %v17999_v12, %v17998_v2  ;;  %v18004_v26 = vand.u32 4294901760, %v12888_v33  ;;  %v13029_v12 = vld [vmem:[%s11250_s4 + $0x368] sm:$0xff]  ;;  %v13035_v2 = vld [vmem:[%s11250_s4 + $0x3f0] sm:$0xff]  ;;  %v18009_v63 = vand.u32 4294901760, %v12663_v28 }
 0x213   : > { %17993 = vst [vmem:[#allocation53_spill] sm:$0xff] %v12993_v31  ;;  %17995 = vst [vmem:[#allocation54_spill] sm:$0xff] %v12998_v48  ;;  %v13014_v46 = vsub.f32 %v12660_v30, %v18001_v27  ;;  %v18010_v33 = vand.u32 4294901760, %v12684_v8  ;;  %v18011_v27 = vand.u32 4294901760, %v12687_v0  ;;  %v18015_v51 = vand.u32 4294901760, %v12714_v10 }
 0x214   : > { %17997 = vst [vmem:[#allocation55_spill] sm:$0xff] %v13003_v14  ;;  %18000 = vst [vmem:[#allocation13_spill] sm:$0xff] %v13009_v60  ;;  %v13021_v43 = vpack.c.bf16 %v18004_v26, %v18003_v41  ;;  %v13045_v40 = vsub.f32 %v12663_v28, %v18009_v63  ;;  %v18013_v41 = vand.u32 4294901760, %v12711_v11  ;;  %9820 = vmatpush3.bf16.xpose.msra.mxu1 %v13009_v60  ;;  %v13093_v60 = vld [vmem:[%s11250_s4 + $0x270] sm:$0xff] }
 0x215   : > { %18002 = vst [vmem:[#allocation14_spill] sm:$0xff] %v13014_v46  ;;  %18007 = vst [vmem:[#allocation16_spill] sm:$0xff] %v13029_v12  ;;  %v13050_v30 = vsub.f32 %v12684_v8, %v18010_v33  ;;  %v13055_v35 = vsub.f32 %v12687_v0, %v18011_v27  ;;  %v13070_v0 = vsub.f32 %v12714_v10, %v18015_v51  ;;  %v18018_v27 = vand.u32 4294901760, %v12962_v22  ;;  %v13096_v22 = vld [vmem:[%s11250_s4 + $0x278] sm:$0xff] }
 0x216   : > { %18005 = vst [vmem:[#allocation15_spill] sm:$0xff] %v13021_v43  ;;  %18008 = vst [vmem:[#allocation18_spill] sm:$0xff] %v13038_v25  ;;  %v13060_v26 = vsub.f32 %v12711_v11, %v18013_v41  ;;  %9822 = vmatprep.subr.bf16.mxu1 %v13021_v43  ;;  %v18017_v11 = vand.u32 4294901760, %v12959_v16  ;;  %v18020_v33 = vand.u32 4294901760, %v12690_v5  ;;  %v18022_v10 = vand.u32 4294901760, %v12985_v61 }
 0x217   : > { %18012 = vst [vmem:[#allocation19_spill] sm:$0xff] %v13055_v35  ;;  %18016 = vst [vmem:[#allocation21_spill] sm:$0xff] %v13070_v0  ;;  %v18023_v51 = vand.u32 4294901760, %v12988_v19  ;;  %v18026_v8 = vand.u32 4294901760, %v12817_v13  ;;  %v18031_v19 = vand.u32 4294901760, %v12723_v47  ;;  %v18037_v16 = vand.u32 4294901760, %v12833_v56 }
 0x218   : > { %18014 = vst [vmem:[#allocation20_spill] sm:$0xff] %v13060_v26  ;;  %v13077_v41 = vpack.c.bf16 %v18018_v27, %v18017_v11  ;;  %v13084_v28 = vsub.f32 %v12690_v5, %v18020_v33  ;;  %v18025_v11 = vand.u32 4294901760, %v12812_v54  ;;  %v18027_v5 = vand.u32 4294901760, %v12693_v15 }
 0x219   : > { %v13090_v43 = vpack.c.bf16 %v18023_v51, %v18022_v10  ;;  %v2433_v63 = vsub.f32 %v12817_v13, %v18026_v8  ;;  %v18029_v10 = vand.u32 4294901760, %v12720_v57  ;;  %v13117_v61 = vsub.f32 %v12723_v47, %v18031_v19 }
 0x21a   : > { %18019 = vst [vmem:[#allocation22_spill] sm:$0xff] %v13077_v41  ;;  %18021 = vst [vmem:[#allocation23_spill] sm:$0xff] %v13084_v28  ;;  %v2426_v27 = vsub.f32 %v12812_v54, %v18025_v11  ;;  %v13107_v33 = vsub.f32 %v12693_v15, %v18027_v5  ;;  %v18033_v54 = vand.u32 4294901760, %v13026_v55  ;;  %v18034_v8 = vand.u32 4294901760, %v13029_v12  ;;  %v13127_v15 = vld [vmem:[%s11250_s4 + $0x370] sm:$0xff]  ;;  %v13130_v5 = vld [vmem:[%s11250_s4 + $0x378] sm:$0xff]  ;;  %9632 = vmatpush3.bf16.xpose.msra.mxu0 %v13077_v41 }
 0x21b   : > { %18024 = vst [vmem:[#allocation24_spill] sm:$0xff] %v13090_v43  ;;  %v13112_v51 = vsub.f32 %v12720_v57, %v18029_v10  ;;  %18032 = vst [vmem:[#allocation37_spill] sm:$0xff] %v13117_v61  ;;  %v18036_v57 = vand.u32 4294901760, %v12822_v4  ;;  %v3288_v47 = vsub.f32 %v12833_v56, %v18037_v16  ;;  %v18038_v11 = vand.u32 4294901760, %v12744_v62  ;;  %9634 = vmatprep.subr.bf16.mxu0 %v13090_v43 }
 0x21c   : > { %18028 = vst [vmem:[#allocation26_spill] sm:$0xff] %v13107_v33  ;;  %v13124_v13 = vpack.c.bf16 %v18034_v8, %v18033_v54  ;;  %v18040_v54 = vand.u32 4294901760, %v13035_v2  ;;  %v18041_v8 = vand.u32 4294901760, %v13038_v25  ;;  %v2427_v16 = vand.u32 4294901760, %v2426_v27 }
 0x21d   : > { %18030 = vst [vmem:[#allocation28_spill] sm:$0xff] %v13112_v51  ;;  %v3281_v10 = vsub.f32 %v12822_v4, %v18036_v57  ;;  %v13142_v12 = vsub.f32 %v12744_v62, %v18038_v11  ;;  %v2434_v19 = vand.u32 4294901760, %v2433_v63  ;;  %v18043_v25 = vand.u32 4294901760, %v12838_v24 }
 0x21e   : > { %18035 = vst [vmem:[#allocation38_spill] sm:$0xff] %v13124_v13  ;;  %v13149_v55 = vpack.c.bf16 %v18041_v8, %v18040_v54  ;;  %9824 = vmatpush3.bf16.xpose.msra.mxu1 %v13124_v13  ;;  %v3289_v57 = vand.u32 4294901760, %v3288_v47  ;;  %v18044_v63 = vand.u32 4294901760, %v12843_v36  ;;  %v18045_v11 = vand.u32 4294901760, %v12747_v18 }
 0x21f   : > { %18039 = vst [vmem:[#allocation44_spill] sm:$0xff] %v13142_v12  ;;  %v2314_v54 = vsub.f32 %v12838_v24, %v18043_v25  ;;  %v3282_v4 = vand.u32 4294901760, %v3281_v10  ;;  %v18047_v25 = vand.u32 4294901760, %v13093_v60  ;;  %v18048_v8 = vand.u32 4294901760, %v13096_v22 }
 0x220   : > { %18042 = vst [vmem:[#allocation46_spill] sm:$0xff] %v13149_v55  ;;  %v2321_v27 = vsub.f32 %v12843_v36, %v18044_v63  ;;  %v13170_v41 = vsub.f32 %v12747_v18, %v18045_v11  ;;  %9826 = vmatprep.subr.bf16.mxu1 %v13149_v55  ;;  %v18050_v63 = vand.u32 4294901760, %v12771_v32  ;;  %v9637_v13 = vpack.c.bf16 %v2434_v19, %v2427_v16 }
 0x221   : > { %v13177_v56 = vpack.c.bf16 %v18048_v8, %v18047_v25  ;;  %v18051_v18 = vand.u32 4294901760, %v12879_v7  ;;  %v18052_v55 = vand.u32 4294901760, %v12893_v38  ;;  %v18053_v8 = vand.u32 4294901760, %v12774_v9 }
 0x222   : > { %18046 = vst [vmem:[#allocation56_spill] sm:$0xff] %v13170_v41  ;;  %v13184_v62 = vsub.f32 %v12771_v32, %v18050_v63  ;;  %v18055_v47 = vand.u32 4294901760, %v12750_v6  ;;  %v18057_v32 = vand.u32 4294901760, %v13127_v15  ;;  %v18058_v19 = vand.u32 4294901760, %v13130_v5 }
 0x223   : > { %18049 = vst [vmem:[#allocation60_spill] sm:$0xff] %v13177_v56  ;;  %v2440_v11 = vsub.f32 %v12879_v7, %v18051_v18  ;;  %v2447_v43 = vsub.f32 %v12893_v38, %v18052_v55  ;;  %v13195_v25 = vsub.f32 %v12774_v9, %v18053_v8  ;;  %v18060_v63 = vand.u32 4294901760, %v12854_v29  ;;  %9636 = vmatpush3.bf16.xpose.msra.mxu0 %v13177_v56 }
 0x224   : > { %v13200_v10 = vsub.f32 %v12750_v6, %v18055_v47  ;;  %v13206_v16 = vpack.c.bf16 %v18058_v19, %v18057_v32  ;;  %v9829_v18 = vpack.c.bf16 %v3289_v57, %v3282_v4  ;;  %v2315_v38 = vand.u32 4294901760, %v2314_v54  ;;  %9638 = vmatprep.subr.bf16.mxu0 %v9637_v13 }
 0x225   : > { %18054 = vst [vmem:[#allocation61_spill] sm:$0xff] %v13195_v25  ;;  %v3169_v55 = vsub.f32 %v12854_v29, %v18060_v63  ;;  %v2322_v7 = vand.u32 4294901760, %v2321_v27  ;;  %v18061_v9 = vand.u32 4294901760, %v12874_v39  ;;  %v18062_v6 = vand.u32 4294901760, %v12898_v45 }
 0x226   : > { %18056 = vst [vmem:[#allocation66_spill] sm:$0xff] %v13200_v10  ;;  %18059 = vst [vmem:[#allocation69_spill] sm:$0xff] %v13206_v16  ;;  %v18063_v32 = vand.u32 4294901760, %v12903_v50  ;;  %v16958_v36 = vand.u32 4294901760, %v12908_v59  ;;  %v2441_v57 = vand.u32 4294901760, %v2440_v11  ;;  %v2448_v54 = vand.u32 4294901760, %v2447_v43  ;;  %9828 = vmatpush3.bf16.xpose.msra.mxu1 %v13206_v16 }
 0x227   : > { %v3176_v8 = vsub.f32 %v12874_v39, %v18061_v9  ;;  %v3295_v47 = vsub.f32 %v12898_v45, %v18062_v6  ;;  %v18064_v9 = vand.u32 4294901760, %v12753_v3  ;;  %v3170_v6 = vand.u32 4294901760, %v3169_v55  ;;  %9830 = vmatprep.subr.bf16.mxu1 %v9829_v18 }
 0x228   : > { %v3302_v19 = vsub.f32 %v12903_v50, %v18063_v32  ;;  %v16959_v45 = vand.u32 4294901760, %v12918_v37  ;;  %v9639_v4 = vpack.c.bf16 %v2322_v7, %v2315_v38  ;;  %v16966_v43 = vand.u32 4294901760, %v12950_v52 }
 0x229   : > { %v13228_v56 = vsub.f32 %v12753_v3, %v18064_v9  ;;  %v3177_v13 = vand.u32 4294901760, %v3176_v8  ;;  %v3296_v63 = vand.u32 4294901760, %v3295_v47  ;;  %v2328_v3 = vsub.f32 %v12908_v59, %v16958_v36 }
 0x22a   : > { %v3303_v27 = vand.u32 4294901760, %v3302_v19  ;;  %v18066_v55 = vand.u32 4294901760, %v12913_v1  ;;  %v18067_v32 = vand.u32 4294901760, %v12780_v17  ;;  %v9641_v38 = vpack.c.bf16 %v2448_v54, %v2441_v57  ;;  %8030 = vmatmul.mubr.f32.vlgmr.msra.gmra.mrb[2].mxu0 %v17910_v49 }
 0x22b   : > { %18065 = vst [vmem:[#allocation76_spill] sm:$0xff] %v13228_v56  ;;  %v18069_v8 = vand.u32 4294901760, %v12940_v23  ;;  %v18070_v47 = vand.u32 4294901760, %v12945_v21  ;;  %v18071_v36 = vand.u32 4294901760, %v12783_v20  ;;  %9640 = vmatpush3.bf16.xpose.msra.mxu0 %v9639_v4  ;;  %v2329_v54 = vand.u32 4294901760, %v2328_v3  ;;  %v18078_v4 = vld [vmem:[#allocation75_spill] sm:$0xff] }
 0x22c   : > { %v2335_v9 = vsub.f32 %v12913_v1, %v18066_v55  ;;  %v13244_v7 = vsub.f32 %v12780_v17, %v18067_v32  ;;  %v3183_v55 = vsub.f32 %v12918_v37, %v16959_v45  ;;  %v18072_v17 = vand.u32 4294901760, %v12926_v42  ;;  %v18074_v45 = vld [vmem:[#allocation45_spill] sm:$0xff]  ;;  %9642 = vmatprep.subr.bf16.mxu0 %v9641_v38 }
 0x22d   : > { %v2454_v18 = vsub.f32 %v12940_v23, %v18069_v8  ;;  %v2461_v19 = vsub.f32 %v12945_v21, %v18070_v47  ;;  %v13255_v11 = vsub.f32 %v12783_v20, %v18071_v36  ;;  %v9831_v32 = vpack.c.bf16 %v3177_v13, %v3170_v6  ;;  %v18076_v6 = vld [vmem:[#allocation72_spill] sm:$0xff]  ;;  %8234 = vmatmul.mubr.f32.vlgmr.msra.gmra.mrb[2].mxu1 %v17910_v49 }
 0x22e   : > { %18068 = vst [vmem:[#allocation73_spill] sm:$0xff] %v13244_v7  ;;  %v3190_v57 = vsub.f32 %v12926_v42, %v18072_v17  ;;  %v3309_v8 = vsub.f32 %v12950_v52, %v16966_v43  ;;  %v18073_v20 = vand.u32 4294901760, %v12967_v53  ;;  %v18075_v16 = vand.u32 4294901760, %v18074_v45  ;;  %8063 = vmatprep.mubr.f32.mxu0 %v18076_v6  ;;  %8267 = vmatprep.mubr.f32.mxu1 %v18076_v6 }
 0x22f   : > { %v9833_v17 = vpack.c.bf16 %v3303_v27, %v3296_v63  ;;  %v2336_v42 = vand.u32 4294901760, %v2335_v9  ;;  %v2455_v13 = vand.u32 4294901760, %v2454_v18  ;;  %v2462_v43 = vand.u32 4294901760, %v2461_v19  ;;  %9832 = vmatpush3.bf16.xpose.msra.mxu1 %v9831_v32  ;;  %v18080_v19 = vld [vmem:[#allocation43_spill] sm:$0xff] }
 0x230   : > { %v3316_v36 = vsub.f32 %v12967_v53, %v18073_v20  ;;  %v13275_v37 = vsub.f32 %v18074_v45, %v18075_v16  ;;  %v16971_v52 = vand.u32 4294901760, %v12998_v48  ;;  %v16973_v20 = vand.u32 4294901760, %v13003_v14 }
 0x231   : > { %v3184_v47 = vand.u32 4294901760, %v3183_v55  ;;  %v3191_v53 = vand.u32 4294901760, %v3190_v57  ;;  %v18077_v45 = vand.u32 4294901760, %v12972_v34  ;;  %v3310_v63 = vand.u32 4294901760, %v3309_v8  ;;  %9834 = vmatprep.subr.bf16.mxu1 %v9833_v17  ;;  %v18084_v17 = vld [vmem:[#allocation83_spill] sm:$0xff] }
 0x232   : > { %v3317_v3 = vand.u32 4294901760, %v3316_v36  ;;  %v18079_v9 = vand.u32 4294901760, %v12977_v44  ;;  %v18081_v55 = vand.u32 4294901760, %v18080_v19  ;;  %v18082_v8 = vand.u32 4294901760, %v12866_v58 }
 0x233   : > { %v2342_v16 = vsub.f32 %v12972_v34, %v18077_v45  ;;  %v9643_v45 = vpack.c.bf16 %v2336_v42, %v2329_v54  ;;  %v2468_v18 = vsub.f32 %v12998_v48, %v16971_v52  ;;  %v18085_v42 = vand.u32 4294901760, %v18084_v17 }
 0x234   : > { %v2349_v38 = vsub.f32 %v12977_v44, %v18079_v9  ;;  %v13293_v57 = vsub.f32 %v18080_v19, %v18081_v55  ;;  %v13300_v36 = vsub.f32 %v12866_v58, %v18082_v8  ;;  %v9645_v9 = vpack.c.bf16 %v2462_v43, %v2455_v13  ;;  %v18087_v55 = vld [vmem:[#allocation47_spill] sm:$0xff] }
 0x235   : > { %v2475_v19 = vsub.f32 %v13003_v14, %v16973_v20  ;;  %v13311_v54 = vsub.f32 %v18084_v17, %v18085_v42  ;;  %v18088_v32 = vand.u32 4294901760, %v18087_v55  ;;  %v9835_v58 = vpack.c.bf16 %v3191_v53, %v3184_v47  ;;  %9644 = vmatpush3.bf16.xpose.msra.mxu0 %v9643_v45 }
 0x236   : > { %18083 = vst [vmem:[#allocation80_spill] sm:$0xff] %v13300_v36  ;;  %v18089_v43 = vand.u32 4294901760, %v18078_v4  ;;  %v9837_v8 = vpack.c.bf16 %v3317_v3, %v3310_v63  ;;  %v2343_v52 = vand.u32 4294901760, %v2342_v16  ;;  %v2350_v49 = vand.u32 4294901760, %v2349_v38  ;;  %9646 = vmatprep.subr.bf16.mxu0 %v9645_v9  ;;  %v18093_v38 = vld [vmem:[#allocation50_spill] sm:$0xff] }
 0x237   : > { %18086 = vst [vmem:[#allocation84_spill] sm:$0xff] %v13311_v54  ;;  %v13316_v27 = vsub.f32 %v18087_v55, %v18088_v32  ;;  %v18090_v20 = vand.u32 4294901760, %v12993_v31  ;;  %v18091_v17 = vand.u32 4294901760, %v13014_v46  ;;  %v18092_v32 = vand.u32 4294901760, %v13045_v40  ;;  %9836 = vmatpush3.bf16.xpose.msra.mxu1 %v9835_v58 }
 0x238   : > { %v3197_v13 = vsub.f32 %v18078_v4, %v18089_v43  ;;  %v2469_v16 = vand.u32 4294901760, %v2468_v18  ;;  %v2476_v63 = vand.u32 4294901760, %v2475_v19  ;;  %v18094_v45 = vand.u32 4294901760, %v18093_v38  ;;  %9838 = vmatprep.subr.bf16.mxu1 %v9837_v8 }
 0x239   : > { %v3204_v14 = vsub.f32 %v12993_v31, %v18090_v20  ;;  %v3323_v42 = vsub.f32 %v13014_v46, %v18091_v17  ;;  %v3330_v53 = vsub.f32 %v13045_v40, %v18092_v32  ;;  %v9647_v47 = vpack.c.bf16 %v2350_v49, %v2343_v52  ;;  %v18098_v46 = vld [vmem:[#allocation86_spill] sm:$0xff] }
 0x23a   : > { %v13337_v43 = vsub.f32 %v18093_v38, %v18094_v45  ;;  %v3198_v17 = vand.u32 4294901760, %v3197_v13  ;;  %v18096_v3 = vand.u32 4294901760, %v13050_v30  ;;  %v18097_v13 = vand.u32 4294901760, %v13055_v35 }
 0x23b   : > { %v3205_v55 = vand.u32 4294901760, %v3204_v14  ;;  %v3324_v19 = vand.u32 4294901760, %v3323_v42  ;;  %v3331_v20 = vand.u32 4294901760, %v3330_v53  ;;  %v18099_v32 = vand.u32 4294901760, %v18098_v46  ;;  %v18103_v53 = vld [vmem:[#allocation85_spill] sm:$0xff] }
 0x23c   : > { %18095 = vst [vmem:[#allocation90_spill] sm:$0xff] %v13337_v43  ;;  %v2356_v38 = vsub.f32 %v13050_v30, %v18096_v3  ;;  %v2363_v45 = vsub.f32 %v13055_v35, %v18097_v13  ;;  %v9649_v49 = vpack.c.bf16 %v2476_v63, %v2469_v16  ;;  %v18101_v14 = vand.u32 4294901760, %v13084_v28 }
 0x23d   : > { %v13352_v52 = vsub.f32 %v18098_v46, %v18099_v32  ;;  %v18102_v8 = vand.u32 4294901760, %v13107_v33  ;;  %v18104_v3 = vand.u32 4294901760, %v18103_v53  ;;  %v18106_v13 = vand.u32 4294901760, %v13060_v26  ;;  %9648 = vmatpush3.bf16.xpose.msra.mxu0 %v9647_v47 }
 0x23e   : > { %v2482_v58 = vsub.f32 %v13084_v28, %v18101_v14  ;;  %v18107_v46 = vand.u32 4294901760, %v13070_v0  ;;  %v9839_v32 = vpack.c.bf16 %v3205_v55, %v3198_v17  ;;  %v18108_v14 = vand.u32 4294901760, %v13112_v51  ;;  %v18110_v28 = vld [vmem:[#allocation62_spill] sm:$0xff]  ;;  %9650 = vmatprep.subr.bf16.mxu0 %v9649_v49 }
 0x23f   : > { %18100 = vst [vmem:[#allocation87_spill] sm:$0xff] %v13352_v52  ;;  %v2489_v42 = vsub.f32 %v13107_v33, %v18102_v8  ;;  %v13363_v9 = vsub.f32 %v18103_v53, %v18104_v3  ;;  %v3211_v18 = vsub.f32 %v13060_v26, %v18106_v13  ;;  %v18109_v33 = vand.u32 4294901760, %v13117_v61 }
 0x240   : > { %v3218_v16 = vsub.f32 %v13070_v0, %v18107_v46  ;;  %v3337_v8 = vsub.f32 %v13112_v51, %v18108_v14  ;;  %v18111_v35 = vand.u32 4294901760, %v18110_v28  ;;  %v9841_v46 = vpack.c.bf16 %v3331_v20, %v3324_v19  ;;  %9840 = vmatpush3.bf16.xpose.msra.mxu1 %v9839_v32  ;;  %v18116_v32 = vld [vmem:[#allocation17_spill] sm:$0xff] }
 0x241   : > { %18105 = vst [vmem:[#allocation93_spill] sm:$0xff] %v13363_v9  ;;  %v3344_v53 = vsub.f32 %v13117_v61, %v18109_v33  ;;  %v2357_v0 = vand.u32 4294901760, %v2356_v38  ;;  %v2364_v63 = vand.u32 4294901760, %v2363_v45  ;;  %v2483_v55 = vand.u32 4294901760, %v2482_v58  ;;  %v18114_v45 = vld [vmem:[#allocation63_spill] sm:$0xff] }
 0x242   : > { %v13382_v13 = vsub.f32 %v18110_v28, %v18111_v35  ;;  %v2490_v17 = vand.u32 4294901760, %v2489_v42  ;;  %v16992_v14 = vand.u32 4294901760, %v13200_v10  ;;  %v16993_v51 = vand.u32 4294901760, %v13228_v56  ;;  %9842 = vmatprep.subr.bf16.mxu1 %v9841_v46  ;;  %v18119_v46 = vld [vmem:[#allocation16_spill] sm:$0xff] }
 0x243   : > { %v3212_v26 = vand.u32 4294901760, %v3211_v18  ;;  %v3219_v33 = vand.u32 4294901760, %v3218_v16  ;;  %v18112_v3 = vand.u32 4294901760, %v13142_v12  ;;  %v16995_v35 = vand.u32 4294901760, %v13184_v62 }
 0x244   : > { %v3338_v28 = vand.u32 4294901760, %v3337_v8  ;;  %v3345_v47 = vand.u32 4294901760, %v3344_v53  ;;  %v18113_v20 = vand.u32 4294901760, %v13170_v41  ;;  %v16994_v38 = vand.u32 4294901760, %v13195_v25 }
 0x245   : > { %v2370_v61 = vsub.f32 %v13142_v12, %v18112_v3  ;;  %v18115_v49 = vand.u32 4294901760, %v18114_v45  ;;  %v9651_v58 = vpack.c.bf16 %v2364_v63, %v2357_v0  ;;  %v18117_v8 = vand.u32 4294901760, %v18116_v32 }
 0x246   : > { %v2377_v19 = vsub.f32 %v13170_v41, %v18113_v20  ;;  %v9653_v3 = vpack.c.bf16 %v2490_v17, %v2483_v55  ;;  %v2496_v20 = vsub.f32 %v13200_v10, %v16992_v14  ;;  %v18120_v0 = vand.u32 4294901760, %v18119_v46 }
 0x247   : > { %v13397_v18 = vsub.f32 %v18114_v45, %v18115_v49  ;;  %v13404_v53 = vsub.f32 %v18116_v32, %v18117_v8  ;;  %v2503_v45 = vsub.f32 %v13228_v56, %v16993_v51  ;;  %v18122_v49 = vld [vmem:[#allocation92_spill] sm:$0xff]  ;;  %v9843_v32 = vpack.c.bf16 %v3219_v33, %v3212_v26  ;;  %9652 = vmatpush3.bf16.xpose.msra.mxu0 %v9651_v58 }
 0x248   : > { %v13415_v63 = vsub.f32 %v18119_v46, %v18120_v0  ;;  %v18123_v16 = vand.u32 4294901760, %v18122_v49  ;;  %v3225_v55 = vsub.f32 %v13184_v62, %v16995_v35  ;;  %v9845_v17 = vpack.c.bf16 %v3345_v47, %v3338_v28  ;;  %9654 = vmatprep.subr.bf16.mxu0 %v9653_v3  ;;  %v18126_v58 = vld [vmem:[#allocation96_spill] sm:$0xff] }
 0x249   : > { %18118 = vst [vmem:[#allocation45_spill] sm:$0xff] %v13404_v53  ;;  %v2371_v8 = vand.u32 4294901760, %v2370_v61  ;;  %v2378_v14 = vand.u32 4294901760, %v2377_v19  ;;  %v3232_v51 = vsub.f32 %v13195_v25, %v16994_v38  ;;  %v18124_v46 = vand.u32 4294901760, %v13244_v7  ;;  %9844 = vmatpush3.bf16.xpose.msra.mxu1 %v9843_v32 }
 0x24a   : > { %18121 = vst [vmem:[#allocation75_spill] sm:$0xff] %v13415_v63  ;;  %v13420_v42 = vsub.f32 %v18122_v49, %v18123_v16  ;;  %v18125_v16 = vand.u32 4294901760, %v13255_v11  ;;  %v2497_v61 = vand.u32 4294901760, %v2496_v20  ;;  %v2504_v28 = vand.u32 4294901760, %v2503_v45  ;;  %9846 = vmatprep.subr.bf16.mxu1 %v9845_v17 }
 0x24b   : > { %v3351_v0 = vsub.f32 %v13244_v7, %v18124_v46  ;;  %v18127_v38 = vand.u32 4294901760, %v18126_v58  ;;  %v3226_v46 = vand.u32 4294901760, %v3225_v55  ;;  %v17000_v7 = vand.u32 4294901760, %v13300_v36 }
 0x24c   : > { %v3358_v26 = vsub.f32 %v13255_v11, %v18125_v16  ;;  %v9655_v33 = vpack.c.bf16 %v2378_v14, %v2371_v8  ;;  %v3233_v49 = vand.u32 4294901760, %v3232_v51  ;;  %v17003_v3 = vand.u32 4294901760, %v13352_v52 }
 0x24d   : > { %v13441_v35 = vsub.f32 %v18126_v58, %v18127_v38  ;;  %v3352_v45 = vand.u32 4294901760, %v3351_v0  ;;  %v18128_v47 = vand.u32 4294901760, %v13275_v37  ;;  %v18129_v55 = vand.u32 4294901760, %v13293_v57 }
 0x24e   : > { %v3359_v19 = vand.u32 4294901760, %v3358_v26  ;;  %v18130_v16 = vand.u32 4294901760, %v13035_v2  ;;  %v9657_v51 = vpack.c.bf16 %v2504_v28, %v2497_v61  ;;  %v18132_v32 = vand.u32 4294901760, %v13316_v27  ;;  %v18134_v26 = vld [vmem:[#allocation18_spill] sm:$0xff] }
 0x24f   : > { %v2384_v38 = vsub.f32 %v13275_v37, %v18128_v47  ;;  %v2391_v58 = vsub.f32 %v13293_v57, %v18129_v55  ;;  %v18133_v8 = vand.u32 4294901760, %v13337_v43  ;;  %v18135_v47 = vand.u32 4294901760, %v18134_v26  ;;  %9656 = vmatpush3.bf16.xpose.msra.mxu0 %v9655_v33 }
 0x250   : > { %v13456_v14 = vsub.f32 %v13035_v2, %v18130_v16  ;;  %v2510_v17 = vsub.f32 %v13316_v27, %v18132_v32  ;;  %v3239_v55 = vsub.f32 %v13300_v36, %v17000_v7  ;;  %v18137_v2 = vand.u32 4294901760, %v13311_v54  ;;  %9658 = vmatprep.subr.bf16.mxu0 %v9657_v51 }
 0x251   : > { %v2517_v0 = vsub.f32 %v13337_v43, %v18133_v8  ;;  %v13467_v20 = vsub.f32 %v18134_v26, %v18135_v47  ;;  %v9847_v16 = vpack.c.bf16 %v3233_v49, %v3226_v46  ;;  %v3365_v32 = vsub.f32 %v13352_v52, %v17003_v3 }
 0x252   : > { %18131 = vst [vmem:[#allocation43_spill] sm:$0xff] %v13456_v14  ;;  %v3246_v61 = vsub.f32 %v13311_v54, %v18137_v2  ;;  %v18138_v8 = vand.u32 4294901760, %v13363_v9  ;;  %v18139_v43 = vand.u32 4294901760, %v13093_v60  ;;  %v9849_v2 = vpack.c.bf16 %v3359_v19, %v3352_v45 }
 0x253   : > { %18136 = vst [vmem:[#allocation83_spill] sm:$0xff] %v13467_v20  ;;  %v2385_v54 = vand.u32 4294901760, %v2384_v38  ;;  %v2392_v28 = vand.u32 4294901760, %v2391_v58  ;;  %v2511_v49 = vand.u32 4294901760, %v2510_v17  ;;  %v2518_v46 = vand.u32 4294901760, %v2517_v0  ;;  %9848 = vmatpush3.bf16.xpose.msra.mxu1 %v9847_v16 }
 0x254   : > { %v3372_v26 = vsub.f32 %v13363_v9, %v18138_v8  ;;  %v13486_v7 = vsub.f32 %v13093_v60, %v18139_v43  ;;  %v17019_v3 = vand.u32 4294901760, %v13420_v42  ;;  %v17018_v52 = vand.u32 4294901760, %v13441_v35  ;;  %9850 = vmatprep.subr.bf16.mxu1 %v9849_v2 }
 0x255   : > { %v3240_v36 = vand.u32 4294901760, %v3239_v55  ;;  %v3247_v8 = vand.u32 4294901760, %v3246_v61  ;;  %v18141_v47 = vand.u32 4294901760, %v13382_v13  ;;  %v17017_v60 = vand.u32 4294901760, %v13404_v53 }
 0x256   : > { %18140 = vst [vmem:[#allocation47_spill] sm:$0xff] %v13486_v7  ;;  %v3366_v43 = vand.u32 4294901760, %v3365_v32  ;;  %v3373_v33 = vand.u32 4294901760, %v3372_v26  ;;  %v18142_v19 = vand.u32 4294901760, %v13397_v18  ;;  %v17011_v38 = vand.u32 4294901760, %v13415_v63 }
 0x257   : > { %v2398_v9 = vsub.f32 %v13382_v13, %v18141_v47  ;;  %v18143_v58 = vand.u32 4294901760, %v13096_v22  ;;  %v9659_v17 = vpack.c.bf16 %v2392_v28, %v2385_v54  ;;  %v17010_v0 = vand.u32 4294901760, %v13456_v14 }
 0x258   : > { %v2405_v45 = vsub.f32 %v13397_v18, %v18142_v19  ;;  %v17012_v55 = vand.u32 4294901760, %v13467_v20  ;;  %v9661_v61 = vpack.c.bf16 %v2518_v46, %v2511_v49  ;;  %v2524_v16 = vsub.f32 %v13420_v42, %v17019_v3  ;;  %v18168_v3 = vld [vmem:[#allocation21_spill] sm:$0xff] }
 0x259   : > { %v13501_v51 = vsub.f32 %v13096_v22, %v18143_v58  ;;  %v2531_v32 = vsub.f32 %v13441_v35, %v17018_v52  ;;  %v18145_v26 = vand.u32 4294901760, %v13127_v15  ;;  %v18147_v54 = vand.u32 4294901760, %v13130_v5  ;;  %9660 = vmatpush3.bf16.xpose.msra.mxu0 %v9659_v17  ;;  %v18167_v52 = vld [vmem:[#allocation20_spill] sm:$0xff] }
 0x25a   : > { %v9851_v47 = vpack.c.bf16 %v3247_v8, %v3240_v36  ;;  %v3253_v2 = vsub.f32 %v13404_v53, %v17017_v60  ;;  %v9853_v49 = vpack.c.bf16 %v3373_v33, %v3366_v43  ;;  %v2399_v46 = vand.u32 4294901760, %v2398_v9  ;;  %9662 = vmatprep.subr.bf16.mxu0 %v9661_v61 }
 0x25b   : > { %18144 = vst [vmem:[#allocation50_spill] sm:$0xff] %v13501_v51  ;;  %v13514_v22 = vsub.f32 %v13127_v15, %v18145_v26  ;;  %v13519_v28 = vsub.f32 %v13130_v5, %v18147_v54  ;;  %v2406_v19 = vand.u32 4294901760, %v2405_v45  ;;  %v3260_v58 = vsub.f32 %v13415_v63, %v17011_v38 }
 0x25c   : > { %v3379_v15 = vsub.f32 %v13456_v14, %v17010_v0  ;;  %v3386_v5 = vsub.f32 %v13467_v20, %v17012_v55  ;;  %v17015_v36 = vand.u32 4294901760, %v13486_v7  ;;  %v17014_v8 = vand.u32 4294901760, %v13501_v51  ;;  %9852 = vmatpush3.bf16.xpose.msra.mxu1 %v9851_v47 }
 0x25d   : > { %18146 = vst [vmem:[#allocation86_spill] sm:$0xff] %v13514_v22  ;;  %18148 = vst [vmem:[#allocation85_spill] sm:$0xff] %v13519_v28  ;;  %v2525_v9 = vand.u32 4294901760, %v2524_v16  ;;  %v2532_v43 = vand.u32 4294901760, %v2531_v32  ;;  %v3254_v33 = vand.u32 4294901760, %v3253_v2  ;;  %v9663_v45 = vpack.c.bf16 %v2406_v19, %v2399_v46  ;;  %9854 = vmatprep.subr.bf16.mxu1 %v9853_v49 }
 0x25e   : > { %v3261_v26 = vand.u32 4294901760, %v3260_v58  ;;  %v17013_v17 = vand.u32 4294901760, %v13514_v22  ;;  %v17016_v54 = vand.u32 4294901760, %v13519_v28  ;;  %v3380_v0 = vand.u32 4294901760, %v3379_v15 }
 0x25f   : > { %v3387_v38 = vand.u32 4294901760, %v3386_v5  ;;  %v2412_v55 = vsub.f32 %v13486_v7, %v17015_v36  ;;  %v2419_v61 = vsub.f32 %v13501_v51, %v17014_v8  ;;  %v9665_v16 = vpack.c.bf16 %v2532_v43, %v2525_v9  ;;  %v18149_v9 = vld [vmem:[#allocation42_spill] sm:$0xff]  ;;  %v18150_v43 = vld [vmem:[#allocation41_spill] sm:$0xff] }
 0x260   : > { %v9855_v32 = vpack.c.bf16 %v3261_v26, %v3254_v33  ;;  %v3267_v47 = vsub.f32 %v13514_v22, %v17013_v17  ;;  %v3274_v2 = vsub.f32 %v13519_v28, %v17016_v54  ;;  %v9669_v33 = vpack.c.bf16 %v18150_v43, %v18149_v9  ;;  %v18151_v17 = vld [vmem:[#allocation48_spill] sm:$0xff]  ;;  %v18152_v8 = vld [vmem:[#allocation49_spill] sm:$0xff] }
 0x261   : > { %9664 = vmatpush3.bf16.xpose.msra.mxu0 %v9663_v45  ;;  %v9857_v49 = vpack.c.bf16 %v3387_v38, %v3380_v0  ;;  %v2413_v46 = vand.u32 4294901760, %v2412_v55  ;;  %v2420_v19 = vand.u32 4294901760, %v2419_v61  ;;  %v9861_v36 = vpack.c.bf16 %v18152_v8, %v18151_v17  ;;  %v18153_v38 = vld [vmem:[#allocation52_spill] sm:$0xff]  ;;  %v18154_v55 = vld [vmem:[#allocation81_spill] sm:$0xff] }
 0x262   : > { %9666 = vmatprep.subr.bf16.mxu0 %v9665_v16  ;;  %v3268_v58 = vand.u32 4294901760, %v3267_v47  ;;  %v3275_v15 = vand.u32 4294901760, %v3274_v2  ;;  %v9671_v0 = vpack.c.bf16 %v18153_v38, %v12838_v24  ;;  %v18155_v45 = vld [vmem:[#allocation88_spill] sm:$0xff]  ;;  %v9863_v16 = vpack.c.bf16 %v12874_v39, %v12854_v29  ;;  %v18157_v2 = vld [vmem:[#allocation78_spill] sm:$0xff] }
 0x263   : > { %v9667_v5 = vpack.c.bf16 %v2420_v19, %v2413_v46  ;;  %v9673_v61 = vpack.c.bf16 %v18155_v45, %v18154_v55  ;;  %v18158_v46 = vld [vmem:[#allocation95_spill] sm:$0xff]  ;;  %v18159_v19 = vld [vmem:[#allocation98_spill] sm:$0xff] }
 0x264   : > { %9856 = vmatpush3.bf16.xpose.msra.mxu1 %v9855_v32  ;;  %v9859_v26 = vpack.c.bf16 %v3275_v15, %v3268_v58  ;;  %v18156_v32 = vld [vmem:[#allocation94_spill] sm:$0xff]  ;;  %v9867_v58 = vpack.c.bf16 %v18159_v19, %v18158_v46  ;;  %v18160_v15 = vld [vmem:[#allocation64_spill] sm:$0xff] }
 0x265   : > { %9858 = vmatprep.subr.bf16.mxu1 %v9857_v49  ;;  %v9865_v47 = vpack.c.bf16 %v12903_v50, %v18156_v32  ;;  %v9677_v49 = vpack.c.bf16 %v12945_v21, %v12940_v23 }
 0x269   : > { %9668 = vmatpush3.bf16.xpose.msra.mxu0 %v9667_v5  ;;  %v18161_v5 = vld [vmem:[#allocation68_spill] sm:$0xff] }
 0x26a   : > { %9670 = vmatprep.subr.bf16.mxu0 %v9669_v33  ;;  %v9869_v33 = vpack.c.bf16 %v18161_v5, %v18160_v15 }
 0x26c   : > { %9860 = vmatpush3.bf16.xpose.msra.mxu1 %v9859_v26  ;;  %v9679_v26 = vpack.c.bf16 %v12977_v44, %v12972_v34  ;;  %v9875_v44 = vpack.c.bf16 %v18168_v3, %v18167_v52 }
 0x26d   : > { %9862 = vmatprep.subr.bf16.mxu1 %v9861_v36  ;;  %v9675_v36 = vpack.c.bf16 %v12913_v1, %v12908_v59 }
 0x270   : > { %8064 = vmatmul.mubr.f32.vlgmr.msra.gmra.mrb[2].mxu0 %v18076_v6 }
 0x271   : > { %9672 = vmatpush3.bf16.xpose.msra.mxu0 %v9671_v0  ;;  %8097 = vmatprep.mubr.f32.mxu0 %v18157_v2  ;;  %v18162_v0 = vld [vmem:[#allocation55_spill] sm:$0xff] }
 0x272   : > { %9674 = vmatprep.subr.bf16.mxu0 %v9673_v61  ;;  %v9681_v61 = vpack.c.bf16 %v18162_v0, %v12998_v48  ;;  %v18169_v0 = vld [vmem:[#allocation28_spill] sm:$0xff]  ;;  %v18170_v48 = vld [vmem:[#allocation37_spill] sm:$0xff] }
 0x273   : > { %8268 = vmatmul.mubr.f32.vlgmr.msra.gmra.mrb[2].mxu1 %v18076_v6 }
 0x274   : > { %9864 = vmatpush3.bf16.xpose.msra.mxu1 %v9863_v16  ;;  %8301 = vmatprep.mubr.f32.mxu1 %v18157_v2  ;;  %v9871_v16 = vpack.c.bf16 %v12993_v31, %v18078_v4  ;;  %v9877_v31 = vpack.c.bf16 %v18170_v48, %v18169_v0 }
 0x275   : > { %9866 = vmatprep.subr.bf16.mxu1 %v9865_v47  ;;  %v18163_v47 = vld [vmem:[#allocation14_spill] sm:$0xff] }
 0x276   : > { %v9873_v54 = vpack.c.bf16 %v13045_v40, %v18163_v47 }
 0x279   : > { %9676 = vmatpush3.bf16.xpose.msra.mxu0 %v9675_v36  ;;  %v18164_v36 = vld [vmem:[#allocation19_spill] sm:$0xff] }
 0x27a   : > { %9678 = vmatprep.subr.bf16.mxu0 %v9677_v49  ;;  %v9683_v49 = vpack.c.bf16 %v18164_v36, %v13050_v30 }
 0x27c   : > { %9868 = vmatpush3.bf16.xpose.msra.mxu1 %v9867_v58  ;;  %v18165_v58 = vld [vmem:[#allocation23_spill] sm:$0xff] }
 0x27d   : > { %9870 = vmatprep.subr.bf16.mxu1 %v9869_v33  ;;  %v18166_v33 = vld [vmem:[#allocation26_spill] sm:$0xff] }
 0x27e   : > { %v9685_v60 = vpack.c.bf16 %v18166_v33, %v18165_v58 }
 0x281   : > { %9680 = vmatpush3.bf16.xpose.msra.mxu0 %v9679_v26  ;;  %v9687_v26 = vpack.c.bf16 %v13170_v41, %v13142_v12  ;;  %v18174_v41 = vld [vmem:[#allocation84_spill] sm:$0xff] }
 0x282   : > { %9682 = vmatprep.subr.bf16.mxu0 %v9681_v61  ;;  %v9879_v61 = vpack.c.bf16 %v13195_v25, %v13184_v62 }
 0x284   : > { %9872 = vmatpush3.bf16.xpose.msra.mxu1 %v9871_v16  ;;  %v18171_v16 = vld [vmem:[#allocation73_spill] sm:$0xff] }
 0x285   : > { %9874 = vmatprep.subr.bf16.mxu1 %v9873_v54  ;;  %v9689_v54 = vpack.c.bf16 %v13228_v56, %v13200_v10  ;;  %v9881_v3 = vpack.c.bf16 %v13255_v11, %v18171_v16  ;;  %v18175_v56 = vld [vmem:[#allocation87_spill] sm:$0xff]  ;;  %v18176_v10 = vld [vmem:[#allocation93_spill] sm:$0xff] }
 0x286   : > { %v9885_v25 = vpack.c.bf16 %v18176_v10, %v18175_v56 }
 0x289   : > { %9684 = vmatpush3.bf16.xpose.msra.mxu0 %v9683_v49  ;;  %v18173_v49 = vld [vmem:[#allocation80_spill] sm:$0xff] }
 0x28a   : > { %9686 = vmatprep.subr.bf16.mxu0 %v9685_v60  ;;  %v9883_v12 = vpack.c.bf16 %v18174_v41, %v18173_v49 }
 0x28c   : > { %9876 = vmatpush3.bf16.xpose.msra.mxu1 %v9875_v44  ;;  %v9691_v44 = vpack.c.bf16 %v13293_v57, %v13275_v37 }
 0x28d   : > { %9878 = vmatprep.subr.bf16.mxu1 %v9877_v31  ;;  %v18172_v31 = vld [vmem:[#allocation90_spill] sm:$0xff] }
 0x28e   : > { %v9693_v60 = vpack.c.bf16 %v18172_v31, %v13316_v27 }
 0x291   : > { %9688 = vmatpush3.bf16.xpose.msra.mxu0 %v9687_v26  ;;  %v9695_v26 = vpack.c.bf16 %v13397_v18, %v13382_v13 }
 0x292   : > { %9690 = vmatprep.subr.bf16.mxu0 %v9689_v54  ;;  %v9887_v54 = vpack.c.bf16 %v13415_v63, %v13404_v53  ;;  %v18192_v63 = vld [vmem:[#allocation71_spill] sm:$0xff] }
 0x294   : > { %9880 = vmatpush3.bf16.xpose.msra.mxu1 %v9879_v61  ;;  %v9889_v61 = vpack.c.bf16 %v13467_v20, %v13456_v14  ;;  %v18180_v20 = vld [vmem:[#allocation82_spill] sm:$0xff] }
 0x295   : > { %9882 = vmatprep.subr.bf16.mxu1 %v9881_v3  ;;  %v9697_v3 = vpack.c.bf16 %v13441_v35, %v13420_v42  ;;  %v18190_v14 = vld [vmem:[#allocation70_spill] sm:$0xff] }
 0x299   : > { %9692 = vmatpush3.bf16.xpose.msra.mxu0 %v9691_v44  ;;  %v18177_v44 = vld [vmem:[#allocation77_spill] sm:$0xff] }
 0x29a   : > { %9694 = vmatprep.subr.bf16.mxu0 %v9693_v60  ;;  %v18178_v60 = vld [vmem:[#allocation25_spill] sm:$0xff] }
 0x29c   : > { %9884 = vmatpush3.bf16.xpose.msra.mxu1 %v9883_v12  ;;  %v9699_v12 = vpack.c.bf16 %v13501_v51, %v13486_v7 }
 0x29d   : > { %9886 = vmatprep.subr.bf16.mxu1 %v9885_v25  ;;  %v9891_v25 = vpack.c.bf16 %v13519_v28, %v13514_v22  ;;  %v7355_v28 = vlaneseq  ;;  %v18187_v22 = vld [vmem:[#allocation57_spill] sm:$0xff] }
 0x29f   : > { %v7356_v51 = vshrl.u32 %v7355_v28, 7  ;;  %v18194_v28 = vld [vmem:[#allocation97_spill] sm:$0xff] }
 0x2a1   : > { %9696 = vmatpush3.bf16.xpose.msra.mxu0 %v9695_v26  ;;  %v18179_v26 = vld [vmem:[#allocation27_spill] sm:$0xff] }
 0x2a2   : > { %9698 = vmatprep.subr.bf16.mxu0 %v9697_v3  ;;  %v18181_v3 = vld [vmem:[#allocation30_spill] sm:$0xff] }
 0x2a4   : > { %9888 = vmatpush3.bf16.xpose.msra.mxu1 %v9887_v54  ;;  %v18182_v54 = vld [vmem:[#allocation91_spill] sm:$0xff] }
 0x2a5   : > { %9890 = vmatprep.subr.bf16.mxu1 %v9889_v61  ;;  %v18183_v61 = vld [vmem:[#allocation31_spill] sm:$0xff] }
 0x2a9   : > { %9700 = vmatpush3.bf16.xpose.msra.mxu0 %v9699_v12  ;;  %v18184_v12 = vld [vmem:[#allocation32_spill] sm:$0xff] }
 0x2aa   : > { %9702 = vmatprep.subr.bf16.mxu0 %v18177_v44  ;;  %v11063_v44 = vmov 1966171168  }
 0x2ac   : > { %9892 = vmatpush3.bf16.xpose.msra.mxu1 %v9891_v25  ;;  %v18185_v25 = vld [vmem:[#allocation39_spill] sm:$0xff] }
 0x2ad   : > { %9894 = vmatprep.subr.bf16.mxu1 %v18178_v60  ;;  %v18186_v60 = vld [vmem:[#allocation40_spill] sm:$0xff] }
 0x2b0   : > { %8098 = vmatmul.mubr.f32.vlgmr.msra.gmra.mrb[2].mxu0 %v18157_v2 }
 0x2b1   : > { %9704 = vmatpush3.bf16.xpose.msra.mxu0 %v18179_v26  ;;  %8131 = vmatprep.mubr.f32.mxu0 %v18180_v20  ;;  %v7353_v26 = vunpack.c.l.s4 %v11063_v44 }
 0x2b2   : > { %9706 = vmatprep.subr.bf16.mxu0 %v18181_v3 }
 0x2b3   : > { %8302 = vmatmul.mubr.f32.vlgmr.msra.gmra.mrb[2].mxu1 %v18157_v2  ;;  %v7354_v3 = vunpack.c.0.s8 %v7353_v26  ;;  %v18188_v2 = vld [vmem:[#allocation58_spill] sm:$0xff] }
 0x2b4   : > { %9896 = vmatpush3.bf16.xpose.msra.mxu1 %v18182_v54  ;;  %8335 = vmatprep.mubr.f32.mxu1 %v18180_v20  ;;  %v18189_v54 = vld [vmem:[#allocation67_spill] sm:$0xff] }
 0x2b5   : > { %9898 = vmatprep.subr.bf16.mxu1 %v18183_v61 }
 0x2b8   : > { %v1342_v7 = vpop.f32.mrb[0].mxu0 }
 0x2b9   : > { %9708 = vmatpush3.bf16.xpose.msra.mxu0 %v18184_v12  ;;  %v1344_v61 = vpop.f32.mrb[1].mxu0  ;;  %v13634_v12 = vsub.s32 %v7354_v3, %v7356_v51  ;;  %v18197_v3 = vld [vmem:[#allocation34_spill] sm:$0xff] }
 0x2ba   : > { %9710 = vmatprep.subr.bf16.mxu0 %v18185_v25  ;;  %v7348_v25 = vcombine.low %v1342_v7, %v1344_v61  ;;  %v18198_v7 = vld [vmem:[#allocation33_spill] sm:$0xff]  ;;  %v18199_v61 = vld [vmem:[#allocation35_spill] sm:$0xff]  ;;  %v18207_v51 = vld [vmem:[#allocation22_spill] sm:$0xff] }
 0x2bb   : > { %18191 = vst [vmem:[#allocation62_spill] sm:$0xff] %v13634_v12 }
 0x2bc   : > { %9900 = vmatpush3.bf16.xpose.msra.mxu1 %v18186_v60  ;;  %v2197_v60 = vpop.f32.mrb[0].mxu1  ;;  %v13638_v53 = vrot.slane %v7348_v25, %v13634_v12  ;;  %v18201_v25 = vld [vmem:[#allocation51_spill] sm:$0xff] }
 0x2bd   : > { %9902 = vmatprep.subr.bf16.mxu1 %v18187_v22  ;;  %v2199_v44 = vpop.f32.mrb[1].mxu1 }
 0x2be   : > { %18193 = vst [vmem:[#allocation63_spill] sm:$0xff] %v13638_v53  ;;  %v7349_v26 = vcombine.low %v2197_v60, %v2199_v44  ;;  %v18202_v60 = vld [vmem:[#allocation74_spill] sm:$0xff]  ;;  %v18203_v44 = vld [vmem:[#allocation59_spill] sm:$0xff] }
 0x2bf   : > { %v18209_v53 = vld [vmem:[#allocation38_spill] sm:$0xff] }
 0x2c1   : > { %9712 = vmatpush3.bf16.xpose.msra.mxu0 %v18188_v2  ;;  %v13642_v2 = vrot.slane %v7349_v26, %v13634_v12  ;;  %v18204_v26 = vld [vmem:[#allocation65_spill] sm:$0xff] }
 0x2c2   : > { %9714 = vmatprep.subr.bf16.mxu0 %v18189_v54  ;;  %v18196_v54 = vld [vmem:[#allocation29_spill] sm:$0xff] }
 0x2c3   : > { %18195 = vst [vmem:[#allocation17_spill] sm:$0xff] %v13642_v2  ;;  %v18205_v12 = vld [vmem:[#allocation13_spill] sm:$0xff]  ;;  %v18208_v2 = vld [vmem:[#allocation24_spill] sm:$0xff] }
 0x2c4   : > { %9904 = vmatpush3.bf16.xpose.msra.mxu1 %v18190_v14 }
 0x2c5   : > { %9906 = vmatprep.subr.bf16.mxu1 %v18192_v63  ;;  %v18200_v63 = vld [vmem:[#allocation36_spill] sm:$0xff] }
 0x2c9   : > { %9716 = vmatpush3.bf16.xpose.msra.mxu0 %v18194_v28 }
 0x2ca   : > { %9718 = vmatprep.subr.bf16.mxu0 %v18196_v54  ;;  %v18206_v54 = vld [vmem:[#allocation15_spill] sm:$0xff] }
 0x2cc   : > { %9908 = vmatpush3.bf16.xpose.msra.mxu1 %v18197_v3 }
 0x2cd   : > { %9910 = vmatprep.subr.bf16.mxu1 %v18198_v7 }
 0x2d1   : > { %9720 = vmatpush3.bf16.xpose.msra.mxu0 %v18199_v61  ;;  %v18210_v61 = vld [vmem:[#allocation46_spill] sm:$0xff] }
 0x2d2   : > { %9722 = vmatprep.subr.bf16.mxu0 %v18200_v63 }
 0x2d4   : > { %9912 = vmatpush3.bf16.xpose.msra.mxu1 %v18201_v25  ;;  %v18211_v25 = vand.u32 4294901760, %v18149_v9  ;;  %v18219_v9 = vand.u32 4294901760, %v18154_v55  ;;  %v18228_v55 = vand.u32 4294901760, %v12945_v21 }
 0x2d5   : > { %9914 = vmatprep.subr.bf16.mxu1 %v18202_v60  ;;  %v18212_v60 = vand.u32 4294901760, %v18150_v43  ;;  %v18220_v43 = vand.u32 4294901760, %v18155_v45  ;;  %v18229_v45 = vand.u32 4294901760, %v18158_v46  ;;  %v18238_v46 = vld [vmem:[#allocation55_spill] sm:$0xff] }
 0x2d7   : > { %v9733_v63 = vpack.c.bf16 %v18212_v60, %v18211_v25  ;;  %v9737_v25 = vpack.c.bf16 %v18220_v43, %v18219_v9  ;;  %v18232_v60 = vand.u32 4294901760, %v18161_v5  ;;  %v18236_v9 = vld [vmem:[#allocation54_spill] sm:$0xff]  ;;  %v18243_v5 = vand.u32 4294901760, %v18163_v47 }
 0x2d8   : > { %v18237_v43 = vand.u32 4294901760, %v18236_v9  ;;  %v18266_v9 = vand.u32 4294901760, %v13255_v11  ;;  %v18273_v11 = vand.u32 4294901760, %v18175_v56 }
 0x2d9   : > { %9724 = vmatpush3.bf16.xpose.msra.mxu0 %v18203_v44  ;;  %v18213_v44 = vld [vmem:[#allocation60_spill] sm:$0xff] }
 0x2da   : > { %9726 = vmatprep.subr.bf16.mxu0 %v18204_v26  ;;  %v18214_v26 = vand.u32 4294901760, %v18151_v17  ;;  %v18221_v17 = vand.u32 4294901760, %v12854_v29  ;;  %v18225_v29 = vand.u32 4294901760, %v12908_v59  ;;  %v18233_v59 = vand.u32 4294901760, %v12972_v34 }
 0x2db   : > { %v18245_v34 = vand.u32 4294901760, %v13050_v30  ;;  %v18254_v30 = vld [vmem:[#allocation44_spill] sm:$0xff] }
 0x2dc   : > { %9916 = vmatpush3.bf16.xpose.msra.mxu1 %v18205_v12  ;;  %v18215_v12 = vand.u32 4294901760, %v18152_v8  ;;  %v18222_v8 = vand.u32 4294901760, %v12874_v39  ;;  %v18226_v39 = vand.u32 4294901760, %v12913_v1  ;;  %v18234_v1 = vld [vmem:[#allocation79_spill] sm:$0xff] }
 0x2dd   : > { %9918 = vmatprep.subr.bf16.mxu1 %v18206_v54 }
 0x2de   : > { %v9925_v54 = vpack.c.bf16 %v18215_v12, %v18214_v26 }
 0x2e1   : > { %9728 = vmatpush3.bf16.xpose.msra.mxu0 %v18207_v51  ;;  %v18216_v51 = vld [vmem:[#allocation69_spill] sm:$0xff] }
 0x2e2   : > { %9730 = vmatprep.subr.bf16.mxu0 %v18208_v2 }
 0x2e4   : > { %9920 = vmatpush3.bf16.xpose.msra.mxu1 %v18209_v53  ;;  %v18217_v53 = vand.u32 4294901760, %v12838_v24  ;;  %v18224_v24 = vand.u32 4294901760, %v12903_v50 }
 0x2e5   : > { %9922 = vmatprep.subr.bf16.mxu1 %v18210_v61  ;;  %v18218_v61 = vand.u32 4294901760, %v18153_v38  ;;  %v18227_v38 = vand.u32 4294901760, %v12940_v23  ;;  %v18235_v23 = vand.u32 4294901760, %v18234_v1  ;;  %v18262_v1 = vand.u32 4294901760, %v13184_v62 }
 0x2e6   : > { %v18270_v62 = vand.u32 4294901760, %v18172_v31  ;;  %v18277_v31 = vand.u32 4294901760, %v13420_v42  ;;  %v18289_v42 = vld [vmem:[#allocation50_spill] sm:$0xff] }
 0x2e7   : > { %v9735_v2 = vpack.c.bf16 %v18218_v61, %v18217_v53  ;;  %v9739_v53 = vpack.c.bf16 %v18226_v39, %v18225_v29  ;;  %v9741_v50 = vpack.c.bf16 %v18228_v55, %v18227_v38  ;;  %v18231_v61 = vand.u32 4294901760, %v18160_v15  ;;  %v18250_v55 = vld [vmem:[#allocation21_spill] sm:$0xff] }
 0x2e8   : > { %v9743_v21 = vpack.c.bf16 %v18235_v23, %v18233_v59  ;;  %v18247_v39 = vand.u32 4294901760, %v18165_v58  ;;  %v18249_v38 = vand.u32 4294901760, %v18167_v52  ;;  %v18251_v47 = vand.u32 4294901760, %v18250_v55  ;;  %v18256_v58 = vld [vmem:[#allocation56_spill] sm:$0xff]  ;;  %v18263_v23 = vld [vmem:[#allocation61_spill] sm:$0xff] }
 0x2e9   : > { %9732 = vmatpush3.bf16.xpose.msra.mxu0 %v18213_v44  ;;  %v9933_v26 = vpack.c.bf16 %v18232_v60, %v18231_v61  ;;  %v18258_v61 = vld [vmem:[#allocation66_spill] sm:$0xff]  ;;  %v18260_v52 = vld [vmem:[#allocation76_spill] sm:$0xff]  ;;  %v18290_v55 = vand.u32 4294901760, %v18289_v42 }
 0x2ea   : > { %9734 = vmatprep.subr.bf16.mxu0 %v9733_v63  ;;  %v9927_v63 = vpack.c.bf16 %v18222_v8, %v18221_v17  ;;  %v18240_v17 = vand.u32 4294901760, %v18078_v4  ;;  %v18241_v8 = vld [vmem:[#allocation53_spill] sm:$0xff]  ;;  %v18248_v4 = vand.u32 4294901760, %v18166_v33  ;;  %v18259_v60 = vand.u32 4294901760, %v18258_v61  ;;  %v18300_v61 = vld [vmem:[#allocation31_spill] sm:$0xff] }
 0x2eb   : > { %v18242_v15 = vand.u32 4294901760, %v18241_v8  ;;  %v13909_v42 = vld [vmem:[%s11250_s4 + $0x418] sm:$0xff] }
 0x2ec   : > { %9924 = vmatpush3.bf16.xpose.msra.mxu1 %v18216_v51 }
 0x2ed   : > { %9926 = vmatprep.subr.bf16.mxu1 %v9925_v54  ;;  %v18223_v54 = vand.u32 4294901760, %v18156_v32  ;;  %v18230_v32 = vand.u32 4294901760, %v18159_v19 }
 0x2ef   : > { %v9929_v12 = vpack.c.bf16 %v18224_v24, %v18223_v54  ;;  %v18244_v54 = vand.u32 4294901760, %v13045_v40  ;;  %v18252_v40 = vand.u32 4294901760, %v18169_v0  ;;  %v18264_v0 = vand.u32 4294901760, %v18263_v23  ;;  %v18306_v23 = vld [vmem:[#allocation71_spill] sm:$0xff] }
 0x2f0   : > { %8132 = vmatmul.mubr.f32.vlgmr.msra.gmra.mrb[2].mxu0 %v18180_v20 }
 0x2f1   : > { %9736 = vmatpush3.bf16.xpose.msra.mxu0 %v9735_v2  ;;  %8165 = vmatprep.mubr.f32.mxu0 %v18076_v6  ;;  %v9931_v2 = vpack.c.bf16 %v18230_v32, %v18229_v45  ;;  %v9937_v24 = vpack.c.bf16 %v18244_v54, %v18243_v5  ;;  %v18253_v45 = vand.u32 4294901760, %v18170_v48  ;;  %v18265_v48 = vand.u32 4294901760, %v18171_v16 }
 0x2f2   : > { %9738 = vmatprep.subr.bf16.mxu0 %v9737_v25  ;;  %v18239_v25 = vand.u32 4294901760, %v18238_v46  ;;  %v18267_v46 = vand.u32 4294901760, %v13275_v37  ;;  %v18272_v16 = vand.u32 4294901760, %v18174_v41  ;;  %v18274_v5 = vand.u32 4294901760, %v18176_v10  ;;  %v18283_v10 = vld [vmem:[#allocation43_spill] sm:$0xff] }
 0x2f3   : > { %8336 = vmatmul.mubr.f32.vlgmr.msra.gmra.mrb[2].mxu1 %v18180_v20  ;;  %v9941_v32 = vpack.c.bf16 %v18253_v45, %v18252_v40  ;;  %v18275_v37 = vand.u32 4294901760, %v13382_v13  ;;  %v18287_v13 = vld [vmem:[#allocation47_spill] sm:$0xff]  ;;  %v18293_v40 = vld [vmem:[#allocation85_spill] sm:$0xff] }
 0x2f4   : > { %9928 = vmatpush3.bf16.xpose.msra.mxu1 %v9927_v63  ;;  %8369 = vmatprep.mubr.f32.mxu1 %v18076_v6  ;;  %v9745_v19 = vpack.c.bf16 %v18239_v25, %v18237_v43  ;;  %v9935_v63 = vpack.c.bf16 %v18242_v15, %v18240_v17  ;;  %v9945_v43 = vpack.c.bf16 %v18266_v9, %v18265_v48  ;;  %v18268_v25 = vand.u32 4294901760, %v13293_v57  ;;  %v18310_v48 = vld [vmem:[#allocation51_spill] sm:$0xff]  ;;  %v18311_v9 = vld [vmem:[#allocation74_spill] sm:$0xff] }
 0x2f5   : > { %9930 = vmatprep.subr.bf16.mxu1 %v9929_v12  ;;  %v18246_v12 = vand.u32 4294901760, %v18164_v36  ;;  %v18255_v36 = vand.u32 4294901760, %v18254_v30  ;;  %v18269_v17 = vand.u32 4294901760, %v13316_v27  ;;  %v18271_v15 = vand.u32 4294901760, %v18173_v49  ;;  %v18295_v30 = vld [vmem:[#allocation77_spill] sm:$0xff] }
 0x2f6   : > { %v9949_v54 = vpack.c.bf16 %v18274_v5, %v18273_v11  ;;  %v18276_v27 = vand.u32 4294901760, %v13397_v18  ;;  %v18278_v49 = vand.u32 4294901760, %v13441_v35  ;;  %v18288_v18 = vand.u32 4294901760, %v18287_v13 }
 0x2f7   : > { %v9747_v29 = vpack.c.bf16 %v18246_v12, %v18245_v34  ;;  %v9757_v8 = vpack.c.bf16 %v18270_v62, %v18269_v17  ;;  %v18281_v12 = vld [vmem:[#allocation75_spill] sm:$0xff]  ;;  %v18294_v45 = vand.u32 4294901760, %v18293_v40 }
 0x2f8   : > { %v9759_v57 = vpack.c.bf16 %v18276_v27, %v18275_v37  ;;  %v9761_v41 = vpack.c.bf16 %v18278_v49, %v18277_v31  ;;  %v18282_v56 = vand.u32 4294901760, %v18281_v12  ;;  %v9763_v35 = vpack.c.bf16 %v18290_v55, %v18288_v18  ;;  %v13852_v37 = vld [vmem:[%s11250_s4 + $0x400] sm:$0xff]  ;;  %v13855_v27 = vld [vmem:[%s11250_s4 + $0x408] sm:$0xff]  ;;  %v13861_v31 = vld [vmem:[%s11250_s4 + $0x498] sm:$0xff] }
 0x2f9   : > { %9740 = vmatpush3.bf16.xpose.msra.mxu0 %v9739_v53  ;;  %v9749_v53 = vpack.c.bf16 %v18248_v4, %v18247_v39  ;;  %v18284_v39 = vand.u32 4294901760, %v18283_v10  ;;  %v18285_v4 = vld [vmem:[#allocation83_spill] sm:$0xff]  ;;  %v13876_v12 = vld [vmem:[%s11250_s4 + $0x508] sm:$0xff]  ;;  %v13912_v55 = vld [vmem:[%s11250_s4 + $0x4a0] sm:$0xff] }
 0x2fa   : > { %9742 = vmatprep.subr.bf16.mxu0 %v9741_v50  ;;  %v9939_v50 = vpack.c.bf16 %v18251_v47, %v18249_v38  ;;  %v18291_v47 = vld [vmem:[#allocation86_spill] sm:$0xff]  ;;  %v13885_v10 = vld [vmem:[%s11250_s4 + $0x598] sm:$0xff] }
 0x2fb   : > { %v17049_v13 = vand.u32 4294901760, %v13885_v10  ;;  %v13906_v18 = vld [vmem:[%s11250_s4 + $0x410] sm:$0xff] }
 0x2fc   : > { %9932 = vmatpush3.bf16.xpose.msra.mxu1 %v9931_v2  ;;  %v18257_v2 = vand.u32 4294901760, %v18256_v58  ;;  %v18297_v58 = vld [vmem:[#allocation27_spill] sm:$0xff]  ;;  %v17048_v40 = vand.u32 4294901760, %v13906_v18 }
 0x2fd   : > { %9934 = vmatprep.subr.bf16.mxu1 %v9933_v26  ;;  %v18261_v26 = vand.u32 4294901760, %v18260_v52  ;;  %v18302_v52 = vld [vmem:[#allocation39_spill] sm:$0xff] }
 0x2fe   : > { %v9751_v33 = vpack.c.bf16 %v18257_v2, %v18255_v36  ;;  %v18296_v36 = vld [vmem:[#allocation25_spill] sm:$0xff]  ;;  %v18298_v2 = vld [vmem:[#allocation30_spill] sm:$0xff] }
 0x2ff   : > { %v9753_v59 = vpack.c.bf16 %v18261_v26, %v18259_v60  ;;  %v18301_v60 = vld [vmem:[#allocation32_spill] sm:$0xff] }
 0x300   : > { %v18303_v26 = vld [vmem:[#allocation40_spill] sm:$0xff] }
 0x301   : > { %9744 = vmatpush3.bf16.xpose.msra.mxu0 %v9743_v21  ;;  %v9943_v21 = vpack.c.bf16 %v18264_v0, %v18262_v1  ;;  %v18305_v1 = vld [vmem:[#allocation67_spill] sm:$0xff]  ;;  %v18307_v0 = vld [vmem:[#allocation29_spill] sm:$0xff] }
 0x302   : > { %9746 = vmatprep.subr.bf16.mxu0 %v9745_v19  ;;  %v9755_v19 = vpack.c.bf16 %v18268_v25, %v18267_v46  ;;  %v13829_v46 = vld [vmem:[%s11250_s4 + $0x488] sm:$0xff] }
 0x303   : > { %v18316_v25 = vld [vmem:[#allocation22_spill] sm:$0xff]  ;;  %v17067_v62 = vand.u32 4294901760, %v13829_v46 }
 0x304   : > { %9936 = vmatpush3.bf16.xpose.msra.mxu1 %v9935_v63  ;;  %v9947_v63 = vpack.c.bf16 %v18272_v16, %v18271_v15  ;;  %v13839_v15 = vld [vmem:[%s11250_s4 + $0x588] sm:$0xff] }
 0x305   : > { %9938 = vmatprep.subr.bf16.mxu1 %v9937_v24  ;;  %v18279_v24 = vld [vmem:[#allocation45_spill] sm:$0xff]  ;;  %v18318_v16 = vld [vmem:[#allocation38_spill] sm:$0xff]  ;;  %v17065_v5 = vand.u32 4294901760, %v13839_v15 }
 0x306   : > { %v18280_v34 = vand.u32 4294901760, %v18279_v24  ;;  %v17063_v24 = vand.u32 4294901760, %v13855_v27 }
 0x309   : > { %9748 = vmatpush3.bf16.xpose.msra.mxu0 %v9747_v29  ;;  %v9951_v29 = vpack.c.bf16 %v18282_v56, %v18280_v34  ;;  %v13873_v34 = vld [vmem:[%s11250_s4 + $0x500] sm:$0xff]  ;;  %v17055_v56 = vand.u32 4294901760, %v13861_v31 }
 0x30a   : > { %9750 = vmatprep.subr.bf16.mxu0 %v9749_v53  ;;  %v18286_v53 = vand.u32 4294901760, %v18285_v4  ;;  %v17057_v4 = vand.u32 4294901760, %v13876_v12 }
 0x30c   : > { %9940 = vmatpush3.bf16.xpose.msra.mxu1 %v9939_v50  ;;  %v9953_v38 = vpack.c.bf16 %v18286_v53, %v18284_v39  ;;  %v18292_v50 = vand.u32 4294901760, %v18291_v47  ;;  %v17062_v39 = vand.u32 4294901760, %v13873_v34 }
 0x30d   : > { %9942 = vmatprep.subr.bf16.mxu1 %v9941_v32 }
 0x30e   : > { %v9955_v32 = vpack.c.bf16 %v18294_v45, %v18292_v50  ;;  %v13922_v47 = vpack.c.bf16 %v17057_v4, %v17062_v39  ;;  %v17047_v45 = vand.u32 4294901760, %v13909_v42  ;;  %v14060_v4 = vld [vmem:[%s11250_s4 + $0x538] sm:$0xff]  ;;  %v14096_v39 = vld [vmem:[%s11250_s4 + $0x4d0] sm:$0xff] }
 0x310   : > { %18324 = vst [vmem:[#allocation42_spill] sm:$0xff] %v13922_v47 }
 0x311   : > { %9752 = vmatpush3.bf16.xpose.msra.mxu0 %v9751_v33  ;;  %v18299_v33 = vld [vmem:[#allocation91_spill] sm:$0xff] }
 0x312   : > { %9754 = vmatprep.subr.bf16.mxu0 %v9753_v59  ;;  %v18304_v59 = vld [vmem:[#allocation58_spill] sm:$0xff] }
 0x314   : > { %9944 = vmatpush3.bf16.xpose.msra.mxu1 %v9943_v21  ;;  %v18309_v21 = vld [vmem:[#allocation36_spill] sm:$0xff] }
 0x315   : > { %9946 = vmatprep.subr.bf16.mxu1 %v9945_v43  ;;  %v18313_v43 = vld [vmem:[#allocation65_spill] sm:$0xff] }
 0x319   : > { %9756 = vmatpush3.bf16.xpose.msra.mxu0 %v9755_v19  ;;  %v18317_v19 = vld [vmem:[#allocation24_spill] sm:$0xff] }
 0x31a   : > { %9758 = vmatprep.subr.bf16.mxu0 %v9757_v8  ;;  %v13836_v8 = vld [vmem:[%s11250_s4 + $0x580] sm:$0xff] }
 0x31b   : > { %v17066_v11 = vand.u32 4294901760, %v13836_v8 }
 0x31c   : > { %9948 = vmatpush3.bf16.xpose.msra.mxu1 %v9947_v63  ;;  %v18319_v63 = vld [vmem:[#allocation46_spill] sm:$0xff] }
 0x31d   : > { %9950 = vmatprep.subr.bf16.mxu1 %v9949_v54  ;;  %v13868_v49 = vpack.c.bf16 %v17065_v5, %v17066_v11  ;;  %v18338_v11 = vand.u32 4294901760, %v14060_v4 }
 0x31f   : > { %18321 = vst [vmem:[#allocation92_spill] sm:$0xff] %v13868_v49 }
 0x321   : > { %9760 = vmatpush3.bf16.xpose.msra.mxu0 %v9759_v57  ;;  %v13858_v57 = vld [vmem:[%s11250_s4 + $0x490] sm:$0xff] }
 0x322   : > { %9762 = vmatprep.subr.bf16.mxu0 %v9761_v41  ;;  %v17064_v41 = vand.u32 4294901760, %v13852_v37 }
 0x324   : > { %9952 = vmatpush3.bf16.xpose.msra.mxu1 %v9951_v29  ;;  %v13882_v29 = vld [vmem:[%s11250_s4 + $0x590] sm:$0xff]  ;;  %v13895_v53 = vpack.c.bf16 %v17063_v24, %v17064_v41  ;;  %v14093_v24 = vld [vmem:[%s11250_s4 + $0x448] sm:$0xff] }
 0x325   : > { %9954 = vmatprep.subr.bf16.mxu1 %v9953_v38  ;;  %v17050_v38 = vand.u32 4294901760, %v13882_v29 }
 0x326   : > { %18322 = vst [vmem:[#allocation96_spill] sm:$0xff] %v13895_v53 }
 0x327   : > { %v13929_v50 = vpack.c.bf16 %v17049_v13, %v17050_v38  ;;  %v14033_v13 = vld [vmem:[%s11250_s4 + $0x438] sm:$0xff]  ;;  %v14036_v38 = vld [vmem:[%s11250_s4 + $0x4c0] sm:$0xff] }
 0x329   : > { %9764 = vmatpush3.bf16.xpose.msra.mxu0 %v9763_v35  ;;  %v13915_v35 = vld [vmem:[%s11250_s4 + $0x4a8] sm:$0xff]  ;;  %18325 = vst [vmem:[#allocation41_spill] sm:$0xff] %v13929_v50 }
 0x32a   : > { %9766 = vmatprep.subr.bf16.mxu0 %v18295_v30  ;;  %v13937_v30 = vld [vmem:[%s11250_s4 + $0x518] sm:$0xff] }
 0x32c   : > { %9956 = vmatpush3.bf16.xpose.msra.mxu1 %v9955_v32  ;;  %v13934_v32 = vld [vmem:[%s11250_s4 + $0x510] sm:$0xff] }
 0x32d   : > { %9958 = vmatprep.subr.bf16.mxu1 %v18296_v36  ;;  %v18326_v36 = vld [vmem:[#allocation89_spill] sm:$0xff] }
 0x330   : > { %8166 = vmatmul.mubr.f32.vlgmr.msra.gmra.mrb[2].mxu0 %v18076_v6 }
 0x331   : > { %9768 = vmatpush3.bf16.xpose.msra.mxu0 %v18297_v58  ;;  %8199 = vmatprep.mubr.f32.mxu0 %v18076_v6  ;;  %v17044_v58 = vand.u32 4294901760, %v13912_v55 }
 0x332   : > { %9770 = vmatprep.subr.bf16.mxu0 %v18298_v2  ;;  %v17043_v2 = vand.u32 4294901760, %v13915_v35 }
 0x333   : > { %8370 = vmatmul.mubr.f32.vlgmr.msra.gmra.mrb[2].mxu1 %v18076_v6 }
 0x334   : > { %9960 = vmatpush3.bf16.xpose.msra.mxu1 %v18299_v33  ;;  %8403 = vmatprep.mubr.f32.mxu1 %v18076_v6  ;;  %v13944_v33 = vld [vmem:[%s11250_s4 + $0x5a0] sm:$0xff] }
 0x335   : > { %9962 = vmatprep.subr.bf16.mxu1 %v18300_v61  ;;  %v13947_v61 = vld [vmem:[%s11250_s4 + $0x5a8] sm:$0xff] }
 0x339   : > { %9772 = vmatpush3.bf16.xpose.msra.mxu0 %v18301_v60  ;;  %v17046_v60 = vand.u32 4294901760, %v13934_v32 }
 0x33a   : > { %9774 = vmatprep.subr.bf16.mxu0 %v18302_v52  ;;  %v17045_v52 = vand.u32 4294901760, %v13937_v30 }
 0x33c   : > { %9964 = vmatpush3.bf16.xpose.msra.mxu1 %v18303_v26  ;;  %v13959_v26 = vpack.c.bf16 %v17047_v45, %v17048_v40  ;;  %v14030_v40 = vld [vmem:[%s11250_s4 + $0x430] sm:$0xff] }
 0x33d   : > { %9966 = vmatprep.subr.bf16.mxu1 %v18187_v22  ;;  %v18308_v22 = vld [vmem:[#allocation35_spill] sm:$0xff] }
 0x33e   : > { %18327 = vst [vmem:[#allocation48_spill] sm:$0xff] %v13959_v26 }
 0x341   : > { %9776 = vmatpush3.bf16.xpose.msra.mxu0 %v18304_v59  ;;  %v17042_v59 = vand.u32 4294901760, %v13944_v33 }
 0x342   : > { %9778 = vmatprep.subr.bf16.mxu0 %v18305_v1  ;;  %v17041_v1 = vand.u32 4294901760, %v13947_v61 }
 0x344   : > { %9968 = vmatpush3.bf16.xpose.msra.mxu1 %v18190_v14  ;;  %v18312_v14 = vld [vmem:[#allocation59_spill] sm:$0xff] }
 0x345   : > { %9970 = vmatprep.subr.bf16.mxu1 %v18306_v23  ;;  %v13967_v23 = vpack.c.bf16 %v17043_v2, %v17044_v58 }
 0x347   : > { %18328 = vst [vmem:[#allocation49_spill] sm:$0xff] %v13967_v23 }
 0x349   : > { %9780 = vmatpush3.bf16.xpose.msra.mxu0 %v18194_v28  ;;  %v18314_v28 = vld [vmem:[#allocation13_spill] sm:$0xff] }
 0x34a   : > { %9782 = vmatprep.subr.bf16.mxu0 %v18307_v0  ;;  %v13970_v0 = vld [vmem:[%s11250_s4 + $0x420] sm:$0xff] }
 0x34c   : > { %9972 = vmatpush3.bf16.xpose.msra.mxu1 %v18197_v3  ;;  %v18315_v3 = vld [vmem:[#allocation15_spill] sm:$0xff] }
 0x34d   : > { %9974 = vmatprep.subr.bf16.mxu1 %v18198_v7  ;;  %v13826_v7 = vld [vmem:[%s11250_s4 + $0x480] sm:$0xff] }
 0x34e   : > { %v17068_v17 = vand.u32 4294901760, %v13826_v7 }
 0x350   : > { %v13849_v54 = vpack.c.bf16 %v17067_v62, %v17068_v17  ;;  %v14090_v17 = vld [vmem:[%s11250_s4 + $0x440] sm:$0xff] }
 0x351   : > { %9784 = vmatpush3.bf16.xpose.msra.mxu0 %v18308_v22  ;;  %v13973_v22 = vld [vmem:[%s11250_s4 + $0x428] sm:$0xff] }
 0x352   : > { %9786 = vmatprep.subr.bf16.mxu0 %v18309_v21  ;;  %18320 = vst [vmem:[#allocation16_spill] sm:$0xff] %v13849_v54  ;;  %v13976_v21 = vld [vmem:[%s11250_s4 + $0x4b0] sm:$0xff] }
 0x354   : > { %9976 = vmatpush3.bf16.xpose.msra.mxu1 %v18310_v48  ;;  %v13979_v48 = vld [vmem:[%s11250_s4 + $0x4b8] sm:$0xff] }
 0x355   : > { %9978 = vmatprep.subr.bf16.mxu1 %v18311_v9  ;;  %v13985_v9 = vpack.c.bf16 %v17045_v52, %v17046_v60 }
 0x357   : > { %18329 = vst [vmem:[#allocation52_spill] sm:$0xff] %v13985_v9 }
 0x359   : > { %9788 = vmatpush3.bf16.xpose.msra.mxu0 %v18312_v14  ;;  %v13992_v14 = vpack.c.bf16 %v17041_v1, %v17042_v59  ;;  %v14009_v1 = vld [vmem:[%s11250_s4 + $0x5b8] sm:$0xff] }
 0x35a   : > { %9790 = vmatprep.subr.bf16.mxu0 %v18313_v43  ;;  %v17052_v43 = vand.u32 4294901760, %v13970_v0  ;;  %v17060_v60 = vand.u32 4294901760, %v14009_v1 }
 0x35b   : > { %18330 = vst [vmem:[#allocation81_spill] sm:$0xff] %v13992_v14 }
 0x35c   : > { %9980 = vmatpush3.bf16.xpose.msra.mxu1 %v18314_v28  ;;  %v17051_v28 = vand.u32 4294901760, %v13973_v22 }
 0x35d   : > { %9982 = vmatprep.subr.bf16.mxu1 %v18315_v3  ;;  %v13997_v3 = vld [vmem:[%s11250_s4 + $0x520] sm:$0xff] }
 0x35e   : > { %v17059_v59 = vand.u32 4294901760, %v13997_v3  ;;  %v14019_v58 = vpack.c.bf16 %v17051_v28, %v17052_v43  ;;  %v14039_v28 = vld [vmem:[%s11250_s4 + $0x4c8] sm:$0xff] }
 0x360   : > { %18331 = vst [vmem:[#allocation88_spill] sm:$0xff] %v14019_v58 }
 0x361   : > { %9792 = vmatpush3.bf16.xpose.msra.mxu0 %v18316_v25  ;;  %v14000_v25 = vld [vmem:[%s11250_s4 + $0x528] sm:$0xff] }
 0x362   : > { %9794 = vmatprep.subr.bf16.mxu0 %v18317_v19  ;;  %v17054_v19 = vand.u32 4294901760, %v13976_v21  ;;  %v17058_v2 = vand.u32 4294901760, %v14000_v25 }
 0x364   : > { %9984 = vmatpush3.bf16.xpose.msra.mxu1 %v18318_v16  ;;  %v17053_v16 = vand.u32 4294901760, %v13979_v48  ;;  %v14045_v43 = vpack.c.bf16 %v17058_v2, %v17059_v59  ;;  %v17072_v2 = vand.u32 4294901760, %v14036_v38  ;;  %v17071_v59 = vand.u32 4294901760, %v14039_v28 }
 0x365   : > { %9986 = vmatprep.subr.bf16.mxu1 %v18319_v63  ;;  %v14006_v63 = vld [vmem:[%s11250_s4 + $0x5b0] sm:$0xff] }
 0x366   : > { %v17061_v52 = vand.u32 4294901760, %v14006_v63  ;;  %v14027_v45 = vpack.c.bf16 %v17053_v16, %v17054_v19  ;;  %18333 = vst [vmem:[#allocation95_spill] sm:$0xff] %v14045_v43  ;;  %v17070_v19 = vand.u32 4294901760, %v14030_v40  ;;  %v14087_v62 = vpack.c.bf16 %v17071_v59, %v17072_v2 }
 0x368   : > { %18332 = vst [vmem:[#allocation94_spill] sm:$0xff] %v14027_v45  ;;  %v14052_v16 = vpack.c.bf16 %v17060_v60, %v17061_v52  ;;  %v14066_v60 = vld [vmem:[%s11250_s4 + $0x5c0] sm:$0xff]  ;;  %v14069_v52 = vld [vmem:[%s11250_s4 + $0x5c8] sm:$0xff]  ;;  %18336 = vst [vmem:[#allocation68_spill] sm:$0xff] %v14087_v62 }
 0x369   : > { %9796 = vmatpush3.bf16.xpose.msra.mxu0 %v18213_v44  ;;  %v17056_v44 = vand.u32 4294901760, %v13858_v57  ;;  %v18340_v59 = vand.u32 4294901760, %v14066_v60  ;;  %v18341_v2 = vand.u32 4294901760, %v14069_v52 }
 0x36a   : > { %9990 = vmatprep.subr.bf16.mxu0 %v13849_v54  ;;  %18334 = vst [vmem:[#allocation98_spill] sm:$0xff] %v14052_v16  ;;  %v18376_v54 = vand.u32 4294901760, %v13861_v31 }
 0x36c   : > { %9988 = vmatpush3.bf16.xpose.msra.mxu1 %v18216_v51  ;;  %v13903_v51 = vpack.c.bf16 %v17055_v56, %v17056_v44  ;;  %v17069_v56 = vand.u32 4294901760, %v14033_v13  ;;  %v14057_v44 = vld [vmem:[%s11250_s4 + $0x530] sm:$0xff] }
 0x36d   : > { %10182 = vmatprep.subr.bf16.mxu1 %v13868_v49  ;;  %v14212_v49 = vld [vmem:[%s11250_s4 + $0x550] sm:$0xff] }
 0x36e   : > { %18323 = vst [vmem:[#allocation18_spill] sm:$0xff] %v13903_v51  ;;  %v14079_v41 = vpack.c.bf16 %v17069_v56, %v17070_v19  ;;  %v14099_v56 = vld [vmem:[%s11250_s4 + $0x4d8] sm:$0xff]  ;;  %v18337_v19 = vand.u32 4294901760, %v14057_v44 }
 0x370   : > { %8200 = vmatmul.mubr.f32.vlgmr.msra.gmra.mrb[2].mxu0 %v18076_v6  ;;  %18335 = vst [vmem:[#allocation64_spill] sm:$0xff] %v14079_v41  ;;  %v14105_v5 = vpack.c.bf16 %v18338_v11, %v18337_v19  ;;  %v18343_v11 = vand.u32 4294901760, %v14093_v24  ;;  %v18354_v19 = vand.u32 4294901760, %v13836_v8 }
 0x371   : > { %9992 = vmatpush3.bf16.xpose.msra.mxu0 %v13895_v53  ;;  %8437 = vmatprep.mubr.f32.mxu0 %v18326_v36 }
 0x372   : > { %9994 = vmatprep.subr.bf16.mxu0 %v13903_v51  ;;  %18339 = vst [vmem:[#allocation14_spill] sm:$0xff] %v14105_v5 }
 0x373   : > { %8404 = vmatmul.mubr.f32.vlgmr.msra.gmra.mrb[2].mxu1 %v18076_v6  ;;  %v18382_v6 = vand.u32 4294901760, %v13909_v42 }
 0x374   : > { %10184 = vmatpush3.bf16.xpose.msra.mxu1 %v13922_v47  ;;  %8641 = vmatprep.mubr.f32.mxu1 %v18326_v36  ;;  %v18358_v47 = vand.u32 4294901760, %v13839_v15 }
 0x375   : > { %10186 = vmatprep.subr.bf16.mxu1 %v13929_v50  ;;  %v14174_v50 = vld [vmem:[%s11250_s4 + $0x4e8] sm:$0xff] }
 0x376   : > { %18357 = vst [vmem:[#allocation84_spill] sm:$0xff] %v14174_v50  ;;  %v14179_v51 = vsub.f32 %v13839_v15, %v18358_v47  ;;  %v18366_v15 = vand.u32 4294901760, %v13873_v34 }
 0x378   : > { %18359 = vst [vmem:[#allocation87_spill] sm:$0xff] %v14179_v51  ;;  %v14200_v47 = vsub.f32 %v13873_v34, %v18366_v15  ;;  %v18372_v15 = vand.u32 4294901760, %v13858_v57 }
 0x379   : > { %9996 = vmatpush3.bf16.xpose.msra.mxu0 %v13959_v26 }
 0x37a   : > { %9998 = vmatprep.subr.bf16.mxu0 %v13967_v23  ;;  %v18345_v23 = vand.u32 4294901760, %v14096_v39 }
 0x37c   : > { %10188 = vmatpush3.bf16.xpose.msra.mxu1 %v13985_v9 }
 0x37d   : > { %10190 = vmatprep.subr.bf16.mxu1 %v13992_v14  ;;  %v14120_v14 = vld [vmem:[%s11250_s4 + $0x548] sm:$0xff] }
 0x381   : > { %10000 = vmatpush3.bf16.xpose.msra.mxu0 %v14019_v58  ;;  %v14117_v58 = vld [vmem:[%s11250_s4 + $0x540] sm:$0xff] }
 0x382   : > { %10002 = vmatprep.subr.bf16.mxu0 %v14027_v45  ;;  %v14153_v45 = vld [vmem:[%s11250_s4 + $0x458] sm:$0xff] }
 0x383   : > { %18349 = vst [vmem:[#allocation28_spill] sm:$0xff] %v14153_v45 }
 0x384   : > { %10192 = vmatpush3.bf16.xpose.msra.mxu1 %v14045_v43  ;;  %v17097_v43 = vand.u32 4294901760, %v14090_v17 }
 0x385   : > { %10194 = vmatprep.subr.bf16.mxu1 %v14052_v16  ;;  %v14112_v16 = vpack.c.bf16 %v18341_v2, %v18340_v59  ;;  %v14129_v2 = vld [vmem:[%s11250_s4 + $0x5d8] sm:$0xff]  ;;  %v14150_v59 = vld [vmem:[%s11250_s4 + $0x450] sm:$0xff] }
 0x386   : > { %18348 = vst [vmem:[#allocation20_spill] sm:$0xff] %v14150_v59 }
 0x387   : > { %18342 = vst [vmem:[#allocation19_spill] sm:$0xff] %v14112_v16 }
 0x389   : > { %10004 = vmatpush3.bf16.xpose.msra.mxu0 %v14079_v41  ;;  %v14126_v41 = vld [vmem:[%s11250_s4 + $0x5d0] sm:$0xff] }
 0x38a   : > { %10006 = vmatprep.subr.bf16.mxu0 %v14087_v62  ;;  %v14139_v62 = vpack.c.bf16 %v18343_v11, %v17097_v43  ;;  %v18352_v43 = vand.u32 4294901760, %v13829_v46 }
 0x38c   : > { %10196 = vmatpush3.bf16.xpose.msra.mxu1 %v14105_v5  ;;  %18344 = vst [vmem:[#allocation23_spill] sm:$0xff] %v14139_v62  ;;  %v18346_v5 = vand.u32 4294901760, %v14099_v56  ;;  %v14163_v9 = vsub.f32 %v13829_v46, %v18352_v43  ;;  %v18361_v43 = vand.u32 4294901760, %v13855_v27 }
 0x38d   : > { %10198 = vmatprep.subr.bf16.mxu1 %v14112_v16  ;;  %v18350_v16 = vand.u32 4294901760, %v13826_v7 }
 0x38e   : > { %v14147_v26 = vpack.c.bf16 %v18346_v5, %v18345_v23  ;;  %18353 = vst [vmem:[#allocation73_spill] sm:$0xff] %v14163_v9  ;;  %v14168_v5 = vsub.f32 %v13836_v8, %v18354_v19  ;;  %v14171_v23 = vld [vmem:[%s11250_s4 + $0x4e0] sm:$0xff]  ;;  %v14189_v8 = vsub.f32 %v13855_v27, %v18361_v43  ;;  %v18364_v19 = vand.u32 4294901760, %v14120_v14  ;;  %v14234_v27 = vld [vmem:[%s11250_s4 + $0x5e8] sm:$0xff] }
 0x38f   : > { %v14158_v11 = vsub.f32 %v13826_v7, %v18350_v16  ;;  %18356 = vst [vmem:[#allocation80_spill] sm:$0xff] %v14171_v23  ;;  %v18360_v7 = vand.u32 4294901760, %v13852_v37  ;;  %v18363_v16 = vand.u32 4294901760, %v14117_v58  ;;  %v14231_v43 = vld [vmem:[%s11250_s4 + $0x5e0] sm:$0xff]  ;;  %18375 = vst [vmem:[#allocation60_spill] sm:$0xff] %v14234_v27 }
 0x390   : > { %18347 = vst [vmem:[#allocation26_spill] sm:$0xff] %v14147_v26  ;;  %18355 = vst [vmem:[#allocation90_spill] sm:$0xff] %v14168_v5 }
 0x391   : > { %18351 = vst [vmem:[#allocation37_spill] sm:$0xff] %v14158_v11  ;;  %v14184_v46 = vsub.f32 %v13852_v37, %v18360_v7  ;;  %18362 = vst [vmem:[#allocation93_spill] sm:$0xff] %v14189_v8  ;;  %v14195_v20 = vpack.c.bf16 %v18364_v19, %v18363_v16  ;;  %10008 = vmatpush3.bf16.xpose.msra.mxu0 %v14139_v62  ;;  %v18367_v37 = vand.u32 4294901760, %v14126_v41  ;;  %v18368_v7 = vand.u32 4294901760, %v14129_v2  ;;  %v14215_v16 = vld [vmem:[%s11250_s4 + $0x558] sm:$0xff] }
 0x392   : > { %18370 = vst [vmem:[#allocation97_spill] sm:$0xff] %v14215_v16  ;;  %v18371_v19 = vand.u32 4294901760, %v13876_v12  ;;  %v14225_v62 = vsub.f32 %v13858_v57, %v18372_v15  ;;  %10010 = vmatprep.subr.bf16.mxu0 %v14147_v26  ;;  %18374 = vst [vmem:[#allocation33_spill] sm:$0xff] %v14231_v43  ;;  %v18380_v15 = vand.u32 4294901760, %v13885_v10 }
 0x393   : > { %18365 = vst [vmem:[#allocation57_spill] sm:$0xff] %v14195_v20  ;;  %v14207_v53 = vpack.c.bf16 %v18368_v7, %v18367_v37  ;;  %v18381_v7 = vand.u32 4294901760, %v13906_v18 }
 0x394   : > { %v14220_v34 = vsub.f32 %v13876_v12, %v18371_v19  ;;  %18373 = vst [vmem:[#allocation34_spill] sm:$0xff] %v14225_v62  ;;  %v14239_v12 = vsub.f32 %v13861_v31, %v18376_v54  ;;  %v18378_v19 = vand.u32 4294901760, %v13882_v29  ;;  %v14249_v37 = vsub.f32 %v13885_v10, %v18380_v15  ;;  %10200 = vmatpush3.bf16.xpose.msra.mxu1 %v14195_v20  ;;  %v14305_v15 = vld [vmem:[%s11250_s4 + $0x460] sm:$0xff] }
 0x395   : > { %18369 = vst [vmem:[#allocation70_spill] sm:$0xff] %v14207_v53  ;;  %v14254_v26 = vsub.f32 %v13906_v18, %v18381_v7  ;;  %v14259_v54 = vsub.f32 %v13909_v42, %v18382_v6  ;;  %v18383_v31 = vand.u32 4294901760, %v13934_v32  ;;  %v18385_v18 = vand.u32 4294901760, %v13937_v30  ;;  %10202 = vmatprep.subr.bf16.mxu1 %v14207_v53  ;;  %18397 = vst [vmem:[#allocation56_spill] sm:$0xff] %v14305_v15 }
 0x396   : > { %18377 = vst [vmem:[#allocation69_spill] sm:$0xff] %v14239_v12  ;;  %v14244_v57 = vsub.f32 %v13882_v29, %v18378_v19  ;;  %v18387_v6 = vand.u32 4294901760, %v14150_v59  ;;  %v18388_v42 = vand.u32 4294901760, %v14153_v45  ;;  %v18390_v19 = vand.u32 4294901760, %v13912_v55 }
 0x397   : > { %v14264_v29 = vsub.f32 %v13934_v32, %v18383_v31  ;;  %v14272_v7 = vsub.f32 %v13937_v30, %v18385_v18  ;;  %v18391_v30 = vand.u32 4294901760, %v13915_v35  ;;  %v18392_v53 = vand.u32 4294901760, %v13944_v33 }
 0x398   : > { %18379 = vst [vmem:[#allocation79_spill] sm:$0xff] %v14244_v57  ;;  %v14279_v32 = vpack.c.bf16 %v18388_v42, %v18387_v6  ;;  %v14286_v10 = vsub.f32 %v13912_v55, %v18390_v19  ;;  %v18394_v6 = vand.u32 4294901760, %v14171_v23  ;;  %v18395_v42 = vand.u32 4294901760, %v14174_v50  ;;  %v14308_v55 = vld [vmem:[%s11250_s4 + $0x468] sm:$0xff]  ;;  %v14331_v23 = vld [vmem:[%s11250_s4 + $0x4f0] sm:$0xff] }
 0x399   : > { %18384 = vst [vmem:[#allocation54_spill] sm:$0xff] %v14264_v29  ;;  %18386 = vst [vmem:[#allocation55_spill] sm:$0xff] %v14272_v7  ;;  %v14291_v18 = vsub.f32 %v13915_v35, %v18391_v30  ;;  %v14296_v20 = vsub.f32 %v13944_v33, %v18392_v53  ;;  %v18399_v19 = vand.u32 4294901760, %v13947_v61  ;;  %v18401_v30 = vand.u32 4294901760, %v13970_v0 }
 0x39a   : > { %18389 = vst [vmem:[#allocation53_spill] sm:$0xff] %v14279_v32  ;;  %v14302_v31 = vpack.c.bf16 %v18395_v42, %v18394_v6  ;;  %18398 = vst [vmem:[#allocation66_spill] sm:$0xff] %v14308_v55  ;;  %v18402_v33 = vand.u32 4294901760, %v13973_v22  ;;  %v18404_v42 = vand.u32 4294901760, %v13997_v3  ;;  %v18415_v45 = vand.u32 4294901760, %v14215_v16  ;;  %10012 = vmatpush3.bf16.xpose.msra.mxu0 %v14279_v32  ;;  %v14372_v16 = vld [vmem:[%s11250_s4 + $0x560] sm:$0xff] }
 0x39b   : > { %18393 = vst [vmem:[#allocation21_spill] sm:$0xff] %v14296_v20  ;;  %v14313_v35 = vsub.f32 %v13947_v61, %v18399_v19  ;;  %v14318_v53 = vsub.f32 %v13970_v0, %v18401_v30  ;;  %18406 = vst [vmem:[#allocation75_spill] sm:$0xff] %v14331_v23  ;;  %v14334_v61 = vld [vmem:[%s11250_s4 + $0x4f8] sm:$0xff]  ;;  %v18408_v19 = vand.u32 4294901760, %v14000_v25  ;;  %v18410_v30 = vand.u32 4294901760, %v13976_v21 }
 0x39c   : > { %18396 = vst [vmem:[#allocation44_spill] sm:$0xff] %v14302_v31  ;;  %v14323_v6 = vsub.f32 %v13973_v22, %v18402_v33  ;;  %v14328_v50 = vsub.f32 %v13997_v3, %v18404_v42  ;;  %18407 = vst [vmem:[#allocation43_spill] sm:$0xff] %v14334_v61  ;;  %v18412_v33 = vand.u32 4294901760, %v13979_v48  ;;  %v18414_v42 = vand.u32 4294901760, %v14212_v49  ;;  %10014 = vmatprep.subr.bf16.mxu0 %v14302_v31  ;;  %v14384_v32 = vld [vmem:[%s11250_s4 + $0x5f8] sm:$0xff] }
 0x39d   : > { %18400 = vst [vmem:[#allocation76_spill] sm:$0xff] %v14313_v35  ;;  %v14339_v0 = vsub.f32 %v14000_v25, %v18408_v19  ;;  %v14344_v22 = vsub.f32 %v13976_v21, %v18410_v30  ;;  %v18417_v59 = vand.u32 4294901760, %v14006_v63  ;;  %v18419_v21 = vand.u32 4294901760, %v14231_v43  ;;  %18422 = vst [vmem:[#allocation25_spill] sm:$0xff] %v14372_v16 }
 0x39e   : > { %18403 = vst [vmem:[#allocation61_spill] sm:$0xff] %v14323_v6  ;;  %18405 = vst [vmem:[#allocation45_spill] sm:$0xff] %v14328_v50  ;;  %v14349_v3 = vsub.f32 %v13979_v48, %v18412_v33  ;;  %v14355_v50 = vpack.c.bf16 %v18415_v45, %v18414_v42  ;;  %v18420_v19 = vand.u32 4294901760, %v14234_v27  ;;  %v14375_v45 = vld [vmem:[%s11250_s4 + $0x568] sm:$0xff]  ;;  %v14381_v42 = vld [vmem:[%s11250_s4 + $0x5f0] sm:$0xff]  ;;  %v18425_v33 = vand.u32 4294901760, %v14009_v1 }
 0x39f   : > { %18409 = vst [vmem:[#allocation83_spill] sm:$0xff] %v14339_v0  ;;  %18411 = vst [vmem:[#allocation47_spill] sm:$0xff] %v14344_v22  ;;  %v14360_v25 = vsub.f32 %v14006_v63, %v18417_v59  ;;  %v18426_v27 = vand.u32 4294901760, %v14030_v40  ;;  %v18427_v59 = vand.u32 4294901760, %v14033_v13  ;;  %v18431_v43 = vand.u32 4294901760, %v14060_v4 }
 0x3a0   : > { %18413 = vst [vmem:[#allocation50_spill] sm:$0xff] %v14349_v3  ;;  %18416 = vst [vmem:[#allocation86_spill] sm:$0xff] %v14355_v50  ;;  %v14367_v30 = vpack.c.bf16 %v18420_v19, %v18419_v21  ;;  %v14391_v48 = vsub.f32 %v14009_v1, %v18425_v33  ;;  %v18429_v21 = vand.u32 4294901760, %v14057_v44  ;;  %10204 = vmatpush3.bf16.xpose.msra.mxu1 %v14355_v50  ;;  %v14439_v50 = vld [vmem:[%s11250_s4 + $0x470] sm:$0xff] }
 0x3a1   : > { %18418 = vst [vmem:[#allocation85_spill] sm:$0xff] %v14360_v25  ;;  %18423 = vst [vmem:[#allocation27_spill] sm:$0xff] %v14375_v45  ;;  %v14396_v63 = vsub.f32 %v14030_v40, %v18426_v27  ;;  %v14401_v31 = vsub.f32 %v14033_v13, %v18427_v59  ;;  %v14416_v13 = vsub.f32 %v14060_v4, %v18431_v43  ;;  %v18434_v59 = vand.u32 4294901760, %v14308_v55  ;;  %v14442_v55 = vld [vmem:[%s11250_s4 + $0x478] sm:$0xff] }
 0x3a2   : > { %18421 = vst [vmem:[#allocation77_spill] sm:$0xff] %v14367_v30  ;;  %18424 = vst [vmem:[#allocation30_spill] sm:$0xff] %v14384_v32  ;;  %v14406_v19 = vsub.f32 %v14057_v44, %v18429_v21  ;;  %10206 = vmatprep.subr.bf16.mxu1 %v14367_v30  ;;  %v18433_v44 = vand.u32 4294901760, %v14305_v15  ;;  %v18436_v27 = vand.u32 4294901760, %v14036_v38  ;;  %v18438_v4 = vand.u32 4294901760, %v14331_v23 }
 0x3a3   : > { %18428 = vst [vmem:[#allocation91_spill] sm:$0xff] %v14401_v31  ;;  %18432 = vst [vmem:[#allocation32_spill] sm:$0xff] %v14416_v13  ;;  %v18439_v43 = vand.u32 4294901760, %v14334_v61  ;;  %v18442_v40 = vand.u32 4294901760, %v14163_v9  ;;  %v18447_v61 = vand.u32 4294901760, %v14069_v52  ;;  %v18453_v15 = vand.u32 4294901760, %v14179_v51 }
 0x3a4   : > { %18430 = vst [vmem:[#allocation31_spill] sm:$0xff] %v14406_v19  ;;  %v14423_v21 = vpack.c.bf16 %v18434_v59, %v18433_v44  ;;  %v14430_v1 = vsub.f32 %v14036_v38, %v18436_v27  ;;  %v18441_v44 = vand.u32 4294901760, %v14158_v11  ;;  %v18443_v38 = vand.u32 4294901760, %v14039_v28 }
 0x3a5   : > { %v14436_v30 = vpack.c.bf16 %v18439_v43, %v18438_v4  ;;  %v4143_v33 = vsub.f32 %v14163_v9, %v18442_v40  ;;  %v18445_v4 = vand.u32 4294901760, %v14066_v60  ;;  %v14463_v23 = vsub.f32 %v14069_v52, %v18447_v61 }
 0x3a6   : > { %18435 = vst [vmem:[#allocation39_spill] sm:$0xff] %v14423_v21  ;;  %18437 = vst [vmem:[#allocation40_spill] sm:$0xff] %v14430_v1  ;;  %v4136_v59 = vsub.f32 %v14158_v11, %v18441_v44  ;;  %v14453_v27 = vsub.f32 %v14039_v28, %v18443_v38  ;;  %v18449_v11 = vand.u32 4294901760, %v14372_v16  ;;  %v18450_v40 = vand.u32 4294901760, %v14375_v45  ;;  %v14473_v28 = vld [vmem:[%s11250_s4 + $0x570] sm:$0xff]  ;;  %v14476_v38 = vld [vmem:[%s11250_s4 + $0x578] sm:$0xff]  ;;  %10016 = vmatpush3.bf16.xpose.msra.mxu0 %v14423_v21 }
 0x3a7   : > { %18440 = vst [vmem:[#allocation58_spill] sm:$0xff] %v14436_v30  ;;  %v14458_v43 = vsub.f32 %v14066_v60, %v18445_v4  ;;  %18448 = vst [vmem:[#allocation29_spill] sm:$0xff] %v14463_v23  ;;  %v18452_v60 = vand.u32 4294901760, %v14168_v5  ;;  %v4998_v52 = vsub.f32 %v14179_v51, %v18453_v15  ;;  %v18454_v44 = vand.u32 4294901760, %v14090_v17  ;;  %10018 = vmatprep.subr.bf16.mxu0 %v14436_v30 }
 0x3a8   : > { %18444 = vst [vmem:[#allocation67_spill] sm:$0xff] %v14453_v27  ;;  %v14470_v9 = vpack.c.bf16 %v18450_v40, %v18449_v11  ;;  %v18456_v11 = vand.u32 4294901760, %v14381_v42  ;;  %v18457_v40 = vand.u32 4294901760, %v14384_v32  ;;  %v4137_v15 = vand.u32 4294901760, %v4136_v59 }
 0x3a9   : > { %18446 = vst [vmem:[#allocation71_spill] sm:$0xff] %v14458_v43  ;;  %v4991_v4 = vsub.f32 %v14168_v5, %v18452_v60  ;;  %v14488_v45 = vsub.f32 %v14090_v17, %v18454_v44  ;;  %v4144_v61 = vand.u32 4294901760, %v4143_v33  ;;  %v18459_v32 = vand.u32 4294901760, %v14184_v46 }
 0x3aa   : > { %18451 = vst [vmem:[#allocation35_spill] sm:$0xff] %v14470_v9  ;;  %v14495_v16 = vpack.c.bf16 %v18457_v40, %v18456_v11  ;;  %10208 = vmatpush3.bf16.xpose.msra.mxu1 %v14470_v9  ;;  %v4999_v60 = vand.u32 4294901760, %v4998_v52  ;;  %v18460_v33 = vand.u32 4294901760, %v14189_v8  ;;  %v18461_v44 = vand.u32 4294901760, %v14093_v24 }
 0x3ab   : > { %18455 = vst [vmem:[#allocation36_spill] sm:$0xff] %v14488_v45  ;;  %v4024_v11 = vsub.f32 %v14184_v46, %v18459_v32  ;;  %v4992_v5 = vand.u32 4294901760, %v4991_v4  ;;  %v18463_v32 = vand.u32 4294901760, %v14439_v50  ;;  %v18464_v40 = vand.u32 4294901760, %v14442_v55 }
 0x3ac   : > { %18458 = vst [vmem:[#allocation51_spill] sm:$0xff] %v14495_v16  ;;  %v4031_v59 = vsub.f32 %v14189_v8, %v18460_v33  ;;  %v14516_v21 = vsub.f32 %v14093_v24, %v18461_v44  ;;  %10210 = vmatprep.subr.bf16.mxu1 %v14495_v16  ;;  %v18466_v33 = vand.u32 4294901760, %v14117_v58  ;;  %v10021_v9 = vpack.c.bf16 %v4144_v61, %v4137_v15 }
 0x3ad   : > { %v14523_v51 = vpack.c.bf16 %v18464_v40, %v18463_v32  ;;  %v18467_v24 = vand.u32 4294901760, %v14225_v62  ;;  %v18468_v16 = vand.u32 4294901760, %v14239_v12  ;;  %v18469_v40 = vand.u32 4294901760, %v14120_v14 }
 0x3ae   : > { %18462 = vst [vmem:[#allocation74_spill] sm:$0xff] %v14516_v21  ;;  %v14530_v17 = vsub.f32 %v14117_v58, %v18466_v33  ;;  %v18471_v52 = vand.u32 4294901760, %v14096_v39  ;;  %v18473_v58 = vand.u32 4294901760, %v14473_v28  ;;  %v18474_v61 = vand.u32 4294901760, %v14476_v38 }
 0x3af   : > { %18465 = vst [vmem:[#allocation59_spill] sm:$0xff] %v14523_v51  ;;  %v4150_v44 = vsub.f32 %v14225_v62, %v18467_v24  ;;  %v4157_v30 = vsub.f32 %v14239_v12, %v18468_v16  ;;  %v14541_v32 = vsub.f32 %v14120_v14, %v18469_v40  ;;  %v18476_v33 = vand.u32 4294901760, %v14200_v47  ;;  %10020 = vmatpush3.bf16.xpose.msra.mxu0 %v14523_v51 }
 0x3b0   : > { %v14546_v4 = vsub.f32 %v14096_v39, %v18471_v52  ;;  %v14552_v15 = vpack.c.bf16 %v18474_v61, %v18473_v58  ;;  %v10213_v24 = vpack.c.bf16 %v4999_v60, %v4992_v5  ;;  %v4025_v12 = vand.u32 4294901760, %v4024_v11  ;;  %10022 = vmatprep.subr.bf16.mxu0 %v10021_v9 }
 0x3b1   : > { %18470 = vst [vmem:[#allocation65_spill] sm:$0xff] %v14541_v32  ;;  %v4879_v16 = vsub.f32 %v14200_v47, %v18476_v33  ;;  %v4032_v62 = vand.u32 4294901760, %v4031_v59  ;;  %v18477_v14 = vand.u32 4294901760, %v14220_v34  ;;  %v18478_v39 = vand.u32 4294901760, %v14244_v57 }
 0x3b2   : > { %18472 = vst [vmem:[#allocation13_spill] sm:$0xff] %v14546_v4  ;;  %18475 = vst [vmem:[#allocation15_spill] sm:$0xff] %v14552_v15  ;;  %v18479_v58 = vand.u32 4294901760, %v14249_v37  ;;  %v17183_v8 = vand.u32 4294901760, %v14254_v26  ;;  %v4151_v60 = vand.u32 4294901760, %v4150_v44  ;;  %v4158_v11 = vand.u32 4294901760, %v4157_v30  ;;  %10212 = vmatpush3.bf16.xpose.msra.mxu1 %v14552_v15 }
 0x3b3   : > { %v4886_v40 = vsub.f32 %v14220_v34, %v18477_v14  ;;  %v5005_v52 = vsub.f32 %v14244_v57, %v18478_v39  ;;  %v18480_v14 = vand.u32 4294901760, %v14099_v56  ;;  %v4880_v39 = vand.u32 4294901760, %v4879_v16  ;;  %10214 = vmatprep.subr.bf16.mxu1 %v10213_v24 }
 0x3b4   : > { %v5012_v61 = vsub.f32 %v14249_v37, %v18479_v58  ;;  %v17184_v57 = vand.u32 4294901760, %v14264_v29  ;;  %v10023_v5 = vpack.c.bf16 %v4032_v62, %v4025_v12  ;;  %v17191_v30 = vand.u32 4294901760, %v14296_v20 }
 0x3b5   : > { %v14574_v51 = vsub.f32 %v14099_v56, %v18480_v14  ;;  %v4887_v9 = vand.u32 4294901760, %v4886_v40  ;;  %v5006_v33 = vand.u32 4294901760, %v5005_v52  ;;  %v4038_v56 = vsub.f32 %v14254_v26, %v17183_v8 }
 0x3b6   : > { %v5013_v59 = vand.u32 4294901760, %v5012_v61  ;;  %v18482_v16 = vand.u32 4294901760, %v14259_v54  ;;  %v18483_v58 = vand.u32 4294901760, %v14126_v41  ;;  %v10025_v12 = vpack.c.bf16 %v4158_v11, %v4151_v60  ;;  %8438 = vmatmul.mubr.f32.vlgmr.msra.gmra.mrb[4].mxu0 %v18326_v36 }
 0x3b7   : > { %18481 = vst [vmem:[#allocation22_spill] sm:$0xff] %v14574_v51  ;;  %v18485_v40 = vand.u32 4294901760, %v14286_v10  ;;  %v18486_v52 = vand.u32 4294901760, %v14291_v18  ;;  %v18487_v8 = vand.u32 4294901760, %v14129_v2  ;;  %10024 = vmatpush3.bf16.xpose.msra.mxu0 %v10023_v5  ;;  %v4039_v11 = vand.u32 4294901760, %v4038_v56  ;;  %v18494_v5 = vld [vmem:[#allocation45_spill] sm:$0xff] }
 0x3b8   : > { %v4045_v14 = vsub.f32 %v14259_v54, %v18482_v16  ;;  %v14590_v62 = vsub.f32 %v14126_v41, %v18483_v58  ;;  %v4893_v16 = vsub.f32 %v14264_v29, %v17184_v57  ;;  %v18488_v41 = vand.u32 4294901760, %v14272_v7  ;;  %v18490_v57 = vld [vmem:[#allocation20_spill] sm:$0xff]  ;;  %10026 = vmatprep.subr.bf16.mxu0 %v10025_v12 }
 0x3b9   : > { %v4164_v24 = vsub.f32 %v14286_v10, %v18485_v40  ;;  %v4171_v61 = vsub.f32 %v14291_v18, %v18486_v52  ;;  %v14601_v44 = vsub.f32 %v14129_v2, %v18487_v8  ;;  %v10215_v58 = vpack.c.bf16 %v4887_v9, %v4880_v39  ;;  %v18492_v39 = vld [vmem:[#allocation72_spill] sm:$0xff]  ;;  %8642 = vmatmul.mubr.f32.vlgmr.msra.gmra.mrb[4].mxu1 %v18326_v36 }
 0x3ba   : > { %18484 = vst [vmem:[#allocation24_spill] sm:$0xff] %v14590_v62  ;;  %v4900_v60 = vsub.f32 %v14272_v7, %v18488_v41  ;;  %v5019_v40 = vsub.f32 %v14296_v20, %v17191_v30  ;;  %v18489_v2 = vand.u32 4294901760, %v14313_v35  ;;  %v18491_v15 = vand.u32 4294901760, %v18490_v57  ;;  %8471 = vmatprep.mubr.f32.mxu0 %v18492_v39  ;;  %8675 = vmatprep.mubr.f32.mxu1 %v18492_v39 }
 0x3bb   : > { %v10217_v41 = vpack.c.bf16 %v5013_v59, %v5006_v33  ;;  %v4046_v7 = vand.u32 4294901760, %v4045_v14  ;;  %v4165_v9 = vand.u32 4294901760, %v4164_v24  ;;  %v4172_v30 = vand.u32 4294901760, %v4171_v61  ;;  %10216 = vmatpush3.bf16.xpose.msra.mxu1 %v10215_v58  ;;  %v18496_v61 = vld [vmem:[#allocation28_spill] sm:$0xff] }
 0x3bc   : > { %v5026_v8 = vsub.f32 %v14313_v35, %v18489_v2  ;;  %v14621_v29 = vsub.f32 %v18490_v57, %v18491_v15  ;;  %v17196_v20 = vand.u32 4294901760, %v14344_v22  ;;  %v17198_v2 = vand.u32 4294901760, %v14349_v3 }
 0x3bd   : > { %v4894_v52 = vand.u32 4294901760, %v4893_v16  ;;  %v4901_v35 = vand.u32 4294901760, %v4900_v60  ;;  %v18493_v57 = vand.u32 4294901760, %v14318_v53  ;;  %v5020_v33 = vand.u32 4294901760, %v5019_v40  ;;  %10218 = vmatprep.subr.bf16.mxu1 %v10217_v41  ;;  %v18500_v41 = vld [vmem:[#allocation97_spill] sm:$0xff] }
 0x3be   : > { %v5027_v56 = vand.u32 4294901760, %v5026_v8  ;;  %v18495_v14 = vand.u32 4294901760, %v14323_v6  ;;  %v18497_v16 = vand.u32 4294901760, %v18496_v61  ;;  %v18498_v40 = vand.u32 4294901760, %v14212_v49 }
 0x3bf   : > { %v4052_v15 = vsub.f32 %v14318_v53, %v18493_v57  ;;  %v10027_v57 = vpack.c.bf16 %v4046_v7, %v4039_v11  ;;  %v4178_v24 = vsub.f32 %v14344_v22, %v17196_v20  ;;  %v18501_v7 = vand.u32 4294901760, %v18500_v41 }
 0x3c0   : > { %v4059_v12 = vsub.f32 %v14323_v6, %v18495_v14  ;;  %v14639_v60 = vsub.f32 %v18496_v61, %v18497_v16  ;;  %v14646_v8 = vsub.f32 %v14212_v49, %v18498_v40  ;;  %v10029_v14 = vpack.c.bf16 %v4172_v30, %v4165_v9  ;;  %v18503_v16 = vld [vmem:[#allocation80_spill] sm:$0xff] }
 0x3c1   : > { %v4185_v61 = vsub.f32 %v14349_v3, %v17198_v2  ;;  %v14657_v11 = vsub.f32 %v18500_v41, %v18501_v7  ;;  %v18504_v58 = vand.u32 4294901760, %v18503_v16  ;;  %v10219_v49 = vpack.c.bf16 %v4901_v35, %v4894_v52  ;;  %10028 = vmatpush3.bf16.xpose.msra.mxu0 %v10027_v57 }
 0x3c2   : > { %18499 = vst [vmem:[#allocation38_spill] sm:$0xff] %v14646_v8  ;;  %v18505_v30 = vand.u32 4294901760, %v18494_v5  ;;  %v10221_v40 = vpack.c.bf16 %v5027_v56, %v5020_v33  ;;  %v4053_v20 = vand.u32 4294901760, %v4052_v15  ;;  %v4060_v36 = vand.u32 4294901760, %v4059_v12  ;;  %10030 = vmatprep.subr.bf16.mxu0 %v10029_v14  ;;  %v18509_v12 = vld [vmem:[#allocation84_spill] sm:$0xff] }
 0x3c3   : > { %18502 = vst [vmem:[#allocation46_spill] sm:$0xff] %v14657_v11  ;;  %v14662_v59 = vsub.f32 %v18503_v16, %v18504_v58  ;;  %v18506_v2 = vand.u32 4294901760, %v14339_v0  ;;  %v18507_v41 = vand.u32 4294901760, %v14360_v25  ;;  %v18508_v58 = vand.u32 4294901760, %v14391_v48  ;;  %10220 = vmatpush3.bf16.xpose.msra.mxu1 %v10219_v49 }
 0x3c4   : > { %v4907_v9 = vsub.f32 %v18494_v5, %v18505_v30  ;;  %v4179_v15 = vand.u32 4294901760, %v4178_v24  ;;  %v4186_v33 = vand.u32 4294901760, %v4185_v61  ;;  %v18510_v57 = vand.u32 4294901760, %v18509_v12  ;;  %10222 = vmatprep.subr.bf16.mxu1 %v10221_v40 }
 0x3c5   : > { %v4914_v3 = vsub.f32 %v14339_v0, %v18506_v2  ;;  %v5033_v7 = vsub.f32 %v14360_v25, %v18507_v41  ;;  %v5040_v35 = vsub.f32 %v14391_v48, %v18508_v58  ;;  %v10031_v52 = vpack.c.bf16 %v4060_v36, %v4053_v20  ;;  %v18514_v25 = vld [vmem:[#allocation33_spill] sm:$0xff] }
 0x3c6   : > { %v14683_v30 = vsub.f32 %v18509_v12, %v18510_v57  ;;  %v4908_v41 = vand.u32 4294901760, %v4907_v9  ;;  %v18512_v56 = vand.u32 4294901760, %v14396_v63  ;;  %v18513_v9 = vand.u32 4294901760, %v14401_v31 }
 0x3c7   : > { %v4915_v16 = vand.u32 4294901760, %v4914_v3  ;;  %v5034_v61 = vand.u32 4294901760, %v5033_v7  ;;  %v5041_v2 = vand.u32 4294901760, %v5040_v35  ;;  %v18515_v58 = vand.u32 4294901760, %v18514_v25  ;;  %v18519_v35 = vld [vmem:[#allocation60_spill] sm:$0xff] }
 0x3c8   : > { %18511 = vst [vmem:[#allocation20_spill] sm:$0xff] %v14683_v30  ;;  %v4066_v12 = vsub.f32 %v14396_v63, %v18512_v56  ;;  %v4073_v57 = vsub.f32 %v14401_v31, %v18513_v9  ;;  %v10033_v36 = vpack.c.bf16 %v4186_v33, %v4179_v15  ;;  %v18517_v3 = vand.u32 4294901760, %v14430_v1 }
 0x3c9   : > { %v14698_v20 = vsub.f32 %v18514_v25, %v18515_v58  ;;  %v18518_v40 = vand.u32 4294901760, %v14453_v27  ;;  %v18520_v56 = vand.u32 4294901760, %v18519_v35  ;;  %v18522_v9 = vand.u32 4294901760, %v14406_v19  ;;  %10032 = vmatpush3.bf16.xpose.msra.mxu0 %v10031_v52 }
 0x3ca   : > { %v4192_v49 = vsub.f32 %v14430_v1, %v18517_v3  ;;  %v18523_v25 = vand.u32 4294901760, %v14416_v13  ;;  %v10223_v58 = vpack.c.bf16 %v4915_v16, %v4908_v41  ;;  %v18524_v3 = vand.u32 4294901760, %v14458_v43  ;;  %v18526_v1 = vld [vmem:[#allocation56_spill] sm:$0xff]  ;;  %10034 = vmatprep.subr.bf16.mxu0 %v10033_v36 }
 0x3cb   : > { %18516 = vst [vmem:[#allocation45_spill] sm:$0xff] %v14698_v20  ;;  %v4199_v7 = vsub.f32 %v14453_v27, %v18518_v40  ;;  %v14709_v14 = vsub.f32 %v18519_v35, %v18520_v56  ;;  %v4921_v24 = vsub.f32 %v14406_v19, %v18522_v9  ;;  %v18525_v27 = vand.u32 4294901760, %v14463_v23 }
 0x3cc   : > { %v4928_v15 = vsub.f32 %v14416_v13, %v18523_v25  ;;  %v5047_v40 = vsub.f32 %v14458_v43, %v18524_v3  ;;  %v18527_v31 = vand.u32 4294901760, %v18526_v1  ;;  %v10225_v25 = vpack.c.bf16 %v5041_v2, %v5034_v61  ;;  %10224 = vmatpush3.bf16.xpose.msra.mxu1 %v10223_v58  ;;  %v18532_v58 = vld [vmem:[#allocation25_spill] sm:$0xff] }
 0x3cd   : > { %18521 = vst [vmem:[#allocation28_spill] sm:$0xff] %v14709_v14  ;;  %v5054_v35 = vsub.f32 %v14463_v23, %v18525_v27  ;;  %v4067_v13 = vand.u32 4294901760, %v4066_v12  ;;  %v4074_v33 = vand.u32 4294901760, %v4073_v57  ;;  %v4193_v16 = vand.u32 4294901760, %v4192_v49  ;;  %v18530_v57 = vld [vmem:[#allocation66_spill] sm:$0xff] }
 0x3ce   : > { %v14728_v9 = vsub.f32 %v18526_v1, %v18527_v31  ;;  %v4200_v41 = vand.u32 4294901760, %v4199_v7  ;;  %v17217_v3 = vand.u32 4294901760, %v14546_v4  ;;  %v17218_v43 = vand.u32 4294901760, %v14574_v51  ;;  %10226 = vmatprep.subr.bf16.mxu1 %v10225_v25  ;;  %v18535_v25 = vld [vmem:[#allocation27_spill] sm:$0xff] }
 0x3cf   : > { %v4922_v19 = vand.u32 4294901760, %v4921_v24  ;;  %v4929_v27 = vand.u32 4294901760, %v4928_v15  ;;  %v18528_v56 = vand.u32 4294901760, %v14488_v45  ;;  %v17220_v31 = vand.u32 4294901760, %v14530_v17 }
 0x3d0   : > { %v5048_v1 = vand.u32 4294901760, %v5047_v40  ;;  %v5055_v52 = vand.u32 4294901760, %v5054_v35  ;;  %v18529_v2 = vand.u32 4294901760, %v14516_v21  ;;  %v17219_v12 = vand.u32 4294901760, %v14541_v32 }
 0x3d1   : > { %v4080_v23 = vsub.f32 %v14488_v45, %v18528_v56  ;;  %v18531_v36 = vand.u32 4294901760, %v18530_v57  ;;  %v10035_v49 = vpack.c.bf16 %v4074_v33, %v4067_v13  ;;  %v18533_v40 = vand.u32 4294901760, %v18532_v58 }
 0x3d2   : > { %v4087_v61 = vsub.f32 %v14516_v21, %v18529_v2  ;;  %v10037_v56 = vpack.c.bf16 %v4200_v41, %v4193_v16  ;;  %v4206_v2 = vsub.f32 %v14546_v4, %v17217_v3  ;;  %v18536_v13 = vand.u32 4294901760, %v18535_v25 }
 0x3d3   : > { %v14743_v24 = vsub.f32 %v18530_v57, %v18531_v36  ;;  %v14750_v35 = vsub.f32 %v18532_v58, %v18533_v40  ;;  %v4213_v57 = vsub.f32 %v14574_v51, %v17218_v43  ;;  %v18538_v36 = vld [vmem:[#allocation75_spill] sm:$0xff]  ;;  %v10227_v58 = vpack.c.bf16 %v4929_v27, %v4922_v19  ;;  %10036 = vmatpush3.bf16.xpose.msra.mxu0 %v10035_v49 }
 0x3d4   : > { %v14761_v33 = vsub.f32 %v18535_v25, %v18536_v13  ;;  %v18539_v15 = vand.u32 4294901760, %v18538_v36  ;;  %v4935_v16 = vsub.f32 %v14530_v17, %v17220_v31  ;;  %v10229_v41 = vpack.c.bf16 %v5055_v52, %v5048_v1  ;;  %10038 = vmatprep.subr.bf16.mxu0 %v10037_v56  ;;  %v18542_v49 = vld [vmem:[#allocation43_spill] sm:$0xff] }
 0x3d5   : > { %18534 = vst [vmem:[#allocation97_spill] sm:$0xff] %v14750_v35  ;;  %v4081_v40 = vand.u32 4294901760, %v4080_v23  ;;  %v4088_v3 = vand.u32 4294901760, %v4087_v61  ;;  %v4942_v43 = vsub.f32 %v14541_v32, %v17219_v12  ;;  %v18540_v25 = vand.u32 4294901760, %v14590_v62  ;;  %10228 = vmatpush3.bf16.xpose.msra.mxu1 %v10227_v58 }
 0x3d6   : > { %18537 = vst [vmem:[#allocation80_spill] sm:$0xff] %v14761_v33  ;;  %v14766_v7 = vsub.f32 %v18538_v36, %v18539_v15  ;;  %v18541_v15 = vand.u32 4294901760, %v14601_v44  ;;  %v4207_v23 = vand.u32 4294901760, %v4206_v2  ;;  %v4214_v1 = vand.u32 4294901760, %v4213_v57  ;;  %10230 = vmatprep.subr.bf16.mxu1 %v10229_v41 }
 0x3d7   : > { %v5061_v13 = vsub.f32 %v14590_v62, %v18540_v25  ;;  %v18543_v12 = vand.u32 4294901760, %v18542_v49  ;;  %v4936_v25 = vand.u32 4294901760, %v4935_v16  ;;  %v17225_v62 = vand.u32 4294901760, %v14646_v8 }
 0x3d8   : > { %v5068_v19 = vsub.f32 %v14601_v44, %v18541_v15  ;;  %v10039_v27 = vpack.c.bf16 %v4088_v3, %v4081_v40  ;;  %v4943_v36 = vand.u32 4294901760, %v4942_v43  ;;  %v17228_v56 = vand.u32 4294901760, %v14698_v20 }
 0x3d9   : > { %v14787_v31 = vsub.f32 %v18542_v49, %v18543_v12  ;;  %v5062_v57 = vand.u32 4294901760, %v5061_v13  ;;  %v18545_v52 = vand.u32 4294901760, %v14621_v29  ;;  %v18546_v16 = vand.u32 4294901760, %v14639_v60 }
 0x3da   : > { %v5069_v61 = vand.u32 4294901760, %v5068_v19  ;;  %v18547_v15 = vand.u32 4294901760, %v14381_v42  ;;  %v10041_v43 = vpack.c.bf16 %v4214_v1, %v4207_v23  ;;  %v18549_v58 = vand.u32 4294901760, %v14662_v59  ;;  %v18551_v19 = vld [vmem:[#allocation30_spill] sm:$0xff] }
 0x3db   : > { %18544 = vst [vmem:[#allocation84_spill] sm:$0xff] %v14787_v31  ;;  %v4094_v12 = vsub.f32 %v14621_v29, %v18545_v52  ;;  %v4101_v49 = vsub.f32 %v14639_v60, %v18546_v16  ;;  %v18550_v40 = vand.u32 4294901760, %v14683_v30  ;;  %v18552_v52 = vand.u32 4294901760, %v18551_v19  ;;  %10040 = vmatpush3.bf16.xpose.msra.mxu0 %v10039_v27 }
 0x3dc   : > { %v14802_v3 = vsub.f32 %v14381_v42, %v18547_v15  ;;  %v4220_v41 = vsub.f32 %v14662_v59, %v18549_v58  ;;  %v4949_v16 = vsub.f32 %v14646_v8, %v17225_v62  ;;  %v18554_v42 = vand.u32 4294901760, %v14657_v11  ;;  %10042 = vmatprep.subr.bf16.mxu0 %v10041_v43 }
 0x3dd   : > { %v4227_v13 = vsub.f32 %v14683_v30, %v18550_v40  ;;  %v14813_v2 = vsub.f32 %v18551_v19, %v18552_v52  ;;  %v10231_v15 = vpack.c.bf16 %v4943_v36, %v4936_v25  ;;  %v5075_v58 = vsub.f32 %v14698_v20, %v17228_v56 }
 0x3de   : > { %18548 = vst [vmem:[#allocation33_spill] sm:$0xff] %v14802_v3  ;;  %v4956_v23 = vsub.f32 %v14657_v11, %v18554_v42  ;;  %v18555_v40 = vand.u32 4294901760, %v14709_v14  ;;  %v18556_v30 = vand.u32 4294901760, %v14439_v50  ;;  %v10233_v42 = vpack.c.bf16 %v5069_v61, %v5062_v57 }
 0x3df   : > { %18553 = vst [vmem:[#allocation60_spill] sm:$0xff] %v14813_v2  ;;  %v4095_v11 = vand.u32 4294901760, %v4094_v12  ;;  %v4102_v1 = vand.u32 4294901760, %v4101_v49  ;;  %v4221_v36 = vand.u32 4294901760, %v4220_v41  ;;  %v4228_v25 = vand.u32 4294901760, %v4227_v13  ;;  %10232 = vmatpush3.bf16.xpose.msra.mxu1 %v10231_v15 }
 0x3e0   : > { %v5082_v19 = vsub.f32 %v14709_v14, %v18555_v40  ;;  %v14832_v62 = vsub.f32 %v14439_v50, %v18556_v30  ;;  %v17244_v56 = vand.u32 4294901760, %v14766_v7  ;;  %v17243_v20 = vand.u32 4294901760, %v14787_v31  ;;  %10234 = vmatprep.subr.bf16.mxu1 %v10233_v42 }
 0x3e1   : > { %v4950_v8 = vand.u32 4294901760, %v4949_v16  ;;  %v4957_v40 = vand.u32 4294901760, %v4956_v23  ;;  %v18558_v52 = vand.u32 4294901760, %v14728_v9  ;;  %v17242_v50 = vand.u32 4294901760, %v14750_v35 }
 0x3e2   : > { %18557 = vst [vmem:[#allocation56_spill] sm:$0xff] %v14832_v62  ;;  %v5076_v30 = vand.u32 4294901760, %v5075_v58  ;;  %v5083_v27 = vand.u32 4294901760, %v5082_v19  ;;  %v18559_v61 = vand.u32 4294901760, %v14743_v24  ;;  %v17236_v12 = vand.u32 4294901760, %v14761_v33 }
 0x3e3   : > { %v4108_v14 = vsub.f32 %v14728_v9, %v18558_v52  ;;  %v18560_v49 = vand.u32 4294901760, %v14442_v55  ;;  %v10043_v41 = vpack.c.bf16 %v4102_v1, %v4095_v11  ;;  %v17235_v13 = vand.u32 4294901760, %v14802_v3 }
 0x3e4   : > { %v4115_v57 = vsub.f32 %v14743_v24, %v18559_v61  ;;  %v17237_v16 = vand.u32 4294901760, %v14813_v2  ;;  %v10045_v23 = vpack.c.bf16 %v4228_v25, %v4221_v36  ;;  %v4234_v15 = vsub.f32 %v14766_v7, %v17244_v56  ;;  %v18585_v56 = vld [vmem:[#allocation32_spill] sm:$0xff] }
 0x3e5   : > { %v14847_v43 = vsub.f32 %v14442_v55, %v18560_v49  ;;  %v4241_v58 = vsub.f32 %v14787_v31, %v17243_v20  ;;  %v18562_v19 = vand.u32 4294901760, %v14473_v28  ;;  %v18564_v11 = vand.u32 4294901760, %v14476_v38  ;;  %10044 = vmatpush3.bf16.xpose.msra.mxu0 %v10043_v41  ;;  %v18584_v20 = vld [vmem:[#allocation31_spill] sm:$0xff] }
 0x3e6   : > { %v10235_v52 = vpack.c.bf16 %v4957_v40, %v4950_v8  ;;  %v4963_v42 = vsub.f32 %v14750_v35, %v17242_v50  ;;  %v10237_v36 = vpack.c.bf16 %v5083_v27, %v5076_v30  ;;  %v4109_v25 = vand.u32 4294901760, %v4108_v14  ;;  %10046 = vmatprep.subr.bf16.mxu0 %v10045_v23 }
 0x3e7   : > { %18561 = vst [vmem:[#allocation66_spill] sm:$0xff] %v14847_v43  ;;  %v14860_v55 = vsub.f32 %v14473_v28, %v18562_v19  ;;  %v14865_v1 = vsub.f32 %v14476_v38, %v18564_v11  ;;  %v4116_v61 = vand.u32 4294901760, %v4115_v57  ;;  %v4970_v49 = vsub.f32 %v14761_v33, %v17236_v12 }
 0x3e8   : > { %v5089_v28 = vsub.f32 %v14802_v3, %v17235_v13  ;;  %v5096_v38 = vsub.f32 %v14813_v2, %v17237_v16  ;;  %v17240_v8 = vand.u32 4294901760, %v14832_v62  ;;  %v17239_v40 = vand.u32 4294901760, %v14847_v43  ;;  %10236 = vmatpush3.bf16.xpose.msra.mxu1 %v10235_v52 }
 0x3e9   : > { %18563 = vst [vmem:[#allocation25_spill] sm:$0xff] %v14860_v55  ;;  %18565 = vst [vmem:[#allocation27_spill] sm:$0xff] %v14865_v1  ;;  %v4235_v14 = vand.u32 4294901760, %v4234_v15  ;;  %v4242_v30 = vand.u32 4294901760, %v4241_v58  ;;  %v4964_v27 = vand.u32 4294901760, %v4963_v42  ;;  %v10047_v57 = vpack.c.bf16 %v4116_v61, %v4109_v25  ;;  %10238 = vmatprep.subr.bf16.mxu1 %v10237_v36 }
 0x3ea   : > { %v4971_v19 = vand.u32 4294901760, %v4970_v49  ;;  %v17238_v41 = vand.u32 4294901760, %v14860_v55  ;;  %v17241_v11 = vand.u32 4294901760, %v14865_v1  ;;  %v5090_v13 = vand.u32 4294901760, %v5089_v28 }
 0x3eb   : > { %v5097_v12 = vand.u32 4294901760, %v5096_v38  ;;  %v4122_v16 = vsub.f32 %v14832_v62, %v17240_v8  ;;  %v4129_v23 = vsub.f32 %v14847_v43, %v17239_v40  ;;  %v10049_v15 = vpack.c.bf16 %v4242_v30, %v4235_v14  ;;  %v18566_v14 = vld [vmem:[#allocation37_spill] sm:$0xff]  ;;  %v18569_v40 = vld [vmem:[#allocation87_spill] sm:$0xff] }
 0x3ec   : > { %v10239_v58 = vpack.c.bf16 %v4971_v19, %v4964_v27  ;;  %v4977_v52 = vsub.f32 %v14860_v55, %v17238_v41  ;;  %v4984_v42 = vsub.f32 %v14865_v1, %v17241_v11  ;;  %v18567_v30 = vld [vmem:[#allocation73_spill] sm:$0xff]  ;;  %v18568_v41 = vld [vmem:[#allocation90_spill] sm:$0xff] }
 0x3ed   : > { %10048 = vmatpush3.bf16.xpose.msra.mxu0 %v10047_v57  ;;  %v10241_v36 = vpack.c.bf16 %v5097_v12, %v5090_v13  ;;  %v4123_v25 = vand.u32 4294901760, %v4122_v16  ;;  %v4130_v61 = vand.u32 4294901760, %v4129_v23  ;;  %v10053_v27 = vpack.c.bf16 %v18567_v30, %v18566_v14  ;;  %v18570_v12 = vld [vmem:[#allocation93_spill] sm:$0xff]  ;;  %v18571_v16 = vld [vmem:[#allocation34_spill] sm:$0xff] }
 0x3ee   : > { %10050 = vmatprep.subr.bf16.mxu0 %v10049_v15  ;;  %v4978_v49 = vand.u32 4294901760, %v4977_v52  ;;  %v4985_v28 = vand.u32 4294901760, %v4984_v42  ;;  %v10245_v8 = vpack.c.bf16 %v18569_v40, %v18568_v41  ;;  %v10055_v13 = vpack.c.bf16 %v18570_v12, %v14184_v46  ;;  %v18572_v57 = vld [vmem:[#allocation69_spill] sm:$0xff]  ;;  %v18574_v42 = vld [vmem:[#allocation78_spill] sm:$0xff] }
 0x3ef   : > { %v10051_v38 = vpack.c.bf16 %v4130_v61, %v4123_v25  ;;  %v10057_v23 = vpack.c.bf16 %v18572_v57, %v18571_v16  ;;  %v10247_v15 = vpack.c.bf16 %v14220_v34, %v14200_v47  ;;  %v18575_v25 = vld [vmem:[#allocation54_spill] sm:$0xff]  ;;  %v18576_v61 = vld [vmem:[#allocation55_spill] sm:$0xff] }
 0x3f0   : > { %10240 = vmatpush3.bf16.xpose.msra.mxu1 %v10239_v58  ;;  %v10243_v19 = vpack.c.bf16 %v4985_v28, %v4978_v49  ;;  %v18573_v58 = vld [vmem:[#allocation79_spill] sm:$0xff]  ;;  %v10251_v49 = vpack.c.bf16 %v18576_v61, %v18575_v25  ;;  %v18577_v28 = vld [vmem:[#allocation21_spill] sm:$0xff] }
 0x3f1   : > { %10242 = vmatprep.subr.bf16.mxu1 %v10241_v36  ;;  %v10249_v52 = vpack.c.bf16 %v14249_v37, %v18573_v58  ;;  %v10061_v36 = vpack.c.bf16 %v14291_v18, %v14286_v10 }
 0x3f5   : > { %10052 = vmatpush3.bf16.xpose.msra.mxu0 %v10051_v38  ;;  %v18578_v38 = vld [vmem:[#allocation76_spill] sm:$0xff] }
 0x3f6   : > { %10054 = vmatprep.subr.bf16.mxu0 %v10053_v27  ;;  %v10253_v27 = vpack.c.bf16 %v18578_v38, %v18577_v28 }
 0x3f8   : > { %10244 = vmatpush3.bf16.xpose.msra.mxu1 %v10243_v19  ;;  %v10063_v19 = vpack.c.bf16 %v14323_v6, %v14318_v53  ;;  %v10259_v6 = vpack.c.bf16 %v18585_v56, %v18584_v20 }
 0x3f9   : > { %10246 = vmatprep.subr.bf16.mxu1 %v10245_v8  ;;  %v10059_v8 = vpack.c.bf16 %v14259_v54, %v14254_v26 }
 0x3fc   : > { %8472 = vmatmul.mubr.f32.vlgmr.msra.gmra.mrb[4].mxu0 %v18492_v39 }
 0x3fd   : > { %10056 = vmatpush3.bf16.xpose.msra.mxu0 %v10055_v13  ;;  %8505 = vmatprep.mubr.f32.mxu0 %v18574_v42  ;;  %v18579_v13 = vld [vmem:[#allocation50_spill] sm:$0xff] }
 0x3fe   : > { %10058 = vmatprep.subr.bf16.mxu0 %v10057_v23  ;;  %v10065_v23 = vpack.c.bf16 %v18579_v13, %v14344_v22  ;;  %v18586_v13 = vld [vmem:[#allocation71_spill] sm:$0xff]  ;;  %v18587_v22 = vld [vmem:[#allocation29_spill] sm:$0xff] }
 0x3ff   : > { %8676 = vmatmul.mubr.f32.vlgmr.msra.gmra.mrb[4].mxu1 %v18492_v39 }
 0x400   : > { %10248 = vmatpush3.bf16.xpose.msra.mxu1 %v10247_v15  ;;  %8709 = vmatprep.mubr.f32.mxu1 %v18574_v42  ;;  %v10255_v15 = vpack.c.bf16 %v14339_v0, %v18494_v5  ;;  %v10261_v0 = vpack.c.bf16 %v18587_v22, %v18586_v13 }
 0x401   : > { %10250 = vmatprep.subr.bf16.mxu1 %v10249_v52  ;;  %v18580_v52 = vld [vmem:[#allocation85_spill] sm:$0xff] }
 0x402   : > { %v10257_v11 = vpack.c.bf16 %v14391_v48, %v18580_v52 }
 0x405   : > { %10060 = vmatpush3.bf16.xpose.msra.mxu0 %v10059_v8  ;;  %v18581_v8 = vld [vmem:[#allocation91_spill] sm:$0xff] }
 0x406   : > { %10062 = vmatprep.subr.bf16.mxu0 %v10061_v36  ;;  %v10067_v36 = vpack.c.bf16 %v18581_v8, %v14396_v63 }
 0x408   : > { %10252 = vmatpush3.bf16.xpose.msra.mxu1 %v10251_v49  ;;  %v18582_v49 = vld [vmem:[#allocation40_spill] sm:$0xff] }
 0x409   : > { %10254 = vmatprep.subr.bf16.mxu1 %v10253_v27  ;;  %v18583_v27 = vld [vmem:[#allocation67_spill] sm:$0xff] }
 0x40a   : > { %v10069_v50 = vpack.c.bf16 %v18583_v27, %v18582_v49 }
 0x40d   : > { %10064 = vmatpush3.bf16.xpose.msra.mxu0 %v10063_v19  ;;  %v10071_v19 = vpack.c.bf16 %v14516_v21, %v14488_v45  ;;  %v18591_v21 = vld [vmem:[#allocation46_spill] sm:$0xff] }
 0x40e   : > { %10066 = vmatprep.subr.bf16.mxu0 %v10065_v23  ;;  %v10263_v23 = vpack.c.bf16 %v14541_v32, %v14530_v17 }
 0x410   : > { %10256 = vmatpush3.bf16.xpose.msra.mxu1 %v10255_v15  ;;  %v18588_v15 = vld [vmem:[#allocation24_spill] sm:$0xff] }
 0x411   : > { %10258 = vmatprep.subr.bf16.mxu1 %v10257_v11  ;;  %v10073_v11 = vpack.c.bf16 %v14574_v51, %v14546_v4  ;;  %v10265_v56 = vpack.c.bf16 %v14601_v44, %v18588_v15  ;;  %v18592_v51 = vld [vmem:[#allocation45_spill] sm:$0xff]  ;;  %v18593_v4 = vld [vmem:[#allocation28_spill] sm:$0xff] }
 0x412   : > { %v10269_v32 = vpack.c.bf16 %v18593_v4, %v18592_v51 }
 0x415   : > { %10068 = vmatpush3.bf16.xpose.msra.mxu0 %v10067_v36  ;;  %v18590_v36 = vld [vmem:[#allocation38_spill] sm:$0xff] }
 0x416   : > { %10070 = vmatprep.subr.bf16.mxu0 %v10069_v50  ;;  %v10267_v45 = vpack.c.bf16 %v18591_v21, %v18590_v36 }
 0x418   : > { %10260 = vmatpush3.bf16.xpose.msra.mxu1 %v10259_v6  ;;  %v10075_v6 = vpack.c.bf16 %v14639_v60, %v14621_v29 }
 0x419   : > { %10262 = vmatprep.subr.bf16.mxu1 %v10261_v0  ;;  %v18589_v0 = vld [vmem:[#allocation20_spill] sm:$0xff] }
 0x41a   : > { %v10077_v50 = vpack.c.bf16 %v18589_v0, %v14662_v59 }
 0x41d   : > { %10072 = vmatpush3.bf16.xpose.msra.mxu0 %v10071_v19  ;;  %v10079_v19 = vpack.c.bf16 %v14743_v24, %v14728_v9 }
 0x41e   : > { %10074 = vmatprep.subr.bf16.mxu0 %v10073_v11  ;;  %v10271_v11 = vpack.c.bf16 %v14761_v33, %v14750_v35 }
 0x420   : > { %10264 = vmatpush3.bf16.xpose.msra.mxu1 %v10263_v23  ;;  %v10273_v23 = vpack.c.bf16 %v14813_v2, %v14802_v3  ;;  %v18597_v2 = vld [vmem:[#allocation82_spill] sm:$0xff] }
 0x421   : > { %10266 = vmatprep.subr.bf16.mxu1 %v10265_v56  ;;  %v10081_v56 = vpack.c.bf16 %v14787_v31, %v14766_v7  ;;  %v18612_v3 = vld [vmem:[#allocation14_spill] sm:$0xff] }
 0x425   : > { %10076 = vmatpush3.bf16.xpose.msra.mxu0 %v10075_v6  ;;  %v18594_v6 = vld [vmem:[#allocation16_spill] sm:$0xff] }
 0x426   : > { %10078 = vmatprep.subr.bf16.mxu0 %v10077_v50  ;;  %v18595_v50 = vld [vmem:[#allocation92_spill] sm:$0xff] }
 0x428   : > { %10268 = vmatpush3.bf16.xpose.msra.mxu1 %v10267_v45  ;;  %v10083_v45 = vpack.c.bf16 %v14847_v43, %v14832_v62  ;;  %v18608_v43 = vld [vmem:[#allocation98_spill] sm:$0xff]  ;;  %v18611_v62 = vld [vmem:[#allocation68_spill] sm:$0xff] }
 0x429   : > { %10270 = vmatprep.subr.bf16.mxu1 %v10269_v32  ;;  %v10275_v32 = vpack.c.bf16 %v14865_v1, %v14860_v55  ;;  %v18606_v1 = vld [vmem:[#allocation94_spill] sm:$0xff] }
 0x42d   : > { %10080 = vmatpush3.bf16.xpose.msra.mxu0 %v10079_v19  ;;  %v18596_v19 = vld [vmem:[#allocation96_spill] sm:$0xff] }
 0x42e   : > { %10082 = vmatprep.subr.bf16.mxu0 %v10081_v56  ;;  %v18598_v56 = vld [vmem:[#allocation18_spill] sm:$0xff] }
 0x430   : > { %10272 = vmatpush3.bf16.xpose.msra.mxu1 %v10271_v11  ;;  %v18599_v11 = vld [vmem:[#allocation42_spill] sm:$0xff] }
 0x431   : > { %10274 = vmatprep.subr.bf16.mxu1 %v10273_v23  ;;  %v18600_v23 = vld [vmem:[#allocation41_spill] sm:$0xff] }
 0x435   : > { %10084 = vmatpush3.bf16.xpose.msra.mxu0 %v10083_v45  ;;  %v18601_v45 = vld [vmem:[#allocation48_spill] sm:$0xff] }
 0x436   : > { %10086 = vmatprep.subr.bf16.mxu0 %v18594_v6  ;;  %v18604_v6 = vld [vmem:[#allocation81_spill] sm:$0xff] }
 0x438   : > { %10276 = vmatpush3.bf16.xpose.msra.mxu1 %v10275_v32  ;;  %v18602_v32 = vld [vmem:[#allocation49_spill] sm:$0xff] }
 0x439   : > { %10278 = vmatprep.subr.bf16.mxu1 %v18595_v50  ;;  %v18603_v50 = vld [vmem:[#allocation52_spill] sm:$0xff] }
 0x43c   : > { %8506 = vmatmul.mubr.f32.vlgmr.msra.gmra.mrb[4].mxu0 %v18574_v42 }
 0x43d   : > { %10088 = vmatpush3.bf16.xpose.msra.mxu0 %v18596_v19  ;;  %8539 = vmatprep.mubr.f32.mxu0 %v18597_v2  ;;  %v18605_v19 = vld [vmem:[#allocation88_spill] sm:$0xff] }
 0x43e   : > { %10090 = vmatprep.subr.bf16.mxu0 %v18598_v56 }
 0x43f   : > { %8710 = vmatmul.mubr.f32.vlgmr.msra.gmra.mrb[4].mxu1 %v18574_v42  ;;  %v18607_v42 = vld [vmem:[#allocation95_spill] sm:$0xff] }
 0x440   : > { %10280 = vmatpush3.bf16.xpose.msra.mxu1 %v18599_v11  ;;  %8743 = vmatprep.mubr.f32.mxu1 %v18597_v2 }
 0x441   : > { %10282 = vmatprep.subr.bf16.mxu1 %v18600_v23 }
 0x443   : > { %v3052_v56 = vpop.f32.mrb[2].mxu0 }
 0x444   : > { %v3054_v11 = vpop.f32.mrb[3].mxu0 }
 0x445   : > { %10092 = vmatpush3.bf16.xpose.msra.mxu0 %v18601_v45  ;;  %v7350_v55 = vcombine.low %v3052_v56, %v3054_v11  ;;  %v18613_v56 = vld [vmem:[#allocation19_spill] sm:$0xff] }
 0x446   : > { %10094 = vmatprep.subr.bf16.mxu0 %v18602_v32  ;;  %v3907_v23 = vpop.f32.mrb[2].mxu1  ;;  %v18609_v32 = vld [vmem:[#allocation62_spill] sm:$0xff]  ;;  %v18614_v11 = vld [vmem:[#allocation63_spill] sm:$0xff] }
 0x447   : > { %v3909_v45 = vpop.f32.mrb[3].mxu1 }
 0x448   : > { %10284 = vmatpush3.bf16.xpose.msra.mxu1 %v18603_v50  ;;  %v7351_v50 = vcombine.low %v3907_v23, %v3909_v45  ;;  %v18617_v45 = vld [vmem:[#allocation23_spill] sm:$0xff] }
 0x449   : > { %10286 = vmatprep.subr.bf16.mxu1 %v18604_v6  ;;  %v7372_v6 = vrot.slane %v7350_v55, %v18609_v32  ;;  %v17263_v55 = vstv %s14981_s22 }
 0x44d   : > { %10096 = vmatpush3.bf16.xpose.msra.mxu0 %v18605_v19  ;;  %v18610_v19 = vld [vmem:[#allocation64_spill] sm:$0xff] }
 0x44e   : > { %10098 = vmatprep.subr.bf16.mxu0 %v18606_v1  ;;  %v7379_v1 = vrot.slane %v7351_v50, %v18609_v32 }
 0x450   : > { %10288 = vmatpush3.bf16.xpose.msra.mxu1 %v18607_v42  ;;  %v7381_v42 = vcombine.low %v7372_v6, %v7379_v1  ;;  %v18619_v1 = vld [vmem:[#allocation57_spill] sm:$0xff]  ;;  %v18620_v6 = vld [vmem:[#allocation70_spill] sm:$0xff] }
 0x451   : > { %10290 = vmatprep.subr.bf16.mxu1 %v18608_v43  ;;  %v18615_v43 = vld [vmem:[#allocation17_spill] sm:$0xff] }
 0x452   : > { %v18616_v33 = vcombine.low %v18614_v11, %v18615_v43  ;;  %v7395_v31 = vrot.slane %v7381_v42, %v18609_v32  ;;  %v18622_v43 = vld [vmem:[#allocation44_spill] sm:$0xff]  ;;  %v18623_v42 = vld [vmem:[#allocation86_spill] sm:$0xff] }
 0x453   : > { %v18626_v11 = vld [vmem:[#allocation58_spill] sm:$0xff] }
 0x454   : > { %v7388_v35 = vrot.slane %v18616_v33, %v18609_v32  ;;  %v18621_v33 = vld [vmem:[#allocation53_spill] sm:$0xff]  ;;  %v18630_v32 = vand.u32 4294901760, %v18567_v30  ;;  %v18638_v30 = vand.u32 4294901760, %v18572_v57  ;;  %v18646_v57 = vand.u32 4294901760, %v14291_v18 }
 0x455   : > { %10100 = vmatpush3.bf16.xpose.msra.mxu0 %v18610_v19 }
 0x456   : > { %10102 = vmatprep.subr.bf16.mxu0 %v18611_v62  ;;  %v7396_v23 = vcombine.low %v7388_v35, %v7395_v31  ;;  %v18618_v62 = vld [vmem:[#allocation26_spill] sm:$0xff]  ;;  %v18624_v31 = vld [vmem:[#allocation77_spill] sm:$0xff]  ;;  %v18625_v35 = vld [vmem:[#allocation39_spill] sm:$0xff] }
 0x458   : > { %10292 = vmatpush3.bf16.xpose.msra.mxu1 %v18612_v3  ;;  %v7459_v50 = vadd.f32 %v17263_v55, %v7396_v23  ;;  %v18627_v23 = vld [vmem:[#allocation35_spill] sm:$0xff] }
 0x459   : > { %10294 = vmatprep.subr.bf16.mxu1 %v18613_v56  ;;  %v18628_v55 = vld [vmem:[#allocation51_spill] sm:$0xff] }
 0x45a   : > { %7461 = vst [vmem:[%s15001_s27] sm:$0xff] %v7459_v50  ;;  %v18629_v50 = vand.u32 4294901760, %v18566_v14  ;;  %v18637_v14 = vand.u32 4294901760, %v18571_v16  ;;  %v18645_v16 = vand.u32 4294901760, %v14286_v10 }
 0x45d   : > { %10104 = vmatpush3.bf16.xpose.msra.mxu0 %v18617_v45 }
 0x45e   : > { %10106 = vmatprep.subr.bf16.mxu0 %v18618_v62 }
 0x460   : > { %10296 = vmatpush3.bf16.xpose.msra.mxu1 %v18619_v1 }
 0x461   : > { %10298 = vmatprep.subr.bf16.mxu1 %v18620_v6  ;;  %v10117_v6 = vpack.c.bf16 %v18630_v32, %v18629_v50  ;;  %v10121_v32 = vpack.c.bf16 %v18638_v30, %v18637_v14  ;;  %v18654_v14 = vld [vmem:[#allocation47_spill] sm:$0xff] }
 0x462   : > { %v18655_v30 = vand.u32 4294901760, %v18654_v14  ;;  %v18684_v14 = vand.u32 4294901760, %v14601_v44  ;;  %v18691_v44 = vand.u32 4294901760, %v18592_v51 }
 0x465   : > { %10108 = vmatpush3.bf16.xpose.msra.mxu0 %v18621_v33  ;;  %v18631_v33 = vld [vmem:[#allocation59_spill] sm:$0xff] }
 0x466   : > { %10110 = vmatprep.subr.bf16.mxu0 %v18622_v43  ;;  %v18632_v43 = vand.u32 4294901760, %v18568_v41  ;;  %v18639_v41 = vand.u32 4294901760, %v14200_v47  ;;  %v18643_v47 = vand.u32 4294901760, %v14254_v26  ;;  %v18651_v26 = vand.u32 4294901760, %v14318_v53 }
 0x467   : > { %v18663_v53 = vand.u32 4294901760, %v14396_v63  ;;  %v18672_v63 = vld [vmem:[#allocation36_spill] sm:$0xff] }
 0x468   : > { %10300 = vmatpush3.bf16.xpose.msra.mxu1 %v18623_v42  ;;  %v18633_v42 = vand.u32 4294901760, %v18569_v40  ;;  %v18640_v40 = vand.u32 4294901760, %v14220_v34  ;;  %v18644_v34 = vand.u32 4294901760, %v14259_v54  ;;  %v18652_v54 = vld [vmem:[#allocation61_spill] sm:$0xff] }
 0x469   : > { %10302 = vmatprep.subr.bf16.mxu1 %v18624_v31  ;;  %v18653_v10 = vand.u32 4294901760, %v18652_v54  ;;  %v18680_v54 = vand.u32 4294901760, %v14530_v17  ;;  %v18688_v17 = vand.u32 4294901760, %v18589_v0  ;;  %v18695_v0 = vand.u32 4294901760, %v14766_v7  ;;  %v18708_v7 = vld [vmem:[#allocation66_spill] sm:$0xff] }
 0x46a   : > { %v10309_v31 = vpack.c.bf16 %v18633_v42, %v18632_v43  ;;  %v18641_v43 = vand.u32 4294901760, %v18573_v58  ;;  %v18647_v58 = vand.u32 4294901760, %v18575_v25  ;;  %v18656_v25 = vld [vmem:[#allocation50_spill] sm:$0xff] }
 0x46b   : > { %v10127_v18 = vpack.c.bf16 %v18653_v10, %v18651_v26  ;;  %v18681_v10 = vld [vmem:[#allocation65_spill] sm:$0xff] }
 0x46d   : > { %10112 = vmatpush3.bf16.xpose.msra.mxu0 %v18625_v35  ;;  %v18634_v35 = vld [vmem:[#allocation15_spill] sm:$0xff] }
 0x46e   : > { %10114 = vmatprep.subr.bf16.mxu0 %v18626_v11 }
 0x470   : > { %10304 = vmatpush3.bf16.xpose.msra.mxu1 %v18627_v23  ;;  %v18635_v23 = vand.u32 4294901760, %v14184_v46  ;;  %v18642_v46 = vand.u32 4294901760, %v14249_v37  ;;  %v10125_v37 = vpack.c.bf16 %v18646_v57, %v18645_v16  ;;  %v18667_v16 = vand.u32 4294901760, %v18584_v20  ;;  %v18668_v57 = vld [vmem:[#allocation32_spill] sm:$0xff]  ;;  %v18678_v20 = vld [vmem:[#allocation22_spill] sm:$0xff] }
 0x471   : > { %10306 = vmatprep.subr.bf16.mxu1 %v18628_v55  ;;  %v18636_v55 = vand.u32 4294901760, %v18570_v12  ;;  %v10123_v12 = vpack.c.bf16 %v18644_v34, %v18643_v47  ;;  %v18665_v34 = vand.u32 4294901760, %v18582_v49  ;;  %v18674_v49 = vld [vmem:[#allocation74_spill] sm:$0xff] }
 0x472   : > { %v10313_v42 = vpack.c.bf16 %v18642_v46, %v18641_v43  ;;  %v18662_v43 = vand.u32 4294901760, %v14391_v48  ;;  %v18670_v48 = vand.u32 4294901760, %v18586_v13  ;;  %v18682_v13 = vand.u32 4294901760, %v18681_v10  ;;  %v18723_v10 = vld [vmem:[#allocation81_spill] sm:$0xff] }
 0x473   : > { %v10119_v11 = vpack.c.bf16 %v18636_v55, %v18635_v23  ;;  %v18648_v55 = vand.u32 4294901760, %v18576_v61  ;;  %v18650_v23 = vand.u32 4294901760, %v18578_v38  ;;  %v18661_v38 = vand.u32 4294901760, %v18580_v52 }
 0x474   : > { %v18669_v52 = vand.u32 4294901760, %v18668_v57 }
 0x475   : > { %10116 = vmatpush3.bf16.xpose.msra.mxu0 %v18631_v33  ;;  %v10321_v46 = vpack.c.bf16 %v18662_v43, %v18661_v38  ;;  %v18692_v38 = vand.u32 4294901760, %v18593_v4  ;;  %v18702_v4 = vld [vmem:[#allocation33_spill] sm:$0xff] }
 0x476   : > { %10118 = vmatprep.subr.bf16.mxu0 %v10117_v6  ;;  %v10311_v6 = vpack.c.bf16 %v18640_v40, %v18639_v41  ;;  %v18658_v41 = vand.u32 4294901760, %v18494_v5  ;;  %v18659_v40 = vld [vmem:[#allocation83_spill] sm:$0xff]  ;;  %v18666_v5 = vand.u32 4294901760, %v18583_v27 }
 0x477   : > { %v10333_v43 = vpack.c.bf16 %v18692_v38, %v18691_v44 }
 0x478   : > { %10308 = vmatpush3.bf16.xpose.msra.mxu1 %v18634_v35 }
 0x479   : > { %10310 = vmatprep.subr.bf16.mxu1 %v10309_v31  ;;  %v10315_v31 = vpack.c.bf16 %v18648_v55, %v18647_v58  ;;  %v18671_v58 = vand.u32 4294901760, %v18587_v22  ;;  %v18683_v22 = vand.u32 4294901760, %v18588_v15  ;;  %v18690_v15 = vand.u32 4294901760, %v18591_v21 }
 0x47b   : > { %v10325_v55 = vpack.c.bf16 %v18671_v58, %v18670_v48  ;;  %v18710_v48 = vld [vmem:[#allocation25_spill] sm:$0xff] }
 0x47c   : > { %8540 = vmatmul.mubr.f32.vlgmr.msra.gmra.mrb[4].mxu0 %v18597_v2  ;;  %v18711_v58 = vand.u32 4294901760, %v18710_v48 }
 0x47d   : > { %10120 = vmatpush3.bf16.xpose.msra.mxu0 %v10119_v11  ;;  %8573 = vmatprep.mubr.f32.mxu0 %v18492_v39  ;;  %v18649_v11 = vand.u32 4294901760, %v18577_v28  ;;  %v18660_v28 = vand.u32 4294901760, %v18659_v40 }
 0x47e   : > { %10122 = vmatprep.subr.bf16.mxu0 %v10121_v32  ;;  %v18657_v32 = vand.u32 4294901760, %v18656_v25  ;;  %v18685_v25 = vand.u32 4294901760, %v14621_v29  ;;  %v18693_v29 = vand.u32 4294901760, %v14728_v9  ;;  %v18706_v9 = vld [vmem:[#allocation56_spill] sm:$0xff] }
 0x47f   : > { %8744 = vmatmul.mubr.f32.vlgmr.msra.gmra.mrb[4].mxu1 %v18597_v2  ;;  %v10317_v50 = vpack.c.bf16 %v18650_v23, %v18649_v11  ;;  %v18676_v11 = vld [vmem:[#allocation13_spill] sm:$0xff] }
 0x480   : > { %10312 = vmatpush3.bf16.xpose.msra.mxu1 %v10311_v6  ;;  %8777 = vmatprep.mubr.f32.mxu1 %v18492_v39  ;;  %v10129_v61 = vpack.c.bf16 %v18657_v32, %v18655_v30  ;;  %v10319_v6 = vpack.c.bf16 %v18660_v28, %v18658_v41  ;;  %v18677_v23 = vand.u32 4294901760, %v18676_v11  ;;  %v10329_v30 = vpack.c.bf16 %v18684_v14, %v18683_v22  ;;  %v18717_v11 = vld [vmem:[#allocation18_spill] sm:$0xff]  ;;  %v18726_v22 = vld [vmem:[#allocation95_spill] sm:$0xff] }
 0x481   : > { %10314 = vmatprep.subr.bf16.mxu1 %v10313_v42  ;;  %v18664_v42 = vand.u32 4294901760, %v18581_v8  ;;  %v18673_v8 = vand.u32 4294901760, %v18672_v63  ;;  %v18686_v32 = vand.u32 4294901760, %v14639_v60  ;;  %v18687_v41 = vand.u32 4294901760, %v14662_v59  ;;  %v18727_v14 = vld [vmem:[#allocation98_spill] sm:$0xff] }
 0x482   : > { %v18689_v28 = vand.u32 4294901760, %v18590_v36  ;;  %v18694_v59 = vand.u32 4294901760, %v14743_v24  ;;  %v18696_v36 = vld [vmem:[#allocation84_spill] sm:$0xff]  ;;  %v18707_v24 = vand.u32 4294901760, %v18706_v9  ;;  %v15258_v9 = vld [vmem:[%s11250_s4 + $0x610] sm:$0xff] }
 0x483   : > { %v10131_v47 = vpack.c.bf16 %v18664_v42, %v18663_v53  ;;  %v10141_v40 = vpack.c.bf16 %v18688_v17, %v18687_v41  ;;  %v18698_v53 = vld [vmem:[#allocation97_spill] sm:$0xff] }
 0x484   : > { %v10143_v60 = vpack.c.bf16 %v18694_v59, %v18693_v29  ;;  %v18699_v42 = vand.u32 4294901760, %v18698_v53  ;;  %v15204_v29 = vld [vmem:[%s11250_s4 + $0x600] sm:$0xff]  ;;  %v15207_v59 = vld [vmem:[%s11250_s4 + $0x608] sm:$0xff] }
 0x485   : > { %10124 = vmatpush3.bf16.xpose.msra.mxu0 %v10123_v12  ;;  %v10133_v12 = vpack.c.bf16 %v18666_v5, %v18665_v34  ;;  %v18703_v5 = vand.u32 4294901760, %v18702_v4  ;;  %v15225_v53 = vld [vmem:[%s11250_s4 + $0x700] sm:$0xff] }
 0x486   : > { %10126 = vmatprep.subr.bf16.mxu0 %v10125_v37  ;;  %v10323_v37 = vpack.c.bf16 %v18669_v52, %v18667_v16  ;;  %v18709_v52 = vand.u32 4294901760, %v18708_v7  ;;  %v17286_v4 = vand.u32 4294901760, %v15225_v53  ;;  %v15264_v7 = vld [vmem:[%s11250_s4 + $0x6a0] sm:$0xff] }
 0x488   : > { %10316 = vmatpush3.bf16.xpose.msra.mxu1 %v10315_v31  ;;  %v18675_v31 = vand.u32 4294901760, %v18674_v49  ;;  %v18714_v49 = vld [vmem:[#allocation16_spill] sm:$0xff] }
 0x489   : > { %10318 = vmatprep.subr.bf16.mxu1 %v10317_v50  ;;  %v18679_v50 = vand.u32 4294901760, %v18678_v20  ;;  %v18719_v20 = vld [vmem:[#allocation41_spill] sm:$0xff] }
 0x48a   : > { %v10135_v27 = vpack.c.bf16 %v18675_v31, %v18673_v8  ;;  %v18715_v31 = vld [vmem:[#allocation92_spill] sm:$0xff] }
 0x48b   : > { %v10137_v26 = vpack.c.bf16 %v18679_v50, %v18677_v23  ;;  %v18718_v23 = vld [vmem:[#allocation42_spill] sm:$0xff]  ;;  %v18720_v50 = vld [vmem:[#allocation48_spill] sm:$0xff] }
 0x48d   : > { %10128 = vmatpush3.bf16.xpose.msra.mxu0 %v10127_v18  ;;  %v10327_v18 = vpack.c.bf16 %v18682_v13, %v18680_v54  ;;  %v18722_v54 = vld [vmem:[#allocation52_spill] sm:$0xff] }
 0x48e   : > { %10130 = vmatprep.subr.bf16.mxu0 %v10129_v61  ;;  %v10139_v61 = vpack.c.bf16 %v18686_v32, %v18685_v25  ;;  %v18724_v13 = vld [vmem:[#allocation88_spill] sm:$0xff]  ;;  %v18729_v25 = vld [vmem:[#allocation70_spill] sm:$0xff]  ;;  %v18730_v32 = vld [vmem:[#allocation53_spill] sm:$0xff] }
 0x490   : > { %10320 = vmatpush3.bf16.xpose.msra.mxu1 %v10319_v6  ;;  %v10331_v6 = vpack.c.bf16 %v18690_v15, %v18689_v28  ;;  %v15191_v28 = vld [vmem:[%s11250_s4 + $0x788] sm:$0xff]  ;;  %v18736_v15 = vld [vmem:[#allocation35_spill] sm:$0xff] }
 0x491   : > { %10322 = vmatprep.subr.bf16.mxu1 %v10321_v46  ;;  %v18697_v46 = vand.u32 4294901760, %v18696_v36  ;;  %v17289_v38 = vand.u32 4294901760, %v15191_v28 }
 0x493   : > { %v10145_v21 = vpack.c.bf16 %v18697_v46, %v18695_v0  ;;  %v15213_v0 = vld [vmem:[%s11250_s4 + $0x698] sm:$0xff]  ;;  %v17288_v46 = vand.u32 4294901760, %v15204_v29 }
 0x495   : > { %10132 = vmatpush3.bf16.xpose.msra.mxu0 %v10131_v47  ;;  %v18700_v47 = vld [vmem:[#allocation80_spill] sm:$0xff] }
 0x496   : > { %10134 = vmatprep.subr.bf16.mxu0 %v10133_v12  ;;  %v18701_v51 = vand.u32 4294901760, %v18700_v47  ;;  %v18704_v12 = vld [vmem:[#allocation60_spill] sm:$0xff]  ;;  %v17279_v47 = vand.u32 4294901760, %v15213_v0 }
 0x497   : > { %v18705_v16 = vand.u32 4294901760, %v18704_v12 }
 0x498   : > { %10324 = vmatpush3.bf16.xpose.msra.mxu1 %v10323_v37  ;;  %v10335_v34 = vpack.c.bf16 %v18701_v51, %v18699_v42  ;;  %v10147_v37 = vpack.c.bf16 %v18709_v52, %v18707_v24  ;;  %v15228_v42 = vld [vmem:[%s11250_s4 + $0x708] sm:$0xff]  ;;  %v15234_v51 = vld [vmem:[%s11250_s4 + $0x790] sm:$0xff]  ;;  %v15261_v24 = vld [vmem:[%s11250_s4 + $0x618] sm:$0xff] }
 0x499   : > { %10326 = vmatprep.subr.bf16.mxu1 %v10325_v55  ;;  %v10337_v57 = vpack.c.bf16 %v18705_v16, %v18703_v5  ;;  %v18712_v55 = vld [vmem:[#allocation27_spill] sm:$0xff]  ;;  %v17281_v5 = vand.u32 4294901760, %v15228_v42  ;;  %v17274_v16 = vand.u32 4294901760, %v15234_v51  ;;  %v15267_v52 = vld [vmem:[%s11250_s4 + $0x6a8] sm:$0xff] }
 0x49a   : > { %v18713_v63 = vand.u32 4294901760, %v18712_v55  ;;  %v17271_v55 = vand.u32 4294901760, %v15261_v24 }
 0x49c   : > { %v10339_v8 = vpack.c.bf16 %v18713_v63, %v18711_v58  ;;  %v17272_v58 = vand.u32 4294901760, %v15258_v9  ;;  %v15286_v63 = vld [vmem:[%s11250_s4 + $0x710] sm:$0xff] }
 0x49d   : > { %10136 = vmatpush3.bf16.xpose.msra.mxu0 %v10135_v27  ;;  %v18716_v27 = vld [vmem:[#allocation96_spill] sm:$0xff] }
 0x49e   : > { %10138 = vmatprep.subr.bf16.mxu0 %v10137_v26  ;;  %v18721_v26 = vld [vmem:[#allocation49_spill] sm:$0xff] }
 0x4a0   : > { %10328 = vmatpush3.bf16.xpose.msra.mxu1 %v10327_v18  ;;  %v18725_v18 = vld [vmem:[#allocation94_spill] sm:$0xff] }
 0x4a1   : > { %10330 = vmatprep.subr.bf16.mxu1 %v10329_v30  ;;  %v18728_v30 = vld [vmem:[#allocation68_spill] sm:$0xff] }
 0x4a5   : > { %10140 = vmatpush3.bf16.xpose.msra.mxu0 %v10139_v61  ;;  %v18731_v61 = vld [vmem:[#allocation44_spill] sm:$0xff] }
 0x4a6   : > { %10142 = vmatprep.subr.bf16.mxu0 %v10141_v40  ;;  %v15188_v40 = vld [vmem:[%s11250_s4 + $0x780] sm:$0xff] }
 0x4a7   : > { %v17290_v44 = vand.u32 4294901760, %v15188_v40 }
 0x4a8   : > { %10332 = vmatpush3.bf16.xpose.msra.mxu1 %v10331_v6  ;;  %v18737_v6 = vld [vmem:[#allocation51_spill] sm:$0xff] }
 0x4a9   : > { %10334 = vmatprep.subr.bf16.mxu1 %v10333_v43  ;;  %v15220_v36 = vpack.c.bf16 %v17289_v38, %v17290_v44 }
 0x4ab   : > { %18739 = vst [vmem:[#allocation43_spill] sm:$0xff] %v15220_v36 }
 0x4ad   : > { %10144 = vmatpush3.bf16.xpose.msra.mxu0 %v10143_v60  ;;  %v15210_v60 = vld [vmem:[%s11250_s4 + $0x690] sm:$0xff] }
 0x4ae   : > { %10146 = vmatprep.subr.bf16.mxu0 %v10145_v21  ;;  %v17287_v21 = vand.u32 4294901760, %v15207_v59 }
 0x4b0   : > { %10336 = vmatpush3.bf16.xpose.msra.mxu1 %v10335_v34  ;;  %v15237_v34 = vld [vmem:[%s11250_s4 + $0x798] sm:$0xff]  ;;  %v15247_v12 = vpack.c.bf16 %v17287_v21, %v17288_v46  ;;  %v15445_v21 = vld [vmem:[%s11250_s4 + $0x648] sm:$0xff] }
 0x4b1   : > { %10338 = vmatprep.subr.bf16.mxu1 %v10337_v57  ;;  %v17273_v57 = vand.u32 4294901760, %v15237_v34 }
 0x4b2   : > { %18740 = vst [vmem:[#allocation30_spill] sm:$0xff] %v15247_v12 }
 0x4b3   : > { %v15281_v48 = vpack.c.bf16 %v17273_v57, %v17274_v16  ;;  %v15385_v57 = vld [vmem:[%s11250_s4 + $0x638] sm:$0xff]  ;;  %v15388_v16 = vld [vmem:[%s11250_s4 + $0x6c0] sm:$0xff] }
 0x4b5   : > { %10148 = vmatpush3.bf16.xpose.msra.mxu0 %v10147_v37  ;;  %v15274_v37 = vpack.c.bf16 %v17281_v5, %v17286_v4  ;;  %18743 = vst [vmem:[#allocation90_spill] sm:$0xff] %v15281_v48  ;;  %v15412_v5 = vld [vmem:[%s11250_s4 + $0x738] sm:$0xff]  ;;  %v15448_v4 = vld [vmem:[%s11250_s4 + $0x6d0] sm:$0xff] }
 0x4b6   : > { %10150 = vmatprep.subr.bf16.mxu0 %v18714_v49  ;;  %v18744_v49 = vld [vmem:[#allocation89_spill] sm:$0xff]  ;;  %v18756_v44 = vand.u32 4294901760, %v15412_v5 }
 0x4b7   : > { %18742 = vst [vmem:[#allocation73_spill] sm:$0xff] %v15274_v37 }
 0x4b8   : > { %10340 = vmatpush3.bf16.xpose.msra.mxu1 %v10339_v8  ;;  %v15289_v8 = vld [vmem:[%s11250_s4 + $0x718] sm:$0xff] }
 0x4b9   : > { %10342 = vmatprep.subr.bf16.mxu1 %v18715_v31  ;;  %v17268_v31 = vand.u32 4294901760, %v15264_v7 }
 0x4bc   : > { %8574 = vmatmul.mubr.f32.vlgmr.msra.gmra.mrb[4].mxu0 %v18492_v39 }
 0x4bd   : > { %10152 = vmatpush3.bf16.xpose.msra.mxu0 %v18716_v27  ;;  %8607 = vmatprep.mubr.f32.mxu0 %v18492_v39  ;;  %v17267_v27 = vand.u32 4294901760, %v15267_v52 }
 0x4be   : > { %10154 = vmatprep.subr.bf16.mxu0 %v18717_v11  ;;  %v15296_v11 = vld [vmem:[%s11250_s4 + $0x7a0] sm:$0xff] }
 0x4bf   : > { %8778 = vmatmul.mubr.f32.vlgmr.msra.gmra.mrb[4].mxu1 %v18492_v39 }
 0x4c0   : > { %10344 = vmatpush3.bf16.xpose.msra.mxu1 %v18718_v23  ;;  %8811 = vmatprep.mubr.f32.mxu1 %v18492_v39  ;;  %v15299_v23 = vld [vmem:[%s11250_s4 + $0x7a8] sm:$0xff] }
 0x4c1   : > { %10346 = vmatprep.subr.bf16.mxu1 %v18719_v20  ;;  %v17270_v20 = vand.u32 4294901760, %v15286_v63 }
 0x4c5   : > { %10156 = vmatpush3.bf16.xpose.msra.mxu0 %v18720_v50  ;;  %v17269_v50 = vand.u32 4294901760, %v15289_v8 }
 0x4c6   : > { %10158 = vmatprep.subr.bf16.mxu0 %v18721_v26  ;;  %v15311_v26 = vpack.c.bf16 %v17271_v55, %v17272_v58  ;;  %v15382_v58 = vld [vmem:[%s11250_s4 + $0x630] sm:$0xff] }
 0x4c8   : > { %10348 = vmatpush3.bf16.xpose.msra.mxu1 %v18722_v54  ;;  %18745 = vst [vmem:[#allocation87_spill] sm:$0xff] %v15311_v26  ;;  %v17266_v54 = vand.u32 4294901760, %v15296_v11 }
 0x4c9   : > { %10350 = vmatprep.subr.bf16.mxu1 %v18723_v10  ;;  %v17265_v10 = vand.u32 4294901760, %v15299_v23 }
 0x4cd   : > { %10160 = vmatpush3.bf16.xpose.msra.mxu0 %v18724_v13  ;;  %v15319_v13 = vpack.c.bf16 %v17267_v27, %v17268_v31 }
 0x4ce   : > { %10162 = vmatprep.subr.bf16.mxu0 %v18725_v18  ;;  %v15322_v18 = vld [vmem:[%s11250_s4 + $0x620] sm:$0xff] }
 0x4cf   : > { %18746 = vst [vmem:[#allocation93_spill] sm:$0xff] %v15319_v13 }
 0x4d0   : > { %10352 = vmatpush3.bf16.xpose.msra.mxu1 %v18726_v22  ;;  %v15325_v22 = vld [vmem:[%s11250_s4 + $0x628] sm:$0xff] }
 0x4d1   : > { %10354 = vmatprep.subr.bf16.mxu1 %v18727_v14  ;;  %v15328_v14 = vld [vmem:[%s11250_s4 + $0x6b0] sm:$0xff] }
 0x4d5   : > { %10164 = vmatpush3.bf16.xpose.msra.mxu0 %v18610_v19  ;;  %v18732_v19 = vld [vmem:[#allocation86_spill] sm:$0xff] }
 0x4d6   : > { %10166 = vmatprep.subr.bf16.mxu0 %v18728_v30  ;;  %v15331_v30 = vld [vmem:[%s11250_s4 + $0x6b8] sm:$0xff] }
 0x4d8   : > { %10356 = vmatpush3.bf16.xpose.msra.mxu1 %v18612_v3  ;;  %v18733_v3 = vld [vmem:[#allocation77_spill] sm:$0xff] }
 0x4d9   : > { %10358 = vmatprep.subr.bf16.mxu1 %v18613_v56  ;;  %v15178_v56 = vld [vmem:[%s11250_s4 + $0x680] sm:$0xff] }
 0x4da   : > { %v17292_v41 = vand.u32 4294901760, %v15178_v56 }
 0x4dd   : > { %10168 = vmatpush3.bf16.xpose.msra.mxu0 %v18617_v45  ;;  %v15181_v45 = vld [vmem:[%s11250_s4 + $0x688] sm:$0xff] }
 0x4de   : > { %10170 = vmatprep.subr.bf16.mxu0 %v18618_v62  ;;  %v18734_v62 = vld [vmem:[#allocation39_spill] sm:$0xff]  ;;  %v17291_v17 = vand.u32 4294901760, %v15181_v45 }
 0x4e0   : > { %10360 = vmatpush3.bf16.xpose.msra.mxu1 %v18619_v1  ;;  %v18735_v1 = vld [vmem:[#allocation58_spill] sm:$0xff]  ;;  %v15201_v43 = vpack.c.bf16 %v17291_v17, %v17292_v41  ;;  %v15442_v41 = vld [vmem:[%s11250_s4 + $0x640] sm:$0xff] }
 0x4e1   : > { %10362 = vmatprep.subr.bf16.mxu1 %v18729_v25  ;;  %v15337_v25 = vpack.c.bf16 %v17269_v50, %v17270_v20 }
 0x4e2   : > { %18738 = vst [vmem:[#allocation75_spill] sm:$0xff] %v15201_v43 }
 0x4e3   : > { %18747 = vst [vmem:[#allocation34_spill] sm:$0xff] %v15337_v25 }
 0x4e5   : > { %10172 = vmatpush3.bf16.xpose.msra.mxu0 %v18730_v32  ;;  %v15344_v32 = vpack.c.bf16 %v17265_v10, %v17266_v54  ;;  %v15361_v10 = vld [vmem:[%s11250_s4 + $0x7b8] sm:$0xff] }
 0x4e6   : > { %10174 = vmatprep.subr.bf16.mxu0 %v18731_v61  ;;  %v17276_v61 = vand.u32 4294901760, %v15322_v18  ;;  %v17284_v20 = vand.u32 4294901760, %v15361_v10 }
 0x4e7   : > { %18748 = vst [vmem:[#allocation69_spill] sm:$0xff] %v15344_v32 }
 0x4e8   : > { %10364 = vmatpush3.bf16.xpose.msra.mxu1 %v18732_v19  ;;  %v17275_v19 = vand.u32 4294901760, %v15325_v22 }
 0x4e9   : > { %10366 = vmatprep.subr.bf16.mxu1 %v18733_v3  ;;  %v15349_v3 = vld [vmem:[%s11250_s4 + $0x720] sm:$0xff] }
 0x4ea   : > { %v17283_v54 = vand.u32 4294901760, %v15349_v3  ;;  %v15371_v31 = vpack.c.bf16 %v17275_v19, %v17276_v61  ;;  %v15391_v19 = vld [vmem:[%s11250_s4 + $0x6c8] sm:$0xff] }
 0x4ec   : > { %18749 = vst [vmem:[#allocation79_spill] sm:$0xff] %v15371_v31 }
 0x4ed   : > { %10176 = vmatpush3.bf16.xpose.msra.mxu0 %v18734_v62  ;;  %v15352_v62 = vld [vmem:[%s11250_s4 + $0x728] sm:$0xff] }
 0x4ee   : > { %10178 = vmatprep.subr.bf16.mxu0 %v18735_v1  ;;  %v17278_v1 = vand.u32 4294901760, %v15328_v14  ;;  %v17282_v27 = vand.u32 4294901760, %v15352_v62 }
 0x4f0   : > { %10368 = vmatpush3.bf16.xpose.msra.mxu1 %v18736_v15  ;;  %v17277_v15 = vand.u32 4294901760, %v15331_v30  ;;  %v15397_v61 = vpack.c.bf16 %v17282_v27, %v17283_v54  ;;  %v17296_v27 = vand.u32 4294901760, %v15388_v16  ;;  %v17295_v54 = vand.u32 4294901760, %v15391_v19 }
 0x4f1   : > { %10370 = vmatprep.subr.bf16.mxu1 %v18737_v6  ;;  %v15358_v6 = vld [vmem:[%s11250_s4 + $0x7b0] sm:$0xff] }
 0x4f2   : > { %v17285_v50 = vand.u32 4294901760, %v15358_v6  ;;  %v15379_v55 = vpack.c.bf16 %v17277_v15, %v17278_v1  ;;  %18751 = vst [vmem:[#allocation55_spill] sm:$0xff] %v15397_v61  ;;  %v17294_v1 = vand.u32 4294901760, %v15382_v58  ;;  %v15439_v17 = vpack.c.bf16 %v17295_v54, %v17296_v27 }
 0x4f4   : > { %18750 = vst [vmem:[#allocation54_spill] sm:$0xff] %v15379_v55  ;;  %v15404_v15 = vpack.c.bf16 %v17284_v20, %v17285_v50  ;;  %v15418_v20 = vld [vmem:[%s11250_s4 + $0x7c0] sm:$0xff]  ;;  %v15421_v50 = vld [vmem:[%s11250_s4 + $0x7c8] sm:$0xff]  ;;  %18754 = vst [vmem:[#allocation85_spill] sm:$0xff] %v15439_v17 }
 0x4f5   : > { %10180 = vmatpush3.bf16.xpose.msra.mxu0 %v18631_v33  ;;  %v17280_v33 = vand.u32 4294901760, %v15210_v60  ;;  %v18758_v54 = vand.u32 4294901760, %v15418_v20  ;;  %v18759_v27 = vand.u32 4294901760, %v15421_v50 }
 0x4f6   : > { %10374 = vmatprep.subr.bf16.mxu0 %v15201_v43  ;;  %18752 = vst [vmem:[#allocation21_spill] sm:$0xff] %v15404_v15  ;;  %v18794_v43 = vand.u32 4294901760, %v15213_v0 }
 0x4f8   : > { %10372 = vmatpush3.bf16.xpose.msra.mxu1 %v18634_v35  ;;  %v15255_v35 = vpack.c.bf16 %v17279_v47, %v17280_v33  ;;  %v17293_v47 = vand.u32 4294901760, %v15385_v57  ;;  %v15409_v33 = vld [vmem:[%s11250_s4 + $0x730] sm:$0xff] }
 0x4f9   : > { %10566 = vmatprep.subr.bf16.mxu1 %v15220_v36  ;;  %v15564_v36 = vld [vmem:[%s11250_s4 + $0x750] sm:$0xff] }
 0x4fa   : > { %18741 = vst [vmem:[#allocation37_spill] sm:$0xff] %v15255_v35  ;;  %v15431_v46 = vpack.c.bf16 %v17293_v47, %v17294_v1  ;;  %v15451_v47 = vld [vmem:[%s11250_s4 + $0x6d8] sm:$0xff]  ;;  %v18755_v1 = vand.u32 4294901760, %v15409_v33 }
 0x4fc   : > { %8608 = vmatmul.mubr.f32.vlgmr.msra.gmra.mrb[4].mxu0 %v18492_v39  ;;  %18753 = vst [vmem:[#allocation76_spill] sm:$0xff] %v15431_v46  ;;  %v15457_v38 = vpack.c.bf16 %v18756_v44, %v18755_v1  ;;  %v18761_v44 = vand.u32 4294901760, %v15445_v21  ;;  %v18772_v1 = vand.u32 4294901760, %v15188_v40 }
 0x4fd   : > { %10376 = vmatpush3.bf16.xpose.msra.mxu0 %v15247_v12  ;;  %8845 = vmatprep.mubr.f32.mxu0 %v18744_v49 }
 0x4fe   : > { %10378 = vmatprep.subr.bf16.mxu0 %v15255_v35  ;;  %18757 = vst [vmem:[#allocation91_spill] sm:$0xff] %v15457_v38 }
 0x4ff   : > { %8812 = vmatmul.mubr.f32.vlgmr.msra.gmra.mrb[4].mxu1 %v18492_v39  ;;  %v18800_v39 = vand.u32 4294901760, %v15261_v24 }
 0x500   : > { %10568 = vmatpush3.bf16.xpose.msra.mxu1 %v15274_v37  ;;  %9049 = vmatprep.mubr.f32.mxu1 %v18744_v49  ;;  %v18776_v37 = vand.u32 4294901760, %v15191_v28 }
 0x501   : > { %10570 = vmatprep.subr.bf16.mxu1 %v15281_v48  ;;  %v15526_v48 = vld [vmem:[%s11250_s4 + $0x6e8] sm:$0xff] }
 0x502   : > { %18775 = vst [vmem:[#allocation45_spill] sm:$0xff] %v15526_v48  ;;  %v15531_v35 = vsub.f32 %v15191_v28, %v18776_v37  ;;  %v18784_v28 = vand.u32 4294901760, %v15225_v53 }
 0x504   : > { %18777 = vst [vmem:[#allocation28_spill] sm:$0xff] %v15531_v35  ;;  %v15552_v37 = vsub.f32 %v15225_v53, %v18784_v28  ;;  %v18790_v28 = vand.u32 4294901760, %v15210_v60 }
 0x505   : > { %10380 = vmatpush3.bf16.xpose.msra.mxu0 %v15311_v26 }
 0x506   : > { %10382 = vmatprep.subr.bf16.mxu0 %v15319_v13  ;;  %v18763_v13 = vand.u32 4294901760, %v15448_v4 }
 0x508   : > { %10572 = vmatpush3.bf16.xpose.msra.mxu1 %v15337_v25 }
 0x509   : > { %10574 = vmatprep.subr.bf16.mxu1 %v15344_v32  ;;  %v15472_v32 = vld [vmem:[%s11250_s4 + $0x748] sm:$0xff] }
 0x50d   : > { %10384 = vmatpush3.bf16.xpose.msra.mxu0 %v15371_v31  ;;  %v15469_v31 = vld [vmem:[%s11250_s4 + $0x740] sm:$0xff] }
 0x50e   : > { %10386 = vmatprep.subr.bf16.mxu0 %v15379_v55  ;;  %v15505_v55 = vld [vmem:[%s11250_s4 + $0x658] sm:$0xff] }
 0x50f   : > { %18767 = vst [vmem:[#allocation29_spill] sm:$0xff] %v15505_v55 }
 0x510   : > { %10576 = vmatpush3.bf16.xpose.msra.mxu1 %v15397_v61  ;;  %v17321_v61 = vand.u32 4294901760, %v15442_v41 }
 0x511   : > { %10578 = vmatprep.subr.bf16.mxu1 %v15404_v15  ;;  %v15464_v15 = vpack.c.bf16 %v18759_v27, %v18758_v54  ;;  %v15481_v27 = vld [vmem:[%s11250_s4 + $0x7d8] sm:$0xff]  ;;  %v15502_v54 = vld [vmem:[%s11250_s4 + $0x650] sm:$0xff] }
 0x512   : > { %18766 = vst [vmem:[#allocation71_spill] sm:$0xff] %v15502_v54 }
 0x513   : > { %18760 = vst [vmem:[#allocation40_spill] sm:$0xff] %v15464_v15 }
 0x515   : > { %10388 = vmatpush3.bf16.xpose.msra.mxu0 %v15431_v46  ;;  %v15478_v46 = vld [vmem:[%s11250_s4 + $0x7d0] sm:$0xff] }
 0x516   : > { %10390 = vmatprep.subr.bf16.mxu0 %v15439_v17  ;;  %v15491_v17 = vpack.c.bf16 %v18761_v44, %v17321_v61  ;;  %v18770_v61 = vand.u32 4294901760, %v15181_v45 }
 0x518   : > { %10580 = vmatpush3.bf16.xpose.msra.mxu1 %v15457_v38  ;;  %18762 = vst [vmem:[#allocation67_spill] sm:$0xff] %v15491_v17  ;;  %v18764_v38 = vand.u32 4294901760, %v15451_v47  ;;  %v15515_v25 = vsub.f32 %v15181_v45, %v18770_v61  ;;  %v18779_v61 = vand.u32 4294901760, %v15207_v59 }
 0x519   : > { %10582 = vmatprep.subr.bf16.mxu1 %v15464_v15  ;;  %v18768_v15 = vand.u32 4294901760, %v15178_v56 }
 0x51a   : > { %v15499_v26 = vpack.c.bf16 %v18764_v38, %v18763_v13  ;;  %18771 = vst [vmem:[#allocation20_spill] sm:$0xff] %v15515_v25  ;;  %v15520_v38 = vsub.f32 %v15188_v40, %v18772_v1  ;;  %v15523_v13 = vld [vmem:[%s11250_s4 + $0x6e0] sm:$0xff]  ;;  %v15541_v40 = vsub.f32 %v15207_v59, %v18779_v61  ;;  %v18782_v1 = vand.u32 4294901760, %v15472_v32  ;;  %v15586_v59 = vld [vmem:[%s11250_s4 + $0x7e8] sm:$0xff] }
 0x51b   : > { %v15510_v44 = vsub.f32 %v15178_v56, %v18768_v15  ;;  %18774 = vst [vmem:[#allocation46_spill] sm:$0xff] %v15523_v13  ;;  %v18778_v56 = vand.u32 4294901760, %v15204_v29  ;;  %v18781_v15 = vand.u32 4294901760, %v15469_v31  ;;  %v15583_v61 = vld [vmem:[%s11250_s4 + $0x7e0] sm:$0xff]  ;;  %18793 = vst [vmem:[#allocation26_spill] sm:$0xff] %v15586_v59 }
 0x51c   : > { %18765 = vst [vmem:[#allocation31_spill] sm:$0xff] %v15499_v26  ;;  %18773 = vst [vmem:[#allocation38_spill] sm:$0xff] %v15520_v38 }
 0x51d   : > { %18769 = vst [vmem:[#allocation24_spill] sm:$0xff] %v15510_v44  ;;  %v15536_v45 = vsub.f32 %v15204_v29, %v18778_v56  ;;  %18780 = vst [vmem:[#allocation64_spill] sm:$0xff] %v15541_v40  ;;  %v15547_v2 = vpack.c.bf16 %v18782_v1, %v18781_v15  ;;  %10392 = vmatpush3.bf16.xpose.msra.mxu0 %v15491_v17  ;;  %v18785_v29 = vand.u32 4294901760, %v15478_v46  ;;  %v18786_v56 = vand.u32 4294901760, %v15481_v27  ;;  %v15567_v15 = vld [vmem:[%s11250_s4 + $0x758] sm:$0xff] }
 0x51e   : > { %18788 = vst [vmem:[#allocation63_spill] sm:$0xff] %v15567_v15  ;;  %v18789_v1 = vand.u32 4294901760, %v15228_v42  ;;  %v15577_v17 = vsub.f32 %v15210_v60, %v18790_v28  ;;  %10394 = vmatprep.subr.bf16.mxu0 %v15499_v26  ;;  %18792 = vst [vmem:[#allocation23_spill] sm:$0xff] %v15583_v61  ;;  %v18798_v28 = vand.u32 4294901760, %v15237_v34 }
 0x51f   : > { %18783 = vst [vmem:[#allocation14_spill] sm:$0xff] %v15547_v2  ;;  %v15559_v12 = vpack.c.bf16 %v18786_v56, %v18785_v29  ;;  %v18799_v56 = vand.u32 4294901760, %v15258_v9 }
 0x520   : > { %v15572_v53 = vsub.f32 %v15228_v42, %v18789_v1  ;;  %18791 = vst [vmem:[#allocation17_spill] sm:$0xff] %v15577_v17  ;;  %v15591_v42 = vsub.f32 %v15213_v0, %v18794_v43  ;;  %v18796_v1 = vand.u32 4294901760, %v15234_v51  ;;  %v15601_v29 = vsub.f32 %v15237_v34, %v18798_v28  ;;  %10584 = vmatpush3.bf16.xpose.msra.mxu1 %v15547_v2  ;;  %v15657_v28 = vld [vmem:[%s11250_s4 + $0x660] sm:$0xff] }
 0x521   : > { %18787 = vst [vmem:[#allocation19_spill] sm:$0xff] %v15559_v12  ;;  %v15606_v26 = vsub.f32 %v15258_v9, %v18799_v56  ;;  %v15611_v43 = vsub.f32 %v15261_v24, %v18800_v39  ;;  %v18801_v0 = vand.u32 4294901760, %v15286_v63  ;;  %v18803_v9 = vand.u32 4294901760, %v15289_v8  ;;  %10586 = vmatprep.subr.bf16.mxu1 %v15559_v12  ;;  %18815 = vst [vmem:[#allocation32_spill] sm:$0xff] %v15657_v28 }
 0x522   : > { %18795 = vst [vmem:[#allocation57_spill] sm:$0xff] %v15591_v42  ;;  %v15596_v60 = vsub.f32 %v15234_v51, %v18796_v1  ;;  %v18805_v39 = vand.u32 4294901760, %v15502_v54  ;;  %v18806_v24 = vand.u32 4294901760, %v15505_v55  ;;  %v18808_v1 = vand.u32 4294901760, %v15264_v7 }
 0x523   : > { %v15616_v51 = vsub.f32 %v15286_v63, %v18801_v0  ;;  %v15624_v56 = vsub.f32 %v15289_v8, %v18803_v9  ;;  %v18809_v8 = vand.u32 4294901760, %v15267_v52  ;;  %v18810_v12 = vand.u32 4294901760, %v15296_v11 }
 0x524   : > { %18797 = vst [vmem:[#allocation59_spill] sm:$0xff] %v15596_v60  ;;  %v15631_v63 = vpack.c.bf16 %v18806_v24, %v18805_v39  ;;  %v15638_v34 = vsub.f32 %v15264_v7, %v18808_v1  ;;  %v18812_v39 = vand.u32 4294901760, %v15523_v13  ;;  %v18813_v24 = vand.u32 4294901760, %v15526_v48  ;;  %v15660_v7 = vld [vmem:[%s11250_s4 + $0x668] sm:$0xff]  ;;  %v15683_v13 = vld [vmem:[%s11250_s4 + $0x6f0] sm:$0xff] }
 0x525   : > { %18802 = vst [vmem:[#allocation15_spill] sm:$0xff] %v15616_v51  ;;  %18804 = vst [vmem:[#allocation61_spill] sm:$0xff] %v15624_v56  ;;  %v15643_v9 = vsub.f32 %v15267_v52, %v18809_v8  ;;  %v15648_v2 = vsub.f32 %v15296_v11, %v18810_v12  ;;  %v18817_v1 = vand.u32 4294901760, %v15299_v23  ;;  %v18819_v8 = vand.u32 4294901760, %v15322_v18 }
 0x526   : > { %18807 = vst [vmem:[#allocation47_spill] sm:$0xff] %v15631_v63  ;;  %v15654_v0 = vpack.c.bf16 %v18813_v24, %v18812_v39  ;;  %18816 = vst [vmem:[#allocation36_spill] sm:$0xff] %v15660_v7  ;;  %v18820_v11 = vand.u32 4294901760, %v15325_v22  ;;  %v18822_v24 = vand.u32 4294901760, %v15349_v3  ;;  %v18833_v55 = vand.u32 4294901760, %v15567_v15  ;;  %10396 = vmatpush3.bf16.xpose.msra.mxu0 %v15631_v63  ;;  %v15724_v15 = vld [vmem:[%s11250_s4 + $0x760] sm:$0xff] }
 0x527   : > { %18811 = vst [vmem:[#allocation50_spill] sm:$0xff] %v15648_v2  ;;  %v15665_v52 = vsub.f32 %v15299_v23, %v18817_v1  ;;  %v15670_v12 = vsub.f32 %v15322_v18, %v18819_v8  ;;  %18824 = vst [vmem:[#allocation65_spill] sm:$0xff] %v15683_v13  ;;  %v15686_v23 = vld [vmem:[%s11250_s4 + $0x6f8] sm:$0xff]  ;;  %v18826_v1 = vand.u32 4294901760, %v15352_v62  ;;  %v18828_v8 = vand.u32 4294901760, %v15328_v14 }
 0x528   : > { %18814 = vst [vmem:[#allocation83_spill] sm:$0xff] %v15654_v0  ;;  %v15675_v39 = vsub.f32 %v15325_v22, %v18820_v11  ;;  %v15680_v48 = vsub.f32 %v15349_v3, %v18822_v24  ;;  %18825 = vst [vmem:[#allocation84_spill] sm:$0xff] %v15686_v23  ;;  %v18830_v11 = vand.u32 4294901760, %v15331_v30  ;;  %v18832_v24 = vand.u32 4294901760, %v15564_v36  ;;  %10398 = vmatprep.subr.bf16.mxu0 %v15654_v0  ;;  %v15736_v63 = vld [vmem:[%s11250_s4 + $0x7f8] sm:$0xff] }
 0x529   : > { %18818 = vst [vmem:[#allocation74_spill] sm:$0xff] %v15665_v52  ;;  %v15691_v18 = vsub.f32 %v15352_v62, %v18826_v1  ;;  %v15696_v22 = vsub.f32 %v15328_v14, %v18828_v8  ;;  %v18835_v54 = vand.u32 4294901760, %v15358_v6  ;;  %v18837_v14 = vand.u32 4294901760, %v15583_v61  ;;  %18840 = vst [vmem:[#allocation25_spill] sm:$0xff] %v15724_v15 }
 0x52a   : > { %18821 = vst [vmem:[#allocation13_spill] sm:$0xff] %v15675_v39  ;;  %18823 = vst [vmem:[#allocation22_spill] sm:$0xff] %v15680_v48  ;;  %v15701_v3 = vsub.f32 %v15331_v30, %v18830_v11  ;;  %v15707_v48 = vpack.c.bf16 %v18833_v55, %v18832_v24  ;;  %v18838_v1 = vand.u32 4294901760, %v15586_v59  ;;  %v15727_v55 = vld [vmem:[%s11250_s4 + $0x768] sm:$0xff]  ;;  %v15733_v24 = vld [vmem:[%s11250_s4 + $0x7f0] sm:$0xff]  ;;  %v18843_v11 = vand.u32 4294901760, %v15361_v10 }
 0x52b   : > { %18827 = vst [vmem:[#allocation97_spill] sm:$0xff] %v15691_v18  ;;  %18829 = vst [vmem:[#allocation80_spill] sm:$0xff] %v15696_v22  ;;  %v15712_v62 = vsub.f32 %v15358_v6, %v18835_v54  ;;  %v18844_v59 = vand.u32 4294901760, %v15382_v58  ;;  %v18845_v54 = vand.u32 4294901760, %v15385_v57  ;;  %v18849_v61 = vand.u32 4294901760, %v15412_v5 }
 0x52c   : > { %18831 = vst [vmem:[#allocation33_spill] sm:$0xff] %v15701_v3  ;;  %18834 = vst [vmem:[#allocation60_spill] sm:$0xff] %v15707_v48  ;;  %v15719_v8 = vpack.c.bf16 %v18838_v1, %v18837_v14  ;;  %v15743_v30 = vsub.f32 %v15361_v10, %v18843_v11  ;;  %v18847_v14 = vand.u32 4294901760, %v15409_v33  ;;  %10588 = vmatpush3.bf16.xpose.msra.mxu1 %v15707_v48  ;;  %v15791_v48 = vld [vmem:[%s11250_s4 + $0x670] sm:$0xff] }
 0x52d   : > { %18836 = vst [vmem:[#allocation56_spill] sm:$0xff] %v15712_v62  ;;  %18841 = vst [vmem:[#allocation27_spill] sm:$0xff] %v15727_v55  ;;  %v15748_v6 = vsub.f32 %v15382_v58, %v18844_v59  ;;  %v15753_v0 = vsub.f32 %v15385_v57, %v18845_v54  ;;  %v15768_v57 = vsub.f32 %v15412_v5, %v18849_v61  ;;  %v18852_v54 = vand.u32 4294901760, %v15660_v7  ;;  %v15794_v7 = vld [vmem:[%s11250_s4 + $0x678] sm:$0xff] }
 0x52e   : > { %18839 = vst [vmem:[#allocation66_spill] sm:$0xff] %v15719_v8  ;;  %18842 = vst [vmem:[#allocation16_spill] sm:$0xff] %v15736_v63  ;;  %v15758_v1 = vsub.f32 %v15409_v33, %v18847_v14  ;;  %10590 = vmatprep.subr.bf16.mxu1 %v15719_v8  ;;  %v18851_v33 = vand.u32 4294901760, %v15657_v28  ;;  %v18854_v59 = vand.u32 4294901760, %v15388_v16  ;;  %v18856_v5 = vand.u32 4294901760, %v15683_v13 }
 0x52f   : > { %18846 = vst [vmem:[#allocation92_spill] sm:$0xff] %v15753_v0  ;;  %18850 = vst [vmem:[#allocation18_spill] sm:$0xff] %v15768_v57  ;;  %v18857_v61 = vand.u32 4294901760, %v15686_v23  ;;  %v18860_v58 = vand.u32 4294901760, %v15515_v25  ;;  %v18865_v23 = vand.u32 4294901760, %v15421_v50  ;;  %v18871_v28 = vand.u32 4294901760, %v15531_v35 }
 0x530   : > { %18848 = vst [vmem:[#allocation96_spill] sm:$0xff] %v15758_v1  ;;  %v15775_v14 = vpack.c.bf16 %v18852_v54, %v18851_v33  ;;  %v15782_v10 = vsub.f32 %v15388_v16, %v18854_v59  ;;  %v18859_v33 = vand.u32 4294901760, %v15510_v44  ;;  %v18861_v16 = vand.u32 4294901760, %v15391_v19 }
 0x531   : > { %v15788_v8 = vpack.c.bf16 %v18857_v61, %v18856_v5  ;;  %v5853_v11 = vsub.f32 %v15515_v25, %v18860_v58  ;;  %v18863_v5 = vand.u32 4294901760, %v15418_v20  ;;  %v15815_v13 = vsub.f32 %v15421_v50, %v18865_v23 }
 0x532   : > { %18853 = vst [vmem:[#allocation42_spill] sm:$0xff] %v15775_v14  ;;  %18855 = vst [vmem:[#allocation41_spill] sm:$0xff] %v15782_v10  ;;  %v5846_v54 = vsub.f32 %v15510_v44, %v18859_v33  ;;  %v15805_v59 = vsub.f32 %v15391_v19, %v18861_v16  ;;  %v18867_v44 = vand.u32 4294901760, %v15724_v15  ;;  %v18868_v58 = vand.u32 4294901760, %v15727_v55  ;;  %v15825_v19 = vld [vmem:[%s11250_s4 + $0x770] sm:$0xff]  ;;  %v15828_v16 = vld [vmem:[%s11250_s4 + $0x778] sm:$0xff]  ;;  %10400 = vmatpush3.bf16.xpose.msra.mxu0 %v15775_v14 }
 0x533   : > { %18858 = vst [vmem:[#allocation48_spill] sm:$0xff] %v15788_v8  ;;  %v15810_v61 = vsub.f32 %v15418_v20, %v18863_v5  ;;  %18866 = vst [vmem:[#allocation81_spill] sm:$0xff] %v15815_v13  ;;  %v18870_v20 = vand.u32 4294901760, %v15520_v38  ;;  %v6708_v50 = vsub.f32 %v15531_v35, %v18871_v28  ;;  %v18872_v33 = vand.u32 4294901760, %v15442_v41  ;;  %10402 = vmatprep.subr.bf16.mxu0 %v15788_v8 }
 0x534   : > { %18862 = vst [vmem:[#allocation49_spill] sm:$0xff] %v15805_v59  ;;  %v15822_v25 = vpack.c.bf16 %v18868_v58, %v18867_v44  ;;  %v18874_v44 = vand.u32 4294901760, %v15733_v24  ;;  %v18875_v58 = vand.u32 4294901760, %v15736_v63  ;;  %v5847_v28 = vand.u32 4294901760, %v5846_v54 }
 0x535   : > { %18864 = vst [vmem:[#allocation52_spill] sm:$0xff] %v15810_v61  ;;  %v6701_v5 = vsub.f32 %v15520_v38, %v18870_v20  ;;  %v15840_v55 = vsub.f32 %v15442_v41, %v18872_v33  ;;  %v5854_v23 = vand.u32 4294901760, %v5853_v11  ;;  %v18877_v63 = vand.u32 4294901760, %v15536_v45 }
 0x536   : > { %18869 = vst [vmem:[#allocation88_spill] sm:$0xff] %v15822_v25  ;;  %v15847_v15 = vpack.c.bf16 %v18875_v58, %v18874_v44  ;;  %10592 = vmatpush3.bf16.xpose.msra.mxu1 %v15822_v25  ;;  %v6709_v20 = vand.u32 4294901760, %v6708_v50  ;;  %v18878_v11 = vand.u32 4294901760, %v15541_v40  ;;  %v18879_v33 = vand.u32 4294901760, %v15445_v21 }
 0x537   : > { %18873 = vst [vmem:[#allocation94_spill] sm:$0xff] %v15840_v55  ;;  %v5734_v44 = vsub.f32 %v15536_v45, %v18877_v63  ;;  %v6702_v38 = vand.u32 4294901760, %v6701_v5  ;;  %v18881_v63 = vand.u32 4294901760, %v15791_v48  ;;  %v18882_v58 = vand.u32 4294901760, %v15794_v7 }
 0x538   : > { %18876 = vst [vmem:[#allocation95_spill] sm:$0xff] %v15847_v15  ;;  %v5741_v54 = vsub.f32 %v15541_v40, %v18878_v11  ;;  %v15868_v14 = vsub.f32 %v15445_v21, %v18879_v33  ;;  %10594 = vmatprep.subr.bf16.mxu1 %v15847_v15  ;;  %v18884_v11 = vand.u32 4294901760, %v15469_v31  ;;  %v10405_v25 = vpack.c.bf16 %v5854_v23, %v5847_v28 }
 0x539   : > { %v15875_v35 = vpack.c.bf16 %v18882_v58, %v18881_v63  ;;  %v18885_v21 = vand.u32 4294901760, %v15577_v17  ;;  %v18886_v15 = vand.u32 4294901760, %v15591_v42  ;;  %v18887_v58 = vand.u32 4294901760, %v15472_v32 }
 0x53a   : > { %18880 = vst [vmem:[#allocation98_spill] sm:$0xff] %v15868_v14  ;;  %v15882_v41 = vsub.f32 %v15469_v31, %v18884_v11  ;;  %v18889_v50 = vand.u32 4294901760, %v15448_v4  ;;  %v18891_v31 = vand.u32 4294901760, %v15825_v19  ;;  %v18892_v23 = vand.u32 4294901760, %v15828_v16 }
 0x53b   : > { %18883 = vst [vmem:[#allocation68_spill] sm:$0xff] %v15875_v35  ;;  %v5860_v33 = vsub.f32 %v15577_v17, %v18885_v21  ;;  %v5867_v8 = vsub.f32 %v15591_v42, %v18886_v15  ;;  %v15893_v63 = vsub.f32 %v15472_v32, %v18887_v58  ;;  %v18894_v11 = vand.u32 4294901760, %v15552_v37  ;;  %10404 = vmatpush3.bf16.xpose.msra.mxu0 %v15875_v35 }
 0x53c   : > { %v15898_v5 = vsub.f32 %v15448_v4, %v18889_v50  ;;  %v15904_v28 = vpack.c.bf16 %v18892_v23, %v18891_v31  ;;  %v10597_v21 = vpack.c.bf16 %v6709_v20, %v6702_v38  ;;  %v5735_v42 = vand.u32 4294901760, %v5734_v44  ;;  %10406 = vmatprep.subr.bf16.mxu0 %v10405_v25 }
 0x53d   : > { %18888 = vst [vmem:[#allocation70_spill] sm:$0xff] %v15893_v63  ;;  %v6589_v15 = vsub.f32 %v15552_v37, %v18894_v11  ;;  %v5742_v17 = vand.u32 4294901760, %v5741_v54  ;;  %v18895_v32 = vand.u32 4294901760, %v15572_v53  ;;  %v18896_v4 = vand.u32 4294901760, %v15596_v60 }
 0x53e   : > { %18890 = vst [vmem:[#allocation53_spill] sm:$0xff] %v15898_v5  ;;  %18893 = vst [vmem:[#allocation44_spill] sm:$0xff] %v15904_v28  ;;  %v18897_v31 = vand.u32 4294901760, %v15601_v29  ;;  %v17407_v40 = vand.u32 4294901760, %v15606_v26  ;;  %v5861_v20 = vand.u32 4294901760, %v5860_v33  ;;  %v5868_v44 = vand.u32 4294901760, %v5867_v8  ;;  %10596 = vmatpush3.bf16.xpose.msra.mxu1 %v15904_v28 }
 0x53f   : > { %v6596_v58 = vsub.f32 %v15572_v53, %v18895_v32  ;;  %v6715_v50 = vsub.f32 %v15596_v60, %v18896_v4  ;;  %v18898_v32 = vand.u32 4294901760, %v15451_v47  ;;  %v6590_v4 = vand.u32 4294901760, %v6589_v15  ;;  %10598 = vmatprep.subr.bf16.mxu1 %v10597_v21 }
 0x540   : > { %v6722_v23 = vsub.f32 %v15601_v29, %v18897_v31  ;;  %v17408_v60 = vand.u32 4294901760, %v15616_v51  ;;  %v10407_v38 = vpack.c.bf16 %v5742_v17, %v5735_v42  ;;  %v17415_v8 = vand.u32 4294901760, %v15648_v2 }
 0x541   : > { %v15926_v35 = vsub.f32 %v15451_v47, %v18898_v32  ;;  %v6597_v25 = vand.u32 4294901760, %v6596_v58  ;;  %v6716_v11 = vand.u32 4294901760, %v6715_v50  ;;  %v5748_v47 = vsub.f32 %v15606_v26, %v17407_v40 }
 0x542   : > { %v6723_v54 = vand.u32 4294901760, %v6722_v23  ;;  %v18900_v15 = vand.u32 4294901760, %v15611_v43  ;;  %v18901_v31 = vand.u32 4294901760, %v15478_v46  ;;  %v10409_v42 = vpack.c.bf16 %v5868_v44, %v5861_v20  ;;  %8846 = vmatmul.mubr.f32.vlgmr.msra.gmra.mrb[6].mxu0 %v18744_v49 }
 0x543   : > { %18899 = vst [vmem:[#allocation86_spill] sm:$0xff] %v15926_v35  ;;  %v18903_v58 = vand.u32 4294901760, %v15638_v34  ;;  %v18904_v50 = vand.u32 4294901760, %v15643_v9  ;;  %v18905_v40 = vand.u32 4294901760, %v15481_v27  ;;  %10408 = vmatpush3.bf16.xpose.msra.mxu0 %v10407_v38  ;;  %v5749_v44 = vand.u32 4294901760, %v5748_v47  ;;  %v18912_v38 = vld [vmem:[#allocation22_spill] sm:$0xff] }
 0x544   : > { %v5755_v32 = vsub.f32 %v15611_v43, %v18900_v15  ;;  %v15942_v17 = vsub.f32 %v15478_v46, %v18901_v31  ;;  %v6603_v15 = vsub.f32 %v15616_v51, %v17408_v60  ;;  %v18906_v46 = vand.u32 4294901760, %v15624_v56  ;;  %v18908_v60 = vld [vmem:[#allocation71_spill] sm:$0xff]  ;;  %10410 = vmatprep.subr.bf16.mxu0 %v10409_v42 }
 0x545   : > { %v5874_v21 = vsub.f32 %v15638_v34, %v18903_v58  ;;  %v5881_v23 = vsub.f32 %v15643_v9, %v18904_v50  ;;  %v15953_v33 = vsub.f32 %v15481_v27, %v18905_v40  ;;  %v10599_v31 = vpack.c.bf16 %v6597_v25, %v6590_v4  ;;  %v18910_v4 = vld [vmem:[#allocation72_spill] sm:$0xff]  ;;  %9050 = vmatmul.mubr.f32.vlgmr.msra.gmra.mrb[6].mxu1 %v18744_v49  ;;  %v18914_v49 = vld [vmem:[#allocation29_spill] sm:$0xff] }
 0x546   : > { %18902 = vst [vmem:[#allocation77_spill] sm:$0xff] %v15942_v17  ;;  %v6610_v20 = vsub.f32 %v15624_v56, %v18906_v46  ;;  %v6729_v58 = vsub.f32 %v15648_v2, %v17415_v8  ;;  %v18907_v27 = vand.u32 4294901760, %v15665_v52  ;;  %v18909_v28 = vand.u32 4294901760, %v18908_v60  ;;  %8879 = vmatprep.mubr.f32.mxu0 %v18910_v4  ;;  %9083 = vmatprep.mubr.f32.mxu1 %v18910_v4 }
 0x547   : > { %v10601_v46 = vpack.c.bf16 %v6723_v54, %v6716_v11  ;;  %v5756_v56 = vand.u32 4294901760, %v5755_v32  ;;  %v5875_v25 = vand.u32 4294901760, %v5874_v21  ;;  %v5882_v8 = vand.u32 4294901760, %v5881_v23  ;;  %10600 = vmatpush3.bf16.xpose.msra.mxu1 %v10599_v31 }
 0x548   : > { %v6736_v40 = vsub.f32 %v15665_v52, %v18907_v27  ;;  %v15973_v51 = vsub.f32 %v18908_v60, %v18909_v28  ;;  %v17420_v2 = vand.u32 4294901760, %v15696_v22  ;;  %v17421_v27 = vand.u32 4294901760, %v15701_v3 }
 0x549   : > { %v6604_v50 = vand.u32 4294901760, %v6603_v15  ;;  %v6611_v52 = vand.u32 4294901760, %v6610_v20  ;;  %v18911_v60 = vand.u32 4294901760, %v15670_v12  ;;  %v17424_v54 = vand.u32 4294901760, %v18912_v38  ;;  %10602 = vmatprep.subr.bf16.mxu1 %v10601_v46  ;;  %v18918_v46 = vld [vmem:[#allocation63_spill] sm:$0xff] }
 0x54a   : > { %v6730_v11 = vand.u32 4294901760, %v6729_v58  ;;  %v6737_v47 = vand.u32 4294901760, %v6736_v40  ;;  %v18913_v32 = vand.u32 4294901760, %v15675_v39  ;;  %v18915_v23 = vand.u32 4294901760, %v18914_v49 }
 0x54b   : > { %v5762_v28 = vsub.f32 %v15670_v12, %v18911_v60  ;;  %v10411_v20 = vpack.c.bf16 %v5756_v56, %v5749_v44  ;;  %v18916_v58 = vand.u32 4294901760, %v15564_v36  ;;  %v5888_v21 = vsub.f32 %v15696_v22, %v17420_v2 }
 0x54c   : > { %v5769_v42 = vsub.f32 %v15675_v39, %v18913_v32  ;;  %v15991_v15 = vsub.f32 %v18914_v49, %v18915_v23  ;;  %v10413_v32 = vpack.c.bf16 %v5882_v8, %v5875_v25  ;;  %v5895_v49 = vsub.f32 %v15701_v3, %v17421_v27  ;;  %v18921_v23 = vld [vmem:[#allocation46_spill] sm:$0xff] }
 0x54d   : > { %v15998_v40 = vsub.f32 %v15564_v36, %v18916_v58  ;;  %v18919_v56 = vand.u32 4294901760, %v18918_v46  ;;  %v18922_v31 = vand.u32 4294901760, %v18921_v23  ;;  %v10603_v36 = vpack.c.bf16 %v6611_v52, %v6604_v50  ;;  %10412 = vmatpush3.bf16.xpose.msra.mxu0 %v10411_v20 }
 0x54e   : > { %v6617_v8 = vsub.f32 %v18912_v38, %v17424_v54  ;;  %v10605_v25 = vpack.c.bf16 %v6737_v47, %v6730_v11  ;;  %v5763_v58 = vand.u32 4294901760, %v5762_v28  ;;  %v5770_v2 = vand.u32 4294901760, %v5769_v42  ;;  %10414 = vmatprep.subr.bf16.mxu0 %v10413_v32  ;;  %v18926_v42 = vld [vmem:[#allocation45_spill] sm:$0xff] }
 0x54f   : > { %18917 = vst [vmem:[#allocation39_spill] sm:$0xff] %v15998_v40  ;;  %v16009_v44 = vsub.f32 %v18918_v46, %v18919_v56  ;;  %v16014_v60 = vsub.f32 %v18921_v23, %v18922_v31  ;;  %v18923_v27 = vand.u32 4294901760, %v15691_v18  ;;  %v18924_v46 = vand.u32 4294901760, %v15712_v62  ;;  %10604 = vmatpush3.bf16.xpose.msra.mxu1 %v10603_v36 }
 0x550   : > { %v18925_v31 = vand.u32 4294901760, %v15743_v30  ;;  %v5889_v28 = vand.u32 4294901760, %v5888_v21  ;;  %v5896_v11 = vand.u32 4294901760, %v5895_v49  ;;  %v18927_v20 = vand.u32 4294901760, %v18926_v42  ;;  %10606 = vmatprep.subr.bf16.mxu1 %v10605_v25 }
 0x551   : > { %18920 = vst [vmem:[#allocation58_spill] sm:$0xff] %v16009_v44  ;;  %v6624_v3 = vsub.f32 %v15691_v18, %v18923_v27  ;;  %v6743_v56 = vsub.f32 %v15712_v62, %v18924_v46  ;;  %v6618_v46 = vand.u32 4294901760, %v6617_v8  ;;  %v10415_v50 = vpack.c.bf16 %v5770_v2, %v5763_v58  ;;  %v18931_v62 = vld [vmem:[#allocation23_spill] sm:$0xff] }
 0x552   : > { %v6750_v52 = vsub.f32 %v15743_v30, %v18925_v31  ;;  %v16035_v54 = vsub.f32 %v18926_v42, %v18927_v20  ;;  %v18929_v47 = vand.u32 4294901760, %v15748_v6  ;;  %v18930_v8 = vand.u32 4294901760, %v15753_v0 }
 0x553   : > { %v6625_v23 = vand.u32 4294901760, %v6624_v3  ;;  %v6744_v49 = vand.u32 4294901760, %v6743_v56  ;;  %v18932_v31 = vand.u32 4294901760, %v18931_v62  ;;  %v10417_v3 = vpack.c.bf16 %v5896_v11, %v5889_v28 }
 0x554   : > { %18928 = vst [vmem:[#allocation35_spill] sm:$0xff] %v16035_v54  ;;  %v6751_v27 = vand.u32 4294901760, %v6750_v52  ;;  %v5776_v42 = vsub.f32 %v15748_v6, %v18929_v47  ;;  %v5783_v20 = vsub.f32 %v15753_v0, %v18930_v8  ;;  %v18934_v36 = vand.u32 4294901760, %v15782_v10  ;;  %v18936_v52 = vld [vmem:[#allocation26_spill] sm:$0xff] }
 0x555   : > { %v16050_v2 = vsub.f32 %v18931_v62, %v18932_v31  ;;  %v18935_v58 = vand.u32 4294901760, %v15805_v59  ;;  %v18937_v47 = vand.u32 4294901760, %v18936_v52  ;;  %v18939_v8 = vand.u32 4294901760, %v15758_v1  ;;  %10416 = vmatpush3.bf16.xpose.msra.mxu0 %v10415_v50 }
 0x556   : > { %v5902_v25 = vsub.f32 %v15782_v10, %v18934_v36  ;;  %v18940_v62 = vand.u32 4294901760, %v15768_v57  ;;  %v10607_v31 = vpack.c.bf16 %v6625_v23, %v6618_v46  ;;  %v18941_v36 = vand.u32 4294901760, %v15810_v61  ;;  %v18943_v10 = vld [vmem:[#allocation32_spill] sm:$0xff]  ;;  %10418 = vmatprep.subr.bf16.mxu0 %v10417_v3 }
 0x557   : > { %18933 = vst [vmem:[#allocation51_spill] sm:$0xff] %v16050_v2  ;;  %v5909_v56 = vsub.f32 %v15805_v59, %v18935_v58  ;;  %v16061_v32 = vsub.f32 %v18936_v52, %v18937_v47  ;;  %v6631_v21 = vsub.f32 %v15758_v1, %v18939_v8  ;;  %v18942_v59 = vand.u32 4294901760, %v15815_v13 }
 0x558   : > { %v6638_v28 = vsub.f32 %v15768_v57, %v18940_v62  ;;  %v6757_v58 = vsub.f32 %v15810_v61, %v18941_v36  ;;  %v18944_v0 = vand.u32 4294901760, %v18943_v10  ;;  %v10609_v62 = vpack.c.bf16 %v6751_v27, %v6744_v49  ;;  %10608 = vmatpush3.bf16.xpose.msra.mxu1 %v10607_v31  ;;  %v18949_v31 = vld [vmem:[#allocation25_spill] sm:$0xff] }
 0x559   : > { %18938 = vst [vmem:[#allocation89_spill] sm:$0xff] %v16061_v32  ;;  %v6764_v52 = vsub.f32 %v15815_v13, %v18942_v59  ;;  %v5777_v57 = vand.u32 4294901760, %v5776_v42  ;;  %v5784_v11 = vand.u32 4294901760, %v5783_v20  ;;  %v5903_v23 = vand.u32 4294901760, %v5902_v25  ;;  %v18947_v20 = vld [vmem:[#allocation36_spill] sm:$0xff] }
 0x55a   : > { %v16080_v8 = vsub.f32 %v18943_v10, %v18944_v0  ;;  %v5910_v46 = vand.u32 4294901760, %v5909_v56  ;;  %v17441_v36 = vand.u32 4294901760, %v15898_v5  ;;  %v17442_v61 = vand.u32 4294901760, %v15926_v35  ;;  %10610 = vmatprep.subr.bf16.mxu1 %v10609_v62  ;;  %v18951_v62 = vld [vmem:[#allocation27_spill] sm:$0xff] }
 0x55b   : > { %v6632_v1 = vand.u32 4294901760, %v6631_v21  ;;  %v6639_v59 = vand.u32 4294901760, %v6638_v28  ;;  %v18945_v47 = vand.u32 4294901760, %v15840_v55  ;;  %v17444_v0 = vand.u32 4294901760, %v15882_v41 }
 0x55c   : > { %v6758_v10 = vand.u32 4294901760, %v6757_v58  ;;  %v6765_v50 = vand.u32 4294901760, %v6764_v52  ;;  %v18946_v27 = vand.u32 4294901760, %v15868_v14  ;;  %v17443_v42 = vand.u32 4294901760, %v15893_v63 }
 0x55d   : > { %v5790_v13 = vsub.f32 %v15840_v55, %v18945_v47  ;;  %v18948_v3 = vand.u32 4294901760, %v18947_v20  ;;  %v10419_v25 = vpack.c.bf16 %v5784_v11, %v5777_v57  ;;  %v18950_v58 = vand.u32 4294901760, %v18949_v31 }
 0x55e   : > { %v5797_v49 = vsub.f32 %v15868_v14, %v18946_v27  ;;  %v10421_v47 = vpack.c.bf16 %v5910_v46, %v5903_v23  ;;  %v5916_v27 = vsub.f32 %v15898_v5, %v17441_v36  ;;  %v18952_v57 = vand.u32 4294901760, %v18951_v62 }
 0x55f   : > { %v16095_v21 = vsub.f32 %v18947_v20, %v18948_v3  ;;  %v16102_v52 = vsub.f32 %v18949_v31, %v18950_v58  ;;  %v5923_v20 = vsub.f32 %v15926_v35, %v17442_v61  ;;  %v18953_v3 = vld [vmem:[#allocation65_spill] sm:$0xff]  ;;  %v10611_v31 = vpack.c.bf16 %v6639_v59, %v6632_v1  ;;  %10420 = vmatpush3.bf16.xpose.msra.mxu0 %v10419_v25  ;;  %v18957_v25 = vld [vmem:[#allocation84_spill] sm:$0xff] }
 0x560   : > { %v16113_v11 = vsub.f32 %v18951_v62, %v18952_v57  ;;  %v18954_v28 = vand.u32 4294901760, %v18953_v3  ;;  %v6645_v23 = vsub.f32 %v15882_v41, %v17444_v0  ;;  %v10613_v46 = vpack.c.bf16 %v6765_v50, %v6758_v10  ;;  %10422 = vmatprep.subr.bf16.mxu0 %v10421_v47 }
 0x561   : > { %v5791_v58 = vand.u32 4294901760, %v5790_v13  ;;  %v5798_v36 = vand.u32 4294901760, %v5797_v49  ;;  %v6652_v61 = vsub.f32 %v15893_v63, %v17443_v42  ;;  %v18955_v62 = vand.u32 4294901760, %v15942_v17  ;;  %10612 = vmatpush3.bf16.xpose.msra.mxu1 %v10611_v31 }
 0x562   : > { %v16118_v56 = vsub.f32 %v18953_v3, %v18954_v28  ;;  %v18956_v28 = vand.u32 4294901760, %v15953_v33  ;;  %v5917_v13 = vand.u32 4294901760, %v5916_v27  ;;  %v5924_v10 = vand.u32 4294901760, %v5923_v20  ;;  %10614 = vmatprep.subr.bf16.mxu1 %v10613_v46 }
 0x563   : > { %v6771_v57 = vsub.f32 %v15942_v17, %v18955_v62  ;;  %v18958_v42 = vand.u32 4294901760, %v18957_v25  ;;  %v6646_v62 = vand.u32 4294901760, %v6645_v23  ;;  %v17449_v17 = vand.u32 4294901760, %v15998_v40 }
 0x564   : > { %v6778_v1 = vsub.f32 %v15953_v33, %v18956_v28  ;;  %v10423_v59 = vpack.c.bf16 %v5798_v36, %v5791_v58  ;;  %v6653_v3 = vand.u32 4294901760, %v6652_v61  ;;  %v17452_v47 = vand.u32 4294901760, %v16050_v2 }
 0x565   : > { %v16139_v0 = vsub.f32 %v18957_v25, %v18958_v42  ;;  %v6772_v20 = vand.u32 4294901760, %v6771_v57  ;;  %v18959_v50 = vand.u32 4294901760, %v15973_v51  ;;  %v18960_v23 = vand.u32 4294901760, %v15991_v15 }
 0x566   : > { %v6779_v49 = vand.u32 4294901760, %v6778_v1  ;;  %v18961_v28 = vand.u32 4294901760, %v15733_v24  ;;  %v10425_v61 = vpack.c.bf16 %v5924_v10, %v5917_v13  ;;  %v18963_v31 = vand.u32 4294901760, %v16014_v60  ;;  %v18965_v1 = vld [vmem:[#allocation16_spill] sm:$0xff] }
 0x567   : > { %v5804_v42 = vsub.f32 %v15973_v51, %v18959_v50  ;;  %v5811_v25 = vsub.f32 %v15991_v15, %v18960_v23  ;;  %v18964_v58 = vand.u32 4294901760, %v16035_v54  ;;  %v18966_v50 = vand.u32 4294901760, %v18965_v1  ;;  %10424 = vmatpush3.bf16.xpose.msra.mxu0 %v10423_v59 }
 0x568   : > { %v16154_v36 = vsub.f32 %v15733_v24, %v18961_v28  ;;  %v5930_v46 = vsub.f32 %v16014_v60, %v18963_v31  ;;  %v6659_v23 = vsub.f32 %v15998_v40, %v17449_v17  ;;  %v18968_v24 = vand.u32 4294901760, %v16009_v44  ;;  %10426 = vmatprep.subr.bf16.mxu0 %v10425_v61 }
 0x569   : > { %v5937_v57 = vsub.f32 %v16035_v54, %v18964_v58  ;;  %v16165_v27 = vsub.f32 %v18965_v1, %v18966_v50  ;;  %v10615_v28 = vpack.c.bf16 %v6653_v3, %v6646_v62  ;;  %v6785_v31 = vsub.f32 %v16050_v2, %v17452_v47 }
 0x56a   : > { %18962 = vst [vmem:[#allocation71_spill] sm:$0xff] %v16154_v36  ;;  %v6666_v13 = vsub.f32 %v16009_v44, %v18968_v24  ;;  %v18969_v58 = vand.u32 4294901760, %v16061_v32  ;;  %v18970_v54 = vand.u32 4294901760, %v15791_v48  ;;  %v10617_v24 = vpack.c.bf16 %v6779_v49, %v6772_v20 }
 0x56b   : > { %18967 = vst [vmem:[#allocation72_spill] sm:$0xff] %v16165_v27  ;;  %v5805_v44 = vand.u32 4294901760, %v5804_v42  ;;  %v5812_v10 = vand.u32 4294901760, %v5811_v25  ;;  %v5931_v3 = vand.u32 4294901760, %v5930_v46  ;;  %v5938_v62 = vand.u32 4294901760, %v5937_v57  ;;  %10616 = vmatpush3.bf16.xpose.msra.mxu1 %v10615_v28 }
 0x56c   : > { %v6792_v1 = vsub.f32 %v16061_v32, %v18969_v58  ;;  %v16184_v17 = vsub.f32 %v15791_v48, %v18970_v54  ;;  %v17468_v47 = vand.u32 4294901760, %v16118_v56  ;;  %v17467_v2 = vand.u32 4294901760, %v16139_v0  ;;  %10618 = vmatprep.subr.bf16.mxu1 %v10617_v24 }
 0x56d   : > { %v6660_v40 = vand.u32 4294901760, %v6659_v23  ;;  %v6667_v58 = vand.u32 4294901760, %v6666_v13  ;;  %v18972_v50 = vand.u32 4294901760, %v16080_v8  ;;  %v17466_v48 = vand.u32 4294901760, %v16102_v52 }
 0x56e   : > { %18971 = vst [vmem:[#allocation22_spill] sm:$0xff] %v16184_v17  ;;  %v6786_v54 = vand.u32 4294901760, %v6785_v31  ;;  %v6793_v59 = vand.u32 4294901760, %v6792_v1  ;;  %v18973_v49 = vand.u32 4294901760, %v16095_v21  ;;  %v17460_v42 = vand.u32 4294901760, %v16113_v11 }
 0x56f   : > { %v5818_v32 = vsub.f32 %v16080_v8, %v18972_v50  ;;  %v18974_v25 = vand.u32 4294901760, %v15794_v7  ;;  %v10427_v46 = vpack.c.bf16 %v5812_v10, %v5805_v44  ;;  %v17459_v57 = vand.u32 4294901760, %v16154_v36 }
 0x570   : > { %v5825_v20 = vsub.f32 %v16095_v21, %v18973_v49  ;;  %v17461_v23 = vand.u32 4294901760, %v16165_v27  ;;  %v10429_v13 = vpack.c.bf16 %v5938_v62, %v5931_v3  ;;  %v5944_v28 = vsub.f32 %v16118_v56, %v17468_v47  ;;  %v18999_v47 = vld [vmem:[#allocation18_spill] sm:$0xff] }
 0x571   : > { %v16199_v61 = vsub.f32 %v15794_v7, %v18974_v25  ;;  %v5951_v31 = vsub.f32 %v16139_v0, %v17467_v2  ;;  %v18976_v1 = vand.u32 4294901760, %v15825_v19  ;;  %v18978_v44 = vand.u32 4294901760, %v15828_v16  ;;  %10428 = vmatpush3.bf16.xpose.msra.mxu0 %v10427_v46  ;;  %v18998_v2 = vld [vmem:[#allocation96_spill] sm:$0xff] }
 0x572   : > { %v10619_v50 = vpack.c.bf16 %v6667_v58, %v6660_v40  ;;  %v6673_v24 = vsub.f32 %v16102_v52, %v17466_v48  ;;  %v10621_v3 = vpack.c.bf16 %v6793_v59, %v6786_v54  ;;  %v5819_v62 = vand.u32 4294901760, %v5818_v32  ;;  %10430 = vmatprep.subr.bf16.mxu0 %v10429_v13 }
 0x573   : > { %18975 = vst [vmem:[#allocation29_spill] sm:$0xff] %v16199_v61  ;;  %v16212_v7 = vsub.f32 %v15825_v19, %v18976_v1  ;;  %v16217_v10 = vsub.f32 %v15828_v16, %v18978_v44  ;;  %v5826_v49 = vand.u32 4294901760, %v5825_v20  ;;  %v6680_v25 = vsub.f32 %v16113_v11, %v17460_v42 }
 0x574   : > { %v6799_v19 = vsub.f32 %v16154_v36, %v17459_v57  ;;  %v6806_v16 = vsub.f32 %v16165_v27, %v17461_v23  ;;  %v17464_v40 = vand.u32 4294901760, %v16184_v17  ;;  %v17463_v58 = vand.u32 4294901760, %v16199_v61  ;;  %10620 = vmatpush3.bf16.xpose.msra.mxu1 %v10619_v50 }
 0x575   : > { %18977 = vst [vmem:[#allocation63_spill] sm:$0xff] %v16212_v7  ;;  %18979 = vst [vmem:[#allocation46_spill] sm:$0xff] %v16217_v10  ;;  %v5945_v32 = vand.u32 4294901760, %v5944_v28  ;;  %v5952_v54 = vand.u32 4294901760, %v5951_v31  ;;  %v6674_v59 = vand.u32 4294901760, %v6673_v24  ;;  %v10431_v20 = vpack.c.bf16 %v5826_v49, %v5819_v62  ;;  %10622 = vmatprep.subr.bf16.mxu1 %v10621_v3 }
 0x576   : > { %v6681_v1 = vand.u32 4294901760, %v6680_v25  ;;  %v17462_v46 = vand.u32 4294901760, %v16212_v7  ;;  %v17465_v44 = vand.u32 4294901760, %v16217_v10  ;;  %v6800_v57 = vand.u32 4294901760, %v6799_v19 }
 0x577   : > { %v6807_v42 = vand.u32 4294901760, %v6806_v16  ;;  %v5832_v23 = vsub.f32 %v16184_v17, %v17464_v40  ;;  %v5839_v13 = vsub.f32 %v16199_v61, %v17463_v58  ;;  %v10433_v28 = vpack.c.bf16 %v5952_v54, %v5945_v32  ;;  %v18980_v32 = vld [vmem:[#allocation24_spill] sm:$0xff] }
 0x578   : > { %v10623_v31 = vpack.c.bf16 %v6681_v1, %v6674_v59  ;;  %v6687_v50 = vsub.f32 %v16212_v7, %v17462_v46  ;;  %v6694_v24 = vsub.f32 %v16217_v10, %v17465_v44  ;;  %v18981_v54 = vld [vmem:[#allocation20_spill] sm:$0xff]  ;;  %v18982_v46 = vld [vmem:[#allocation38_spill] sm:$0xff] }
 0x579   : > { %10432 = vmatpush3.bf16.xpose.msra.mxu0 %v10431_v20  ;;  %v10625_v3 = vpack.c.bf16 %v6807_v42, %v6800_v57  ;;  %v5833_v62 = vand.u32 4294901760, %v5832_v23  ;;  %v5840_v49 = vand.u32 4294901760, %v5839_v13  ;;  %v10437_v59 = vpack.c.bf16 %v18981_v54, %v18980_v32  ;;  %v18983_v58 = vld [vmem:[#allocation28_spill] sm:$0xff]  ;;  %v18985_v23 = vld [vmem:[#allocation17_spill] sm:$0xff] }
 0x57a   : > { %10434 = vmatprep.subr.bf16.mxu0 %v10433_v28  ;;  %v6688_v25 = vand.u32 4294901760, %v6687_v50  ;;  %v6695_v19 = vand.u32 4294901760, %v6694_v24  ;;  %v10629_v40 = vpack.c.bf16 %v18983_v58, %v18982_v46  ;;  %v18984_v42 = vld [vmem:[#allocation64_spill] sm:$0xff]  ;;  %v18986_v20 = vld [vmem:[#allocation57_spill] sm:$0xff]  ;;  %v10631_v28 = vpack.c.bf16 %v15572_v53, %v15552_v37  ;;  %v18988_v24 = vld [vmem:[#allocation78_spill] sm:$0xff] }
 0x57b   : > { %v10435_v16 = vpack.c.bf16 %v5840_v49, %v5833_v62  ;;  %v10439_v57 = vpack.c.bf16 %v18984_v42, %v15536_v45  ;;  %v10441_v13 = vpack.c.bf16 %v18986_v20, %v18985_v23  ;;  %v18989_v62 = vld [vmem:[#allocation15_spill] sm:$0xff]  ;;  %v18990_v49 = vld [vmem:[#allocation61_spill] sm:$0xff] }
 0x57c   : > { %10624 = vmatpush3.bf16.xpose.msra.mxu1 %v10623_v31  ;;  %v10627_v1 = vpack.c.bf16 %v6695_v19, %v6688_v25  ;;  %v18987_v31 = vld [vmem:[#allocation59_spill] sm:$0xff]  ;;  %v10635_v25 = vpack.c.bf16 %v18990_v49, %v18989_v62  ;;  %v18991_v19 = vld [vmem:[#allocation50_spill] sm:$0xff] }
 0x57d   : > { %10626 = vmatprep.subr.bf16.mxu1 %v10625_v3  ;;  %v10633_v50 = vpack.c.bf16 %v15601_v29, %v18987_v31  ;;  %v10445_v3 = vpack.c.bf16 %v15643_v9, %v15638_v34 }
 0x581   : > { %10436 = vmatpush3.bf16.xpose.msra.mxu0 %v10435_v16  ;;  %v18992_v16 = vld [vmem:[#allocation74_spill] sm:$0xff] }
 0x582   : > { %10438 = vmatprep.subr.bf16.mxu0 %v10437_v59  ;;  %v10637_v59 = vpack.c.bf16 %v18992_v16, %v18991_v19 }
 0x584   : > { %10628 = vmatpush3.bf16.xpose.msra.mxu1 %v10627_v1  ;;  %v10447_v1 = vpack.c.bf16 %v15675_v39, %v15670_v12  ;;  %v10643_v39 = vpack.c.bf16 %v18999_v47, %v18998_v2 }
 0x585   : > { %10630 = vmatprep.subr.bf16.mxu1 %v10629_v40  ;;  %v10443_v40 = vpack.c.bf16 %v15611_v43, %v15606_v26 }
 0x588   : > { %8880 = vmatmul.mubr.f32.vlgmr.msra.gmra.mrb[6].mxu0 %v18910_v4 }
 0x589   : > { %10440 = vmatpush3.bf16.xpose.msra.mxu0 %v10439_v57  ;;  %8913 = vmatprep.mubr.f32.mxu0 %v18988_v24  ;;  %v18993_v57 = vld [vmem:[#allocation33_spill] sm:$0xff] }
 0x58a   : > { %10442 = vmatprep.subr.bf16.mxu0 %v10441_v13  ;;  %v10449_v13 = vpack.c.bf16 %v18993_v57, %v15696_v22  ;;  %v19000_v57 = vld [vmem:[#allocation52_spill] sm:$0xff]  ;;  %v19001_v22 = vld [vmem:[#allocation81_spill] sm:$0xff] }
 0x58b   : > { %9084 = vmatmul.mubr.f32.vlgmr.msra.gmra.mrb[6].mxu1 %v18910_v4 }
 0x58c   : > { %10632 = vmatpush3.bf16.xpose.msra.mxu1 %v10631_v28  ;;  %9117 = vmatprep.mubr.f32.mxu1 %v18988_v24  ;;  %v10639_v28 = vpack.c.bf16 %v15691_v18, %v18912_v38  ;;  %v10645_v18 = vpack.c.bf16 %v19001_v22, %v19000_v57 }
 0x58d   : > { %10634 = vmatprep.subr.bf16.mxu1 %v10633_v50  ;;  %v18994_v50 = vld [vmem:[#allocation56_spill] sm:$0xff] }
 0x58e   : > { %v10641_v44 = vpack.c.bf16 %v15743_v30, %v18994_v50 }
 0x591   : > { %10444 = vmatpush3.bf16.xpose.msra.mxu0 %v10443_v40  ;;  %v18995_v40 = vld [vmem:[#allocation92_spill] sm:$0xff] }
 0x592   : > { %10446 = vmatprep.subr.bf16.mxu0 %v10445_v3  ;;  %v10451_v3 = vpack.c.bf16 %v18995_v40, %v15748_v6 }
 0x594   : > { %10636 = vmatpush3.bf16.xpose.msra.mxu1 %v10635_v25  ;;  %v18996_v25 = vld [vmem:[#allocation41_spill] sm:$0xff] }
 0x595   : > { %10638 = vmatprep.subr.bf16.mxu1 %v10637_v59  ;;  %v18997_v59 = vld [vmem:[#allocation49_spill] sm:$0xff] }
 0x596   : > { %v10453_v48 = vpack.c.bf16 %v18997_v59, %v18996_v25 }
 0x599   : > { %10448 = vmatpush3.bf16.xpose.msra.mxu0 %v10447_v1  ;;  %v10455_v1 = vpack.c.bf16 %v15868_v14, %v15840_v55  ;;  %v19005_v14 = vld [vmem:[#allocation58_spill] sm:$0xff] }
 0x59a   : > { %10450 = vmatprep.subr.bf16.mxu0 %v10449_v13  ;;  %v10647_v13 = vpack.c.bf16 %v15893_v63, %v15882_v41 }
 0x59c   : > { %10640 = vmatpush3.bf16.xpose.msra.mxu1 %v10639_v28  ;;  %v19002_v28 = vld [vmem:[#allocation77_spill] sm:$0xff] }
 0x59d   : > { %10642 = vmatprep.subr.bf16.mxu1 %v10641_v44  ;;  %v10457_v44 = vpack.c.bf16 %v15926_v35, %v15898_v5  ;;  %v10649_v47 = vpack.c.bf16 %v15953_v33, %v19002_v28  ;;  %v19006_v35 = vld [vmem:[#allocation51_spill] sm:$0xff]  ;;  %v19007_v5 = vld [vmem:[#allocation89_spill] sm:$0xff] }
 0x59e   : > { %v10653_v63 = vpack.c.bf16 %v19007_v5, %v19006_v35 }
 0x5a1   : > { %10452 = vmatpush3.bf16.xpose.msra.mxu0 %v10451_v3  ;;  %v19004_v3 = vld [vmem:[#allocation39_spill] sm:$0xff] }
 0x5a2   : > { %10454 = vmatprep.subr.bf16.mxu0 %v10453_v48  ;;  %v10651_v55 = vpack.c.bf16 %v19005_v14, %v19004_v3 }
 0x5a4   : > { %10644 = vmatpush3.bf16.xpose.msra.mxu1 %v10643_v39  ;;  %v10459_v39 = vpack.c.bf16 %v15991_v15, %v15973_v51 }
 0x5a5   : > { %10646 = vmatprep.subr.bf16.mxu1 %v10645_v18  ;;  %v19003_v18 = vld [vmem:[#allocation35_spill] sm:$0xff] }
 0x5a6   : > { %v10461_v48 = vpack.c.bf16 %v19003_v18, %v16014_v60 }
 0x5a9   : > { %10456 = vmatpush3.bf16.xpose.msra.mxu0 %v10455_v1  ;;  %v10463_v1 = vpack.c.bf16 %v16095_v21, %v16080_v8 }
 0x5aa   : > { %10458 = vmatprep.subr.bf16.mxu0 %v10457_v44  ;;  %v10655_v44 = vpack.c.bf16 %v16113_v11, %v16102_v52 }
 0x5ac   : > { %10648 = vmatpush3.bf16.xpose.msra.mxu1 %v10647_v13  ;;  %v10657_v13 = vpack.c.bf16 %v16165_v27, %v16154_v36  ;;  %v19011_v27 = vld [vmem:[#allocation82_spill] sm:$0xff] }
 0x5ad   : > { %10650 = vmatprep.subr.bf16.mxu1 %v10649_v47  ;;  %v10465_v47 = vpack.c.bf16 %v16139_v0, %v16118_v56 }
 0x5b1   : > { %10460 = vmatpush3.bf16.xpose.msra.mxu0 %v10459_v39  ;;  %v19008_v39 = vld [vmem:[#allocation75_spill] sm:$0xff] }
 0x5b2   : > { %10462 = vmatprep.subr.bf16.mxu0 %v10461_v48  ;;  %v19009_v48 = vld [vmem:[#allocation43_spill] sm:$0xff] }
 0x5b4   : > { %10652 = vmatpush3.bf16.xpose.msra.mxu1 %v10651_v55  ;;  %v10467_v55 = vpack.c.bf16 %v16199_v61, %v16184_v17  ;;  %v19022_v61 = vld [vmem:[#allocation21_spill] sm:$0xff] }
 0x5b5   : > { %10654 = vmatprep.subr.bf16.mxu1 %v10653_v63  ;;  %v10659_v63 = vpack.c.bf16 %v16217_v10, %v16212_v7  ;;  %v19020_v10 = vld [vmem:[#allocation54_spill] sm:$0xff] }
 0x5b9   : > { %10464 = vmatpush3.bf16.xpose.msra.mxu0 %v10463_v1  ;;  %v19010_v1 = vld [vmem:[#allocation30_spill] sm:$0xff] }
 0x5ba   : > { %10466 = vmatprep.subr.bf16.mxu0 %v10465_v47  ;;  %v19012_v47 = vld [vmem:[#allocation37_spill] sm:$0xff] }
 0x5bc   : > { %10656 = vmatpush3.bf16.xpose.msra.mxu1 %v10655_v44  ;;  %v19013_v44 = vld [vmem:[#allocation73_spill] sm:$0xff] }
 0x5bd   : > { %10658 = vmatprep.subr.bf16.mxu1 %v10657_v13  ;;  %v19014_v13 = vld [vmem:[#allocation90_spill] sm:$0xff] }
 0x5c1   : > { %10468 = vmatpush3.bf16.xpose.msra.mxu0 %v10467_v55  ;;  %v19015_v55 = vld [vmem:[#allocation87_spill] sm:$0xff] }
 0x5c2   : > { %10470 = vmatprep.subr.bf16.mxu0 %v19008_v39  ;;  %v19018_v39 = vld [vmem:[#allocation69_spill] sm:$0xff] }
 0x5c4   : > { %10660 = vmatpush3.bf16.xpose.msra.mxu1 %v10659_v63  ;;  %v19016_v63 = vld [vmem:[#allocation93_spill] sm:$0xff] }
 0x5c5   : > { %10662 = vmatprep.subr.bf16.mxu1 %v19009_v48  ;;  %v19017_v48 = vld [vmem:[#allocation34_spill] sm:$0xff] }
 0x5c8   : > { %8914 = vmatmul.mubr.f32.vlgmr.msra.gmra.mrb[6].mxu0 %v18988_v24 }
 0x5c9   : > { %10472 = vmatpush3.bf16.xpose.msra.mxu0 %v19010_v1  ;;  %8947 = vmatprep.mubr.f32.mxu0 %v19011_v27  ;;  %v19019_v1 = vld [vmem:[#allocation79_spill] sm:$0xff] }
 0x5ca   : > { %10474 = vmatprep.subr.bf16.mxu0 %v19012_v47 }
 0x5cb   : > { %9118 = vmatmul.mubr.f32.vlgmr.msra.gmra.mrb[6].mxu1 %v18988_v24  ;;  %v19021_v24 = vld [vmem:[#allocation55_spill] sm:$0xff] }
 0x5cc   : > { %10664 = vmatpush3.bf16.xpose.msra.mxu1 %v19013_v44  ;;  %9151 = vmatprep.mubr.f32.mxu1 %v19011_v27 }
 0x5cd   : > { %10666 = vmatprep.subr.bf16.mxu1 %v19014_v13 }
 0x5cf   : > { %v4762_v47 = vpop.f32.mrb[4].mxu0 }
 0x5d0   : > { %v4764_v44 = vpop.f32.mrb[5].mxu0 }
 0x5d1   : > { %10476 = vmatpush3.bf16.xpose.msra.mxu0 %v19015_v55  ;;  %v7397_v7 = vcombine.low %v4762_v47, %v4764_v44  ;;  %v19023_v55 = vld [vmem:[#allocation62_spill] sm:$0xff]  ;;  %v19029_v47 = vld [vmem:[#allocation40_spill] sm:$0xff]  ;;  %v19030_v44 = vld [vmem:[#allocation67_spill] sm:$0xff] }
 0x5d2   : > { %10478 = vmatprep.subr.bf16.mxu0 %v19016_v63  ;;  %v5617_v13 = vpop.f32.mrb[4].mxu1 }
 0x5d3   : > { %v5619_v17 = vpop.f32.mrb[5].mxu1  ;;  %v16334_v36 = vrot.slane %v7397_v7, %v19023_v55  ;;  %v19032_v7 = vld [vmem:[#allocation14_spill] sm:$0xff] }
 0x5d4   : > { %10668 = vmatpush3.bf16.xpose.msra.mxu1 %v19017_v48  ;;  %v7398_v63 = vcombine.low %v5617_v13, %v5619_v17  ;;  %v19025_v48 = vld [vmem:[#allocation76_spill] sm:$0xff]  ;;  %v19033_v17 = vld [vmem:[#allocation19_spill] sm:$0xff] }
 0x5d5   : > { %10670 = vmatprep.subr.bf16.mxu1 %v19018_v39  ;;  %19024 = vst [vmem:[#allocation45_spill] sm:$0xff] %v16334_v36  ;;  %v19034_v13 = vld [vmem:[#allocation47_spill] sm:$0xff]  ;;  %v19040_v36 = vld [vmem:[#allocation88_spill] sm:$0xff] }
 0x5d6   : > { %v16338_v39 = vrot.slane %v7398_v63, %v19023_v55  ;;  %v19035_v63 = vld [vmem:[#allocation83_spill] sm:$0xff]  ;;  %v19036_v55 = vld [vmem:[#allocation60_spill] sm:$0xff] }
 0x5d8   : > { %19026 = vst [vmem:[#allocation23_spill] sm:$0xff] %v16338_v39  ;;  %v19039_v39 = vld [vmem:[#allocation48_spill] sm:$0xff] }
 0x5d9   : > { %10480 = vmatpush3.bf16.xpose.msra.mxu0 %v19019_v1  ;;  %v19027_v1 = vld [vmem:[#allocation85_spill] sm:$0xff] }
 0x5da   : > { %10482 = vmatprep.subr.bf16.mxu0 %v19020_v10  ;;  %v19028_v10 = vld [vmem:[#allocation91_spill] sm:$0xff] }
 0x5dc   : > { %10672 = vmatpush3.bf16.xpose.msra.mxu1 %v19021_v24  ;;  %v19038_v24 = vld [vmem:[#allocation42_spill] sm:$0xff] }
 0x5dd   : > { %10674 = vmatprep.subr.bf16.mxu1 %v19022_v61  ;;  %v19031_v61 = vld [vmem:[#allocation31_spill] sm:$0xff] }
 0x5e1   : > { %10484 = vmatpush3.bf16.xpose.msra.mxu0 %v19025_v48 }
 0x5e2   : > { %10486 = vmatprep.subr.bf16.mxu0 %v19027_v1  ;;  %v19037_v1 = vld [vmem:[#allocation66_spill] sm:$0xff] }
 0x5e4   : > { %10676 = vmatpush3.bf16.xpose.msra.mxu1 %v19028_v10 }
 0x5e5   : > { %10678 = vmatprep.subr.bf16.mxu1 %v19029_v47 }
 0x5e9   : > { %10488 = vmatpush3.bf16.xpose.msra.mxu0 %v19030_v44  ;;  %v19041_v44 = vld [vmem:[#allocation95_spill] sm:$0xff] }
 0x5ea   : > { %10490 = vmatprep.subr.bf16.mxu0 %v19031_v61 }
 0x5ec   : > { %10680 = vmatpush3.bf16.xpose.msra.mxu1 %v19032_v7  ;;  %v19042_v7 = vand.u32 4294901760, %v18980_v32  ;;  %v19050_v32 = vand.u32 4294901760, %v18985_v23  ;;  %v19059_v23 = vand.u32 4294901760, %v15643_v9 }
 0x5ed   : > { %10682 = vmatprep.subr.bf16.mxu1 %v19033_v17  ;;  %v19043_v17 = vand.u32 4294901760, %v18981_v54  ;;  %v19051_v54 = vand.u32 4294901760, %v18986_v20  ;;  %v19060_v20 = vand.u32 4294901760, %v18989_v62  ;;  %v19069_v62 = vld [vmem:[#allocation33_spill] sm:$0xff] }
 0x5ef   : > { %v10501_v61 = vpack.c.bf16 %v19043_v17, %v19042_v7  ;;  %v10505_v7 = vpack.c.bf16 %v19051_v54, %v19050_v32  ;;  %v19070_v54 = vand.u32 4294901760, %v19069_v62  ;;  %v19099_v62 = vand.u32 4294901760, %v15991_v15 }
 0x5f0   : > { %v19107_v15 = vand.u32 4294901760, %v16095_v21 }
 0x5f1   : > { %10492 = vmatpush3.bf16.xpose.msra.mxu0 %v19034_v13  ;;  %v19044_v13 = vld [vmem:[#allocation68_spill] sm:$0xff] }
 0x5f2   : > { %10494 = vmatprep.subr.bf16.mxu0 %v19035_v63  ;;  %v19045_v63 = vand.u32 4294901760, %v18982_v46  ;;  %v19052_v46 = vand.u32 4294901760, %v15552_v37  ;;  %v19056_v37 = vand.u32 4294901760, %v15606_v26  ;;  %v19064_v26 = vand.u32 4294901760, %v15670_v12 }
 0x5f3   : > { %v19076_v12 = vand.u32 4294901760, %v15748_v6  ;;  %v19085_v6 = vld [vmem:[#allocation94_spill] sm:$0xff] }
 0x5f4   : > { %10684 = vmatpush3.bf16.xpose.msra.mxu1 %v19036_v55  ;;  %v19046_v55 = vand.u32 4294901760, %v18983_v58  ;;  %v19053_v58 = vand.u32 4294901760, %v15572_v53  ;;  %v19057_v53 = vand.u32 4294901760, %v15611_v43  ;;  %v19065_v43 = vld [vmem:[#allocation13_spill] sm:$0xff] }
 0x5f5   : > { %10686 = vmatprep.subr.bf16.mxu1 %v19037_v1 }
 0x5f6   : > { %v10693_v1 = vpack.c.bf16 %v19046_v55, %v19045_v63  ;;  %v19067_v63 = vld [vmem:[#allocation80_spill] sm:$0xff] }
 0x5f7   : > { %v19068_v32 = vand.u32 4294901760, %v19067_v63 }
 0x5f9   : > { %10496 = vmatpush3.bf16.xpose.msra.mxu0 %v19038_v24  ;;  %v19047_v24 = vld [vmem:[#allocation44_spill] sm:$0xff] }
 0x5fa   : > { %10498 = vmatprep.subr.bf16.mxu0 %v19039_v39 }
 0x5fc   : > { %10688 = vmatpush3.bf16.xpose.msra.mxu1 %v19040_v36  ;;  %v19048_v36 = vand.u32 4294901760, %v15536_v45  ;;  %v19055_v45 = vand.u32 4294901760, %v15601_v29 }
 0x5fd   : > { %10690 = vmatprep.subr.bf16.mxu1 %v19041_v44  ;;  %v19049_v44 = vand.u32 4294901760, %v18984_v42  ;;  %v19058_v42 = vand.u32 4294901760, %v15638_v34  ;;  %v19066_v34 = vand.u32 4294901760, %v19065_v43  ;;  %v19094_v43 = vld [vmem:[#allocation70_spill] sm:$0xff] }
 0x5ff   : > { %v10503_v39 = vpack.c.bf16 %v19049_v44, %v19048_v36  ;;  %v10507_v36 = vpack.c.bf16 %v19057_v53, %v19056_v37  ;;  %v10509_v29 = vpack.c.bf16 %v19059_v23, %v19058_v42  ;;  %v19063_v44 = vand.u32 4294901760, %v18992_v16  ;;  %v19081_v42 = vld [vmem:[#allocation18_spill] sm:$0xff] }
 0x600   : > { %v10511_v9 = vpack.c.bf16 %v19066_v34, %v19064_v26  ;;  %v19074_v16 = vand.u32 4294901760, %v18994_v50  ;;  %v19078_v37 = vand.u32 4294901760, %v18996_v25  ;;  %v19082_v50 = vand.u32 4294901760, %v19081_v42  ;;  %v19087_v25 = vld [vmem:[#allocation98_spill] sm:$0xff] }
 0x601   : > { %10500 = vmatpush3.bf16.xpose.msra.mxu0 %v19044_v13  ;;  %v19093_v26 = vand.u32 4294901760, %v15882_v41  ;;  %v19101_v41 = vand.u32 4294901760, %v19003_v18  ;;  %v19108_v18 = vand.u32 4294901760, %v16118_v56  ;;  %v19118_v56 = vld [vmem:[#allocation29_spill] sm:$0xff] }
 0x602   : > { %10502 = vmatprep.subr.bf16.mxu0 %v10501_v61  ;;  %v10695_v61 = vpack.c.bf16 %v19053_v58, %v19052_v46  ;;  %v19072_v46 = vld [vmem:[#allocation97_spill] sm:$0xff] }
 0x604   : > { %10692 = vmatpush3.bf16.xpose.msra.mxu1 %v19047_v24 }
 0x605   : > { %10694 = vmatprep.subr.bf16.mxu1 %v10693_v1  ;;  %v19054_v1 = vand.u32 4294901760, %v18987_v31  ;;  %v19061_v31 = vand.u32 4294901760, %v18990_v49  ;;  %v10513_v49 = vpack.c.bf16 %v19070_v54, %v19068_v32  ;;  %v19098_v32 = vand.u32 4294901760, %v15973_v51 }
 0x606   : > { %v19106_v51 = vand.u32 4294901760, %v16080_v8  ;;  %v19116_v8 = vld [vmem:[#allocation22_spill] sm:$0xff] }
 0x607   : > { %v10697_v55 = vpack.c.bf16 %v19055_v45, %v19054_v1  ;;  %v19077_v45 = vand.u32 4294901760, %v18995_v40  ;;  %v19086_v40 = vand.u32 4294901760, %v19085_v6  ;;  %v10523_v54 = vpack.c.bf16 %v19099_v62, %v19098_v32  ;;  %v19129_v6 = vld [vmem:[#allocation90_spill] sm:$0xff]  ;;  %v19150_v62 = vld [vmem:[#allocation95_spill] sm:$0xff] }
 0x608   : > { %8948 = vmatmul.mubr.f32.vlgmr.msra.gmra.mrb[6].mxu0 %v19011_v27  ;;  %v19117_v21 = vand.u32 4294901760, %v19116_v8  ;;  %v19147_v32 = vld [vmem:[#allocation42_spill] sm:$0xff] }
 0x609   : > { %10504 = vmatpush3.bf16.xpose.msra.mxu0 %v10503_v39  ;;  %8981 = vmatprep.mubr.f32.mxu0 %v18910_v4  ;;  %v10699_v39 = vpack.c.bf16 %v19061_v31, %v19060_v20  ;;  %v19088_v31 = vand.u32 4294901760, %v19087_v25  ;;  %v19131_v25 = vld [vmem:[#allocation93_spill] sm:$0xff] }
 0x60a   : > { %10506 = vmatprep.subr.bf16.mxu0 %v10505_v7  ;;  %v19071_v7 = vand.u32 4294901760, %v18912_v38  ;;  %v19079_v38 = vand.u32 4294901760, %v18997_v59 }
 0x60b   : > { %9152 = vmatmul.mubr.f32.vlgmr.msra.gmra.mrb[6].mxu1 %v19011_v27  ;;  %v19062_v27 = vand.u32 4294901760, %v18991_v19  ;;  %v19073_v19 = vand.u32 4294901760, %v19072_v46  ;;  %v10519_v59 = vpack.c.bf16 %v19088_v31, %v19086_v40  ;;  %v19102_v46 = vand.u32 4294901760, %v19004_v3  ;;  %v19130_v40 = vld [vmem:[#allocation87_spill] sm:$0xff]  ;;  %v19132_v31 = vld [vmem:[#allocation34_spill] sm:$0xff] }
 0x60c   : > { %10696 = vmatpush3.bf16.xpose.msra.mxu1 %v10695_v61  ;;  %9185 = vmatprep.mubr.f32.mxu1 %v18910_v4  ;;  %v19075_v61 = vand.u32 4294901760, %v15743_v30  ;;  %v10517_v53 = vpack.c.bf16 %v19079_v38, %v19078_v37  ;;  %v19083_v30 = vand.u32 4294901760, %v19000_v57  ;;  %v19095_v57 = vand.u32 4294901760, %v19094_v43  ;;  %v19140_v43 = vld [vmem:[#allocation31_spill] sm:$0xff] }
 0x60d   : > { %10698 = vmatprep.subr.bf16.mxu1 %v10697_v55  ;;  %v10701_v17 = vpack.c.bf16 %v19063_v44, %v19062_v27  ;;  %v10703_v58 = vpack.c.bf16 %v19073_v19, %v19071_v7  ;;  %v10515_v55 = vpack.c.bf16 %v19077_v45, %v19076_v12  ;;  %v19109_v3 = vand.u32 4294901760, %v16139_v0  ;;  %v19114_v45 = vld [vmem:[#allocation72_spill] sm:$0xff] }
 0x60e   : > { %v10705_v1 = vpack.c.bf16 %v19075_v61, %v19074_v16  ;;  %v10711_v34 = vpack.c.bf16 %v19095_v57, %v19093_v26  ;;  %v19110_v61 = vand.u32 4294901760, %v16102_v52  ;;  %v19119_v38 = vand.u32 4294901760, %v19118_v56  ;;  %v19122_v52 = vld [vmem:[#allocation46_spill] sm:$0xff]  ;;  %v19139_v26 = vld [vmem:[#allocation67_spill] sm:$0xff] }
 0x60f   : > { %v19123_v42 = vand.u32 4294901760, %v19122_v52  ;;  %v19141_v57 = vld [vmem:[#allocation14_spill] sm:$0xff] }
 0x610   : > { %v10531_v0 = vpack.c.bf16 %v19119_v38, %v19117_v21 }
 0x611   : > { %10508 = vmatpush3.bf16.xpose.msra.mxu0 %v10507_v36  ;;  %v19080_v36 = vand.u32 4294901760, %v18998_v2  ;;  %v19091_v2 = vld [vmem:[#allocation86_spill] sm:$0xff] }
 0x612   : > { %10510 = vmatprep.subr.bf16.mxu0 %v10509_v29  ;;  %v19084_v29 = vand.u32 4294901760, %v19001_v22  ;;  %v19092_v44 = vand.u32 4294901760, %v19091_v2  ;;  %v19096_v22 = vand.u32 4294901760, %v19002_v28  ;;  %v19103_v28 = vand.u32 4294901760, %v19005_v14  ;;  %v19136_v2 = vld [vmem:[#allocation55_spill] sm:$0xff] }
 0x613   : > { %v10707_v23 = vpack.c.bf16 %v19082_v50, %v19080_v36  ;;  %v10529_v14 = vpack.c.bf16 %v19109_v3, %v19108_v18  ;;  %v19124_v50 = vld [vmem:[#allocation75_spill] sm:$0xff]  ;;  %v19155_v18 = vstv %s14981_s22 }
 0x614   : > { %10700 = vmatpush3.bf16.xpose.msra.mxu1 %v10699_v39  ;;  %v10709_v20 = vpack.c.bf16 %v19084_v29, %v19083_v30  ;;  %v19089_v39 = vld [vmem:[#allocation53_spill] sm:$0xff]  ;;  %v10715_v19 = vpack.c.bf16 %v19103_v28, %v19102_v46  ;;  %v19126_v30 = vld [vmem:[#allocation30_spill] sm:$0xff] }
 0x615   : > { %10702 = vmatprep.subr.bf16.mxu1 %v10701_v17  ;;  %v19090_v27 = vand.u32 4294901760, %v19089_v39  ;;  %v19127_v29 = vld [vmem:[#allocation37_spill] sm:$0xff]  ;;  %v19134_v39 = vld [vmem:[#allocation79_spill] sm:$0xff]  ;;  %v19151_v28 = vld [vmem:[#allocation62_spill] sm:$0xff] }
 0x617   : > { %v10521_v17 = vpack.c.bf16 %v19092_v44, %v19090_v27  ;;  %v19135_v27 = vld [vmem:[#allocation54_spill] sm:$0xff]  ;;  %v19137_v44 = vld [vmem:[#allocation21_spill] sm:$0xff] }
 0x619   : > { %10512 = vmatpush3.bf16.xpose.msra.mxu0 %v10511_v9  ;;  %v19097_v9 = vand.u32 4294901760, %v15953_v33  ;;  %v19104_v33 = vand.u32 4294901760, %v19006_v35  ;;  %v19111_v35 = vand.u32 4294901760, %v16113_v11 }
 0x61a   : > { %10514 = vmatprep.subr.bf16.mxu0 %v10513_v49  ;;  %v19100_v49 = vand.u32 4294901760, %v16014_v60  ;;  %v10527_v60 = vpack.c.bf16 %v19107_v15, %v19106_v51 }
 0x61b   : > { %v10713_v63 = vpack.c.bf16 %v19097_v9, %v19096_v22  ;;  %v19143_v22 = vld [vmem:[#allocation47_spill] sm:$0xff] }
 0x61c   : > { %10704 = vmatpush3.bf16.xpose.msra.mxu1 %v10703_v58  ;;  %v10525_v7 = vpack.c.bf16 %v19101_v41, %v19100_v49  ;;  %v19105_v58 = vand.u32 4294901760, %v19007_v5  ;;  %v19112_v5 = vld [vmem:[#allocation71_spill] sm:$0xff] }
 0x61d   : > { %10706 = vmatprep.subr.bf16.mxu1 %v10705_v1  ;;  %v10719_v1 = vpack.c.bf16 %v19111_v35, %v19110_v61  ;;  %v19113_v12 = vand.u32 4294901760, %v19112_v5  ;;  %v19144_v9 = vld [vmem:[#allocation83_spill] sm:$0xff] }
 0x61e   : > { %v10717_v16 = vpack.c.bf16 %v19105_v58, %v19104_v33 }
 0x621   : > { %10516 = vmatpush3.bf16.xpose.msra.mxu0 %v10515_v55  ;;  %v19115_v55 = vand.u32 4294901760, %v19114_v45 }
 0x622   : > { %10518 = vmatprep.subr.bf16.mxu0 %v10517_v53  ;;  %v19120_v53 = vld [vmem:[#allocation63_spill] sm:$0xff] }
 0x623   : > { %v10721_v37 = vpack.c.bf16 %v19115_v55, %v19113_v12  ;;  %v19121_v36 = vand.u32 4294901760, %v19120_v53 }
 0x624   : > { %10708 = vmatpush3.bf16.xpose.msra.mxu1 %v10707_v23  ;;  %v19125_v23 = vld [vmem:[#allocation43_spill] sm:$0xff] }
 0x625   : > { %10710 = vmatprep.subr.bf16.mxu1 %v10709_v20  ;;  %v10723_v11 = vpack.c.bf16 %v19123_v42, %v19121_v36  ;;  %v19128_v20 = vld [vmem:[#allocation73_spill] sm:$0xff] }
 0x629   : > { %10520 = vmatpush3.bf16.xpose.msra.mxu0 %v10519_v59  ;;  %v19133_v59 = vld [vmem:[#allocation69_spill] sm:$0xff] }
 0x62a   : > { %10522 = vmatprep.subr.bf16.mxu0 %v10521_v17  ;;  %v19138_v17 = vld [vmem:[#allocation85_spill] sm:$0xff] }
 0x62c   : > { %10712 = vmatpush3.bf16.xpose.msra.mxu1 %v10711_v34  ;;  %v19142_v34 = vld [vmem:[#allocation19_spill] sm:$0xff] }
 0x62d   : > { %10714 = vmatprep.subr.bf16.mxu1 %v10713_v63  ;;  %v19145_v63 = vld [vmem:[#allocation60_spill] sm:$0xff] }
 0x631   : > { %10524 = vmatpush3.bf16.xpose.msra.mxu0 %v10523_v54 }
 0x632   : > { %10526 = vmatprep.subr.bf16.mxu0 %v10525_v7 }
 0x634   : > { %10716 = vmatpush3.bf16.xpose.msra.mxu1 %v10715_v19 }
 0x635   : > { %10718 = vmatprep.subr.bf16.mxu1 %v10717_v16  ;;  %v19153_v16 = vld [vmem:[#allocation23_spill] sm:$0xff] }
 0x639   : > { %10528 = vmatpush3.bf16.xpose.msra.mxu0 %v10527_v60 }
 0x63a   : > { %10530 = vmatprep.subr.bf16.mxu0 %v10529_v14 }
 0x63c   : > { %10720 = vmatpush3.bf16.xpose.msra.mxu1 %v10719_v1 }
 0x63d   : > { %10722 = vmatprep.subr.bf16.mxu1 %v10721_v37 }
 0x641   : > { %10532 = vmatpush3.bf16.xpose.msra.mxu0 %v10531_v0 }
 0x642   : > { %10534 = vmatprep.subr.bf16.mxu0 %v19124_v50 }
 0x644   : > { %10724 = vmatpush3.bf16.xpose.msra.mxu1 %v10723_v11 }
 0x645   : > { %10726 = vmatprep.subr.bf16.mxu1 %v19125_v23 }
 0x648   : > { %8982 = vmatmul.mubr.f32.vlgmr.msra.gmra.mrb[6].mxu0 %v18910_v4 }
 0x649   : > { %10536 = vmatpush3.bf16.xpose.msra.mxu0 %v19126_v30  ;;  %9015 = vmatprep.mubr.f32.mxu0 %v18910_v4 }
 0x64a   : > { %10538 = vmatprep.subr.bf16.mxu0 %v19127_v29 }
 0x64b   : > { %9186 = vmatmul.mubr.f32.vlgmr.msra.gmra.mrb[6].mxu1 %v18910_v4 }
 0x64c   : > { %10728 = vmatpush3.bf16.xpose.msra.mxu1 %v19128_v20  ;;  %9219 = vmatprep.mubr.f32.mxu1 %v18910_v4 }
 0x64d   : > { %10730 = vmatprep.subr.bf16.mxu1 %v19129_v6 }
 0x651   : > { %10540 = vmatpush3.bf16.xpose.msra.mxu0 %v19130_v40 }
 0x652   : > { %10542 = vmatprep.subr.bf16.mxu0 %v19131_v25 }
 0x654   : > { %10732 = vmatpush3.bf16.xpose.msra.mxu1 %v19132_v31 }
 0x655   : > { %10734 = vmatprep.subr.bf16.mxu1 %v19133_v59 }
 0x659   : > { %10544 = vmatpush3.bf16.xpose.msra.mxu0 %v19134_v39 }
 0x65a   : > { %10546 = vmatprep.subr.bf16.mxu0 %v19135_v27 }
 0x65c   : > { %10736 = vmatpush3.bf16.xpose.msra.mxu1 %v19136_v2 }
 0x65d   : > { %10738 = vmatprep.subr.bf16.mxu1 %v19137_v44 }
 0x661   : > { %10548 = vmatpush3.bf16.xpose.msra.mxu0 %v19025_v48  ;;  %v19146_v48 = vld [vmem:[#allocation66_spill] sm:$0xff] }
 0x662   : > { %10550 = vmatprep.subr.bf16.mxu0 %v19138_v17 }
 0x664   : > { %10740 = vmatpush3.bf16.xpose.msra.mxu1 %v19028_v10  ;;  %v19148_v10 = vld [vmem:[#allocation48_spill] sm:$0xff] }
 0x665   : > { %10742 = vmatprep.subr.bf16.mxu1 %v19029_v47  ;;  %v19149_v47 = vld [vmem:[#allocation88_spill] sm:$0xff] }
 0x669   : > { %10552 = vmatpush3.bf16.xpose.msra.mxu0 %v19139_v26 }
 0x66a   : > { %10554 = vmatprep.subr.bf16.mxu0 %v19140_v43 }
 0x66c   : > { %10744 = vmatpush3.bf16.xpose.msra.mxu1 %v19141_v57 }
 0x66d   : > { %10746 = vmatprep.subr.bf16.mxu1 %v19142_v34 }
 0x671   : > { %10556 = vmatpush3.bf16.xpose.msra.mxu0 %v19143_v22 }
 0x672   : > { %10558 = vmatprep.subr.bf16.mxu0 %v19144_v9 }
 0x674   : > { %10748 = vmatpush3.bf16.xpose.msra.mxu1 %v19145_v63 }
 0x675   : > { %10750 = vmatprep.subr.bf16.mxu1 %v19146_v48 }
 0x679   : > { %10560 = vmatpush3.bf16.xpose.msra.mxu0 %v19147_v32 }
 0x67a   : > { %10562 = vmatprep.subr.bf16.mxu0 %v19148_v10 }
 0x67c   : > { %10752 = vmatpush3.bf16.xpose.msra.mxu1 %v19149_v47 }
 0x67d   : > { %10754 = vmatprep.subr.bf16.mxu1 %v19150_v62 }
 0x681   : > { %10564 = vmatpush3.bf16.xpose.msra.mxu0 %v19044_v13 }
 0x684   : > { %10756 = vmatpush3.bf16.xpose.msra.mxu1 %v19047_v24  ;;  %v19152_v24 = vld [vmem:[#allocation45_spill] sm:$0xff] }
 0x685   : > { %v19154_v51 = vcombine.low %v19152_v24, %v19153_v16 }
 0x687   : > { %v7437_v15 = vrot.slane %v19154_v51, %v19151_v28 }
 0x688   : > { %9016 = vmatmul.mubr.f32.vlgmr.msra.gmra.mrb[6].mxu0 %v18910_v4 }
 0x68b   : > { %9220 = vmatmul.mubr.f32.vlgmr.msra.gmra.mrb[6].mxu1 %v18910_v4 }
 0x75b   : > { %v6472_v54 = vpop.f32.mrb[6].mxu0 }
 0x75c   : > { %v6474_v49 = vpop.f32.mrb[7].mxu0 }
 0x75d   : > { %v7399_v41 = vcombine.low %v6472_v54, %v6474_v49 }
 0x75e   : > { %v7327_v7 = vpop.f32.mrb[6].mxu1 }
 0x75f   : > { %v7329_v46 = vpop.f32.mrb[7].mxu1  ;;  %v7421_v19 = vrot.slane %v7399_v41, %v19151_v28 }
 0x760   : > { %v7400_v33 = vcombine.low %v7327_v7, %v7329_v46 }
 0x762   : > { %v7428_v13 = vrot.slane %v7400_v33, %v19151_v28 }
 0x764   : > { %v7430_v58 = vcombine.low %v7421_v19, %v7428_v13 }
 0x766   : > { %v7444_v4 = vrot.slane %v7430_v58, %v19151_v28 }
 0x768   : > { %v7445_v60 = vcombine.low %v7437_v15, %v7444_v4 }
 0x76a   : > { %v7460_v3 = vadd.f32 %v19155_v18, %v7445_v60 }
 0x76c   : > { %7462 = vst [vmem:[%s15001_s27 + $0x8] sm:$0xff] %v7460_v3 }
 0x76d   : > { %10984 = shalt.err (!%p10981_p7)
}
 0x76e   : > { %s10985_s2 = scalar_lea.hbm %s16543_s21, 256  ;;  %s10989_s8 = scalar_lea.hbm %s16596_s3, 512 }
 0x76f   : > { %p10986_p13 = scmp.ne.s32.totalorder %s16543_s21, %s10985_s2  ;;  %p10990_p12 = scmp.lt.u32.totalorder %s16543_s21, %s16596_s3 }
 0x770   : > { %p10991_p4 = scmp.lt.u32.totalorder %s10989_s8, %s10985_s2  ;;  %p10993_p5 = scmp.lt.u32.totalorder %s10985_s2, %s16543_s21 }
 0x771   : > { %p10987_p2 = pnand %p10986_p13, %p19156_p10 }
 0x772   : > { %p10992_p9 = por %p10991_p4, %p10990_p12 }
 0x773   : > { %p10988_p6 = pneg %p10987_p2 }
 0x774   : > { %p10994_p11 = por %p10993_p5, %p10992_p9 }
 0x776   : > { %p10995_p1 = pnand %p10994_p11, %p10988_p6 }
 0x778   : > { %10998 = shalt.err (!%p10995_p1)
}
 0x779   : > { %10843 = dma.vmem_to_hbm [thread:$0]  (%p19156_p10), %s16545_s13, 256, %s16543_s21, %s7464_s7  }
 0x77a PF: > { %s7490_s22 = sand.u32 1, %s11037_s14   ;;  %p19157_p0 = scmp.ne.s32.totalorder %s17490_s26, 0 }
 0x77b   : > { %p19158_p8 = scmp.ge.s32.totalorder %s11057_s19, 2  ;;  %s7491_s24 = scalar_lea.sflag [#allocation6], %s7490_s22 }
 0x77d   : > { %p10854_p3 = pnand %p19158_p8, %p19157_p0 }
 0x77f   : > { %11032 = dma.done.wait (!%p10854_p3), %s7491_s24, 256  }
 0x780   : > { %11034 = vsyncadd (!%p10854_p3), %s7491_s24, 4294967040  ;;  %s21_s19 = sadd.s32 1, %s11057_s19   ;;  %s19159_s14 = smov %s11041_s15 }
 0x781   : > { %p18_p7 = scmp.ge.s32.totalorder %s21_s19, 4   ;;  %s19160_s15 = smov %s11045_s16 }
 0x782   : > { %s19161_s16 = smov %s11209_s6  ;;  %s19162_s17 = smov %s11053_s18 }
 0x783   : > { %s19163_s18 = smov %s19165_s5  ;;  %20 = sbr.rel (!%p18_p7) target bundleno = 9 (0x9), region = 90 }
 0x78a   :  { %7496 = vsyncpa [#allocation5], 1 }
 0x78b   :  { %7498 = vsyncpa [#allocation5 + $0x1], 1 }
 0x78c   :  { %7499 = vsyncpa [#allocation8], 1 }
 0x78d   :  { %7500 = vsyncpa [#allocation6], 1 }
 0x78e   :  { %7502 = vsyncpa [#allocation6 + $0x1], 1 }

</bundles_post_ra>
